<compile_context>
chip_gen: v6e
topology: v6e:2x2x1
jax: 0.10.0
libtpu: 0.0.40
codegen_flags: <defaults>
</compile_context>

<pallas_src>
import jax
import jax.numpy as jnp
from jax import lax
from jax.experimental import pallas as pl
from jax.experimental.pallas import tpu as pltpu

LANES = 128


# ----------------------------------------------------------------------------
# Fused LeNet kernel (one sample per grid step)
# ----------------------------------------------------------------------------
def _lenet_kernel(x_ref, w1z_ref, w2z_ref, wf1_ref, wf2_ref, wf3_ref, b_ref,
                  o_ref, z1_ref, z2_ref, rowbuf_ref, p1_ref, p2_ref):
    f32 = jnp.float32
    bf16 = jnp.bfloat16

    b_conv1 = b_ref[0:1, :]
    b_conv2 = b_ref[1:2, :]
    b_fc1 = b_ref[2:3, :]
    b_fc2 = b_ref[3:4, :]
    b_fc3 = b_ref[4:5, :]

    # z1 lane block i (lanes i*128 .. i*128+2) holds input row (h+i); the other
    # lanes stay zero (zeroed once, the stores below only touch lanes 0..2).
    z1_ref[...] = jnp.zeros_like(z1_ref)

    # -------------------- conv1 (3->6, k=5) + ReLU + 2x2 max-pool -----------
    def conv1_row(h):
        # patch slab Z1[u, i*128 + ci] = x[h+i, u, ci]
        for i in range(5):
            z1_ref[:, i * LANES:i * LANES + 3] = x_ref[h + i]       # [32, 3]
        z = z1_ref[...]                                             # [32, 640]
        acc = jnp.zeros((28, LANES), f32)
        for j in range(5):
            acc += jnp.dot(z[j:j + 28, :].astype(bf16), w1z_ref[j],
                           preferred_element_type=f32)
        return jnp.maximum(acc + b_conv1, 0.0)                      # [28, 128]

    def conv1_pool_body(hp, carry):
        r0 = conv1_row(2 * hp)
        r1 = conv1_row(2 * hp + 1)
        rowbuf_ref[...] = jnp.maximum(r0, r1)                       # pool over H
        pooled = jnp.maximum(rowbuf_ref[pl.ds(0, 14, 2), :],        # pool over W
                             rowbuf_ref[pl.ds(1, 14, 2), :])        # [14, 128]
        p1_ref[hp] = pooled
        return carry

    lax.fori_loop(0, 14, conv1_pool_body, 0)

    # -------------------- conv2 (6->16, k=5) + ReLU + 2x2 max-pool ----------
    def conv2_row(h2):
        # patch slab Z2[u, i*128 + c] = p1[h2+i, u, c]  (lanes >= 6 are zeros)
        for i in range(5):
            z2_ref[:, i * LANES:(i + 1) * LANES] = p1_ref[h2 + i]   # [14, 128]
        z = z2_ref[...]                                             # [14, 640]
        acc = jnp.zeros((10, LANES), f32)
        for j in range(5):
            acc += jnp.dot(z[j:j + 10, :].astype(bf16), w2z_ref[j],
                           preferred_element_type=f32)
        return jnp.maximum(acc + b_conv2, 0.0)                      # [10, 128]

    def conv2_pool_body(hp, carry):
        r0 = conv2_row(2 * hp)
        r1 = conv2_row(2 * hp + 1)
        rowbuf_ref[0:10, :] = jnp.maximum(r0, r1)
        pooled = jnp.maximum(rowbuf_ref[pl.ds(0, 5, 2), :],
                             rowbuf_ref[pl.ds(1, 5, 2), :])         # [5, 128]
        p2_ref[hp] = pooled
        return carry

    lax.fori_loop(0, 5, conv2_pool_body, 0)

    # -------------------- fused MLP head: fc1 -> ReLU -> fc2 -> ReLU -> fc3 --
    acc = jnp.zeros((1, LANES), f32)
    for h in range(5):
        row = p2_ref[h]                                             # [5, 128]
        for w in range(5):
            piece = row[w:w + 1, 0:16].astype(bf16)                 # [1, 16]
            k = (h * 5 + w) * 16
            acc += jnp.dot(piece, wf1_ref[k:k + 16, :],
                           preferred_element_type=f32)
    h1 = jnp.maximum(acc + b_fc1, 0.0)                              # [1, 128]
    h2 = jnp.maximum(jnp.dot(h1.astype(bf16), wf2_ref[...],
                             preferred_element_type=f32) + b_fc2, 0.0)
    logits = jnp.dot(h2.astype(bf16), wf3_ref[...],
                     preferred_element_type=f32) + b_fc3
    o_ref[...] = logits                                             # [1, 128]


# ----------------------------------------------------------------------------
# One-time weight preparation (hoisted out of the forward pass)
# ----------------------------------------------------------------------------
def _pad2(a, rows, cols):
    return jnp.pad(a, ((0, rows - a.shape[0]), (0, cols - a.shape[1])))


def prepare_params(params):
    """Re-layout weights once: conv weights -> lane-aligned slabs w[j, i*128+ci, co],
    fc weights -> [K, 128] (N zero-padded), fc1 rows permuted so the in-kernel
    NHWC flatten matches PyTorch's NCHW .view() flatten."""
    def conv_slab(w):                         # torch layout [O, I, KH, KW]
        o, in_c, kh, kw = w.shape
        t = jnp.transpose(w, (3, 2, 1, 0))                     # [KW(j), KH(i), I, O]
        slab = jnp.zeros((kw, kh, LANES, LANES), jnp.float32)
        slab = slab.at[:, :, :in_c, :o].set(t)
        return slab.reshape(kw, kh * LANES, LANES).astype(jnp.bfloat16)

    def pad_bias(b):
        return jnp.pad(b, (0, LANES - b.shape[0]))

    w1z = conv_slab(params["conv1_w"])                         # [5, 640, 128]
    w2z = conv_slab(params["conv2_w"])                         # [5, 640, 128]

    wf1 = jnp.transpose(params["fc1_w"].reshape(120, 16, 5, 5), (2, 3, 1, 0))
    wf1 = _pad2(wf1.reshape(400, 120), 400, LANES).astype(jnp.bfloat16)
    wf2 = _pad2(params["fc2_w"].T, LANES, LANES).astype(jnp.bfloat16)
    wf3 = _pad2(params["fc3_w"].T, LANES, LANES).astype(jnp.bfloat16)

    bias = jnp.stack([pad_bias(params["conv1_b"]), pad_bias(params["conv2_b"]),
                      pad_bias(params["fc1_b"]), pad_bias(params["fc2_b"]),
                      pad_bias(params["fc3_b"])]).astype(jnp.float32)   # [5, 128]
    return {"w1z": w1z, "w2z": w2z, "wf1": wf1, "wf2": wf2, "wf3": wf3,
            "bias": bias}


# ----------------------------------------------------------------------------
# Forward pass
# ----------------------------------------------------------------------------
@jax.jit
def convnet_forward(x_nchw, prepped):
    B = x_nchw.shape[0]
    x = jnp.transpose(x_nchw, (0, 2, 3, 1))                    # NCHW -> NHWC

    out = pl.pallas_call(
        _lenet_kernel,
        out_shape=jax.ShapeDtypeStruct((B, 1, LANES), jnp.float32),
        grid_spec=pltpu.PrefetchScalarGridSpec(
            num_scalar_prefetch=0,
            grid=(B,),
            in_specs=[
                pl.BlockSpec((None, 32, 32, 3), lambda b: (b, 0, 0, 0)),
                pl.BlockSpec((5, 5 * LANES, LANES), lambda b: (0, 0, 0)),
                pl.BlockSpec((5, 5 * LANES, LANES), lambda b: (0, 0, 0)),
                pl.BlockSpec((400, LANES), lambda b: (0, 0)),
                pl.BlockSpec((LANES, LANES), lambda b: (0, 0)),
                pl.BlockSpec((LANES, LANES), lambda b: (0, 0)),
                pl.BlockSpec((5, LANES), lambda b: (0, 0)),
            ],
            out_specs=pl.BlockSpec((None, 1, LANES), lambda b: (b, 0, 0)),
            scratch_shapes=[
                pltpu.VMEM((32, 5 * LANES), jnp.float32),   # conv1 patch slab
                pltpu.VMEM((14, 5 * LANES), jnp.float32),   # conv2 patch slab
                pltpu.VMEM((28, LANES), jnp.float32),       # H-pooled row buffer
                pltpu.VMEM((14, 14, LANES), jnp.float32),   # pooled conv1 output
                pltpu.VMEM((5, 5, LANES), jnp.float32),     # pooled conv2 output
            ],
        ),
        compiler_params=pltpu.CompilerParams(
            dimension_semantics=("parallel",),
            vmem_limit_bytes=32 * 1024 * 1024,
        ),
    )(x, prepped["w1z"], prepped["w2z"], prepped["wf1"], prepped["wf2"],
      prepped["wf3"], prepped["bias"])
    return out.reshape(B, LANES)[:, :10]


# ----------------------------------------------------------------------------
# Parameter init (PyTorch-default-style) and pure-XLA reference
# ----------------------------------------------------------------------------
def init_params(key):
    def conv_init(k, out_c, in_c, ksz):
        bound = 1.0 / (in_c * ksz * ksz) ** 0.5
        k1, k2 = jax.random.split(k)
        w = jax.random.uniform(k1, (out_c, in_c, ksz, ksz), jnp.float32, -bound, bound)
        b = jax.random.uniform(k2, (out_c,), jnp.float32, -bound, bound)
        return w, b

    def lin_init(k, out_f, in_f):
        bound = 1.0 / in_f ** 0.5
        k1, k2 = jax.random.split(k)
        w = jax.random.uniform(k1, (out_f, in_f), jnp.float32, -bound, bound)
        b = jax.random.uniform(k2, (out_f,), jnp.float32, -bound, bound)
        return w, b

    k1, k2, k3, k4, k5 = jax.random.split(key, 5)
    p = {}
    p["conv1_w"], p["conv1_b"] = conv_init(k1, 6, 3, 5)
    p["conv2_w"], p["conv2_b"] = conv_init(k2, 16, 6, 5)
    p["fc1_w"], p["fc1_b"] = lin_init(k3, 120, 16 * 5 * 5)
    p["fc2_w"], p["fc2_b"] = lin_init(k4, 84, 120)
    p["fc3_w"], p["fc3_b"] = lin_init(k5, 10, 84)
    return p


def reference_forward(x, params):
    dn = ("NCHW", "OIHW", "NCHW")
    y = lax.conv_general_dilated(x, params["conv1_w"], (1, 1), "VALID",
                                 dimension_numbers=dn)
    y = jax.nn.relu(y + params["conv1_b"][None, :, None, None])
    y = lax.reduce_window(y, -jnp.inf, lax.max, (1, 1, 2, 2), (1, 1, 2, 2), "VALID")
    y = lax.conv_general_dilated(y, params["conv2_w"], (1, 1), "VALID",
                                 dimension_numbers=dn)
    y = jax.nn.relu(y + params["conv2_b"][None, :, None, None])
    y = lax.reduce_window(y, -jnp.inf, lax.max, (1, 1, 2, 2), (1, 1, 2, 2), "VALID")
    y = y.reshape(y.shape[0], -1)
    y = jax.nn.relu(y @ params["fc1_w"].T + params["fc1_b"])
    y = jax.nn.relu(y @ params["fc2_w"].T + params["fc2_b"])
    return y @ params["fc3_w"].T + params["fc3_b"]


if __name__ == "__main__":
    key = jax.random.PRNGKey(0)
    kx, kp = jax.random.split(key)
    B = 8                                        # small batch; grid = (B,)
    x = jax.random.normal(kx, (B, 3, 32, 32), jnp.float32)
    params = init_params(kp)
    prepped = prepare_params(params)             # one-time weight re-layout

    out = convnet_forward(x, prepped)
    out = jax.block_until_ready(out)
    assert out.shape == (B, 10), out.shape

    ref = reference_forward(x, params)
    max_err = float(jnp.max(jnp.abs(out - ref)))
    # bf16 MXU operands (f32 accumulation) -> slightly looser tolerance than pure f32.
    assert jnp.allclose(out, ref, atol=2e-2, rtol=2e-2), max_err
    print("KERNEL_OK")
</pallas_src>

<mosaic_0001>
module attributes {stable_mosaic.version = 11 : i64} {
  func.func @_lenet_kernel(%arg0: i32, %arg1: memref<1x32x32x3xf32, #tpu.memory_space<vmem>>, %arg2: memref<5x640x128xbf16, #tpu.memory_space<vmem>>, %arg3: memref<5x640x128xbf16, #tpu.memory_space<vmem>>, %arg4: memref<400x128xbf16, #tpu.memory_space<vmem>>, %arg5: memref<128x128xbf16, #tpu.memory_space<vmem>>, %arg6: memref<128x128xbf16, #tpu.memory_space<vmem>>, %arg7: memref<5x128xf32, #tpu.memory_space<vmem>>, %arg8: memref<1x1x128xf32, #tpu.memory_space<vmem>>, %arg9: memref<32x640xf32, #tpu.memory_space<vmem>>, %arg10: memref<14x640xf32, #tpu.memory_space<vmem>>, %arg11: memref<28x128xf32, #tpu.memory_space<vmem>>, %arg12: memref<14x14x128xf32, #tpu.memory_space<vmem>>, %arg13: memref<5x5x128xf32, #tpu.memory_space<vmem>>) attributes {dimension_semantics = [#tpu.dimension_semantics<parallel>], iteration_bounds = array<i64: 8>, scalar_prefetch = 0 : i64, scratch_operands = 5 : i64, tpu.core_type = #tpu.core_type<tc>, window_params = [{transform_indices = @transform_0, window_bounds = array<i64: 1, 32, 32, 3>}, {pipeline_mode = #tpu.pipeline_mode<synchronous>, transform_indices = @transform_1, window_bounds = array<i64: 5, 640, 128>}, {pipeline_mode = #tpu.pipeline_mode<synchronous>, transform_indices = @transform_2, window_bounds = array<i64: 5, 640, 128>}, {pipeline_mode = #tpu.pipeline_mode<synchronous>, transform_indices = @transform_3, window_bounds = array<i64: 400, 128>}, {pipeline_mode = #tpu.pipeline_mode<synchronous>, transform_indices = @transform_4, window_bounds = array<i64: 128, 128>}, {pipeline_mode = #tpu.pipeline_mode<synchronous>, transform_indices = @transform_5, window_bounds = array<i64: 128, 128>}, {pipeline_mode = #tpu.pipeline_mode<synchronous>, transform_indices = @transform_6, window_bounds = array<i64: 5, 128>}, {transform_indices = @transform_7, window_bounds = array<i64: 1, 1, 128>}]} {
    %c0 = arith.constant 0 : index
    %c0_0 = arith.constant 0 : index
    %0 = vector.load %arg7[%c0, %c0_0] : memref<5x128xf32, #tpu.memory_space<vmem>>, vector<1x128xf32>
    %c1 = arith.constant 1 : index
    %c0_1 = arith.constant 0 : index
    %1 = vector.load %arg7[%c1, %c0_1] : memref<5x128xf32, #tpu.memory_space<vmem>>, vector<1x128xf32>
    %c2 = arith.constant 2 : index
    %c0_2 = arith.constant 0 : index
    %2 = vector.load %arg7[%c2, %c0_2] : memref<5x128xf32, #tpu.memory_space<vmem>>, vector<1x128xf32>
    %c3 = arith.constant 3 : index
    %c0_3 = arith.constant 0 : index
    %3 = vector.load %arg7[%c3, %c0_3] : memref<5x128xf32, #tpu.memory_space<vmem>>, vector<1x128xf32>
    %c4 = arith.constant 4 : index
    %c0_4 = arith.constant 0 : index
    %4 = vector.load %arg7[%c4, %c0_4] : memref<5x128xf32, #tpu.memory_space<vmem>>, vector<1x128xf32>
    %cst = arith.constant 0.000000e+00 : f32
    %5 = vector.broadcast %cst : f32 to vector<32x640xf32>
    %c0_5 = arith.constant 0 : index
    %c0_6 = arith.constant 0 : index
    %6 = vector.load %arg9[%c0_5, %c0_6] : memref<32x640xf32, #tpu.memory_space<vmem>>, vector<32x640xf32>
    tpu.vector_store %arg9[%c0_5, %c0_6], %5 {strides = array<i32>} : memref<32x640xf32, #tpu.memory_space<vmem>>, vector<32x640xf32>,
    %c0_i32 = arith.constant 0 : i32
    %c14_i32 = arith.constant 14 : i32
    %7 = arith.addi %c0_i32, %c14_i32 : i32
    %c1_i32 = arith.constant 1 : i32
    scf.for %arg14 = %c0_i32 to %7 step %c1_i32  : i32 {
      %c2_i32 = arith.constant 2 : i32
      %161 = arith.muli %c2_i32, %arg14 : i32
      %c0_i32_89 = arith.constant 0 : i32
      %162 = arith.addi %161, %c0_i32_89 : i32
      %c0_90 = arith.constant 0 : index
      %163 = arith.index_cast %162 : i32 to index
      %c0_91 = arith.constant 0 : index
      %c0_92 = arith.constant 0 : index
      %164 = vector.load %arg1[%c0_90, %163, %c0_91, %c0_92] : memref<1x32x32x3xf32, #tpu.memory_space<vmem>>, vector<1x1x32x3xf32>
      %165 = vector.shape_cast %164 : vector<1x1x32x3xf32> to vector<32x3xf32>
      %c0_93 = arith.constant 0 : index
      %c0_94 = arith.constant 0 : index
      %166 = vector.load %arg9[%c0_93, %c0_94] : memref<32x640xf32, #tpu.memory_space<vmem>>, vector<32x3xf32>
      tpu.vector_store %arg9[%c0_93, %c0_94], %165 {strides = array<i32>} : memref<32x640xf32, #tpu.memory_space<vmem>>, vector<32x3xf32>,
      %c1_i32_95 = arith.constant 1 : i32
      %167 = arith.addi %161, %c1_i32_95 : i32
      %c0_96 = arith.constant 0 : index
      %168 = arith.index_cast %167 : i32 to index
      %c0_97 = arith.constant 0 : index
      %c0_98 = arith.constant 0 : index
      %169 = vector.load %arg1[%c0_96, %168, %c0_97, %c0_98] : memref<1x32x32x3xf32, #tpu.memory_space<vmem>>, vector<1x1x32x3xf32>
      %170 = vector.shape_cast %169 : vector<1x1x32x3xf32> to vector<32x3xf32>
      %c0_99 = arith.constant 0 : index
      %c128_100 = arith.constant 128 : index
      %171 = vector.load %arg9[%c0_99, %c128_100] : memref<32x640xf32, #tpu.memory_space<vmem>>, vector<32x3xf32>
      tpu.vector_store %arg9[%c0_99, %c128_100], %170 {strides = array<i32>} : memref<32x640xf32, #tpu.memory_space<vmem>>, vector<32x3xf32>,
      %c2_i32_101 = arith.constant 2 : i32
      %172 = arith.addi %161, %c2_i32_101 : i32
      %c0_102 = arith.constant 0 : index
      %173 = arith.index_cast %172 : i32 to index
      %c0_103 = arith.constant 0 : index
      %c0_104 = arith.constant 0 : index
      %174 = vector.load %arg1[%c0_102, %173, %c0_103, %c0_104] : memref<1x32x32x3xf32, #tpu.memory_space<vmem>>, vector<1x1x32x3xf32>
      %175 = vector.shape_cast %174 : vector<1x1x32x3xf32> to vector<32x3xf32>
      %c0_105 = arith.constant 0 : index
      %c256_106 = arith.constant 256 : index
      %176 = vector.load %arg9[%c0_105, %c256_106] : memref<32x640xf32, #tpu.memory_space<vmem>>, vector<32x3xf32>
      tpu.vector_store %arg9[%c0_105, %c256_106], %175 {strides = array<i32>} : memref<32x640xf32, #tpu.memory_space<vmem>>, vector<32x3xf32>,
      %c3_i32 = arith.constant 3 : i32
      %177 = arith.addi %161, %c3_i32 : i32
      %c0_107 = arith.constant 0 : index
      %178 = arith.index_cast %177 : i32 to index
      %c0_108 = arith.constant 0 : index
      %c0_109 = arith.constant 0 : index
      %179 = vector.load %arg1[%c0_107, %178, %c0_108, %c0_109] : memref<1x32x32x3xf32, #tpu.memory_space<vmem>>, vector<1x1x32x3xf32>
      %180 = vector.shape_cast %179 : vector<1x1x32x3xf32> to vector<32x3xf32>
      %c0_110 = arith.constant 0 : index
      %c384_111 = arith.constant 384 : index
      %181 = vector.load %arg9[%c0_110, %c384_111] : memref<32x640xf32, #tpu.memory_space<vmem>>, vector<32x3xf32>
      tpu.vector_store %arg9[%c0_110, %c384_111], %180 {strides = array<i32>} : memref<32x640xf32, #tpu.memory_space<vmem>>, vector<32x3xf32>,
      %c4_i32 = arith.constant 4 : i32
      %182 = arith.addi %161, %c4_i32 : i32
      %c0_112 = arith.constant 0 : index
      %183 = arith.index_cast %182 : i32 to index
      %c0_113 = arith.constant 0 : index
      %c0_114 = arith.constant 0 : index
      %184 = vector.load %arg1[%c0_112, %183, %c0_113, %c0_114] : memref<1x32x32x3xf32, #tpu.memory_space<vmem>>, vector<1x1x32x3xf32>
      %185 = vector.shape_cast %184 : vector<1x1x32x3xf32> to vector<32x3xf32>
      %c0_115 = arith.constant 0 : index
      %c512 = arith.constant 512 : index
      %186 = vector.load %arg9[%c0_115, %c512] : memref<32x640xf32, #tpu.memory_space<vmem>>, vector<32x3xf32>
      tpu.vector_store %arg9[%c0_115, %c512], %185 {strides = array<i32>} : memref<32x640xf32, #tpu.memory_space<vmem>>, vector<32x3xf32>,
      %c0_116 = arith.constant 0 : index
      %c0_117 = arith.constant 0 : index
      %187 = vector.load %arg9[%c0_116, %c0_117] : memref<32x640xf32, #tpu.memory_space<vmem>>, vector<32x640xf32>
      %cst_118 = arith.constant 0.000000e+00 : f32
      %188 = vector.broadcast %cst_118 : f32 to vector<28x128xf32>
      %189 = vector.extract_strided_slice %187 {offsets = [0, 0], sizes = [28, 640], strides = [1, 1]} : vector<32x640xf32> to vector<28x640xf32>
      %190 = arith.truncf %189 : vector<28x640xf32> to vector<28x640xbf16>
      %c0_119 = arith.constant 0 : index
      %c0_120 = arith.constant 0 : index
      %c0_121 = arith.constant 0 : index
      %191 = vector.load %arg2[%c0_119, %c0_120, %c0_121] : memref<5x640x128xbf16, #tpu.memory_space<vmem>>, vector<1x640x128xbf16>
      %192 = vector.shape_cast %191 : vector<1x640x128xbf16> to vector<640x128xbf16>
      %cst_122 = arith.constant dense<0.000000e+00> : vector<28x128xf32>
      %193 = tpu.matmul %190, %192, %cst_122 {dimension_numbers = #tpu.dot_dimension_numbers<[1], [0], [0], [1], [0, 0, 1, 1], [], []>} : vector<28x640xbf16>, vector<640x128xbf16>, vector<28x128xf32> -> vector<28x128xf32>
      %194 = arith.addf %188, %193 : vector<28x128xf32>
      %195 = vector.extract_strided_slice %187 {offsets = [1, 0], sizes = [28, 640], strides = [1, 1]} : vector<32x640xf32> to vector<28x640xf32>
      %196 = arith.truncf %195 : vector<28x640xf32> to vector<28x640xbf16>
      %c1_123 = arith.constant 1 : index
      %c0_124 = arith.constant 0 : index
      %c0_125 = arith.constant 0 : index
      %197 = vector.load %arg2[%c1_123, %c0_124, %c0_125] : memref<5x640x128xbf16, #tpu.memory_space<vmem>>, vector<1x640x128xbf16>
      %198 = vector.shape_cast %197 : vector<1x640x128xbf16> to vector<640x128xbf16>
      %cst_126 = arith.constant dense<0.000000e+00> : vector<28x128xf32>
      %199 = tpu.matmul %196, %198, %cst_126 {dimension_numbers = #tpu.dot_dimension_numbers<[1], [0], [0], [1], [0, 0, 1, 1], [], []>} : vector<28x640xbf16>, vector<640x128xbf16>, vector<28x128xf32> -> vector<28x128xf32>
      %200 = arith.addf %194, %199 : vector<28x128xf32>
      %201 = vector.extract_strided_slice %187 {offsets = [2, 0], sizes = [28, 640], strides = [1, 1]} : vector<32x640xf32> to vector<28x640xf32>
      %202 = arith.truncf %201 : vector<28x640xf32> to vector<28x640xbf16>
      %c2_127 = arith.constant 2 : index
      %c0_128 = arith.constant 0 : index
      %c0_129 = arith.constant 0 : index
      %203 = vector.load %arg2[%c2_127, %c0_128, %c0_129] : memref<5x640x128xbf16, #tpu.memory_space<vmem>>, vector<1x640x128xbf16>
      %204 = vector.shape_cast %203 : vector<1x640x128xbf16> to vector<640x128xbf16>
      %cst_130 = arith.constant dense<0.000000e+00> : vector<28x128xf32>
      %205 = tpu.matmul %202, %204, %cst_130 {dimension_numbers = #tpu.dot_dimension_numbers<[1], [0], [0], [1], [0, 0, 1, 1], [], []>} : vector<28x640xbf16>, vector<640x128xbf16>, vector<28x128xf32> -> vector<28x128xf32>
      %206 = arith.addf %200, %205 : vector<28x128xf32>
      %207 = vector.extract_strided_slice %187 {offsets = [3, 0], sizes = [28, 640], strides = [1, 1]} : vector<32x640xf32> to vector<28x640xf32>
      %208 = arith.truncf %207 : vector<28x640xf32> to vector<28x640xbf16>
      %c3_131 = arith.constant 3 : index
      %c0_132 = arith.constant 0 : index
      %c0_133 = arith.constant 0 : index
      %209 = vector.load %arg2[%c3_131, %c0_132, %c0_133] : memref<5x640x128xbf16, #tpu.memory_space<vmem>>, vector<1x640x128xbf16>
      %210 = vector.shape_cast %209 : vector<1x640x128xbf16> to vector<640x128xbf16>
      %cst_134 = arith.constant dense<0.000000e+00> : vector<28x128xf32>
      %211 = tpu.matmul %208, %210, %cst_134 {dimension_numbers = #tpu.dot_dimension_numbers<[1], [0], [0], [1], [0, 0, 1, 1], [], []>} : vector<28x640xbf16>, vector<640x128xbf16>, vector<28x128xf32> -> vector<28x128xf32>
      %212 = arith.addf %206, %211 : vector<28x128xf32>
      %213 = vector.extract_strided_slice %187 {offsets = [4, 0], sizes = [28, 640], strides = [1, 1]} : vector<32x640xf32> to vector<28x640xf32>
      %214 = arith.truncf %213 : vector<28x640xf32> to vector<28x640xbf16>
      %c4_135 = arith.constant 4 : index
      %c0_136 = arith.constant 0 : index
      %c0_137 = arith.constant 0 : index
      %215 = vector.load %arg2[%c4_135, %c0_136, %c0_137] : memref<5x640x128xbf16, #tpu.memory_space<vmem>>, vector<1x640x128xbf16>
      %216 = vector.shape_cast %215 : vector<1x640x128xbf16> to vector<640x128xbf16>
      %cst_138 = arith.constant dense<0.000000e+00> : vector<28x128xf32>
      %217 = tpu.matmul %214, %216, %cst_138 {dimension_numbers = #tpu.dot_dimension_numbers<[1], [0], [0], [1], [0, 0, 1, 1], [], []>} : vector<28x640xbf16>, vector<640x128xbf16>, vector<28x128xf32> -> vector<28x128xf32>
      %218 = arith.addf %212, %217 : vector<28x128xf32>
      %219 = vector.broadcast %0 : vector<1x128xf32> to vector<28x128xf32>
      %220 = arith.addf %218, %219 : vector<28x128xf32>
      %cst_139 = arith.constant 0.000000e+00 : f32
      %221 = vector.broadcast %cst_139 : f32 to vector<28x128xf32>
      %222 = arith.maximumf %220, %221 : vector<28x128xf32>
      %c2_i32_140 = arith.constant 2 : i32
      %223 = arith.muli %c2_i32_140, %arg14 : i32
      %c1_i32_141 = arith.constant 1 : i32
      %224 = arith.addi %223, %c1_i32_141 : i32
      %c0_i32_142 = arith.constant 0 : i32
      %225 = arith.addi %224, %c0_i32_142 : i32
      %c0_143 = arith.constant 0 : index
      %226 = arith.index_cast %225 : i32 to index
      %c0_144 = arith.constant 0 : index
      %c0_145 = arith.constant 0 : index
      %227 = vector.load %arg1[%c0_143, %226, %c0_144, %c0_145] : memref<1x32x32x3xf32, #tpu.memory_space<vmem>>, vector<1x1x32x3xf32>
      %228 = vector.shape_cast %227 : vector<1x1x32x3xf32> to vector<32x3xf32>
      %c0_146 = arith.constant 0 : index
      %c0_147 = arith.constant 0 : index
      %229 = vector.load %arg9[%c0_146, %c0_147] : memref<32x640xf32, #tpu.memory_space<vmem>>, vector<32x3xf32>
      tpu.vector_store %arg9[%c0_146, %c0_147], %228 {strides = array<i32>} : memref<32x640xf32, #tpu.memory_space<vmem>>, vector<32x3xf32>,
      %c1_i32_148 = arith.constant 1 : i32
      %230 = arith.addi %224, %c1_i32_148 : i32
      %c0_149 = arith.constant 0 : index
      %231 = arith.index_cast %230 : i32 to index
      %c0_150 = arith.constant 0 : index
      %c0_151 = arith.constant 0 : index
      %232 = vector.load %arg1[%c0_149, %231, %c0_150, %c0_151] : memref<1x32x32x3xf32, #tpu.memory_space<vmem>>, vector<1x1x32x3xf32>
      %233 = vector.shape_cast %232 : vector<1x1x32x3xf32> to vector<32x3xf32>
      %c0_152 = arith.constant 0 : index
      %c128_153 = arith.constant 128 : index
      %234 = vector.load %arg9[%c0_152, %c128_153] : memref<32x640xf32, #tpu.memory_space<vmem>>, vector<32x3xf32>
      tpu.vector_store %arg9[%c0_152, %c128_153], %233 {strides = array<i32>} : memref<32x640xf32, #tpu.memory_space<vmem>>, vector<32x3xf32>,
      %c2_i32_154 = arith.constant 2 : i32
      %235 = arith.addi %224, %c2_i32_154 : i32
      %c0_155 = arith.constant 0 : index
      %236 = arith.index_cast %235 : i32 to index
      %c0_156 = arith.constant 0 : index
      %c0_157 = arith.constant 0 : index
      %237 = vector.load %arg1[%c0_155, %236, %c0_156, %c0_157] : memref<1x32x32x3xf32, #tpu.memory_space<vmem>>, vector<1x1x32x3xf32>
      %238 = vector.shape_cast %237 : vector<1x1x32x3xf32> to vector<32x3xf32>
      %c0_158 = arith.constant 0 : index
      %c256_159 = arith.constant 256 : index
      %239 = vector.load %arg9[%c0_158, %c256_159] : memref<32x640xf32, #tpu.memory_space<vmem>>, vector<32x3xf32>
      tpu.vector_store %arg9[%c0_158, %c256_159], %238 {strides = array<i32>} : memref<32x640xf32, #tpu.memory_space<vmem>>, vector<32x3xf32>,
      %c3_i32_160 = arith.constant 3 : i32
      %240 = arith.addi %224, %c3_i32_160 : i32
      %c0_161 = arith.constant 0 : index
      %241 = arith.index_cast %240 : i32 to index
      %c0_162 = arith.constant 0 : index
      %c0_163 = arith.constant 0 : index
      %242 = vector.load %arg1[%c0_161, %241, %c0_162, %c0_163] : memref<1x32x32x3xf32, #tpu.memory_space<vmem>>, vector<1x1x32x3xf32>
      %243 = vector.shape_cast %242 : vector<1x1x32x3xf32> to vector<32x3xf32>
      %c0_164 = arith.constant 0 : index
      %c384_165 = arith.constant 384 : index
      %244 = vector.load %arg9[%c0_164, %c384_165] : memref<32x640xf32, #tpu.memory_space<vmem>>, vector<32x3xf32>
      tpu.vector_store %arg9[%c0_164, %c384_165], %243 {strides = array<i32>} : memref<32x640xf32, #tpu.memory_space<vmem>>, vector<32x3xf32>,
      %c4_i32_166 = arith.constant 4 : i32
      %245 = arith.addi %224, %c4_i32_166 : i32
      %c0_167 = arith.constant 0 : index
      %246 = arith.index_cast %245 : i32 to index
      %c0_168 = arith.constant 0 : index
      %c0_169 = arith.constant 0 : index
      %247 = vector.load %arg1[%c0_167, %246, %c0_168, %c0_169] : memref<1x32x32x3xf32, #tpu.memory_space<vmem>>, vector<1x1x32x3xf32>
      %248 = vector.shape_cast %247 : vector<1x1x32x3xf32> to vector<32x3xf32>
      %c0_170 = arith.constant 0 : index
      %c512_171 = arith.constant 512 : index
      %249 = vector.load %arg9[%c0_170, %c512_171] : memref<32x640xf32, #tpu.memory_space<vmem>>, vector<32x3xf32>
      tpu.vector_store %arg9[%c0_170, %c512_171], %248 {strides = array<i32>} : memref<32x640xf32, #tpu.memory_space<vmem>>, vector<32x3xf32>,
      %c0_172 = arith.constant 0 : index
      %c0_173 = arith.constant 0 : index
      %250 = vector.load %arg9[%c0_172, %c0_173] : memref<32x640xf32, #tpu.memory_space<vmem>>, vector<32x640xf32>
      %cst_174 = arith.constant 0.000000e+00 : f32
      %251 = vector.broadcast %cst_174 : f32 to vector<28x128xf32>
      %252 = vector.extract_strided_slice %250 {offsets = [0, 0], sizes = [28, 640], strides = [1, 1]} : vector<32x640xf32> to vector<28x640xf32>
      %253 = arith.truncf %252 : vector<28x640xf32> to vector<28x640xbf16>
      %c0_175 = arith.constant 0 : index
      %c0_176 = arith.constant 0 : index
      %c0_177 = arith.constant 0 : index
      %254 = vector.load %arg2[%c0_175, %c0_176, %c0_177] : memref<5x640x128xbf16, #tpu.memory_space<vmem>>, vector<1x640x128xbf16>
      %255 = vector.shape_cast %254 : vector<1x640x128xbf16> to vector<640x128xbf16>
      %cst_178 = arith.constant dense<0.000000e+00> : vector<28x128xf32>
      %256 = tpu.matmul %253, %255, %cst_178 {dimension_numbers = #tpu.dot_dimension_numbers<[1], [0], [0], [1], [0, 0, 1, 1], [], []>} : vector<28x640xbf16>, vector<640x128xbf16>, vector<28x128xf32> -> vector<28x128xf32>
      %257 = arith.addf %251, %256 : vector<28x128xf32>
      %258 = vector.extract_strided_slice %250 {offsets = [1, 0], sizes = [28, 640], strides = [1, 1]} : vector<32x640xf32> to vector<28x640xf32>
      %259 = arith.truncf %258 : vector<28x640xf32> to vector<28x640xbf16>
      %c1_179 = arith.constant 1 : index
      %c0_180 = arith.constant 0 : index
      %c0_181 = arith.constant 0 : index
      %260 = vector.load %arg2[%c1_179, %c0_180, %c0_181] : memref<5x640x128xbf16, #tpu.memory_space<vmem>>, vector<1x640x128xbf16>
      %261 = vector.shape_cast %260 : vector<1x640x128xbf16> to vector<640x128xbf16>
      %cst_182 = arith.constant dense<0.000000e+00> : vector<28x128xf32>
      %262 = tpu.matmul %259, %261, %cst_182 {dimension_numbers = #tpu.dot_dimension_numbers<[1], [0], [0], [1], [0, 0, 1, 1], [], []>} : vector<28x640xbf16>, vector<640x128xbf16>, vector<28x128xf32> -> vector<28x128xf32>
      %263 = arith.addf %257, %262 : vector<28x128xf32>
      %264 = vector.extract_strided_slice %250 {offsets = [2, 0], sizes = [28, 640], strides = [1, 1]} : vector<32x640xf32> to vector<28x640xf32>
      %265 = arith.truncf %264 : vector<28x640xf32> to vector<28x640xbf16>
      %c2_183 = arith.constant 2 : index
      %c0_184 = arith.constant 0 : index
      %c0_185 = arith.constant 0 : index
      %266 = vector.load %arg2[%c2_183, %c0_184, %c0_185] : memref<5x640x128xbf16, #tpu.memory_space<vmem>>, vector<1x640x128xbf16>
      %267 = vector.shape_cast %266 : vector<1x640x128xbf16> to vector<640x128xbf16>
      %cst_186 = arith.constant dense<0.000000e+00> : vector<28x128xf32>
      %268 = tpu.matmul %265, %267, %cst_186 {dimension_numbers = #tpu.dot_dimension_numbers<[1], [0], [0], [1], [0, 0, 1, 1], [], []>} : vector<28x640xbf16>, vector<640x128xbf16>, vector<28x128xf32> -> vector<28x128xf32>
      %269 = arith.addf %263, %268 : vector<28x128xf32>
      %270 = vector.extract_strided_slice %250 {offsets = [3, 0], sizes = [28, 640], strides = [1, 1]} : vector<32x640xf32> to vector<28x640xf32>
      %271 = arith.truncf %270 : vector<28x640xf32> to vector<28x640xbf16>
      %c3_187 = arith.constant 3 : index
      %c0_188 = arith.constant 0 : index
      %c0_189 = arith.constant 0 : index
      %272 = vector.load %arg2[%c3_187, %c0_188, %c0_189] : memref<5x640x128xbf16, #tpu.memory_space<vmem>>, vector<1x640x128xbf16>
      %273 = vector.shape_cast %272 : vector<1x640x128xbf16> to vector<640x128xbf16>
      %cst_190 = arith.constant dense<0.000000e+00> : vector<28x128xf32>
      %274 = tpu.matmul %271, %273, %cst_190 {dimension_numbers = #tpu.dot_dimension_numbers<[1], [0], [0], [1], [0, 0, 1, 1], [], []>} : vector<28x640xbf16>, vector<640x128xbf16>, vector<28x128xf32> -> vector<28x128xf32>
      %275 = arith.addf %269, %274 : vector<28x128xf32>
      %276 = vector.extract_strided_slice %250 {offsets = [4, 0], sizes = [28, 640], strides = [1, 1]} : vector<32x640xf32> to vector<28x640xf32>
      %277 = arith.truncf %276 : vector<28x640xf32> to vector<28x640xbf16>
      %c4_191 = arith.constant 4 : index
      %c0_192 = arith.constant 0 : index
      %c0_193 = arith.constant 0 : index
      %278 = vector.load %arg2[%c4_191, %c0_192, %c0_193] : memref<5x640x128xbf16, #tpu.memory_space<vmem>>, vector<1x640x128xbf16>
      %279 = vector.shape_cast %278 : vector<1x640x128xbf16> to vector<640x128xbf16>
      %cst_194 = arith.constant dense<0.000000e+00> : vector<28x128xf32>
      %280 = tpu.matmul %277, %279, %cst_194 {dimension_numbers = #tpu.dot_dimension_numbers<[1], [0], [0], [1], [0, 0, 1, 1], [], []>} : vector<28x640xbf16>, vector<640x128xbf16>, vector<28x128xf32> -> vector<28x128xf32>
      %281 = arith.addf %275, %280 : vector<28x128xf32>
      %282 = vector.broadcast %0 : vector<1x128xf32> to vector<28x128xf32>
      %283 = arith.addf %281, %282 : vector<28x128xf32>
      %cst_195 = arith.constant 0.000000e+00 : f32
      %284 = vector.broadcast %cst_195 : f32 to vector<28x128xf32>
      %285 = arith.maximumf %283, %284 : vector<28x128xf32>
      %286 = arith.maximumf %222, %285 : vector<28x128xf32>
      %c0_196 = arith.constant 0 : index
      %c0_197 = arith.constant 0 : index
      %287 = vector.load %arg11[%c0_196, %c0_197] : memref<28x128xf32, #tpu.memory_space<vmem>>, vector<28x128xf32>
      tpu.vector_store %arg11[%c0_196, %c0_197], %286 {strides = array<i32>} : memref<28x128xf32, #tpu.memory_space<vmem>>, vector<28x128xf32>,
      %c0_198 = arith.constant 0 : index
      %c0_199 = arith.constant 0 : index
      %288 = tpu.strided_load %arg11[%c0_198, %c0_199] {strides = array<i32: 2, 1>} : memref<28x128xf32, #tpu.memory_space<vmem>>, vector<14x128xf32>
      %c1_200 = arith.constant 1 : index
      %c0_201 = arith.constant 0 : index
      %289 = tpu.strided_load %arg11[%c1_200, %c0_201] {strides = array<i32: 2, 1>} : memref<28x128xf32, #tpu.memory_space<vmem>>, vector<14x128xf32>
      %290 = arith.maximumf %288, %289 : vector<14x128xf32>
      %291 = arith.index_cast %arg14 : i32 to index
      %c0_202 = arith.constant 0 : index
      %c0_203 = arith.constant 0 : index
      %292 = vector.load %arg12[%291, %c0_202, %c0_203] : memref<14x14x128xf32, #tpu.memory_space<vmem>>, vector<1x14x128xf32>
      %293 = vector.shape_cast %292 : vector<1x14x128xf32> to vector<14x128xf32>
      %294 = vector.shape_cast %290 : vector<14x128xf32> to vector<1x14x128xf32>
      tpu.vector_store %arg12[%291, %c0_202, %c0_203], %294 {strides = array<i32>} : memref<14x14x128xf32, #tpu.memory_space<vmem>>, vector<1x14x128xf32>,
    }
    %c14_i32_7 = arith.constant 14 : i32
    %c0_i32_8 = arith.constant 0 : i32
    %c5_i32 = arith.constant 5 : i32
    %8 = arith.addi %c0_i32_8, %c5_i32 : i32
    %c1_i32_9 = arith.constant 1 : i32
    scf.for %arg14 = %c0_i32_8 to %8 step %c1_i32_9  : i32 {
      %c2_i32 = arith.constant 2 : i32
      %161 = arith.muli %c2_i32, %arg14 : i32
      %c0_i32_89 = arith.constant 0 : i32
      %162 = arith.addi %161, %c0_i32_89 : i32
      %163 = arith.index_cast %162 : i32 to index
      %c0_90 = arith.constant 0 : index
      %c0_91 = arith.constant 0 : index
      %164 = vector.load %arg12[%163, %c0_90, %c0_91] : memref<14x14x128xf32, #tpu.memory_space<vmem>>, vector<1x14x128xf32>
      %165 = vector.shape_cast %164 : vector<1x14x128xf32> to vector<14x128xf32>
      %c0_92 = arith.constant 0 : index
      %c0_93 = arith.constant 0 : index
      %166 = vector.load %arg10[%c0_92, %c0_93] : memref<14x640xf32, #tpu.memory_space<vmem>>, vector<14x128xf32>
      tpu.vector_store %arg10[%c0_92, %c0_93], %165 {strides = array<i32>} : memref<14x640xf32, #tpu.memory_space<vmem>>, vector<14x128xf32>,
      %c1_i32_94 = arith.constant 1 : i32
      %167 = arith.addi %161, %c1_i32_94 : i32
      %168 = arith.index_cast %167 : i32 to index
      %c0_95 = arith.constant 0 : index
      %c0_96 = arith.constant 0 : index
      %169 = vector.load %arg12[%168, %c0_95, %c0_96] : memref<14x14x128xf32, #tpu.memory_space<vmem>>, vector<1x14x128xf32>
      %170 = vector.shape_cast %169 : vector<1x14x128xf32> to vector<14x128xf32>
      %c0_97 = arith.constant 0 : index
      %c128_98 = arith.constant 128 : index
      %171 = vector.load %arg10[%c0_97, %c128_98] : memref<14x640xf32, #tpu.memory_space<vmem>>, vector<14x128xf32>
      tpu.vector_store %arg10[%c0_97, %c128_98], %170 {strides = array<i32>} : memref<14x640xf32, #tpu.memory_space<vmem>>, vector<14x128xf32>,
      %c2_i32_99 = arith.constant 2 : i32
      %172 = arith.addi %161, %c2_i32_99 : i32
      %173 = arith.index_cast %172 : i32 to index
      %c0_100 = arith.constant 0 : index
      %c0_101 = arith.constant 0 : index
      %174 = vector.load %arg12[%173, %c0_100, %c0_101] : memref<14x14x128xf32, #tpu.memory_space<vmem>>, vector<1x14x128xf32>
      %175 = vector.shape_cast %174 : vector<1x14x128xf32> to vector<14x128xf32>
      %c0_102 = arith.constant 0 : index
      %c256_103 = arith.constant 256 : index
      %176 = vector.load %arg10[%c0_102, %c256_103] : memref<14x640xf32, #tpu.memory_space<vmem>>, vector<14x128xf32>
      tpu.vector_store %arg10[%c0_102, %c256_103], %175 {strides = array<i32>} : memref<14x640xf32, #tpu.memory_space<vmem>>, vector<14x128xf32>,
      %c3_i32 = arith.constant 3 : i32
      %177 = arith.addi %161, %c3_i32 : i32
      %178 = arith.index_cast %177 : i32 to index
      %c0_104 = arith.constant 0 : index
      %c0_105 = arith.constant 0 : index
      %179 = vector.load %arg12[%178, %c0_104, %c0_105] : memref<14x14x128xf32, #tpu.memory_space<vmem>>, vector<1x14x128xf32>
      %180 = vector.shape_cast %179 : vector<1x14x128xf32> to vector<14x128xf32>
      %c0_106 = arith.constant 0 : index
      %c384_107 = arith.constant 384 : index
      %181 = vector.load %arg10[%c0_106, %c384_107] : memref<14x640xf32, #tpu.memory_space<vmem>>, vector<14x128xf32>
      tpu.vector_store %arg10[%c0_106, %c384_107], %180 {strides = array<i32>} : memref<14x640xf32, #tpu.memory_space<vmem>>, vector<14x128xf32>,
      %c4_i32 = arith.constant 4 : i32
      %182 = arith.addi %161, %c4_i32 : i32
      %183 = arith.index_cast %182 : i32 to index
      %c0_108 = arith.constant 0 : index
      %c0_109 = arith.constant 0 : index
      %184 = vector.load %arg12[%183, %c0_108, %c0_109] : memref<14x14x128xf32, #tpu.memory_space<vmem>>, vector<1x14x128xf32>
      %185 = vector.shape_cast %184 : vector<1x14x128xf32> to vector<14x128xf32>
      %c0_110 = arith.constant 0 : index
      %c512 = arith.constant 512 : index
      %186 = vector.load %arg10[%c0_110, %c512] : memref<14x640xf32, #tpu.memory_space<vmem>>, vector<14x128xf32>
      tpu.vector_store %arg10[%c0_110, %c512], %185 {strides = array<i32>} : memref<14x640xf32, #tpu.memory_space<vmem>>, vector<14x128xf32>,
      %c0_111 = arith.constant 0 : index
      %c0_112 = arith.constant 0 : index
      %187 = vector.load %arg10[%c0_111, %c0_112] : memref<14x640xf32, #tpu.memory_space<vmem>>, vector<14x640xf32>
      %cst_113 = arith.constant 0.000000e+00 : f32
      %188 = vector.broadcast %cst_113 : f32 to vector<10x128xf32>
      %189 = vector.extract_strided_slice %187 {offsets = [0, 0], sizes = [10, 640], strides = [1, 1]} : vector<14x640xf32> to vector<10x640xf32>
      %190 = arith.truncf %189 : vector<10x640xf32> to vector<10x640xbf16>
      %c0_114 = arith.constant 0 : index
      %c0_115 = arith.constant 0 : index
      %c0_116 = arith.constant 0 : index
      %191 = vector.load %arg3[%c0_114, %c0_115, %c0_116] : memref<5x640x128xbf16, #tpu.memory_space<vmem>>, vector<1x640x128xbf16>
      %192 = vector.shape_cast %191 : vector<1x640x128xbf16> to vector<640x128xbf16>
      %cst_117 = arith.constant dense<0.000000e+00> : vector<10x128xf32>
      %193 = tpu.matmul %190, %192, %cst_117 {dimension_numbers = #tpu.dot_dimension_numbers<[1], [0], [0], [1], [0, 0, 1, 1], [], []>} : vector<10x640xbf16>, vector<640x128xbf16>, vector<10x128xf32> -> vector<10x128xf32>
      %194 = arith.addf %188, %193 : vector<10x128xf32>
      %195 = vector.extract_strided_slice %187 {offsets = [1, 0], sizes = [10, 640], strides = [1, 1]} : vector<14x640xf32> to vector<10x640xf32>
      %196 = arith.truncf %195 : vector<10x640xf32> to vector<10x640xbf16>
      %c1_118 = arith.constant 1 : index
      %c0_119 = arith.constant 0 : index
      %c0_120 = arith.constant 0 : index
      %197 = vector.load %arg3[%c1_118, %c0_119, %c0_120] : memref<5x640x128xbf16, #tpu.memory_space<vmem>>, vector<1x640x128xbf16>
      %198 = vector.shape_cast %197 : vector<1x640x128xbf16> to vector<640x128xbf16>
      %cst_121 = arith.constant dense<0.000000e+00> : vector<10x128xf32>
      %199 = tpu.matmul %196, %198, %cst_121 {dimension_numbers = #tpu.dot_dimension_numbers<[1], [0], [0], [1], [0, 0, 1, 1], [], []>} : vector<10x640xbf16>, vector<640x128xbf16>, vector<10x128xf32> -> vector<10x128xf32>
      %200 = arith.addf %194, %199 : vector<10x128xf32>
      %201 = vector.extract_strided_slice %187 {offsets = [2, 0], sizes = [10, 640], strides = [1, 1]} : vector<14x640xf32> to vector<10x640xf32>
      %202 = arith.truncf %201 : vector<10x640xf32> to vector<10x640xbf16>
      %c2_122 = arith.constant 2 : index
      %c0_123 = arith.constant 0 : index
      %c0_124 = arith.constant 0 : index
      %203 = vector.load %arg3[%c2_122, %c0_123, %c0_124] : memref<5x640x128xbf16, #tpu.memory_space<vmem>>, vector<1x640x128xbf16>
      %204 = vector.shape_cast %203 : vector<1x640x128xbf16> to vector<640x128xbf16>
      %cst_125 = arith.constant dense<0.000000e+00> : vector<10x128xf32>
      %205 = tpu.matmul %202, %204, %cst_125 {dimension_numbers = #tpu.dot_dimension_numbers<[1], [0], [0], [1], [0, 0, 1, 1], [], []>} : vector<10x640xbf16>, vector<640x128xbf16>, vector<10x128xf32> -> vector<10x128xf32>
      %206 = arith.addf %200, %205 : vector<10x128xf32>
      %207 = vector.extract_strided_slice %187 {offsets = [3, 0], sizes = [10, 640], strides = [1, 1]} : vector<14x640xf32> to vector<10x640xf32>
      %208 = arith.truncf %207 : vector<10x640xf32> to vector<10x640xbf16>
      %c3_126 = arith.constant 3 : index
      %c0_127 = arith.constant 0 : index
      %c0_128 = arith.constant 0 : index
      %209 = vector.load %arg3[%c3_126, %c0_127, %c0_128] : memref<5x640x128xbf16, #tpu.memory_space<vmem>>, vector<1x640x128xbf16>
      %210 = vector.shape_cast %209 : vector<1x640x128xbf16> to vector<640x128xbf16>
      %cst_129 = arith.constant dense<0.000000e+00> : vector<10x128xf32>
      %211 = tpu.matmul %208, %210, %cst_129 {dimension_numbers = #tpu.dot_dimension_numbers<[1], [0], [0], [1], [0, 0, 1, 1], [], []>} : vector<10x640xbf16>, vector<640x128xbf16>, vector<10x128xf32> -> vector<10x128xf32>
      %212 = arith.addf %206, %211 : vector<10x128xf32>
      %213 = vector.extract_strided_slice %187 {offsets = [4, 0], sizes = [10, 640], strides = [1, 1]} : vector<14x640xf32> to vector<10x640xf32>
      %214 = arith.truncf %213 : vector<10x640xf32> to vector<10x640xbf16>
      %c4_130 = arith.constant 4 : index
      %c0_131 = arith.constant 0 : index
      %c0_132 = arith.constant 0 : index
      %215 = vector.load %arg3[%c4_130, %c0_131, %c0_132] : memref<5x640x128xbf16, #tpu.memory_space<vmem>>, vector<1x640x128xbf16>
      %216 = vector.shape_cast %215 : vector<1x640x128xbf16> to vector<640x128xbf16>
      %cst_133 = arith.constant dense<0.000000e+00> : vector<10x128xf32>
      %217 = tpu.matmul %214, %216, %cst_133 {dimension_numbers = #tpu.dot_dimension_numbers<[1], [0], [0], [1], [0, 0, 1, 1], [], []>} : vector<10x640xbf16>, vector<640x128xbf16>, vector<10x128xf32> -> vector<10x128xf32>
      %218 = arith.addf %212, %217 : vector<10x128xf32>
      %219 = vector.broadcast %1 : vector<1x128xf32> to vector<10x128xf32>
      %220 = arith.addf %218, %219 : vector<10x128xf32>
      %cst_134 = arith.constant 0.000000e+00 : f32
      %221 = vector.broadcast %cst_134 : f32 to vector<10x128xf32>
      %222 = arith.maximumf %220, %221 : vector<10x128xf32>
      %c2_i32_135 = arith.constant 2 : i32
      %223 = arith.muli %c2_i32_135, %arg14 : i32
      %c1_i32_136 = arith.constant 1 : i32
      %224 = arith.addi %223, %c1_i32_136 : i32
      %c0_i32_137 = arith.constant 0 : i32
      %225 = arith.addi %224, %c0_i32_137 : i32
      %226 = arith.index_cast %225 : i32 to index
      %c0_138 = arith.constant 0 : index
      %c0_139 = arith.constant 0 : index
      %227 = vector.load %arg12[%226, %c0_138, %c0_139] : memref<14x14x128xf32, #tpu.memory_space<vmem>>, vector<1x14x128xf32>
      %228 = vector.shape_cast %227 : vector<1x14x128xf32> to vector<14x128xf32>
      %c0_140 = arith.constant 0 : index
      %c0_141 = arith.constant 0 : index
      %229 = vector.load %arg10[%c0_140, %c0_141] : memref<14x640xf32, #tpu.memory_space<vmem>>, vector<14x128xf32>
      tpu.vector_store %arg10[%c0_140, %c0_141], %228 {strides = array<i32>} : memref<14x640xf32, #tpu.memory_space<vmem>>, vector<14x128xf32>,
      %c1_i32_142 = arith.constant 1 : i32
      %230 = arith.addi %224, %c1_i32_142 : i32
      %231 = arith.index_cast %230 : i32 to index
      %c0_143 = arith.constant 0 : index
      %c0_144 = arith.constant 0 : index
      %232 = vector.load %arg12[%231, %c0_143, %c0_144] : memref<14x14x128xf32, #tpu.memory_space<vmem>>, vector<1x14x128xf32>
      %233 = vector.shape_cast %232 : vector<1x14x128xf32> to vector<14x128xf32>
      %c0_145 = arith.constant 0 : index
      %c128_146 = arith.constant 128 : index
      %234 = vector.load %arg10[%c0_145, %c128_146] : memref<14x640xf32, #tpu.memory_space<vmem>>, vector<14x128xf32>
      tpu.vector_store %arg10[%c0_145, %c128_146], %233 {strides = array<i32>} : memref<14x640xf32, #tpu.memory_space<vmem>>, vector<14x128xf32>,
      %c2_i32_147 = arith.constant 2 : i32
      %235 = arith.addi %224, %c2_i32_147 : i32
      %236 = arith.index_cast %235 : i32 to index
      %c0_148 = arith.constant 0 : index
      %c0_149 = arith.constant 0 : index
      %237 = vector.load %arg12[%236, %c0_148, %c0_149] : memref<14x14x128xf32, #tpu.memory_space<vmem>>, vector<1x14x128xf32>
      %238 = vector.shape_cast %237 : vector<1x14x128xf32> to vector<14x128xf32>
      %c0_150 = arith.constant 0 : index
      %c256_151 = arith.constant 256 : index
      %239 = vector.load %arg10[%c0_150, %c256_151] : memref<14x640xf32, #tpu.memory_space<vmem>>, vector<14x128xf32>
      tpu.vector_store %arg10[%c0_150, %c256_151], %238 {strides = array<i32>} : memref<14x640xf32, #tpu.memory_space<vmem>>, vector<14x128xf32>,
      %c3_i32_152 = arith.constant 3 : i32
      %240 = arith.addi %224, %c3_i32_152 : i32
      %241 = arith.index_cast %240 : i32 to index
      %c0_153 = arith.constant 0 : index
      %c0_154 = arith.constant 0 : index
      %242 = vector.load %arg12[%241, %c0_153, %c0_154] : memref<14x14x128xf32, #tpu.memory_space<vmem>>, vector<1x14x128xf32>
      %243 = vector.shape_cast %242 : vector<1x14x128xf32> to vector<14x128xf32>
      %c0_155 = arith.constant 0 : index
      %c384_156 = arith.constant 384 : index
      %244 = vector.load %arg10[%c0_155, %c384_156] : memref<14x640xf32, #tpu.memory_space<vmem>>, vector<14x128xf32>
      tpu.vector_store %arg10[%c0_155, %c384_156], %243 {strides = array<i32>} : memref<14x640xf32, #tpu.memory_space<vmem>>, vector<14x128xf32>,
      %c4_i32_157 = arith.constant 4 : i32
      %245 = arith.addi %224, %c4_i32_157 : i32
      %246 = arith.index_cast %245 : i32 to index
      %c0_158 = arith.constant 0 : index
      %c0_159 = arith.constant 0 : index
      %247 = vector.load %arg12[%246, %c0_158, %c0_159] : memref<14x14x128xf32, #tpu.memory_space<vmem>>, vector<1x14x128xf32>
      %248 = vector.shape_cast %247 : vector<1x14x128xf32> to vector<14x128xf32>
      %c0_160 = arith.constant 0 : index
      %c512_161 = arith.constant 512 : index
      %249 = vector.load %arg10[%c0_160, %c512_161] : memref<14x640xf32, #tpu.memory_space<vmem>>, vector<14x128xf32>
      tpu.vector_store %arg10[%c0_160, %c512_161], %248 {strides = array<i32>} : memref<14x640xf32, #tpu.memory_space<vmem>>, vector<14x128xf32>,
      %c0_162 = arith.constant 0 : index
      %c0_163 = arith.constant 0 : index
      %250 = vector.load %arg10[%c0_162, %c0_163] : memref<14x640xf32, #tpu.memory_space<vmem>>, vector<14x640xf32>
      %cst_164 = arith.constant 0.000000e+00 : f32
      %251 = vector.broadcast %cst_164 : f32 to vector<10x128xf32>
      %252 = vector.extract_strided_slice %250 {offsets = [0, 0], sizes = [10, 640], strides = [1, 1]} : vector<14x640xf32> to vector<10x640xf32>
      %253 = arith.truncf %252 : vector<10x640xf32> to vector<10x640xbf16>
      %c0_165 = arith.constant 0 : index
      %c0_166 = arith.constant 0 : index
      %c0_167 = arith.constant 0 : index
      %254 = vector.load %arg3[%c0_165, %c0_166, %c0_167] : memref<5x640x128xbf16, #tpu.memory_space<vmem>>, vector<1x640x128xbf16>
      %255 = vector.shape_cast %254 : vector<1x640x128xbf16> to vector<640x128xbf16>
      %cst_168 = arith.constant dense<0.000000e+00> : vector<10x128xf32>
      %256 = tpu.matmul %253, %255, %cst_168 {dimension_numbers = #tpu.dot_dimension_numbers<[1], [0], [0], [1], [0, 0, 1, 1], [], []>} : vector<10x640xbf16>, vector<640x128xbf16>, vector<10x128xf32> -> vector<10x128xf32>
      %257 = arith.addf %251, %256 : vector<10x128xf32>
      %258 = vector.extract_strided_slice %250 {offsets = [1, 0], sizes = [10, 640], strides = [1, 1]} : vector<14x640xf32> to vector<10x640xf32>
      %259 = arith.truncf %258 : vector<10x640xf32> to vector<10x640xbf16>
      %c1_169 = arith.constant 1 : index
      %c0_170 = arith.constant 0 : index
      %c0_171 = arith.constant 0 : index
      %260 = vector.load %arg3[%c1_169, %c0_170, %c0_171] : memref<5x640x128xbf16, #tpu.memory_space<vmem>>, vector<1x640x128xbf16>
      %261 = vector.shape_cast %260 : vector<1x640x128xbf16> to vector<640x128xbf16>
      %cst_172 = arith.constant dense<0.000000e+00> : vector<10x128xf32>
      %262 = tpu.matmul %259, %261, %cst_172 {dimension_numbers = #tpu.dot_dimension_numbers<[1], [0], [0], [1], [0, 0, 1, 1], [], []>} : vector<10x640xbf16>, vector<640x128xbf16>, vector<10x128xf32> -> vector<10x128xf32>
      %263 = arith.addf %257, %262 : vector<10x128xf32>
      %264 = vector.extract_strided_slice %250 {offsets = [2, 0], sizes = [10, 640], strides = [1, 1]} : vector<14x640xf32> to vector<10x640xf32>
      %265 = arith.truncf %264 : vector<10x640xf32> to vector<10x640xbf16>
      %c2_173 = arith.constant 2 : index
      %c0_174 = arith.constant 0 : index
      %c0_175 = arith.constant 0 : index
      %266 = vector.load %arg3[%c2_173, %c0_174, %c0_175] : memref<5x640x128xbf16, #tpu.memory_space<vmem>>, vector<1x640x128xbf16>
      %267 = vector.shape_cast %266 : vector<1x640x128xbf16> to vector<640x128xbf16>
      %cst_176 = arith.constant dense<0.000000e+00> : vector<10x128xf32>
      %268 = tpu.matmul %265, %267, %cst_176 {dimension_numbers = #tpu.dot_dimension_numbers<[1], [0], [0], [1], [0, 0, 1, 1], [], []>} : vector<10x640xbf16>, vector<640x128xbf16>, vector<10x128xf32> -> vector<10x128xf32>
      %269 = arith.addf %263, %268 : vector<10x128xf32>
      %270 = vector.extract_strided_slice %250 {offsets = [3, 0], sizes = [10, 640], strides = [1, 1]} : vector<14x640xf32> to vector<10x640xf32>
      %271 = arith.truncf %270 : vector<10x640xf32> to vector<10x640xbf16>
      %c3_177 = arith.constant 3 : index
      %c0_178 = arith.constant 0 : index
      %c0_179 = arith.constant 0 : index
      %272 = vector.load %arg3[%c3_177, %c0_178, %c0_179] : memref<5x640x128xbf16, #tpu.memory_space<vmem>>, vector<1x640x128xbf16>
      %273 = vector.shape_cast %272 : vector<1x640x128xbf16> to vector<640x128xbf16>
      %cst_180 = arith.constant dense<0.000000e+00> : vector<10x128xf32>
      %274 = tpu.matmul %271, %273, %cst_180 {dimension_numbers = #tpu.dot_dimension_numbers<[1], [0], [0], [1], [0, 0, 1, 1], [], []>} : vector<10x640xbf16>, vector<640x128xbf16>, vector<10x128xf32> -> vector<10x128xf32>
      %275 = arith.addf %269, %274 : vector<10x128xf32>
      %276 = vector.extract_strided_slice %250 {offsets = [4, 0], sizes = [10, 640], strides = [1, 1]} : vector<14x640xf32> to vector<10x640xf32>
      %277 = arith.truncf %276 : vector<10x640xf32> to vector<10x640xbf16>
      %c4_181 = arith.constant 4 : index
      %c0_182 = arith.constant 0 : index
      %c0_183 = arith.constant 0 : index
      %278 = vector.load %arg3[%c4_181, %c0_182, %c0_183] : memref<5x640x128xbf16, #tpu.memory_space<vmem>>, vector<1x640x128xbf16>
      %279 = vector.shape_cast %278 : vector<1x640x128xbf16> to vector<640x128xbf16>
      %cst_184 = arith.constant dense<0.000000e+00> : vector<10x128xf32>
      %280 = tpu.matmul %277, %279, %cst_184 {dimension_numbers = #tpu.dot_dimension_numbers<[1], [0], [0], [1], [0, 0, 1, 1], [], []>} : vector<10x640xbf16>, vector<640x128xbf16>, vector<10x128xf32> -> vector<10x128xf32>
      %281 = arith.addf %275, %280 : vector<10x128xf32>
      %282 = vector.broadcast %1 : vector<1x128xf32> to vector<10x128xf32>
      %283 = arith.addf %281, %282 : vector<10x128xf32>
      %cst_185 = arith.constant 0.000000e+00 : f32
      %284 = vector.broadcast %cst_185 : f32 to vector<10x128xf32>
      %285 = arith.maximumf %283, %284 : vector<10x128xf32>
      %286 = arith.maximumf %222, %285 : vector<10x128xf32>
      %c0_186 = arith.constant 0 : index
      %c0_187 = arith.constant 0 : index
      %287 = vector.load %arg11[%c0_186, %c0_187] : memref<28x128xf32, #tpu.memory_space<vmem>>, vector<10x128xf32>
      tpu.vector_store %arg11[%c0_186, %c0_187], %286 {strides = array<i32>} : memref<28x128xf32, #tpu.memory_space<vmem>>, vector<10x128xf32>,
      %c0_188 = arith.constant 0 : index
      %c0_189 = arith.constant 0 : index
      %288 = tpu.strided_load %arg11[%c0_188, %c0_189] {strides = array<i32: 2, 1>} : memref<28x128xf32, #tpu.memory_space<vmem>>, vector<5x128xf32>
      %c1_190 = arith.constant 1 : index
      %c0_191 = arith.constant 0 : index
      %289 = tpu.strided_load %arg11[%c1_190, %c0_191] {strides = array<i32: 2, 1>} : memref<28x128xf32, #tpu.memory_space<vmem>>, vector<5x128xf32>
      %290 = arith.maximumf %288, %289 : vector<5x128xf32>
      %291 = arith.index_cast %arg14 : i32 to index
      %c0_192 = arith.constant 0 : index
      %c0_193 = arith.constant 0 : index
      %292 = vector.load %arg13[%291, %c0_192, %c0_193] : memref<5x5x128xf32, #tpu.memory_space<vmem>>, vector<1x5x128xf32>
      %293 = vector.shape_cast %292 : vector<1x5x128xf32> to vector<5x128xf32>
      %294 = vector.shape_cast %290 : vector<5x128xf32> to vector<1x5x128xf32>
      tpu.vector_store %arg13[%291, %c0_192, %c0_193], %294 {strides = array<i32>} : memref<5x5x128xf32, #tpu.memory_space<vmem>>, vector<1x5x128xf32>,
    }
    %c5_i32_10 = arith.constant 5 : i32
    %cst_11 = arith.constant 0.000000e+00 : f32
    %9 = vector.broadcast %cst_11 : f32 to vector<1x128xf32>
    %c0_12 = arith.constant 0 : index
    %c0_13 = arith.constant 0 : index
    %c0_14 = arith.constant 0 : index
    %10 = vector.load %arg13[%c0_12, %c0_13, %c0_14] : memref<5x5x128xf32, #tpu.memory_space<vmem>>, vector<1x5x128xf32>
    %11 = vector.shape_cast %10 : vector<1x5x128xf32> to vector<5x128xf32>
    %12 = vector.extract_strided_slice %11 {offsets = [0, 0], sizes = [1, 16], strides = [1, 1]} : vector<5x128xf32> to vector<1x16xf32>
    %13 = arith.truncf %12 : vector<1x16xf32> to vector<1x16xbf16>
    %c0_15 = arith.constant 0 : index
    %c0_16 = arith.constant 0 : index
    %14 = vector.load %arg4[%c0_15, %c0_16] : memref<400x128xbf16, #tpu.memory_space<vmem>>, vector<16x128xbf16>
    %cst_17 = arith.constant dense<0.000000e+00> : vector<1x128xf32>
    %15 = tpu.matmul %13, %14, %cst_17 {dimension_numbers = #tpu.dot_dimension_numbers<[1], [0], [0], [1], [0, 0, 1, 1], [], []>} : vector<1x16xbf16>, vector<16x128xbf16>, vector<1x128xf32> -> vector<1x128xf32>
    %16 = arith.addf %9, %15 : vector<1x128xf32>
    %17 = vector.extract_strided_slice %11 {offsets = [1, 0], sizes = [1, 16], strides = [1, 1]} : vector<5x128xf32> to vector<1x16xf32>
    %18 = arith.truncf %17 : vector<1x16xf32> to vector<1x16xbf16>
    %c16 = arith.constant 16 : index
    %c0_18 = arith.constant 0 : index
    %19 = vector.load %arg4[%c16, %c0_18] : memref<400x128xbf16, #tpu.memory_space<vmem>>, vector<16x128xbf16>
    %cst_19 = arith.constant dense<0.000000e+00> : vector<1x128xf32>
    %20 = tpu.matmul %18, %19, %cst_19 {dimension_numbers = #tpu.dot_dimension_numbers<[1], [0], [0], [1], [0, 0, 1, 1], [], []>} : vector<1x16xbf16>, vector<16x128xbf16>, vector<1x128xf32> -> vector<1x128xf32>
    %21 = arith.addf %16, %20 : vector<1x128xf32>
    %22 = vector.extract_strided_slice %11 {offsets = [2, 0], sizes = [1, 16], strides = [1, 1]} : vector<5x128xf32> to vector<1x16xf32>
    %23 = arith.truncf %22 : vector<1x16xf32> to vector<1x16xbf16>
    %c32 = arith.constant 32 : index
    %c0_20 = arith.constant 0 : index
    %24 = vector.load %arg4[%c32, %c0_20] : memref<400x128xbf16, #tpu.memory_space<vmem>>, vector<16x128xbf16>
    %cst_21 = arith.constant dense<0.000000e+00> : vector<1x128xf32>
    %25 = tpu.matmul %23, %24, %cst_21 {dimension_numbers = #tpu.dot_dimension_numbers<[1], [0], [0], [1], [0, 0, 1, 1], [], []>} : vector<1x16xbf16>, vector<16x128xbf16>, vector<1x128xf32> -> vector<1x128xf32>
    %26 = arith.addf %21, %25 : vector<1x128xf32>
    %27 = vector.extract_strided_slice %11 {offsets = [3, 0], sizes = [1, 16], strides = [1, 1]} : vector<5x128xf32> to vector<1x16xf32>
    %28 = arith.truncf %27 : vector<1x16xf32> to vector<1x16xbf16>
    %c48 = arith.constant 48 : index
    %c0_22 = arith.constant 0 : index
    %29 = vector.load %arg4[%c48, %c0_22] : memref<400x128xbf16, #tpu.memory_space<vmem>>, vector<16x128xbf16>
    %cst_23 = arith.constant dense<0.000000e+00> : vector<1x128xf32>
    %30 = tpu.matmul %28, %29, %cst_23 {dimension_numbers = #tpu.dot_dimension_numbers<[1], [0], [0], [1], [0, 0, 1, 1], [], []>} : vector<1x16xbf16>, vector<16x128xbf16>, vector<1x128xf32> -> vector<1x128xf32>
    %31 = arith.addf %26, %30 : vector<1x128xf32>
    %32 = vector.extract_strided_slice %11 {offsets = [4, 0], sizes = [1, 16], strides = [1, 1]} : vector<5x128xf32> to vector<1x16xf32>
    %33 = arith.truncf %32 : vector<1x16xf32> to vector<1x16xbf16>
    %c64 = arith.constant 64 : index
    %c0_24 = arith.constant 0 : index
    %34 = vector.load %arg4[%c64, %c0_24] : memref<400x128xbf16, #tpu.memory_space<vmem>>, vector<16x128xbf16>
    %cst_25 = arith.constant dense<0.000000e+00> : vector<1x128xf32>
    %35 = tpu.matmul %33, %34, %cst_25 {dimension_numbers = #tpu.dot_dimension_numbers<[1], [0], [0], [1], [0, 0, 1, 1], [], []>} : vector<1x16xbf16>, vector<16x128xbf16>, vector<1x128xf32> -> vector<1x128xf32>
    %36 = arith.addf %31, %35 : vector<1x128xf32>
    %c1_26 = arith.constant 1 : index
    %c0_27 = arith.constant 0 : index
    %c0_28 = arith.constant 0 : index
    %37 = vector.load %arg13[%c1_26, %c0_27, %c0_28] : memref<5x5x128xf32, #tpu.memory_space<vmem>>, vector<1x5x128xf32>
    %38 = vector.shape_cast %37 : vector<1x5x128xf32> to vector<5x128xf32>
    %39 = vector.extract_strided_slice %38 {offsets = [0, 0], sizes = [1, 16], strides = [1, 1]} : vector<5x128xf32> to vector<1x16xf32>
    %40 = arith.truncf %39 : vector<1x16xf32> to vector<1x16xbf16>
    %c80 = arith.constant 80 : index
    %c0_29 = arith.constant 0 : index
    %41 = vector.load %arg4[%c80, %c0_29] : memref<400x128xbf16, #tpu.memory_space<vmem>>, vector<16x128xbf16>
    %cst_30 = arith.constant dense<0.000000e+00> : vector<1x128xf32>
    %42 = tpu.matmul %40, %41, %cst_30 {dimension_numbers = #tpu.dot_dimension_numbers<[1], [0], [0], [1], [0, 0, 1, 1], [], []>} : vector<1x16xbf16>, vector<16x128xbf16>, vector<1x128xf32> -> vector<1x128xf32>
    %43 = arith.addf %36, %42 : vector<1x128xf32>
    %44 = vector.extract_strided_slice %38 {offsets = [1, 0], sizes = [1, 16], strides = [1, 1]} : vector<5x128xf32> to vector<1x16xf32>
    %45 = arith.truncf %44 : vector<1x16xf32> to vector<1x16xbf16>
    %c96 = arith.constant 96 : index
    %c0_31 = arith.constant 0 : index
    %46 = vector.load %arg4[%c96, %c0_31] : memref<400x128xbf16, #tpu.memory_space<vmem>>, vector<16x128xbf16>
    %cst_32 = arith.constant dense<0.000000e+00> : vector<1x128xf32>
    %47 = tpu.matmul %45, %46, %cst_32 {dimension_numbers = #tpu.dot_dimension_numbers<[1], [0], [0], [1], [0, 0, 1, 1], [], []>} : vector<1x16xbf16>, vector<16x128xbf16>, vector<1x128xf32> -> vector<1x128xf32>
    %48 = arith.addf %43, %47 : vector<1x128xf32>
    %49 = vector.extract_strided_slice %38 {offsets = [2, 0], sizes = [1, 16], strides = [1, 1]} : vector<5x128xf32> to vector<1x16xf32>
    %50 = arith.truncf %49 : vector<1x16xf32> to vector<1x16xbf16>
    %c112 = arith.constant 112 : index
    %c0_33 = arith.constant 0 : index
    %51 = vector.load %arg4[%c112, %c0_33] : memref<400x128xbf16, #tpu.memory_space<vmem>>, vector<16x128xbf16>
    %cst_34 = arith.constant dense<0.000000e+00> : vector<1x128xf32>
    %52 = tpu.matmul %50, %51, %cst_34 {dimension_numbers = #tpu.dot_dimension_numbers<[1], [0], [0], [1], [0, 0, 1, 1], [], []>} : vector<1x16xbf16>, vector<16x128xbf16>, vector<1x128xf32> -> vector<1x128xf32>
    %53 = arith.addf %48, %52 : vector<1x128xf32>
    %54 = vector.extract_strided_slice %38 {offsets = [3, 0], sizes = [1, 16], strides = [1, 1]} : vector<5x128xf32> to vector<1x16xf32>
    %55 = arith.truncf %54 : vector<1x16xf32> to vector<1x16xbf16>
    %c128 = arith.constant 128 : index
    %c0_35 = arith.constant 0 : index
    %56 = vector.load %arg4[%c128, %c0_35] : memref<400x128xbf16, #tpu.memory_space<vmem>>, vector<16x128xbf16>
    %cst_36 = arith.constant dense<0.000000e+00> : vector<1x128xf32>
    %57 = tpu.matmul %55, %56, %cst_36 {dimension_numbers = #tpu.dot_dimension_numbers<[1], [0], [0], [1], [0, 0, 1, 1], [], []>} : vector<1x16xbf16>, vector<16x128xbf16>, vector<1x128xf32> -> vector<1x128xf32>
    %58 = arith.addf %53, %57 : vector<1x128xf32>
    %59 = vector.extract_strided_slice %38 {offsets = [4, 0], sizes = [1, 16], strides = [1, 1]} : vector<5x128xf32> to vector<1x16xf32>
    %60 = arith.truncf %59 : vector<1x16xf32> to vector<1x16xbf16>
    %c144 = arith.constant 144 : index
    %c0_37 = arith.constant 0 : index
    %61 = vector.load %arg4[%c144, %c0_37] : memref<400x128xbf16, #tpu.memory_space<vmem>>, vector<16x128xbf16>
    %cst_38 = arith.constant dense<0.000000e+00> : vector<1x128xf32>
    %62 = tpu.matmul %60, %61, %cst_38 {dimension_numbers = #tpu.dot_dimension_numbers<[1], [0], [0], [1], [0, 0, 1, 1], [], []>} : vector<1x16xbf16>, vector<16x128xbf16>, vector<1x128xf32> -> vector<1x128xf32>
    %63 = arith.addf %58, %62 : vector<1x128xf32>
    %c2_39 = arith.constant 2 : index
    %c0_40 = arith.constant 0 : index
    %c0_41 = arith.constant 0 : index
    %64 = vector.load %arg13[%c2_39, %c0_40, %c0_41] : memref<5x5x128xf32, #tpu.memory_space<vmem>>, vector<1x5x128xf32>
    %65 = vector.shape_cast %64 : vector<1x5x128xf32> to vector<5x128xf32>
    %66 = vector.extract_strided_slice %65 {offsets = [0, 0], sizes = [1, 16], strides = [1, 1]} : vector<5x128xf32> to vector<1x16xf32>
    %67 = arith.truncf %66 : vector<1x16xf32> to vector<1x16xbf16>
    %c160 = arith.constant 160 : index
    %c0_42 = arith.constant 0 : index
    %68 = vector.load %arg4[%c160, %c0_42] : memref<400x128xbf16, #tpu.memory_space<vmem>>, vector<16x128xbf16>
    %cst_43 = arith.constant dense<0.000000e+00> : vector<1x128xf32>
    %69 = tpu.matmul %67, %68, %cst_43 {dimension_numbers = #tpu.dot_dimension_numbers<[1], [0], [0], [1], [0, 0, 1, 1], [], []>} : vector<1x16xbf16>, vector<16x128xbf16>, vector<1x128xf32> -> vector<1x128xf32>
    %70 = arith.addf %63, %69 : vector<1x128xf32>
    %71 = vector.extract_strided_slice %65 {offsets = [1, 0], sizes = [1, 16], strides = [1, 1]} : vector<5x128xf32> to vector<1x16xf32>
    %72 = arith.truncf %71 : vector<1x16xf32> to vector<1x16xbf16>
    %c176 = arith.constant 176 : index
    %c0_44 = arith.constant 0 : index
    %73 = vector.load %arg4[%c176, %c0_44] : memref<400x128xbf16, #tpu.memory_space<vmem>>, vector<16x128xbf16>
    %cst_45 = arith.constant dense<0.000000e+00> : vector<1x128xf32>
    %74 = tpu.matmul %72, %73, %cst_45 {dimension_numbers = #tpu.dot_dimension_numbers<[1], [0], [0], [1], [0, 0, 1, 1], [], []>} : vector<1x16xbf16>, vector<16x128xbf16>, vector<1x128xf32> -> vector<1x128xf32>
    %75 = arith.addf %70, %74 : vector<1x128xf32>
    %76 = vector.extract_strided_slice %65 {offsets = [2, 0], sizes = [1, 16], strides = [1, 1]} : vector<5x128xf32> to vector<1x16xf32>
    %77 = arith.truncf %76 : vector<1x16xf32> to vector<1x16xbf16>
    %c192 = arith.constant 192 : index
    %c0_46 = arith.constant 0 : index
    %78 = vector.load %arg4[%c192, %c0_46] : memref<400x128xbf16, #tpu.memory_space<vmem>>, vector<16x128xbf16>
    %cst_47 = arith.constant dense<0.000000e+00> : vector<1x128xf32>
    %79 = tpu.matmul %77, %78, %cst_47 {dimension_numbers = #tpu.dot_dimension_numbers<[1], [0], [0], [1], [0, 0, 1, 1], [], []>} : vector<1x16xbf16>, vector<16x128xbf16>, vector<1x128xf32> -> vector<1x128xf32>
    %80 = arith.addf %75, %79 : vector<1x128xf32>
    %81 = vector.extract_strided_slice %65 {offsets = [3, 0], sizes = [1, 16], strides = [1, 1]} : vector<5x128xf32> to vector<1x16xf32>
    %82 = arith.truncf %81 : vector<1x16xf32> to vector<1x16xbf16>
    %c208 = arith.constant 208 : index
    %c0_48 = arith.constant 0 : index
    %83 = vector.load %arg4[%c208, %c0_48] : memref<400x128xbf16, #tpu.memory_space<vmem>>, vector<16x128xbf16>
    %cst_49 = arith.constant dense<0.000000e+00> : vector<1x128xf32>
    %84 = tpu.matmul %82, %83, %cst_49 {dimension_numbers = #tpu.dot_dimension_numbers<[1], [0], [0], [1], [0, 0, 1, 1], [], []>} : vector<1x16xbf16>, vector<16x128xbf16>, vector<1x128xf32> -> vector<1x128xf32>
    %85 = arith.addf %80, %84 : vector<1x128xf32>
    %86 = vector.extract_strided_slice %65 {offsets = [4, 0], sizes = [1, 16], strides = [1, 1]} : vector<5x128xf32> to vector<1x16xf32>
    %87 = arith.truncf %86 : vector<1x16xf32> to vector<1x16xbf16>
    %c224 = arith.constant 224 : index
    %c0_50 = arith.constant 0 : index
    %88 = vector.load %arg4[%c224, %c0_50] : memref<400x128xbf16, #tpu.memory_space<vmem>>, vector<16x128xbf16>
    %cst_51 = arith.constant dense<0.000000e+00> : vector<1x128xf32>
    %89 = tpu.matmul %87, %88, %cst_51 {dimension_numbers = #tpu.dot_dimension_numbers<[1], [0], [0], [1], [0, 0, 1, 1], [], []>} : vector<1x16xbf16>, vector<16x128xbf16>, vector<1x128xf32> -> vector<1x128xf32>
    %90 = arith.addf %85, %89 : vector<1x128xf32>
    %c3_52 = arith.constant 3 : index
    %c0_53 = arith.constant 0 : index
    %c0_54 = arith.constant 0 : index
    %91 = vector.load %arg13[%c3_52, %c0_53, %c0_54] : memref<5x5x128xf32, #tpu.memory_space<vmem>>, vector<1x5x128xf32>
    %92 = vector.shape_cast %91 : vector<1x5x128xf32> to vector<5x128xf32>
    %93 = vector.extract_strided_slice %92 {offsets = [0, 0], sizes = [1, 16], strides = [1, 1]} : vector<5x128xf32> to vector<1x16xf32>
    %94 = arith.truncf %93 : vector<1x16xf32> to vector<1x16xbf16>
    %c240 = arith.constant 240 : index
    %c0_55 = arith.constant 0 : index
    %95 = vector.load %arg4[%c240, %c0_55] : memref<400x128xbf16, #tpu.memory_space<vmem>>, vector<16x128xbf16>
    %cst_56 = arith.constant dense<0.000000e+00> : vector<1x128xf32>
    %96 = tpu.matmul %94, %95, %cst_56 {dimension_numbers = #tpu.dot_dimension_numbers<[1], [0], [0], [1], [0, 0, 1, 1], [], []>} : vector<1x16xbf16>, vector<16x128xbf16>, vector<1x128xf32> -> vector<1x128xf32>
    %97 = arith.addf %90, %96 : vector<1x128xf32>
    %98 = vector.extract_strided_slice %92 {offsets = [1, 0], sizes = [1, 16], strides = [1, 1]} : vector<5x128xf32> to vector<1x16xf32>
    %99 = arith.truncf %98 : vector<1x16xf32> to vector<1x16xbf16>
    %c256 = arith.constant 256 : index
    %c0_57 = arith.constant 0 : index
    %100 = vector.load %arg4[%c256, %c0_57] : memref<400x128xbf16, #tpu.memory_space<vmem>>, vector<16x128xbf16>
    %cst_58 = arith.constant dense<0.000000e+00> : vector<1x128xf32>
    %101 = tpu.matmul %99, %100, %cst_58 {dimension_numbers = #tpu.dot_dimension_numbers<[1], [0], [0], [1], [0, 0, 1, 1], [], []>} : vector<1x16xbf16>, vector<16x128xbf16>, vector<1x128xf32> -> vector<1x128xf32>
    %102 = arith.addf %97, %101 : vector<1x128xf32>
    %103 = vector.extract_strided_slice %92 {offsets = [2, 0], sizes = [1, 16], strides = [1, 1]} : vector<5x128xf32> to vector<1x16xf32>
    %104 = arith.truncf %103 : vector<1x16xf32> to vector<1x16xbf16>
    %c272 = arith.constant 272 : index
    %c0_59 = arith.constant 0 : index
    %105 = vector.load %arg4[%c272, %c0_59] : memref<400x128xbf16, #tpu.memory_space<vmem>>, vector<16x128xbf16>
    %cst_60 = arith.constant dense<0.000000e+00> : vector<1x128xf32>
    %106 = tpu.matmul %104, %105, %cst_60 {dimension_numbers = #tpu.dot_dimension_numbers<[1], [0], [0], [1], [0, 0, 1, 1], [], []>} : vector<1x16xbf16>, vector<16x128xbf16>, vector<1x128xf32> -> vector<1x128xf32>
    %107 = arith.addf %102, %106 : vector<1x128xf32>
    %108 = vector.extract_strided_slice %92 {offsets = [3, 0], sizes = [1, 16], strides = [1, 1]} : vector<5x128xf32> to vector<1x16xf32>
    %109 = arith.truncf %108 : vector<1x16xf32> to vector<1x16xbf16>
    %c288 = arith.constant 288 : index
    %c0_61 = arith.constant 0 : index
    %110 = vector.load %arg4[%c288, %c0_61] : memref<400x128xbf16, #tpu.memory_space<vmem>>, vector<16x128xbf16>
    %cst_62 = arith.constant dense<0.000000e+00> : vector<1x128xf32>
    %111 = tpu.matmul %109, %110, %cst_62 {dimension_numbers = #tpu.dot_dimension_numbers<[1], [0], [0], [1], [0, 0, 1, 1], [], []>} : vector<1x16xbf16>, vector<16x128xbf16>, vector<1x128xf32> -> vector<1x128xf32>
    %112 = arith.addf %107, %111 : vector<1x128xf32>
    %113 = vector.extract_strided_slice %92 {offsets = [4, 0], sizes = [1, 16], strides = [1, 1]} : vector<5x128xf32> to vector<1x16xf32>
    %114 = arith.truncf %113 : vector<1x16xf32> to vector<1x16xbf16>
    %c304 = arith.constant 304 : index
    %c0_63 = arith.constant 0 : index
    %115 = vector.load %arg4[%c304, %c0_63] : memref<400x128xbf16, #tpu.memory_space<vmem>>, vector<16x128xbf16>
    %cst_64 = arith.constant dense<0.000000e+00> : vector<1x128xf32>
    %116 = tpu.matmul %114, %115, %cst_64 {dimension_numbers = #tpu.dot_dimension_numbers<[1], [0], [0], [1], [0, 0, 1, 1], [], []>} : vector<1x16xbf16>, vector<16x128xbf16>, vector<1x128xf32> -> vector<1x128xf32>
    %117 = arith.addf %112, %116 : vector<1x128xf32>
    %c4_65 = arith.constant 4 : index
    %c0_66 = arith.constant 0 : index
    %c0_67 = arith.constant 0 : index
    %118 = vector.load %arg13[%c4_65, %c0_66, %c0_67] : memref<5x5x128xf32, #tpu.memory_space<vmem>>, vector<1x5x128xf32>
    %119 = vector.shape_cast %118 : vector<1x5x128xf32> to vector<5x128xf32>
    %120 = vector.extract_strided_slice %119 {offsets = [0, 0], sizes = [1, 16], strides = [1, 1]} : vector<5x128xf32> to vector<1x16xf32>
    %121 = arith.truncf %120 : vector<1x16xf32> to vector<1x16xbf16>
    %c320 = arith.constant 320 : index
    %c0_68 = arith.constant 0 : index
    %122 = vector.load %arg4[%c320, %c0_68] : memref<400x128xbf16, #tpu.memory_space<vmem>>, vector<16x128xbf16>
    %cst_69 = arith.constant dense<0.000000e+00> : vector<1x128xf32>
    %123 = tpu.matmul %121, %122, %cst_69 {dimension_numbers = #tpu.dot_dimension_numbers<[1], [0], [0], [1], [0, 0, 1, 1], [], []>} : vector<1x16xbf16>, vector<16x128xbf16>, vector<1x128xf32> -> vector<1x128xf32>
    %124 = arith.addf %117, %123 : vector<1x128xf32>
    %125 = vector.extract_strided_slice %119 {offsets = [1, 0], sizes = [1, 16], strides = [1, 1]} : vector<5x128xf32> to vector<1x16xf32>
    %126 = arith.truncf %125 : vector<1x16xf32> to vector<1x16xbf16>
    %c336 = arith.constant 336 : index
    %c0_70 = arith.constant 0 : index
    %127 = vector.load %arg4[%c336, %c0_70] : memref<400x128xbf16, #tpu.memory_space<vmem>>, vector<16x128xbf16>
    %cst_71 = arith.constant dense<0.000000e+00> : vector<1x128xf32>
    %128 = tpu.matmul %126, %127, %cst_71 {dimension_numbers = #tpu.dot_dimension_numbers<[1], [0], [0], [1], [0, 0, 1, 1], [], []>} : vector<1x16xbf16>, vector<16x128xbf16>, vector<1x128xf32> -> vector<1x128xf32>
    %129 = arith.addf %124, %128 : vector<1x128xf32>
    %130 = vector.extract_strided_slice %119 {offsets = [2, 0], sizes = [1, 16], strides = [1, 1]} : vector<5x128xf32> to vector<1x16xf32>
    %131 = arith.truncf %130 : vector<1x16xf32> to vector<1x16xbf16>
    %c352 = arith.constant 352 : index
    %c0_72 = arith.constant 0 : index
    %132 = vector.load %arg4[%c352, %c0_72] : memref<400x128xbf16, #tpu.memory_space<vmem>>, vector<16x128xbf16>
    %cst_73 = arith.constant dense<0.000000e+00> : vector<1x128xf32>
    %133 = tpu.matmul %131, %132, %cst_73 {dimension_numbers = #tpu.dot_dimension_numbers<[1], [0], [0], [1], [0, 0, 1, 1], [], []>} : vector<1x16xbf16>, vector<16x128xbf16>, vector<1x128xf32> -> vector<1x128xf32>
    %134 = arith.addf %129, %133 : vector<1x128xf32>
    %135 = vector.extract_strided_slice %119 {offsets = [3, 0], sizes = [1, 16], strides = [1, 1]} : vector<5x128xf32> to vector<1x16xf32>
    %136 = arith.truncf %135 : vector<1x16xf32> to vector<1x16xbf16>
    %c368 = arith.constant 368 : index
    %c0_74 = arith.constant 0 : index
    %137 = vector.load %arg4[%c368, %c0_74] : memref<400x128xbf16, #tpu.memory_space<vmem>>, vector<16x128xbf16>
    %cst_75 = arith.constant dense<0.000000e+00> : vector<1x128xf32>
    %138 = tpu.matmul %136, %137, %cst_75 {dimension_numbers = #tpu.dot_dimension_numbers<[1], [0], [0], [1], [0, 0, 1, 1], [], []>} : vector<1x16xbf16>, vector<16x128xbf16>, vector<1x128xf32> -> vector<1x128xf32>
    %139 = arith.addf %134, %138 : vector<1x128xf32>
    %140 = vector.extract_strided_slice %119 {offsets = [4, 0], sizes = [1, 16], strides = [1, 1]} : vector<5x128xf32> to vector<1x16xf32>
    %141 = arith.truncf %140 : vector<1x16xf32> to vector<1x16xbf16>
    %c384 = arith.constant 384 : index
    %c0_76 = arith.constant 0 : index
    %142 = vector.load %arg4[%c384, %c0_76] : memref<400x128xbf16, #tpu.memory_space<vmem>>, vector<16x128xbf16>
    %cst_77 = arith.constant dense<0.000000e+00> : vector<1x128xf32>
    %143 = tpu.matmul %141, %142, %cst_77 {dimension_numbers = #tpu.dot_dimension_numbers<[1], [0], [0], [1], [0, 0, 1, 1], [], []>} : vector<1x16xbf16>, vector<16x128xbf16>, vector<1x128xf32> -> vector<1x128xf32>
    %144 = arith.addf %139, %143 : vector<1x128xf32>
    %145 = arith.addf %144, %2 : vector<1x128xf32>
    %cst_78 = arith.constant 0.000000e+00 : f32
    %146 = vector.broadcast %cst_78 : f32 to vector<1x128xf32>
    %147 = arith.maximumf %145, %146 : vector<1x128xf32>
    %148 = arith.truncf %147 : vector<1x128xf32> to vector<1x128xbf16>
    %c0_79 = arith.constant 0 : index
    %c0_80 = arith.constant 0 : index
    %149 = vector.load %arg5[%c0_79, %c0_80] : memref<128x128xbf16, #tpu.memory_space<vmem>>, vector<128x128xbf16>
    %cst_81 = arith.constant dense<0.000000e+00> : vector<1x128xf32>
    %150 = tpu.matmul %148, %149, %cst_81 {dimension_numbers = #tpu.dot_dimension_numbers<[1], [0], [0], [1], [0, 0, 1, 1], [], []>} : vector<1x128xbf16>, vector<128x128xbf16>, vector<1x128xf32> -> vector<1x128xf32>
    %151 = arith.addf %150, %3 : vector<1x128xf32>
    %cst_82 = arith.constant 0.000000e+00 : f32
    %152 = vector.broadcast %cst_82 : f32 to vector<1x128xf32>
    %153 = arith.maximumf %151, %152 : vector<1x128xf32>
    %154 = arith.truncf %153 : vector<1x128xf32> to vector<1x128xbf16>
    %c0_83 = arith.constant 0 : index
    %c0_84 = arith.constant 0 : index
    %155 = vector.load %arg6[%c0_83, %c0_84] : memref<128x128xbf16, #tpu.memory_space<vmem>>, vector<128x128xbf16>
    %cst_85 = arith.constant dense<0.000000e+00> : vector<1x128xf32>
    %156 = tpu.matmul %154, %155, %cst_85 {dimension_numbers = #tpu.dot_dimension_numbers<[1], [0], [0], [1], [0, 0, 1, 1], [], []>} : vector<1x128xbf16>, vector<128x128xbf16>, vector<1x128xf32> -> vector<1x128xf32>
    %157 = arith.addf %156, %4 : vector<1x128xf32>
    %c0_86 = arith.constant 0 : index
    %c0_87 = arith.constant 0 : index
    %c0_88 = arith.constant 0 : index
    %158 = vector.load %arg8[%c0_86, %c0_87, %c0_88] : memref<1x1x128xf32, #tpu.memory_space<vmem>>, vector<1x1x128xf32>
    %159 = vector.shape_cast %158 : vector<1x1x128xf32> to vector<1x128xf32>
    %160 = vector.shape_cast %157 : vector<1x128xf32> to vector<1x1x128xf32>
    tpu.vector_store %arg8[%c0_86, %c0_87, %c0_88], %160 {strides = array<i32>} : memref<1x1x128xf32, #tpu.memory_space<vmem>>, vector<1x1x128xf32>,
    return
  }
  func.func @transform_0(%arg0: i32) -> (i32, i32, i32, i32) {
    %c0_i32 = arith.constant 0 : i32
    %c0_i32_0 = arith.constant 0 : i32
    %c0_i32_1 = arith.constant 0 : i32
    %c0_i32_2 = arith.constant 0 : i32
    return %arg0, %c0_i32, %c0_i32_0, %c0_i32_1 : i32, i32, i32, i32
  }
  func.func @transform_1(%arg0: i32) -> (i32, i32, i32) {
    %c0_i32 = arith.constant 0 : i32
    %c0_i32_0 = arith.constant 0 : i32
    %c0_i32_1 = arith.constant 0 : i32
    %c0_i32_2 = arith.constant 0 : i32
    return %c0_i32, %c0_i32_0, %c0_i32_1 : i32, i32, i32
  }
  func.func @transform_2(%arg0: i32) -> (i32, i32, i32) {
    %c0_i32 = arith.constant 0 : i32
    %c0_i32_0 = arith.constant 0 : i32
    %c0_i32_1 = arith.constant 0 : i32
    %c0_i32_2 = arith.constant 0 : i32
    return %c0_i32, %c0_i32_0, %c0_i32_1 : i32, i32, i32
  }
  func.func @transform_3(%arg0: i32) -> (i32, i32) {
    %c0_i32 = arith.constant 0 : i32
    %c0_i32_0 = arith.constant 0 : i32
    %c0_i32_1 = arith.constant 0 : i32
    return %c0_i32, %c0_i32_0 : i32, i32
  }
  func.func @transform_4(%arg0: i32) -> (i32, i32) {
    %c0_i32 = arith.constant 0 : i32
    %c0_i32_0 = arith.constant 0 : i32
    %c0_i32_1 = arith.constant 0 : i32
    return %c0_i32, %c0_i32_0 : i32, i32
  }
  func.func @transform_5(%arg0: i32) -> (i32, i32) {
    %c0_i32 = arith.constant 0 : i32
    %c0_i32_0 = arith.constant 0 : i32
    %c0_i32_1 = arith.constant 0 : i32
    return %c0_i32, %c0_i32_0 : i32, i32
  }
  func.func @transform_6(%arg0: i32) -> (i32, i32) {
    %c0_i32 = arith.constant 0 : i32
    %c0_i32_0 = arith.constant 0 : i32
    %c0_i32_1 = arith.constant 0 : i32
    return %c0_i32, %c0_i32_0 : i32, i32
  }
  func.func @transform_7(%arg0: i32) -> (i32, i32, i32) {
    %c0_i32 = arith.constant 0 : i32
    %c0_i32_0 = arith.constant 0 : i32
    %c0_i32_1 = arith.constant 0 : i32
    return %arg0, %c0_i32, %c0_i32_0 : i32, i32, i32
  }
}

</mosaic_0001>

<bundles_post_ra>
// kernel: convnet_forward.1
= control target key start
LH: loop header
LB: loop body
LE: loop exit
PB: predicated region body
PF: predicated region fallthrough
CT: control target
= control target key end

     0   :  { %12 = vsyncpa [#allocation8], 0  ;;  %s20974_s0 = inlined_call_operand.vmem [shape: f32[8,32,32,3], index: 0, kind: input, shape index: {}]   ;;  %s20975_s1 = inlined_call_operand.vmem [shape: bf16[5,640,128], index: 1, kind: input, shape index: {}]   ;;  %s20976_s2 = inlined_call_operand.vmem [shape: bf16[5,640,128], index: 2, kind: input, shape index: {}]   ;;  %s20977_s3 = inlined_call_operand.vmem [shape: bf16[400,128], index: 3, kind: input, shape index: {}]   ;;  %s20978_s4 = inlined_call_operand.vmem [shape: bf16[128,128], index: 4, kind: input, shape index: {}]   ;;  %s20979_s5 = inlined_call_operand.vmem [shape: bf16[128,128], index: 5, kind: input, shape index: {}]   ;;  %s20980_s6 = inlined_call_operand.vmem [shape: f32[5,128], index: 6, kind: input, shape index: {}]   ;;  %s20981_s7 = inlined_call_operand.hbm [shape: f32[8,1,128], index: 7, kind: output, shape index: {}]  }
   0x1   :  { %14 = vsyncpa [#allocation8 + $0x1], 0  ;;  %s17127_s24 = smov 0   ;;  %s17129_s25 = smov 0  }
   0x2   :  { %s17131_s26 = smov 0   ;;  %s17133_s27 = smov 0  }
   0x3 LB: > { %s17148_s28 = sadd.s32 4294967295, %s17072_s27   ;;  %s12006_s29 = sadd.s32 4294967294, %s17072_s27   ;;  %s17072_s27 = sphi %s17133_s27, %s21021_s27   ;;  %s17068_s26 = sphi %s17131_s26, %s21020_s26   ;;  %s17064_s25 = sphi %s17129_s25, %s21019_s25   ;;  %s17060_s24 = sphi %s17127_s24, %s21018_s24  }
   0x4   : > { %s17152_s30 = sadd.s32 1, %s17072_s27   ;;  %s179_s8 = sadd.s32 1, %s17068_s26 }
   0x5   : > { %s176_s9 = ssub.s32 %s17072_s27, %s17152_s30  ;;  %p189_p0 = scmp.ne.s32.totalorder %s17068_s26, %s17064_s25 }
   0x6   : > { %p177_p1 = scmp.eq.s32.totalorder %s176_s9, 0  ;;  %p190_p2 = scmp.eq.s32.totalorder %s17148_s28, 7 }
   0x7   : > { %p195_p3 = scmp.ne.s32.totalorder %s17064_s25, %s17060_s24  ;;  %p196_p4 = scmp.eq.s32.totalorder %s12006_s29, 7 }
   0x8   : > { %s17163_s10 = scalar_select %p177_p1, %s17068_s26, %s179_s8  }
   0x9   : > { %p17165_p5 = por %p190_p2, %p189_p0  ;;  %p17169_p6 = por %p196_p4, %p195_p3 }
   0xa   : > { %p12009_p7 = scmp.ge.s32.totalorder %s17072_s27, 1  ;;  %p240_p8 = scmp.lt.s32.totalorder %s17072_s27, 9 }
   0xc   : > { %p241_p9 = pnand %p12009_p7, %p240_p8 }
   0xe   : > { %244 = sbr.rel (%p241_p9) target bundleno = 2175 (0x87f), region = 48 }
  0x13   : > { %s269_s13 = sand.u32 1, %s17064_s25   ;;  %p271_p10 = scmp.lt.s32.totalorder %s17148_s28, 7  ;;  %v17180_v0 = vld [vmem:[%s20980_s6] ss:$0 sm:$0xff]  ;;  %v17185_v1 = vld [vmem:[%s20980_s6 + $0x1] ss:$0 sm:$0xff] }
  0x14   : > { %20987 = vst [vmem:[#allocation10_spill] sm:$0xff] %v17185_v1  ;;  %v17190_v2 = vld [vmem:[%s20980_s6 + $0x2] sm:$0x1]  ;;  %v17195_v3 = vld [vmem:[%s20980_s6 + $0x3] sm:$0x1]  ;;  %v20982_v5 = vmov 0.0  }
  0x15   : > { %20988 = vst [vmem:[#allocation11_spill] sm:$0xff] %v17190_v2  ;;  %20989 = vst [vmem:[#allocation12_spill] sm:$0xff] %v17195_v3  ;;  %s272_s22 = scalar_select %p271_p10, %s17148_s28, 7  ;;  %v17201_v4 = vld [vmem:[%s20980_s6 + $0x4] sm:$0x1] }
  0x16   : > { %20990 = vst [vmem:[#allocation13_spill] sm:$0xff] %v17201_v4  ;;  %282 = vst [vmem:[#allocation2] sm:$0xff] %v20982_v5  ;;  %s17230_s16 = scalar_lea.vmem [#allocation7], %s269_s13  ;;  %s17232_s17 = smov 0  }
  0x17   : > { %283 = vst [vmem:[#allocation2 + $0x8] sm:$0xff] %v20982_v5  ;;  %284 = vst [vmem:[#allocation2 + $0x10] sm:$0xff] %v20982_v5  ;;  %s14243_s8 = sshll.u32 %s272_s22, 10 }
  0x18   : > { %285 = vst [vmem:[#allocation2 + $0x18] sm:$0xff] %v20982_v5  ;;  %286 = vst [vmem:[#allocation2 + $0x20] sm:$0xff] %v20982_v5  ;;  %s17226_s15 = scalar_lea.vmem %s20974_s0, %s14243_s8 }
  0x19   : > { %287 = vst [vmem:[#allocation2 + $0x28] sm:$0xff] %v20982_v5  ;;  %288 = vst [vmem:[#allocation2 + $0x30] sm:$0xff] %v20982_v5 }
  0x1a   : > { %289 = vst [vmem:[#allocation2 + $0x38] sm:$0xff] %v20982_v5  ;;  %290 = vst [vmem:[#allocation2 + $0x40] sm:$0xff] %v20982_v5 }
  0x1b   : > { %291 = vst [vmem:[#allocation2 + $0x48] sm:$0xff] %v20982_v5  ;;  %292 = vst [vmem:[#allocation2 + $0x50] sm:$0xff] %v20982_v5 }
  0x1c   : > { %293 = vst [vmem:[#allocation2 + $0x58] sm:$0xff] %v20982_v5  ;;  %294 = vst [vmem:[#allocation2 + $0x60] sm:$0xff] %v20982_v5 }
  0x1d   : > { %295 = vst [vmem:[#allocation2 + $0x68] sm:$0xff] %v20982_v5  ;;  %296 = vst [vmem:[#allocation2 + $0x70] sm:$0xff] %v20982_v5 }
  0x1e   : > { %297 = vst [vmem:[#allocation2 + $0x78] sm:$0xff] %v20982_v5  ;;  %298 = vst [vmem:[#allocation2 + $0x80] sm:$0xff] %v20982_v5 }
  0x1f   : > { %299 = vst [vmem:[#allocation2 + $0x88] sm:$0xff] %v20982_v5  ;;  %300 = vst [vmem:[#allocation2 + $0x90] sm:$0xff] %v20982_v5 }
  0x20   : > { %301 = vst [vmem:[#allocation2 + $0x98] sm:$0xff] %v20982_v5 }
  0x21 LB: >> { %v16163_v6 = vld [vmem:[%s20975_s1 + $0x1b8] sm:$0xff]   ;;  %v16167_v10 = vld [vmem:[%s20975_s1 + $0x1b0] sm:$0xff]   ;;  %v16171_v14 = vld [vmem:[%s20975_s1 + $0x1a8] sm:$0xff]   ;;  %s14244_s22 = sshll.u32 %s17076_s17, 6  ;;  %vm315_vm0 = vcmask 23552   ;;  %vm1506_vm3 = vcmask 1046528   ;;  %s17076_s17 = sphi %s17232_s17, %s307_s17  }
  0x22   : >> { %v16164_v7 = vld [vmem:[%s20975_s1 + $0x238] sm:$0xff]   ;;  %14256 = vmatprep.subr.bf16.mxu0 %v16163_v6  ;;  %v16168_v11 = vld [vmem:[%s20975_s1 + $0x230] sm:$0xff]   ;;  %v16172_v15 = vld [vmem:[%s20975_s1 + $0x228] sm:$0xff]   ;;  %s17329_s19 = scalar_lea.vmem %s17226_s15, %s14244_s22  ;;  %vm555_vm1 = vsmask.f32 7424  ;;  %vm2522_vm4 = vcmask 1045504  }
  0x23   : >> { %v16165_v8 = vld [vmem:[%s20975_s1 + $0x178] sm:$0xff]   ;;  %14284 = vmatprep.subr.bf16.mxu1 %v16164_v7  ;;  %v16169_v12 = vld [vmem:[%s20975_s1 + $0x170] sm:$0xff]   ;;  %v16173_v16 = vld [vmem:[%s20975_s1 + $0x168] sm:$0xff]   ;;  %vm2004_vm2 = vsmask.f32 6400  ;;  %s13101_s22 = sshll.u32 %s17076_s17, 4 }
  0x24   : >> { %v16166_v9 = vld [vmem:[%s20975_s1 + $0x1f8] sm:$0xff]   ;;  %14257 = vmatpush3.bf16.msra.mxu0 %v16165_v8  ;;  %v16170_v13 = vld [vmem:[%s20975_s1 + $0x1f0] sm:$0xff]   ;;  %v16174_v17 = vld [vmem:[%s20975_s1 + $0x1e8] sm:$0xff]   ;;  %s5587_s8 = scalar_lea.vmem [#allocation5], %s13101_s22  ;;  %s307_s17 = sadd.s32 1, %s17076_s17  }
  0x25   : >> { %14285 = vmatpush3.bf16.msra.mxu1 %v16166_v9  ;;  %14258 = vmatprep.subr.bf16.mxu0 %v16167_v10  ;;  %v16175_v18 = vld [vmem:[%s20975_s1 + $0x1a0] sm:$0xff]   ;;  %v16179_v22 = vld [vmem:[%s20975_s1 + $0x198] sm:$0xff]   ;;  %v16183_v26 = vld [vmem:[%s20975_s1 + $0x190] sm:$0xff]   ;;  %p304_p11 = scmp.ge.s32.totalorder %s307_s17, 14  }
  0x26   : >> { %14286 = vmatprep.subr.bf16.mxu1 %v16168_v11  ;;  %v16176_v19 = vld [vmem:[%s20975_s1 + $0x220] sm:$0xff]   ;;  %v16180_v23 = vld [vmem:[%s20975_s1 + $0x218] sm:$0xff]   ;;  %v16184_v27 = vld [vmem:[%s20975_s1 + $0x210] sm:$0xff]   ;;  %s19120_s9 = smov (%p304_p11), 0  }
  0x27   : >> { %v16177_v20 = vld [vmem:[%s20975_s1 + $0x160] sm:$0xff]   ;;  %v16181_v24 = vld [vmem:[%s20975_s1 + $0x158] sm:$0xff]   ;;  %v16185_v28 = vld [vmem:[%s20975_s1 + $0x150] sm:$0xff]  }
  0x28   : >> { %14259 = vmatpush3.bf16.msra.mxu0 %v16169_v12  ;;  %v16178_v21 = vld [vmem:[%s20975_s1 + $0x1e0] sm:$0xff]   ;;  %v16182_v25 = vld [vmem:[%s20975_s1 + $0x1d8] sm:$0xff]   ;;  %v16186_v29 = vld [vmem:[%s20975_s1 + $0x1d0] sm:$0xff]  }
  0x29   : >> { %14287 = vmatpush3.bf16.msra.mxu1 %v16170_v13  ;;  %14260 = vmatprep.subr.bf16.mxu0 %v16171_v14  ;;  %v16187_v30 = vld [vmem:[%s20975_s1 + $0x188] sm:$0xff]   ;;  %v16191_v34 = vld [vmem:[%s20975_s1 + $0x180] sm:$0xff]   ;;  %v17344_v40 = vld [vmem:[%s17329_s19 + $0x30] sm:$0xff] }
  0x2a   : >> { %14288 = vmatprep.subr.bf16.mxu1 %v16172_v15  ;;  %v16188_v31 = vld [vmem:[%s20975_s1 + $0x208] sm:$0xff]   ;;  %v16192_v35 = vld [vmem:[%s20975_s1 + $0x200] sm:$0xff]   ;;  %v17347_v41 = vld [vmem:[%s17329_s19 + $0x38] sm:$0xff]  ;;  %329 = vst.msk [vmem:[#allocation2 + $0x58] sm:$0xff] %vm315_vm0, %v17344_v40 }
  0x2b   : >> { %v16189_v32 = vld [vmem:[%s20975_s1 + $0x148] sm:$0xff]   ;;  %v16193_v36 = vld [vmem:[%s20975_s1 + $0x140] sm:$0xff]   ;;  %330 = vst.msk [vmem:[#allocation2 + $0x80] sm:$0xff] %vm315_vm0, %v17347_v41  ;;  %v12565_v44 = vld [vmem:[%s17329_s19 + $0x50] sm:$0xff] }
  0x2c   : >> { %14261 = vmatpush3.bf16.msra.mxu0 %v16173_v16  ;;  %v16190_v33 = vld [vmem:[%s20975_s1 + $0x1c8] sm:$0xff]   ;;  %v16194_v37 = vld [vmem:[%s20975_s1 + $0x1c0] sm:$0xff]   ;;  %v12566_v45 = vld [vmem:[%s17329_s19 + $0x58] sm:$0xff]  ;;  %340 = vst.msk [vmem:[#allocation2 + $0x60] sm:$0xff] %vm315_vm0, %v12565_v44 }
  0x2d   : >> { %14289 = vmatpush3.bf16.msra.mxu1 %v16174_v17  ;;  %14262 = vmatprep.subr.bf16.mxu0 %v16175_v18  ;;  %v17338_v38 = vld [vmem:[%s17329_s19 + $0x20] sm:$0xff]  ;;  %v17341_v39 = vld [vmem:[%s17329_s19 + $0x28] sm:$0xff]  ;;  %v12030_v48 = vld [vmem:[%s17329_s19 + $0x70] sm:$0xff]  ;;  %341 = vst.msk [vmem:[#allocation2 + $0x88] sm:$0xff] %vm315_vm0, %v12566_v45 }
  0x2e   : >> { %14290 = vmatprep.subr.bf16.mxu1 %v16176_v19  ;;  %327 = vst.msk [vmem:[#allocation2 + $0x8] sm:$0xff] %vm315_vm0, %v17338_v38  ;;  %328 = vst.msk [vmem:[#allocation2 + $0x30] sm:$0xff] %vm315_vm0, %v17341_v39  ;;  %v12563_v42 = vld [vmem:[%s17329_s19 + $0x40] sm:$0xff]  ;;  %v12564_v43 = vld [vmem:[%s17329_s19 + $0x48] sm:$0xff] }
  0x2f   : >> { %v12028_v46 = vld [vmem:[%s17329_s19 + $0x60] sm:$0xff]  ;;  %338 = vst.msk [vmem:[#allocation2 + $0x10] sm:$0xff] %vm315_vm0, %v12563_v42  ;;  %339 = vst.msk [vmem:[#allocation2 + $0x38] sm:$0xff] %vm315_vm0, %v12564_v43  ;;  %v12029_v47 = vld [vmem:[%s17329_s19 + $0x68] sm:$0xff] }
  0x30   : >> { %14263 = vmatpush3.bf16.msra.mxu0 %v16177_v20  ;;  %v12031_v49 = vld [vmem:[%s17329_s19 + $0x78] sm:$0xff]  ;;  %349 = vst.msk [vmem:[#allocation2 + $0x18] sm:$0xff] %vm315_vm0, %v12028_v46  ;;  %350 = vst.msk [vmem:[#allocation2 + $0x40] sm:$0xff] %vm315_vm0, %v12029_v47  ;;  %v12571_v50 = vld [vmem:[%s17329_s19 + $0x80] sm:$0xff] }
  0x31   : >> { %14291 = vmatpush3.bf16.msra.mxu1 %v16178_v21  ;;  %14264 = vmatprep.subr.bf16.mxu0 %v16179_v22  ;;  %351 = vst.msk [vmem:[#allocation2 + $0x68] sm:$0xff] %vm315_vm0, %v12030_v48  ;;  %352 = vst.msk [vmem:[#allocation2 + $0x90] sm:$0xff] %vm315_vm0, %v12031_v49  ;;  %v12572_v51 = vld [vmem:[%s17329_s19 + $0x88] sm:$0xff]  ;;  %v12573_v52 = vld [vmem:[%s17329_s19 + $0x90] sm:$0xff] }
  0x32   : >> { %14292 = vmatprep.subr.bf16.mxu1 %v16180_v23  ;;  %v12574_v53 = vld [vmem:[%s17329_s19 + $0x98] sm:$0xff]  ;;  %v311_v54 = vld [vmem:[%s17329_s19] sm:$0xff]  ;;  %v312_v55 = vld [vmem:[%s17329_s19 + $0x8] sm:$0xff]  ;;  %360 = vst.msk [vmem:[#allocation2 + $0x20] sm:$0xff] %vm315_vm0, %v12571_v50 }
  0x33   : >> { %361 = vst.msk [vmem:[#allocation2 + $0x48] sm:$0xff] %vm315_vm0, %v12572_v51  ;;  %362 = vst.msk [vmem:[#allocation2 + $0x70] sm:$0xff] %vm315_vm0, %v12573_v52  ;;  %v313_v56 = vld [vmem:[%s17329_s19 + $0x10] sm:$0xff]  ;;  %v314_v57 = vld [vmem:[%s17329_s19 + $0x18] sm:$0xff] }
  0x34   : >> { %14265 = vmatpush3.bf16.msra.mxu0 %v16181_v24  ;;  %316 = vst.msk [vmem:[#allocation2] sm:$0xff] %vm315_vm0, %v311_v54  ;;  %317 = vst.msk [vmem:[#allocation2 + $0x28] sm:$0xff] %vm315_vm0, %v312_v55  ;;  %v17392_v58 = vld [vmem:[%s20975_s1 + $0x278] sm:$0xff]   ;;  %v380_v62 = vld [vmem:[#allocation2 + $0x80] sm:$0xff] }
  0x35   : >> { %14293 = vmatpush3.bf16.msra.mxu1 %v16182_v25  ;;  %14266 = vmatprep.subr.bf16.mxu0 %v16183_v26  ;;  %363 = vst.msk [vmem:[#allocation2 + $0x98] sm:$0xff] %vm315_vm0, %v12574_v53  ;;  %318 = vst.msk [vmem:[#allocation2 + $0x50] sm:$0xff] %vm315_vm0, %v313_v56  ;;  %v365_v59 = vld [vmem:[#allocation2 + $0x8] sm:$0xff]  ;;  %v370_v60 = vld [vmem:[#allocation2 + $0x30] sm:$0xff] }
  0x36   : >> { %14294 = vmatprep.subr.bf16.mxu1 %v16184_v27  ;;  %319 = vst.msk [vmem:[#allocation2 + $0x78] sm:$0xff] %vm315_vm0, %v314_v57  ;;  %v375_v61 = vld [vmem:[#allocation2 + $0x58] sm:$0xff]  ;;  %v17394_v63 = vpack.c.bf16 %v370_v60, %v365_v59  ;;  %2963 = vst.msk [vmem:[#allocation2 + $0x8] sm:$0xff] %vm315_vm0, %v12563_v42  ;;  %v366_v6 = vld [vmem:[#allocation2 + $0x10] sm:$0xff] }
  0x37   : >> { %2964 = vst.msk [vmem:[#allocation2 + $0x30] sm:$0xff] %vm315_vm0, %v12564_v43  ;;  %2965 = vst.msk [vmem:[#allocation2 + $0x58] sm:$0xff] %vm315_vm0, %v12565_v44  ;;  %v371_v7 = vld [vmem:[#allocation2 + $0x38] sm:$0xff]  ;;  %v17400_v8 = vpack.c.bf16 %v380_v62, %v375_v61  ;;  %v376_v10 = vld [vmem:[#allocation2 + $0x60] sm:$0xff] }
  0x38   : >> { %14267 = vmatpush3.bf16.msra.mxu0 %v16185_v28  ;;  %2966 = vst.msk [vmem:[#allocation2 + $0x80] sm:$0xff] %vm315_vm0, %v12566_v45  ;;  %v367_v9 = vld [vmem:[#allocation2 + $0x18] sm:$0xff]  ;;  %v381_v11 = vld [vmem:[#allocation2 + $0x88] sm:$0xff]  ;;  %v17403_v12 = vpack.c.bf16 %v371_v7, %v366_v6  ;;  %2971 = vst.msk [vmem:[#allocation2 + $0x10] sm:$0xff] %vm315_vm0, %v12028_v46  ;;  %v569_v13 = vshrl.u32 %v17394_v63, 16  ;;  %v571_v14 = vshll.u32 %v17394_v63, 16 }
  0x39   : >> { %14295 = vmatpush3.bf16.msra.mxu1 %v16186_v29  ;;  %14268 = vmatprep.subr.bf16.mxu0 %v16187_v30  ;;  %2972 = vst.msk [vmem:[#allocation2 + $0x38] sm:$0xff] %vm315_vm0, %v12029_v47  ;;  %v372_v15 = vld [vmem:[#allocation2 + $0x40] sm:$0xff]  ;;  %v377_v16 = vld [vmem:[#allocation2 + $0x68] sm:$0xff]  ;;  %v382_v17 = vld [vmem:[#allocation2 + $0x90] sm:$0xff]  ;;  %v17410_v18 = vpack.c.bf16 %v381_v11, %v376_v10  ;;  %v576_v19 = vshll.u32 %v17400_v8, 16  ;;  %v619_v55 = vshrl.u32 %v17400_v8, 16 }
  0x3a   : >> { %14296 = vmatprep.subr.bf16.mxu1 %v16188_v31  ;;  %2979 = vst.msk [vmem:[#allocation2 + $0x18] sm:$0xff] %vm315_vm0, %v12571_v50  ;;  %2973 = vst.msk [vmem:[#allocation2 + $0x60] sm:$0xff] %vm315_vm0, %v12030_v48  ;;  %v17415_v20 = vpack.c.bf16 %v372_v15, %v367_v9  ;;  %v17417_v21 = vpack.c.bf16 %v382_v17, %v377_v16  ;;  %v16196_v22 = vld [vmem:[%s20975_s1 + $0x78] sm:$0xff]   ;;  %v573_v23 = vrot.slane %v571_v14, 1  ;;  %v581_v26 = vshrl.u32 %v17403_v12, 16  ;;  %v16198_v56 = vld [vmem:[%s20975_s1 + $0x270] sm:$0xff]  }
  0x3b   : >> { %2974 = vst.msk [vmem:[#allocation2 + $0x88] sm:$0xff] %vm315_vm0, %v12031_v49  ;;  %2980 = vst.msk [vmem:[#allocation2 + $0x40] sm:$0xff] %vm315_vm0, %v12572_v51  ;;  %v364_v24 = vld [vmem:[#allocation2] sm:$0xff]  ;;  %v369_v25 = vld [vmem:[#allocation2 + $0x28] sm:$0xff]  ;;  %v583_v27 = vshll.u32 %v17403_v12, 16  ;;  %v588_v28 = vshll.u32 %v17410_v18, 16 }
  0x3c   : >> { %14269 = vmatpush3.bf16.msra.mxu0 %v16189_v32  ;;  %2981 = vst.msk [vmem:[#allocation2 + $0x68] sm:$0xff] %vm315_vm0, %v12573_v52  ;;  %2982 = vst.msk [vmem:[#allocation2 + $0x90] sm:$0xff] %vm315_vm0, %v12574_v53  ;;  %v578_v29 = vrot.slane %v576_v19, 1  ;;  %v593_v30 = vshrl.u32 %v17415_v20, 16  ;;  %v595_v31 = vshll.u32 %v17415_v20, 16  ;;  %v600_v32 = vshll.u32 %v17417_v21, 16 }
  0x3d   : >> { %14297 = vmatpush3.bf16.msra.mxu1 %v16190_v33  ;;  %14270 = vmatprep.subr.bf16.mxu0 %v16191_v34  ;;  %v374_v33 = vld [vmem:[#allocation2 + $0x50] sm:$0xff]  ;;  %v379_v34 = vld [vmem:[#allocation2 + $0x78] sm:$0xff]  ;;  %2955 = vst.msk [vmem:[#allocation2] sm:$0xff] %vm315_vm0, %v17338_v38  ;;  %2956 = vst.msk [vmem:[#allocation2 + $0x28] sm:$0xff] %vm315_vm0, %v17341_v39  ;;  %v585_v38 = vrot.slane %v583_v27, 1  ;;  %v590_v43 = vrot.slane %v588_v28, 1 }
  0x3e   : >> { %14298 = vmatprep.subr.bf16.mxu1 %v16192_v35  ;;  %v574_v35 = vor.u32 %v573_v23, %v569_v13  ;;  %2957 = vst.msk [vmem:[#allocation2 + $0x50] sm:$0xff] %vm315_vm0, %v17344_v40  ;;  %2958 = vst.msk [vmem:[#allocation2 + $0x78] sm:$0xff] %vm315_vm0, %v17347_v41  ;;  %v597_v39 = vrot.slane %v595_v31, 1  ;;  %v602_v42 = vrot.slane %v600_v32, 1  ;;  %v16197_v50 = vld [vmem:[%s20975_s1 + $0x38] sm:$0xff]   ;;  %v16199_v51 = vld [vmem:[%s20975_s1 + $0x70] sm:$0xff]   ;;  %v621_v61 = vor.u32 %v619_v55, %v578_v29 }
  0x3f   : >> { %v586_v47 = vor.u32 %v585_v38, %v581_v26  ;;  %v625_v57 = vshrl.u32 %v17417_v21, 16  ;;  %v16200_v60 = vld [vmem:[%s20975_s1 + $0x30] sm:$0xff]   ;;  %v16202_v62 = vld [vmem:[%s20975_s1 + $0x68] sm:$0xff]   ;;  %v622_v11 = vshrl.u32 %v17410_v18, 16  ;;  %v2015_v38 = vrot.slane %v619_v55, 1 }
  0x40   : >> { %14271 = vmatpush3.bf16.msra.mxu0 %v16193_v36  ;;  %v17441_v36 = vpack.c.bf16 %v369_v25, %v364_v24  ;;  %v579_v44 = vsel %vm555_vm1, %v574_v35, %v578_v29  ;;  %v598_v46 = vor.u32 %v597_v39, %v593_v30  ;;  %v16201_v10 = vld [vmem:[%s20975_s1 + $0x268] sm:$0xff]   ;;  %v16204_v24 = vld [vmem:[%s20975_s1 + $0x260] sm:$0xff]   ;;  %v16208_v29 = vld [vmem:[%s20975_s1 + $0x58] sm:$0xff]  }
  0x41   : >> { %14299 = vmatpush3.bf16.msra.mxu1 %v16194_v37  ;;  %15514 = vmatprep.subr.bf16.mxu0 %v17392_v58  ;;  %v17443_v37 = vpack.c.bf16 %v379_v34, %v374_v33  ;;  %v591_v53 = vsel %vm555_vm1, %v586_v47, %v590_v43  ;;  %v627_v6 = vor.u32 %v625_v57, %v602_v42  ;;  %v16203_v15 = vld [vmem:[%s20975_s1 + $0x28] sm:$0xff]   ;;  %v16206_v25 = vld [vmem:[%s20975_s1 + $0x20] sm:$0xff]   ;;  %v16207_v34 = vld [vmem:[%s20975_s1 + $0x258] sm:$0xff]  }
  0x42   : >> { %14322 = vmatprep.subr.bf16.mxu1 %v16196_v22  ;;  %v557_v45 = vshrl.u32 %v17441_v36, 16  ;;  %v559_v40 = vshll.u32 %v17441_v36, 16  ;;  %913 = vmatprep.mubr.bf16.mxu0 %v579_v44  ;;  %v603_v52 = vsel %vm555_vm1, %v598_v46, %v602_v42  ;;  %v624_v22 = vor.u32 %v622_v11, %v590_v43  ;;  %v16209_v35 = vld [vmem:[%s20975_s1 + $0x18] sm:$0xff]   ;;  %v16210_v39 = vld [vmem:[%s20975_s1 + $0x250] sm:$0xff]   ;;  %v373_v46 = vld [vmem:[#allocation2 + $0x48] sm:$0xff] }
  0x43   : >> { %v564_v41 = vshll.u32 %v17443_v37, 16  ;;  %962 = vmatprep.mubr.bf16.mxu1 %v603_v52  ;;  %v616_v9 = vshrl.u32 %v17443_v37, 16  ;;  %v16211_v42 = vld [vmem:[%s20975_s1 + $0x50] sm:$0xff]   ;;  %v2012_v43 = vrot.slane %v569_v13, 1  ;;  %v2013_v13 = vrot.slane %v571_v14, 2 }
  0x44   : >> { %v561_v48 = vrot.slane %v559_v40, 1  ;;  %963 = vmatmul.mubr.bf16.vlgmr.msra.gmra.mxu1 %v591_v53  ;;  %v2005_v33 = vrot.slane %v557_v45, 1  ;;  %v16212_v44 = vld [vmem:[%s20975_s1 + $0x10] sm:$0xff]   ;;  %v12577_v53 = vld [vmem:[%s17329_s19 + $0xa0] sm:$0xff] }
  0x45   : >> { %v566_v49 = vrot.slane %v564_v41, 1  ;;  %14323 = vmatpush3.bf16.msra.mxu1 %v16197_v50  ;;  %v2009_v7 = vrot.slane %v564_v41, 2  ;;  %970 = vmatprep.mubr.bf16.mxu1 %v627_v6  ;;  %v2008_v16 = vrot.slane %v616_v9, 1  ;;  %v16214_v41 = vld [vmem:[%s20975_s1 + $0x48] sm:$0xff]   ;;  %v378_v47 = vld [vmem:[#allocation2 + $0x70] sm:$0xff]  ;;  %v2006_v50 = vrot.slane %v559_v40, 2 }
  0x46   : >> { %v562_v54 = vor.u32 %v561_v48, %v557_v45  ;;  %14324 = vmatprep.subr.bf16.mxu1 %v16199_v51  ;;  %v368_v45 = vld [vmem:[#allocation2 + $0x20] sm:$0xff]  ;;  %v383_v48 = vld [vmem:[#allocation2 + $0x98] sm:$0xff]  ;;  %v12579_v55 = vld [vmem:[%s17329_s19 + $0xb0] sm:$0xff]  ;;  %v2014_v14 = vor.u32 %v2013_v13, %v2012_v43  ;;  %v2030_v43 = vrot.slane %v600_v32, 2  ;;  %v2020_v32 = vrot.slane %v583_v27, 2 }
  0x47   : >> { %v618_v17 = vor.u32 %v616_v9, %v566_v49  ;;  %v17503_v23 = vor.u32 %v2009_v7, %v2008_v16  ;;  %v17541_v51 = vpack.c.bf16 %v373_v46, %v368_v45  ;;  %v17543_v52 = vpack.c.bf16 %v383_v48, %v378_v47  ;;  %2990 = vst.msk [vmem:[#allocation2 + $0x20] sm:$0xff] %vm315_vm0, %v12577_v53  ;;  %v16215_v9 = vld [vmem:[%s20975_s1 + $0x8] sm:$0xff]   ;;  %v16224_v27 = vld [vmem:[%s20975_s1 + $0xb0] sm:$0xff]  }
  0x48   : >> { %v567_v59 = vsel %vm555_vm1, %v562_v54, %v566_v49  ;;  %v2016_v49 = vrot.slane %v576_v19, 2  ;;  %v12578_v54 = vld [vmem:[%s17329_s19 + $0xa8] sm:$0xff]  ;;  %2992 = vst.msk [vmem:[#allocation2 + $0x70] sm:$0xff] %vm315_vm0, %v12579_v55  ;;  %v2007_v40 = vor.u32 %v2006_v50, %v2005_v33  ;;  %v2029_v33 = vrot.slane %v625_v57, 1  ;;  %v16223_v57 = vld [vmem:[%s20975_s1 + $0x130] sm:$0xff]  }
  0x49   : >> { %914 = vmatmul.mubr.bf16.vlgmr.msra.gmra.mxu0 %v567_v59  ;;  %14325 = vmatpush3.bf16.msra.mxu1 %v16200_v60  ;;  %2991 = vst.msk [vmem:[#allocation2 + $0x48] sm:$0xff] %vm315_vm0, %v12578_v54  ;;  %v16213_v59 = vld [vmem:[%s20975_s1 + $0x248] sm:$0xff]   ;;  %v605_v60 = vshrl.u32 %v17541_v51, 16 }
  0x4a   : >> { %15515 = vmatpush3.bf16.msra.mxu0 %v17392_v58  ;;  %921 = vmatprep.mubr.bf16.mxu0 %v621_v61  ;;  %v16205_v58 = vld [vmem:[%s20975_s1 + $0x60] sm:$0xff]   ;;  %v17552_v19 = vor.u32 %v2016_v49, %v2015_v38  ;;  %v607_v61 = vshll.u32 %v17541_v51, 16  ;;  %v17567_v7 = vsel %vm2004_vm2, %v2007_v40, %v17503_v23  ;;  %v2022_v38 = vrot.slane %v622_v11, 1  ;;  %v16225_v49 = vld [vmem:[%s20975_s1 + $0xe8] sm:$0xff]  }
  0x4b   : >> { %15516 = vmatprep.subr.bf16.mxu0 %v16198_v56  ;;  %14326 = vmatprep.subr.bf16.mxu1 %v16202_v62  ;;  %v612_v62 = vshll.u32 %v17543_v52, 16  ;;  %v2019_v11 = vrot.slane %v581_v26, 1  ;;  %v17613_v45 = vor.u32 %v2030_v43, %v2029_v33  ;;  %v16226_v26 = vld [vmem:[%s20975_s1 + $0x128] sm:$0xff]   ;;  %v2033_v48 = vrot.slane %v605_v60, 1 }
  0x4c   : >> { %971 = vmatmul.mubr.bf16.gmra.mxu1 %v624_v22  ;;  %v17563_v6 = vsel %vm2004_vm2, %v2014_v14, %v17552_v19  ;;  %v16218_v22 = vld [vmem:[%s20975_s1] sm:$0xff]   ;;  %v2034_v13 = vrot.slane %v607_v61, 2  ;;  %v16227_v14 = vld [vmem:[%s20975_s1 + $0xa8] sm:$0xff]   ;;  %v1516_v33 = vrot.slane %v17415_v20, 1 }
  0x4d   : >> { %14327 = vmatpush3.bf16.msra.mxu1 %v16203_v15  ;;  %1300 = vmatprep.mubr.bf16.mxu1 %v17394_v63  ;;  %v609_v15 = vrot.slane %v607_v61, 1  ;;  %v614_v16 = vrot.slane %v612_v62, 1  ;;  %v2021_v47 = vor.u32 %v2020_v32, %v2019_v11  ;;  %v2037_v55 = vrot.slane %v612_v62, 2  ;;  %v16232_v61 = vld [vmem:[%s20975_s1 + $0x118] sm:$0xff]   ;;  %v16230_v62 = vld [vmem:[%s20975_s1 + $0xa0] sm:$0xff]   ;;  %v16250_v11 = vld [vmem:[%s20975_s1 + $0x330] sm:$0xff]  }
  0x4e   : >> { %15517 = vmatpush3.bf16.msra.mxu0 %v16198_v56  ;;  %14328 = vmatprep.subr.bf16.mxu1 %v16205_v58  ;;  %v12580_v56 = vld [vmem:[%s17329_s19 + $0xb8] sm:$0xff]  ;;  %v2035_v54 = vor.u32 %v2034_v13, %v2033_v48  ;;  %v16249_v32 = vld [vmem:[%s20975_s1 + $0x2b0] sm:$0xff]   ;;  %v16254_v48 = vld [vmem:[%s20975_s1 + $0x328] sm:$0xff]  }
  0x4f   : >> { %15518 = vmatprep.subr.bf16.mxu0 %v16201_v10  ;;  %2993 = vst.msk [vmem:[#allocation2 + $0x98] sm:$0xff] %vm315_vm0, %v12580_v56  ;;  %v610_v58 = vor.u32 %v609_v15, %v605_v60  ;;  %v16229_v56 = vld [vmem:[%s20975_s1 + $0x120] sm:$0xff]   ;;  %v16233_v15 = vld [vmem:[%s20975_s1 + $0x98] sm:$0xff]   ;;  %v16253_v13 = vld [vmem:[%s20975_s1 + $0x2a8] sm:$0xff]  }
  0x51   : >> { %922 = vmatmul.mubr.bf16.gmra.mxu0 %v618_v17  ;;  %14329 = vmatpush3.bf16.msra.mxu1 %v16206_v25  ;;  %v16216_v17 = vld [vmem:[%s20975_s1 + $0x240] sm:$0xff]   ;;  %v628_v25 = vshrl.u32 %v17543_v52, 16 }
  0x52   : >> { %15519 = vmatpush3.bf16.msra.mxu0 %v16201_v10  ;;  %14330 = vmatprep.subr.bf16.mxu1 %v16208_v29  ;;  %v16217_v10 = vld [vmem:[%s20975_s1 + $0x40] sm:$0xff]   ;;  %v16220_v29 = vld [vmem:[%s20975_s1 + $0x138] sm:$0xff]  }
  0x53   : >> { %15520 = vmatprep.subr.bf16.mxu0 %v16204_v24  ;;  %v2036_v50 = vrot.slane %v628_v25, 1 }
  0x55   : >> { %14331 = vmatpush3.bf16.msra.mxu1 %v16209_v35  ;;  %v2026_v35 = vrot.slane %v593_v30, 1  ;;  %v16221_v30 = vld [vmem:[%s20975_s1 + $0xb8] sm:$0xff]   ;;  %v17648_v40 = vor.u32 %v2037_v55, %v2036_v50 }
  0x56   : >> { %15521 = vmatpush3.bf16.msra.mxu0 %v16204_v24  ;;  %14332 = vmatprep.subr.bf16.mxu1 %v16211_v42  ;;  %v615_v24 = vsel %vm555_vm1, %v610_v58, %v614_v16  ;;  %v630_v42 = vor.u32 %v628_v25, %v614_v16  ;;  %v16234_v16 = vld [vmem:[%s20975_s1 + $0xd0] sm:$0xff]   ;;  %v16238_v58 = vld [vmem:[%s20975_s1 + $0x108] sm:$0xff]   ;;  %v16260_v55 = vld [vmem:[%s20975_s1 + $0x358] sm:$0xff]  }
  0x57   : >> { %15522 = vmatprep.subr.bf16.mxu0 %v16207_v34  ;;  %15530 = vmatprep.mubr.bf16.mxu0 %v615_v24  ;;  %v17657_v60 = vsel %vm2004_vm2, %v2035_v54, %v17648_v40  ;;  %v16241_v24 = vld [vmem:[%s20975_s1 + $0x100] sm:$0xff]   ;;  %v16239_v25 = vld [vmem:[%s20975_s1 + $0x88] sm:$0xff]  }
  0x58   : >> { %v16258_v54 = vld [vmem:[%s20975_s1 + $0x320] sm:$0xff]  }
  0x59   : >> { %14333 = vmatpush3.bf16.msra.mxu1 %v16212_v44 }
  0x5a   : >> { %15523 = vmatpush3.bf16.msra.mxu0 %v16207_v34  ;;  %14334 = vmatprep.subr.bf16.mxu1 %v16214_v41  ;;  %v16219_v34 = vld [vmem:[%s20975_s1 + $0xf8] sm:$0xff]   ;;  %v2023_v41 = vrot.slane %v588_v28, 2 }
  0x5b   : >> { %15524 = vmatprep.subr.bf16.mxu0 %v16210_v39 }
  0x5c   : >> { %v17631_v28 = vor.u32 %v2023_v41, %v2022_v38  ;;  %v16242_v38 = vld [vmem:[%s20975_s1 + $0x80] sm:$0xff]   ;;  %v1510_v41 = vrot.slane %v17394_v63, 1 }
  0x5d   : >> { %14335 = vmatpush3.bf16.msra.mxu1 %v16215_v9  ;;  %v16231_v9 = vld [vmem:[%s20975_s1 + $0xd8] sm:$0xff]  }
  0x5e   : >> { %15525 = vmatpush3.bf16.msra.mxu0 %v16210_v39  ;;  %14336 = vmatprep.subr.bf16.mxu1 %v16217_v10  ;;  %v2027_v39 = vrot.slane %v595_v31, 2  ;;  %v16222_v31 = vld [vmem:[%s20975_s1 + $0xf0] sm:$0xff]   ;;  %v17638_v53 = vsel %vm2004_vm2, %v2021_v47, %v17631_v28  ;;  %v1511_v47 = vrot.slane %v17400_v8, 1 }
  0x5f   : >> { %15526 = vmatprep.subr.bf16.mxu0 %v16213_v59  ;;  %v16235_v10 = vld [vmem:[%s20975_s1 + $0x110] sm:$0xff]  }
  0x60   : >> { %v2028_v44 = vor.u32 %v2027_v39, %v2026_v35  ;;  %v1517_v35 = vrot.slane %v17417_v21, 1  ;;  %v16243_v39 = vld [vmem:[%s20975_s1 + $0x2f8] sm:$0xff]   ;;  %v1512_v50 = vsel %vm1506_vm3, %v1510_v41, %v1511_v47  ;;  %v16280_v41 = vld [vmem:[%s20975_s1 + $0x3f0] sm:$0xff]  }
  0x61   : >> { %14337 = vmatpush3.bf16.msra.mxu1 %v16218_v22  ;;  %v16237_v22 = vld [vmem:[%s20975_s1 + $0xc8] sm:$0xff]  }
  0x62   : >> { %15527 = vmatpush3.bf16.msra.mxu0 %v16213_v59  ;;  %15534 = vmatprep.subr.bf16.mxu1 %v16220_v29  ;;  %v17625_v46 = vsel %vm2004_vm2, %v2028_v44, %v17613_v45  ;;  %v16228_v59 = vld [vmem:[%s20975_s1 + $0xe0] sm:$0xff]   ;;  %v1518_v43 = vsel %vm1506_vm3, %v1516_v33, %v1517_v35  ;;  %v16247_v44 = vld [vmem:[%s20975_s1 + $0x2f0] sm:$0xff]  }
  0x63   : >> { %15528 = vmatprep.subr.bf16.mxu0 %v16216_v17  ;;  %v16274_v33 = vld [vmem:[%s20975_s1 + $0x300] sm:$0xff]  }
  0x64   : >> { %1301 = vmatmul.mubr.bf16.vlgmr.msra.gmra.mxu1 %v17441_v36 }
  0x65   : >> { %15535 = vmatpush3.bf16.msra.mxu1 %v16220_v29  ;;  %1308 = vmatprep.mubr.bf16.mxu1 %v17400_v8  ;;  %v16240_v29 = vld [vmem:[%s20975_s1 + $0xc0] sm:$0xff]  }
  0x66   : >> { %15529 = vmatpush3.bf16.msra.mxu0 %v16216_v17  ;;  %15536 = vmatprep.subr.bf16.mxu1 %v16223_v57  ;;  %v16236_v17 = vld [vmem:[%s20975_s1 + $0x90] sm:$0xff]  }
  0x67   : >> { %14350 = vmatprep.subr.bf16.mxu0 %v16219_v34  ;;  %v16244_v34 = vld [vmem:[%s20975_s1 + $0x378] sm:$0xff]  }
  0x69   : >> { %15531 = vmatmul.mubr.bf16.vlgmr.msra.gmra.mxu0 %v630_v42  ;;  %15537 = vmatpush3.bf16.msra.mxu1 %v16223_v57  ;;  %v16246_v42 = vld [vmem:[%s20975_s1 + $0x338] sm:$0xff]   ;;  %v16248_v57 = vld [vmem:[%s20975_s1 + $0x370] sm:$0xff]  }
  0x6a   : >> { %14351 = vmatpush3.bf16.msra.mxu0 %v16221_v30  ;;  %1349 = vmatprep.mubr.bf16.mxu0 %v17415_v20  ;;  %v16245_v30 = vld [vmem:[%s20975_s1 + $0x2b8] sm:$0xff]  }
  0x6b   : >> { %14352 = vmatprep.subr.bf16.mxu0 %v16222_v31  ;;  %15538 = vmatprep.subr.bf16.mxu1 %v16226_v26  ;;  %v16252_v31 = vld [vmem:[%s20975_s1 + $0x368] sm:$0xff]  }
  0x6c   : >> { %1309 = vmatmul.mubr.bf16.gmra.mxu1 %v17443_v37 }
  0x6d   : >> { %15539 = vmatpush3.bf16.msra.mxu1 %v16226_v26  ;;  %15550 = vmatprep.mubr.bf16.mxu1 %v17541_v51  ;;  %v16251_v26 = vld [vmem:[%s20975_s1 + $0x2e8] sm:$0xff]  }
  0x6e   : >> { %14353 = vmatpush3.bf16.msra.mxu0 %v16224_v27  ;;  %15540 = vmatprep.subr.bf16.mxu1 %v16229_v56  ;;  %v16256_v27 = vld [vmem:[%s20975_s1 + $0x360] sm:$0xff]  }
  0x6f   : >> { %14354 = vmatprep.subr.bf16.mxu0 %v16225_v49  ;;  %v16255_v49 = vld [vmem:[%s20975_s1 + $0x2e0] sm:$0xff]  }
  0x71   : >> { %15541 = vmatpush3.bf16.msra.mxu1 %v16229_v56  ;;  %v16257_v56 = vld [vmem:[%s20975_s1 + $0x2a0] sm:$0xff]  }
  0x72   : >> { %14355 = vmatpush3.bf16.msra.mxu0 %v16227_v14  ;;  %15542 = vmatprep.subr.bf16.mxu1 %v16232_v61  ;;  %v16259_v14 = vld [vmem:[%s20975_s1 + $0x2d8] sm:$0xff]  }
  0x73   : >> { %14356 = vmatprep.subr.bf16.mxu0 %v16228_v59  ;;  %v16262_v59 = vld [vmem:[%s20975_s1 + $0x318] sm:$0xff]  }
  0x75   : >> { %15543 = vmatpush3.bf16.msra.mxu1 %v16232_v61  ;;  %v16264_v61 = vld [vmem:[%s20975_s1 + $0x350] sm:$0xff]  }
  0x76   : >> { %14357 = vmatpush3.bf16.msra.mxu0 %v16230_v62  ;;  %15544 = vmatprep.subr.bf16.mxu1 %v16235_v10  ;;  %v16261_v62 = vld [vmem:[%s20975_s1 + $0x298] sm:$0xff]  }
  0x77   : >> { %14358 = vmatprep.subr.bf16.mxu0 %v16231_v9  ;;  %v16263_v9 = vld [vmem:[%s20975_s1 + $0x2d0] sm:$0xff]  }
  0x79   : >> { %15545 = vmatpush3.bf16.msra.mxu1 %v16235_v10  ;;  %v16266_v10 = vld [vmem:[%s20975_s1 + $0x310] sm:$0xff]  }
  0x7a   : >> { %14359 = vmatpush3.bf16.msra.mxu0 %v16233_v15  ;;  %15546 = vmatprep.subr.bf16.mxu1 %v16238_v58  ;;  %v16268_v15 = vld [vmem:[%s20975_s1 + $0x348] sm:$0xff]  }
  0x7b   : >> { %14360 = vmatprep.subr.bf16.mxu0 %v16234_v16  ;;  %v16265_v16 = vld [vmem:[%s20975_s1 + $0x290] sm:$0xff]  }
  0x7d   : >> { %15547 = vmatpush3.bf16.msra.mxu1 %v16238_v58  ;;  %v16267_v58 = vld [vmem:[%s20975_s1 + $0x2c8] sm:$0xff]  }
  0x7e   : >> { %14361 = vmatpush3.bf16.msra.mxu0 %v16236_v17  ;;  %15548 = vmatprep.subr.bf16.mxu1 %v16241_v24  ;;  %v16270_v17 = vld [vmem:[%s20975_s1 + $0x308] sm:$0xff]  }
  0x7f   : >> { %14362 = vmatprep.subr.bf16.mxu0 %v16237_v22  ;;  %v16272_v22 = vld [vmem:[%s20975_s1 + $0x340] sm:$0xff]  }
  0x81   : >> { %15549 = vmatpush3.bf16.msra.mxu1 %v16241_v24  ;;  %v16269_v24 = vld [vmem:[%s20975_s1 + $0x288] sm:$0xff]  }
  0x82   : >> { %14363 = vmatpush3.bf16.msra.mxu0 %v16239_v25  ;;  %14416 = vmatprep.subr.bf16.mxu1 %v16244_v34  ;;  %v16271_v25 = vld [vmem:[%s20975_s1 + $0x2c0] sm:$0xff]   ;;  %v1514_v34 = vrot.slane %v17410_v18, 1 }
  0x83   : >> { %14364 = vmatprep.subr.bf16.mxu0 %v16240_v29  ;;  %v1513_v29 = vrot.slane %v17403_v12, 1 }
  0x84   : >> { %15551 = vmatmul.mubr.bf16.vlgmr.msra.gmra.mxu1 %v17543_v52 }
  0x85   : >> { %14417 = vmatpush3.bf16.msra.mxu1 %v16246_v42  ;;  %1853 = vmatprep.mubr.bf16.mxu1 %v1518_v43  ;;  %v16273_v42 = vld [vmem:[%s20975_s1 + $0x280] sm:$0xff]   ;;  %v16275_v43 = vld [vmem:[%s20975_s1 + $0x3b8] sm:$0xff]  }
  0x86   : >> { %14365 = vmatpush3.bf16.msra.mxu0 %v16242_v38  ;;  %14418 = vmatprep.subr.bf16.mxu1 %v16248_v57  ;;  %v1507_v38 = vrot.slane %v17441_v36, 1  ;;  %v1508_v57 = vrot.slane %v17443_v37, 1 }
  0x87   : >> { %14388 = vmatprep.subr.bf16.mxu0 %v16243_v39  ;;  %v16276_v39 = vld [vmem:[%s20975_s1 + $0x438] sm:$0xff]  }
  0x89   : >> { %1350 = vmatmul.mubr.bf16.vlgmr.msra.gmra.mxu0 %v17403_v12  ;;  %14419 = vmatpush3.bf16.msra.mxu1 %v16250_v11  ;;  %v16279_v11 = vld [vmem:[%s20975_s1 + $0x430] sm:$0xff]  }
  0x8a   : >> { %14389 = vmatpush3.bf16.msra.mxu0 %v16245_v30  ;;  %1357 = vmatprep.mubr.bf16.mxu0 %v17417_v21  ;;  %v1515_v30 = vsel %vm1506_vm3, %v1513_v29, %v1514_v34  ;;  %v16302_v29 = vld [vmem:[%s20975_s1 + $0x4b0] sm:$0xff]  }
  0x8b   : >> { %14390 = vmatprep.subr.bf16.mxu0 %v16247_v44  ;;  %14420 = vmatprep.subr.bf16.mxu1 %v16252_v31  ;;  %v16277_v44 = vld [vmem:[%s20975_s1 + $0x3f8] sm:$0xff]   ;;  %v1509_v31 = vsel %vm1506_vm3, %v1507_v38, %v1508_v57  ;;  %v16307_v38 = vld [vmem:[%s20975_s1 + $0x468] sm:$0xff]  }
  0x8d   : >> { %14421 = vmatpush3.bf16.msra.mxu1 %v16254_v48  ;;  %v1519_v48 = vrot.slane %v17541_v51, 1 }
  0x8e   : >> { %14391 = vmatpush3.bf16.msra.mxu0 %v16249_v32  ;;  %14422 = vmatprep.subr.bf16.mxu1 %v16256_v27  ;;  %v16278_v32 = vld [vmem:[%s20975_s1 + $0x3b0] sm:$0xff]   ;;  %v16281_v27 = vld [vmem:[%s20975_s1 + $0x3a8] sm:$0xff]  }
  0x8f   : >> { %14392 = vmatprep.subr.bf16.mxu0 %v16251_v26  ;;  %v16282_v26 = vld [vmem:[%s20975_s1 + $0x428] sm:$0xff]  }
  0x91   : >> { %1358 = vmatmul.mubr.bf16.gmra.mxu0 %v17410_v18  ;;  %14423 = vmatpush3.bf16.msra.mxu1 %v16258_v54  ;;  %v16286_v54 = vld [vmem:[%s20975_s1 + $0x3e0] sm:$0xff]  }
  0x92   : >> { %14393 = vmatpush3.bf16.msra.mxu0 %v16253_v13  ;;  %1804 = vmatprep.mubr.bf16.mxu0 %v1512_v50  ;;  %v1520_v13 = vrot.slane %v17543_v52, 1 }
  0x93   : >> { %14394 = vmatprep.subr.bf16.mxu0 %v16255_v49  ;;  %14424 = vmatprep.subr.bf16.mxu1 %v16260_v55  ;;  %v16285_v49 = vld [vmem:[%s20975_s1 + $0x420] sm:$0xff]   ;;  %v16288_v55 = vld [vmem:[%s20975_s1 + $0x418] sm:$0xff]  }
  0x94   : >> { %v1521_v50 = vsel %vm1506_vm3, %v1519_v48, %v1520_v13  ;;  %v16324_v48 = vld [vmem:[%s20975_s1 + $0x5f8] sm:$0xff]  }
  0x95   : >> { %14425 = vmatpush3.bf16.msra.mxu1 %v16262_v59  ;;  %v16290_v59 = vld [vmem:[%s20975_s1 + $0x390] sm:$0xff]  }
  0x96   : >> { %14395 = vmatpush3.bf16.msra.mxu0 %v16257_v56  ;;  %14426 = vmatprep.subr.bf16.mxu1 %v16264_v61  ;;  %v16287_v56 = vld [vmem:[%s20975_s1 + $0x398] sm:$0xff]   ;;  %v16292_v61 = vld [vmem:[%s20975_s1 + $0x3d0] sm:$0xff]  }
  0x97   : >> { %14396 = vmatprep.subr.bf16.mxu0 %v16259_v14  ;;  %v16289_v14 = vld [vmem:[%s20975_s1 + $0x3d8] sm:$0xff]  }
  0x99   : >> { %14427 = vmatpush3.bf16.msra.mxu1 %v16266_v10  ;;  %v16295_v10 = vld [vmem:[%s20975_s1 + $0x3c8] sm:$0xff]  }
  0x9a   : >> { %14397 = vmatpush3.bf16.msra.mxu0 %v16261_v62  ;;  %14428 = vmatprep.subr.bf16.mxu1 %v16268_v15  ;;  %v16294_v62 = vld [vmem:[%s20975_s1 + $0x408] sm:$0xff]   ;;  %v16297_v15 = vld [vmem:[%s20975_s1 + $0x400] sm:$0xff]  }
  0x9b   : >> { %14398 = vmatprep.subr.bf16.mxu0 %v16263_v9  ;;  %v16293_v9 = vld [vmem:[%s20975_s1 + $0x388] sm:$0xff]  }
  0x9d   : >> { %14429 = vmatpush3.bf16.msra.mxu1 %v16270_v17  ;;  %v16300_v17 = vld [vmem:[%s20975_s1 + $0x4f8] sm:$0xff]  }
  0x9e   : >> { %14399 = vmatpush3.bf16.msra.mxu0 %v16265_v16  ;;  %14430 = vmatprep.subr.bf16.mxu1 %v16272_v22  ;;  %v16296_v16 = vld [vmem:[%s20975_s1 + $0x380] sm:$0xff]   ;;  %v16299_v22 = vld [vmem:[%s20975_s1 + $0x4b8] sm:$0xff]  }
  0x9f   : >> { %14400 = vmatprep.subr.bf16.mxu0 %v16267_v58  ;;  %v16298_v58 = vld [vmem:[%s20975_s1 + $0x3c0] sm:$0xff]  }
  0xa1   : >> { %14431 = vmatpush3.bf16.msra.mxu1 %v16274_v33  ;;  %v16306_v33 = vld [vmem:[%s20975_s1 + $0x4e8] sm:$0xff]  }
  0xa2   : >> { %14401 = vmatpush3.bf16.msra.mxu0 %v16269_v24  ;;  %14454 = vmatprep.subr.bf16.mxu1 %v16276_v39  ;;  %v16303_v24 = vld [vmem:[%s20975_s1 + $0x4f0] sm:$0xff]   ;;  %v16312_v39 = vld [vmem:[%s20975_s1 + $0x4d8] sm:$0xff]  }
  0xa3   : >> { %14402 = vmatprep.subr.bf16.mxu0 %v16271_v25  ;;  %v16301_v25 = vld [vmem:[%s20975_s1 + $0x478] sm:$0xff]  }
  0xa4   : >> { %1854 = vmatmul.mubr.bf16.vlgmr.msra.gmra.mxu1 %v1515_v30  ;;  %v16318_v30 = vld [vmem:[%s20975_s1 + $0x4c8] sm:$0xff]  }
  0xa5   : >> { %14455 = vmatpush3.bf16.msra.mxu1 %v16277_v44  ;;  %1861 = vmatprep.mubr.bf16.mxu1 %v1517_v35  ;;  %v16283_v35 = vld [vmem:[%s20975_s1 + $0x3e8] sm:$0xff]   ;;  %v16316_v44 = vld [vmem:[%s20975_s1 + $0x450] sm:$0xff]  }
  0xa6   : >> { %14403 = vmatpush3.bf16.msra.mxu0 %v16273_v42  ;;  %14456 = vmatprep.subr.bf16.mxu1 %v16279_v11  ;;  %v16310_v42 = vld [vmem:[%s20975_s1 + $0x460] sm:$0xff]   ;;  %v16317_v11 = vld [vmem:[%s20975_s1 + $0x488] sm:$0xff]  }
  0xa7   : >> { %15554 = vmatprep.subr.bf16.mxu0 %v16275_v43 }
  0xa9   : >> { %1805 = vmatmul.mubr.bf16.vlgmr.msra.gmra.mxu0 %v1509_v31  ;;  %14457 = vmatpush3.bf16.msra.mxu1 %v16280_v41  ;;  %v16321_v31 = vld [vmem:[%s20975_s1 + $0x4c0] sm:$0xff]  }
  0xaa   : >> { %15555 = vmatpush3.bf16.msra.mxu0 %v16275_v43  ;;  %1812 = vmatprep.mubr.bf16.mxu0 %v1511_v47  ;;  %v16284_v47 = vld [vmem:[%s20975_s1 + $0x3a0] sm:$0xff]   ;;  %v16314_v43 = vld [vmem:[%s20975_s1 + $0x490] sm:$0xff]  }
  0xab   : >> { %15556 = vmatprep.subr.bf16.mxu0 %v16278_v32  ;;  %14458 = vmatprep.subr.bf16.mxu1 %v16282_v26  ;;  %v16320_v41 = vld [vmem:[%s20975_s1 + $0x480] sm:$0xff]   ;;  %v2532_v26 = vrot.slane %v17415_v20, 2  ;;  %v16326_v20 = vld [vmem:[%s20975_s1 + $0x5b8] sm:$0xff]  }
  0xac   : >> { %1862 = vmatmul.mubr.bf16.gmra.mxu1 %v1514_v34  ;;  %v16304_v34 = vld [vmem:[%s20975_s1 + $0x470] sm:$0xff]  }
  0xad   : >> { %14459 = vmatpush3.bf16.msra.mxu1 %v16283_v35  ;;  %2322 = vmatprep.mubr.bf16.mxu1 %v17563_v6  ;;  %v16291_v6 = vld [vmem:[%s20975_s1 + $0x410] sm:$0xff]   ;;  %v16323_v35 = vld [vmem:[%s20975_s1 + $0x578] sm:$0xff]  }
  0xae   : >> { %15557 = vmatpush3.bf16.msra.mxu0 %v16278_v32  ;;  %14460 = vmatprep.subr.bf16.mxu1 %v16285_v49  ;;  %v16319_v32 = vld [vmem:[%s20975_s1 + $0x448] sm:$0xff]   ;;  %v16328_v49 = vld [vmem:[%s20975_s1 + $0x5f0] sm:$0xff]  }
  0xaf   : >> { %15558 = vmatprep.subr.bf16.mxu0 %v16281_v27 }
  0xb1   : >> { %1813 = vmatmul.mubr.bf16.gmra.mxu0 %v1508_v57  ;;  %14461 = vmatpush3.bf16.msra.mxu1 %v16286_v54  ;;  %v16311_v57 = vld [vmem:[%s20975_s1 + $0x498] sm:$0xff]   ;;  %v16327_v54 = vld [vmem:[%s20975_s1 + $0x570] sm:$0xff]  }
  0xb2   : >> { %15559 = vmatpush3.bf16.msra.mxu0 %v16281_v27  ;;  %15570 = vmatprep.mubr.bf16.mxu0 %v1521_v50  ;;  %v2533_v27 = vrot.slane %v17417_v21, 2  ;;  %v16325_v50 = vld [vmem:[%s20975_s1 + $0x538] sm:$0xff]  }
  0xb3   : >> { %15560 = vmatprep.subr.bf16.mxu0 %v16284_v47  ;;  %14462 = vmatprep.subr.bf16.mxu1 %v16288_v55  ;;  %v16330_v55 = vld [vmem:[%s20975_s1 + $0x5b0] sm:$0xff]  }
  0xb5   : >> { %14463 = vmatpush3.bf16.msra.mxu1 %v16289_v14  ;;  %v2526_v14 = vrot.slane %v17394_v63, 2  ;;  %v16333_v63 = vld [vmem:[%s20975_s1 + $0x528] sm:$0xff]  }
  0xb6   : >> { %15561 = vmatpush3.bf16.msra.mxu0 %v16284_v47  ;;  %14464 = vmatprep.subr.bf16.mxu1 %v16291_v6  ;;  %v2534_v47 = vsel %vm2522_vm4, %v2532_v26, %v2533_v27  ;;  %v16331_v6 = vld [vmem:[%s20975_s1 + $0x568] sm:$0xff]  }
  0xb7   : >> { %15562 = vmatprep.subr.bf16.mxu0 %v16287_v56 }
  0xb9   : >> { %14465 = vmatpush3.bf16.msra.mxu1 %v16292_v61  ;;  %v16336_v61 = vld [vmem:[%s20975_s1 + $0x5e0] sm:$0xff]  }
  0xba   : >> { %15563 = vmatpush3.bf16.msra.mxu0 %v16287_v56  ;;  %14466 = vmatprep.subr.bf16.mxu1 %v16294_v62  ;;  %v16332_v56 = vld [vmem:[%s20975_s1 + $0x5e8] sm:$0xff]  }
  0xbb   : >> { %15564 = vmatprep.subr.bf16.mxu0 %v16290_v59 }
  0xbd   : >> { %14467 = vmatpush3.bf16.msra.mxu1 %v16295_v10  ;;  %v16340_v10 = vld [vmem:[%s20975_s1 + $0x5d8] sm:$0xff]  }
  0xbe   : >> { %15565 = vmatpush3.bf16.msra.mxu0 %v16290_v59  ;;  %14468 = vmatprep.subr.bf16.mxu1 %v16297_v15  ;;  %v16334_v59 = vld [vmem:[%s20975_s1 + $0x5a8] sm:$0xff]   ;;  %v16337_v15 = vld [vmem:[%s20975_s1 + $0x520] sm:$0xff]  }
  0xbf   : >> { %15566 = vmatprep.subr.bf16.mxu0 %v16293_v9 }
  0xc1   : >> { %14469 = vmatpush3.bf16.msra.mxu1 %v16298_v58  ;;  %v16344_v58 = vld [vmem:[%s20975_s1 + $0x5d0] sm:$0xff]  }
  0xc2   : >> { %15567 = vmatpush3.bf16.msra.mxu0 %v16293_v9  ;;  %15574 = vmatprep.subr.bf16.mxu1 %v16300_v17  ;;  %v16338_v9 = vld [vmem:[%s20975_s1 + $0x5a0] sm:$0xff]  }
  0xc3   : >> { %15568 = vmatprep.subr.bf16.mxu0 %v16296_v16 }
  0xc4   : >> { %2323 = vmatmul.mubr.bf16.vlgmr.msra.gmra.mxu1 %v17567_v7  ;;  %v16305_v7 = vld [vmem:[%s20975_s1 + $0x4a8] sm:$0xff]  }
  0xc5   : >> { %15575 = vmatpush3.bf16.msra.mxu1 %v16300_v17  ;;  %2330 = vmatprep.mubr.bf16.mxu1 %v17552_v19  ;;  %v16309_v19 = vld [vmem:[%s20975_s1 + $0x4e0] sm:$0xff]   ;;  %v16341_v17 = vld [vmem:[%s20975_s1 + $0x518] sm:$0xff]  }
  0xc6   : >> { %15569 = vmatpush3.bf16.msra.mxu0 %v16296_v16  ;;  %15576 = vmatprep.subr.bf16.mxu1 %v16303_v24  ;;  %v16339_v16 = vld [vmem:[%s20975_s1 + $0x558] sm:$0xff]  }
  0xc7   : >> { %14482 = vmatprep.subr.bf16.mxu0 %v16299_v22  ;;  %v16343_v22 = vld [vmem:[%s20975_s1 + $0x550] sm:$0xff]  }
  0xc9   : >> { %15571 = vmatmul.mubr.bf16.vlgmr.msra.gmra.mxu0 %v1520_v13  ;;  %15577 = vmatpush3.bf16.msra.mxu1 %v16303_v24  ;;  %v16322_v13 = vld [vmem:[%s20975_s1 + $0x440] sm:$0xff]   ;;  %v16346_v24 = vld [vmem:[%s20975_s1 + $0x590] sm:$0xff]  }
  0xca   : >> { %14483 = vmatpush3.bf16.msra.mxu0 %v16301_v25  ;;  %2371 = vmatprep.mubr.bf16.mxu0 %v17625_v46  ;;  %v16308_v46 = vld [vmem:[%s20975_s1 + $0x4a0] sm:$0xff]   ;;  %v16345_v25 = vld [vmem:[%s20975_s1 + $0x510] sm:$0xff]  }
  0xcb   : >> { %14484 = vmatprep.subr.bf16.mxu0 %v16302_v29  ;;  %15578 = vmatprep.subr.bf16.mxu1 %v16306_v33  ;;  %v16348_v29 = vld [vmem:[%s20975_s1 + $0x5c8] sm:$0xff]  }
  0xcc   : >> { %2331 = vmatmul.mubr.bf16.gmra.mxu1 %v17503_v23  ;;  %v16315_v23 = vld [vmem:[%s20975_s1 + $0x4d0] sm:$0xff]  }
  0xcd   : >> { %15579 = vmatpush3.bf16.msra.mxu1 %v16306_v33  ;;  %15590 = vmatprep.mubr.bf16.mxu1 %v17657_v60  ;;  %v16313_v60 = vld [vmem:[%s20975_s1 + $0x458] sm:$0xff]   ;;  %v16347_v33 = vld [vmem:[%s20975_s1 + $0x548] sm:$0xff]  }
  0xce   : >> { %14485 = vmatpush3.bf16.msra.mxu0 %v16304_v34  ;;  %15580 = vmatprep.subr.bf16.mxu1 %v16309_v19  ;;  %v2995_v34 = vld [vmem:[#allocation2 + $0x8] sm:$0xff] }
  0xcf   : >> { %14486 = vmatprep.subr.bf16.mxu0 %v16305_v7  ;;  %v3000_v7 = vld [vmem:[#allocation2 + $0x30] sm:$0xff] }
  0xd1   : >> { %15581 = vmatpush3.bf16.msra.mxu1 %v16309_v19  ;;  %v16350_v19 = vld [vmem:[%s20975_s1 + $0x588] sm:$0xff]  }
  0xd2   : >> { %14487 = vmatpush3.bf16.msra.mxu0 %v16307_v38  ;;  %15582 = vmatprep.subr.bf16.mxu1 %v16312_v39  ;;  %v16349_v38 = vld [vmem:[%s20975_s1 + $0x508] sm:$0xff]  }
  0xd3   : >> { %14488 = vmatprep.subr.bf16.mxu0 %v16308_v46  ;;  %v16352_v46 = vld [vmem:[%s20975_s1 + $0x5c0] sm:$0xff]  }
  0xd5   : >> { %15583 = vmatpush3.bf16.msra.mxu1 %v16312_v39  ;;  %v3005_v39 = vld [vmem:[#allocation2 + $0x58] sm:$0xff] }
  0xd6   : >> { %14489 = vmatpush3.bf16.msra.mxu0 %v16310_v42  ;;  %15584 = vmatprep.subr.bf16.mxu1 %v16315_v23  ;;  %v3010_v42 = vld [vmem:[#allocation2 + $0x80] sm:$0xff] }
  0xd7   : >> { %14490 = vmatprep.subr.bf16.mxu0 %v16311_v57  ;;  %v18072_v57 = vpack.c.bf16 %v3000_v7, %v2995_v34  ;;  %v16366_v7 = vld [vmem:[%s20975_s1 + $0x160] sm:$0xff]  }
  0xd9   : >> { %15585 = vmatpush3.bf16.msra.mxu1 %v16315_v23  ;;  %v3004_v23 = vld [vmem:[#allocation2 + $0x50] sm:$0xff] }
  0xda   : >> { %14491 = vmatpush3.bf16.msra.mxu0 %v16313_v60  ;;  %15586 = vmatprep.subr.bf16.mxu1 %v16318_v30  ;;  %v3009_v60 = vld [vmem:[#allocation2 + $0x78] sm:$0xff] }
  0xdb   : >> { %14492 = vmatprep.subr.bf16.mxu0 %v16314_v43  ;;  %v16351_v43 = vld [vmem:[%s20975_s1 + $0x540] sm:$0xff]   ;;  %v18088_v26 = vpack.c.bf16 %v3009_v60, %v3004_v23 }
  0xdc   : >> { %v2994_v60 = vld [vmem:[#allocation2] sm:$0xff] }
  0xdd   : >> { %15587 = vmatpush3.bf16.msra.mxu1 %v16318_v30  ;;  %v2523_v30 = vrot.slane %v17441_v36, 2  ;;  %v16356_v36 = vld [vmem:[%s20975_s1 + $0x1b8] sm:$0xff]  }
  0xde   : >> { %14493 = vmatpush3.bf16.msra.mxu0 %v16316_v44  ;;  %15588 = vmatprep.subr.bf16.mxu1 %v16321_v31  ;;  %v2529_v44 = vrot.slane %v17403_v12, 2  ;;  %v16355_v12 = vld [vmem:[%s20975_s1 + $0x638] sm:$0xff]  }
  0xdf   : >> { %14494 = vmatprep.subr.bf16.mxu0 %v16317_v11  ;;  %v16353_v11 = vld [vmem:[%s20975_s1 + $0x500] sm:$0xff]  }
  0xe1   : >> { %15589 = vmatpush3.bf16.msra.mxu1 %v16321_v31  ;;  %v16354_v31 = vld [vmem:[%s20975_s1 + $0x580] sm:$0xff]  }
  0xe2   : >> { %14495 = vmatpush3.bf16.msra.mxu0 %v16319_v32  ;;  %14548 = vmatprep.subr.bf16.mxu1 %v16324_v48  ;;  %v2530_v32 = vrot.slane %v17410_v18, 2  ;;  %v3199_v48 = vshll.u32 %v18072_v57, 16 }
  0xe3   : >> { %14496 = vmatprep.subr.bf16.mxu0 %v16320_v41  ;;  %v18086_v41 = vpack.c.bf16 %v3010_v42, %v3005_v39 }
  0xe4   : >> { %15591 = vmatmul.mubr.bf16.vlgmr.msra.gmra.mxu1 %v17648_v40  ;;  %v16329_v40 = vld [vmem:[%s20975_s1 + $0x530] sm:$0xff]  }
  0xe5   : >> { %14549 = vmatpush3.bf16.msra.mxu1 %v16326_v20  ;;  %2869 = vmatprep.mubr.bf16.mxu1 %v2534_v47  ;;  %v16359_v20 = vld [vmem:[%s20975_s1 + $0x1b0] sm:$0xff]   ;;  %v2531_v47 = vsel %vm2522_vm4, %v2529_v44, %v2530_v32  ;;  %v2999_v44 = vld [vmem:[#allocation2 + $0x28] sm:$0xff] }
  0xe6   : >> { %14497 = vmatpush3.bf16.msra.mxu0 %v16322_v13  ;;  %14550 = vmatprep.subr.bf16.mxu1 %v16328_v49  ;;  %v2524_v13 = vrot.slane %v17443_v37, 2  ;;  %v3197_v49 = vshrl.u32 %v18072_v57, 16  ;;  %v16369_v37 = vld [vmem:[%s20975_s1 + $0x158] sm:$0xff]  }
  0xe7   : >> { %14520 = vmatprep.subr.bf16.mxu0 %v16323_v35  ;;  %v16357_v35 = vld [vmem:[%s20975_s1 + $0x178] sm:$0xff]  }
  0xe9   : >> { %2372 = vmatmul.mubr.bf16.vlgmr.msra.gmra.mxu0 %v17638_v53  ;;  %v2527_v53 = vrot.slane %v17400_v8, 2  ;;  %14551 = vmatpush3.bf16.msra.mxu1 %v16330_v55  ;;  %v3201_v55 = vrot.slane %v3199_v48, 1 }
  0xea   : >> { %14521 = vmatpush3.bf16.msra.mxu0 %v16325_v50  ;;  %2379 = vmatprep.mubr.bf16.mxu0 %v17613_v45  ;;  %v16335_v45 = vld [vmem:[%s20975_s1 + $0x560] sm:$0xff]   ;;  %v3204_v50 = vshll.u32 %v18086_v41, 16 }
  0xeb   : >> { %14522 = vmatprep.subr.bf16.mxu0 %v16327_v54  ;;  %14552 = vmatprep.subr.bf16.mxu1 %v16332_v56  ;;  %v2528_v62 = vsel %vm2522_vm4, %v2526_v14, %v2527_v53  ;;  %v3192_v54 = vshll.u32 %v18088_v26, 16  ;;  %v3244_v56 = vshrl.u32 %v18088_v26, 16 }
  0xed   : >> { %14553 = vmatpush3.bf16.msra.mxu1 %v16334_v59  ;;  %v4633_v14 = vrot.slane %v3192_v54, 2  ;;  %v16358_v59 = vld [vmem:[%s20975_s1 + $0x630] sm:$0xff]  }
  0xee   : >> { %14523 = vmatpush3.bf16.msra.mxu0 %v16329_v40  ;;  %14554 = vmatprep.subr.bf16.mxu1 %v16336_v61  ;;  %v2525_v40 = vsel %vm2522_vm4, %v2523_v30, %v2524_v13  ;;  %v4632_v61 = vrot.slane %v3244_v56, 1 }
  0xef   : >> { %14524 = vmatprep.subr.bf16.mxu0 %v16331_v6 }
  0xf1   : >> { %2380 = vmatmul.mubr.bf16.gmra.mxu0 %v17631_v28  ;;  %14555 = vmatpush3.bf16.msra.mxu1 %v16338_v9  ;;  %v16342_v28 = vld [vmem:[%s20975_s1 + $0x598] sm:$0xff]   ;;  %v16362_v9 = vld [vmem:[%s20975_s1 + $0x1a8] sm:$0xff]  }
  0xf2   : >> { %14525 = vmatpush3.bf16.msra.mxu0 %v16333_v63  ;;  %2820 = vmatprep.mubr.bf16.mxu0 %v2528_v62  ;;  %v16360_v63 = vld [vmem:[%s20975_s1 + $0x170] sm:$0xff]  }
  0xf3   : >> { %14526 = vmatprep.subr.bf16.mxu0 %v16335_v45  ;;  %14556 = vmatprep.subr.bf16.mxu1 %v16340_v10  ;;  %v3202_v10 = vor.u32 %v3201_v55, %v3197_v49 }
  0xf5   : >> { %14557 = vmatpush3.bf16.msra.mxu1 %v16342_v28 }
  0xf6   : >> { %14527 = vmatpush3.bf16.msra.mxu0 %v16337_v15  ;;  %14558 = vmatprep.subr.bf16.mxu1 %v16344_v58  ;;  %v18135_v15 = vrot.slane %v3204_v50, 1 }
  0xf7   : >> { %14528 = vmatprep.subr.bf16.mxu0 %v16339_v16  ;;  %v18137_v16 = vor.u32 %v4633_v14, %v4632_v61  ;;  %v16372_v61 = vld [vmem:[%s20975_s1 + $0x150] sm:$0xff]  }
  0xf9   : >> { %14559 = vmatpush3.bf16.msra.mxu1 %v16346_v24 }
  0xfa   : >> { %14529 = vmatpush3.bf16.msra.mxu0 %v16341_v17  ;;  %14560 = vmatprep.subr.bf16.mxu1 %v16348_v29  ;;  %v16361_v17 = vld [vmem:[%s20975_s1 + $0x628] sm:$0xff]  }
  0xfb   : >> { %14530 = vmatprep.subr.bf16.mxu0 %v16343_v22  ;;  %v2536_v22 = vrot.slane %v17543_v52, 2  ;;  %v16384_v52 = vld [vmem:[%s20975_s1 + $0x1f0] sm:$0xff]  }
  0xfd   : >> { %14561 = vmatpush3.bf16.msra.mxu1 %v16350_v19 }
  0xfe   : >> { %14531 = vmatpush3.bf16.msra.mxu0 %v16345_v25  ;;  %14562 = vmatprep.subr.bf16.mxu1 %v16352_v46  ;;  %v16363_v25 = vld [vmem:[%s20975_s1 + $0x168] sm:$0xff]   ;;  %v16368_v46 = vld [vmem:[%s20975_s1 + $0x198] sm:$0xff]  }
  0xff   : >> { %14532 = vmatprep.subr.bf16.mxu0 %v16347_v33  ;;  %v3207_v33 = vsel %vm555_vm1, %v3202_v10, %v18135_v15 }
 0x101   : >> { %14563 = vmatpush3.bf16.msra.mxu1 %v16354_v31  ;;  %v16367_v31 = vld [vmem:[%s20975_s1 + $0x618] sm:$0xff]  }
 0x102   : >> { %14533 = vmatpush3.bf16.msra.mxu0 %v16349_v38  ;;  %14586 = vmatprep.subr.bf16.mxu1 %v16356_v36 }
 0x103   : >> { %14534 = vmatprep.subr.bf16.mxu0 %v16351_v43 }
 0x104   : >> { %v14300_v6 = vpop.f32.mrf.mxu1  ;;  %2870 = vmatmul.mubr.bf16.vlgmr.msra.gmra.mxu1 %v2531_v47 }
 0x105   : >> { %14587 = vmatpush3.bf16.msra.mxu1 %v16357_v35  ;;  %2877 = vmatprep.mubr.bf16.mxu1 %v2533_v27  ;;  %v2535_v27 = vrot.slane %v17541_v51, 2  ;;  %v16364_v51 = vld [vmem:[%s20975_s1 + $0x620] sm:$0xff]   ;;  %v2997_v35 = vld [vmem:[#allocation2 + $0x18] sm:$0xff] }
 0x106   : >> { %14535 = vmatpush3.bf16.msra.mxu0 %v16353_v11  ;;  %v14301_v62 = vpop.f32.mrf.mxu1  ;;  %14588 = vmatprep.subr.bf16.mxu1 %v16359_v20  ;;  %v16371_v20 = vld [vmem:[%s20975_s1 + $0x190] sm:$0xff]  }
 0x107   : >> { %15594 = vmatprep.subr.bf16.mxu0 %v16355_v12  ;;  %v14302_v21 = vadd.f32 %v14301_v62, %v14300_v6  ;;  %v2537_v42 = vsel %vm2522_vm4, %v2535_v27, %v2536_v22  ;;  %v16374_v62 = vld [vmem:[%s20975_s1 + $0x188] sm:$0xff]   ;;  %v3012_v27 = vld [vmem:[#allocation2 + $0x90] sm:$0xff] }
 0x108   : >> { %v14303_v58 = vpop.f32.mrf.mxu1 }
 0x109   : >> { %v14272_v45 = vpop.f32.mrf.mxu0  ;;  %2821 = vmatmul.mubr.bf16.vlgmr.msra.gmra.mxu0 %v2525_v40  ;;  %14589 = vmatpush3.bf16.msra.mxu1 %v16360_v63  ;;  %v3002_v40 = vld [vmem:[#allocation2 + $0x40] sm:$0xff] }
 0x10a   : >> { %15595 = vmatpush3.bf16.msra.mxu0 %v16355_v12  ;;  %2828 = vmatprep.mubr.bf16.mxu0 %v2527_v53  ;;  %v14304_v8 = vpop.f32.mrf.mxu1  ;;  %v16365_v53 = vld [vmem:[%s20975_s1 + $0x1a0] sm:$0xff]  }
 0x10b   : >> { %v14273_v28 = vpop.f32.mrf.mxu0  ;;  %15596 = vmatprep.subr.bf16.mxu0 %v16358_v59  ;;  %14590 = vmatprep.subr.bf16.mxu1 %v16362_v9  ;;  %v14305_v34 = vadd.f32 %v14304_v8, %v14303_v58 }
 0x10c   : >> { %v14274_v24 = vadd.f32 %v14273_v28, %v14272_v45  ;;  %v14306_v39 = vpop.f32.mrf.mxu1  ;;  %2878 = vmatmul.mubr.bf16.gmra.mxu1 %v2530_v32  ;;  %v18193_v45 = vpack.c.bf16 %v3002_v40, %v2997_v35  ;;  %v2998_v28 = vld [vmem:[#allocation2 + $0x20] sm:$0xff]  ;;  %v16383_v35 = vld [vmem:[%s20975_s1 + $0x270] sm:$0xff]  }
 0x10d   : >> { %v14275_v29 = vpop.f32.mrf.mxu0  ;;  %14591 = vmatpush3.bf16.msra.mxu1 %v16363_v25  ;;  %3541 = vmatprep.mubr.bf16.mxu1 %v3207_v33  ;;  %v16375_v25 = vld [vmem:[%s20975_s1 + $0x148] sm:$0xff]  }
 0x10e   : >> { %15597 = vmatpush3.bf16.msra.mxu0 %v16358_v59  ;;  %v18160_v19 = vadd.f32 %v14302_v21, %v14274_v24  ;;  %14592 = vmatprep.subr.bf16.mxu1 %v16365_v53  ;;  %v14307_v30 = vpop.f32.mrf.mxu1  ;;  %v16370_v59 = vld [vmem:[%s20975_s1 + $0x610] sm:$0xff]   ;;  %v3007_v21 = vld [vmem:[#allocation2 + $0x68] sm:$0xff] }
 0x10f   : >> { %v14276_v38 = vpop.f32.mrf.mxu0  ;;  %15598 = vmatprep.subr.bf16.mxu0 %v16361_v17  ;;  %v14308_v11 = vadd.f32 %v14307_v30, %v14306_v39  ;;  %v16373_v24 = vld [vmem:[%s20975_s1 + $0x608] sm:$0xff]   ;;  %v18210_v8 = vpack.c.bf16 %v3012_v27, %v3007_v21  ;;  %v3221_v39 = vshrl.u32 %v18193_v45, 16  ;;  %v3194_v30 = vrot.slane %v3192_v54, 1 }
 0x110   : >> { %v14277_v23 = vadd.f32 %v14276_v38, %v14275_v29  ;;  %v14309_v12 = vpop.f32.mrf.mxu1  ;;  %v16377_v29 = vld [vmem:[%s20975_s1 + $0x180] sm:$0xff]  }
 0x111   : >> { %v14278_v43 = vpop.f32.mrf.mxu0  ;;  %2829 = vmatmul.mubr.bf16.gmra.mxu0 %v2524_v13  ;;  %14593 = vmatpush3.bf16.msra.mxu1 %v16366_v7  ;;  %v18180_v13 = vpack.c.bf16 %v2999_v44, %v2994_v60  ;;  %v3008_v7 = vld [vmem:[#allocation2 + $0x70] sm:$0xff]  ;;  %v3228_v60 = vshll.u32 %v18210_v8, 16  ;;  %v3247_v44 = vshrl.u32 %v18086_v41, 16 }
 0x112   : >> { %15599 = vmatpush3.bf16.msra.mxu0 %v16361_v17  ;;  %15610 = vmatprep.mubr.bf16.mxu0 %v2537_v42  ;;  %v18172_v18 = vadd.f32 %v14305_v34, %v14277_v23  ;;  %v14310_v55 = vpop.f32.mrf.mxu1  ;;  %v3003_v17 = vld [vmem:[#allocation2 + $0x48] sm:$0xff]  ;;  %v16376_v34 = vld [vmem:[%s20975_s1 + $0x600] sm:$0xff]   ;;  %v3013_v42 = vld [vmem:[#allocation2 + $0x98] sm:$0xff] }
 0x113   : >> { %15600 = vmatprep.subr.bf16.mxu0 %v16364_v51  ;;  %v14279_v32 = vpop.f32.mrf.mxu0  ;;  %14594 = vmatprep.subr.bf16.mxu1 %v16368_v46  ;;  %v14311_v14 = vadd.f32 %v14310_v55, %v14309_v12  ;;  %v3187_v10 = vshll.u32 %v18180_v13, 16  ;;  %v3185_v53 = vshrl.u32 %v18180_v13, 16  ;;  %v18219_v38 = vpack.c.bf16 %v3003_v17, %v2998_v28  ;;  %v16378_v46 = vld [vmem:[%s20975_s1 + $0x140] sm:$0xff]   ;;  %v16379_v12 = vld [vmem:[%s20975_s1 + $0x238] sm:$0xff]  }
 0x114   : >> { %v14280_v36 = vadd.f32 %v14279_v32, %v14278_v43 }
 0x115   : >> { %v14281_v47 = vpop.f32.mrf.mxu0  ;;  %14595 = vmatpush3.bf16.msra.mxu1 %v16369_v37  ;;  %v3189_v33 = vrot.slane %v3187_v10, 1  ;;  %v3235_v32 = vshll.u32 %v18219_v38, 16  ;;  %v18246_v37 = vrot.slane %v3228_v60, 1 }
 0x116   : >> { %15601 = vmatpush3.bf16.msra.mxu0 %v16364_v51  ;;  %v18185_v6 = vadd.f32 %v14308_v11, %v14280_v36  ;;  %14596 = vmatprep.subr.bf16.mxu1 %v16371_v20  ;;  %v3223_v51 = vshll.u32 %v18193_v45, 16  ;;  %v16380_v11 = vld [vmem:[%s20975_s1 + $0x278] sm:$0xff]   ;;  %v3249_v20 = vor.u32 %v3247_v44, %v18135_v15  ;;  %v16382_v15 = vld [vmem:[%s20975_s1 + $0x230] sm:$0xff]  }
 0x117   : >> { %15602 = vmatprep.subr.bf16.mxu0 %v16367_v31  ;;  %v14282_v63 = vpop.f32.mrf.mxu0  ;;  %v3190_v43 = vor.u32 %v3189_v33, %v3185_v53  ;;  %v3237_v55 = vrot.slane %v3235_v32, 1 }
 0x118   : >> { %v14283_v9 = vadd.f32 %v14282_v63, %v14281_v47  ;;  %v3225_v23 = vrot.slane %v3223_v51, 1  ;;  %v3233_v47 = vshrl.u32 %v18219_v38, 16 }
 0x119   : >> { %14597 = vmatpush3.bf16.msra.mxu1 %v16372_v61  ;;  %v3195_v36 = vsel %vm555_vm1, %v3190_v43, %v3194_v30 }
 0x11a   : >> { %15603 = vmatpush3.bf16.msra.mxu0 %v16367_v31  ;;  %v18199_v58 = vadd.f32 %v14311_v14, %v14283_v9  ;;  %14598 = vmatprep.subr.bf16.mxu1 %v16374_v62  ;;  %v18236_v31 = vpack.c.bf16 %v3013_v42, %v3008_v7  ;;  %v3226_v54 = vor.u32 %v3225_v23, %v3221_v39  ;;  %v16381_v14 = vld [vmem:[%s20975_s1 + $0x1f8] sm:$0xff]   ;;  %v16386_v9 = vld [vmem:[%s20975_s1 + $0x268] sm:$0xff]   ;;  %v16389_v7 = vld [vmem:[%s20975_s1 + $0x260] sm:$0xff]  }
 0x11b   : >> { %15604 = vmatprep.subr.bf16.mxu0 %v16370_v59  ;;  %v3238_v21 = vor.u32 %v3237_v55, %v3233_v47  ;;  %v2996_v55 = vld [vmem:[#allocation2 + $0x10] sm:$0xff] }
 0x11c   : >> { %v3240_v40 = vshll.u32 %v18236_v31, 16  ;;  %v3231_v61 = vsel %vm555_vm1, %v3226_v54, %v18246_v37 }
 0x11d   : >> { %14599 = vmatpush3.bf16.msra.mxu1 %v16375_v25  ;;  %v16385_v25 = vld [vmem:[%s20975_s1 + $0x228] sm:$0xff]  }
 0x11e   : >> { %15605 = vmatpush3.bf16.msra.mxu0 %v16370_v59  ;;  %14600 = vmatprep.subr.bf16.mxu1 %v16377_v29  ;;  %v18276_v27 = vrot.slane %v3240_v40, 1  ;;  %v3246_v29 = vor.u32 %v3244_v56, %v3194_v30  ;;  %v16387_v56 = vld [vmem:[%s20975_s1 + $0x1e8] sm:$0xff]  }
 0x11f   : >> { %15606 = vmatprep.subr.bf16.mxu0 %v16373_v24 }
 0x121   : >> { %14601 = vmatpush3.bf16.msra.mxu1 %v16378_v46  ;;  %v3243_v46 = vsel %vm555_vm1, %v3238_v21, %v18276_v27 }
 0x122   : >> { %15607 = vmatpush3.bf16.msra.mxu0 %v16373_v24  ;;  %15614 = vmatprep.subr.bf16.mxu1 %v16380_v11 }
 0x123   : >> { %15608 = vmatprep.subr.bf16.mxu0 %v16376_v34 }
 0x124   : >> { %v14338_v59 = vpop.f32.mrf.mxu1  ;;  %3542 = vmatmul.mubr.bf16.vlgmr.msra.gmra.mxu1 %v3195_v36  ;;  %v16391_v36 = vld [vmem:[%s20975_s1 + $0x218] sm:$0xff]  }
 0x125   : >> { %15615 = vmatpush3.bf16.msra.mxu1 %v16380_v11  ;;  %3549 = vmatprep.mubr.bf16.mxu1 %v3249_v20  ;;  %v16388_v11 = vld [vmem:[%s20975_s1 + $0x220] sm:$0xff]  }
 0x126   : >> { %15609 = vmatpush3.bf16.msra.mxu0 %v16376_v34  ;;  %v14339_v62 = vpop.f32.mrf.mxu1  ;;  %15616 = vmatprep.subr.bf16.mxu1 %v16383_v35 }
 0x127   : >> { %14614 = vmatprep.subr.bf16.mxu0 %v16379_v12  ;;  %v14340_v17 = vadd.f32 %v14339_v62, %v14338_v59  ;;  %v3001_v59 = vld [vmem:[#allocation2 + $0x38] sm:$0xff]  ;;  %v16394_v62 = vld [vmem:[%s20975_s1 + $0x210] sm:$0xff]  }
 0x128   : >> { %v14341_v24 = vpop.f32.mrf.mxu1 }
 0x129   : >> { %v15532_v63 = vpop.f32.mrf.mxu0  ;;  %15611 = vmatmul.mubr.bf16.vlgmr.msra.gmra.mxu0 %v2536_v22  ;;  %15617 = vmatpush3.bf16.msra.mxu1 %v16383_v35  ;;  %v16392_v35 = vld [vmem:[%s20975_s1 + $0x258] sm:$0xff]  }
 0x12a   : >> { %v1022_v28 = vadd.f32 %v15532_v63, %v18185_v6  ;;  %14615 = vmatpush3.bf16.msra.mxu0 %v16381_v14  ;;  %3590 = vmatprep.mubr.bf16.mxu0 %v3231_v61  ;;  %v14342_v34 = vpop.f32.mrf.mxu1  ;;  %v16393_v61 = vld [vmem:[%s20975_s1 + $0x1d8] sm:$0xff]  }
 0x12b   : >> { %v1013_v22 = vpop.f32.mrf.mxu0  ;;  %14616 = vmatprep.subr.bf16.mxu0 %v16382_v15  ;;  %15618 = vmatprep.subr.bf16.mxu1 %v16386_v9  ;;  %v14343_v43 = vadd.f32 %v14342_v34, %v14341_v24  ;;  %v16398_v24 = vld [vmem:[%s20975_s1 + $0x248] sm:$0xff]  }
 0x12c   : >> { %v1014_v33 = vadd.f32 %v1013_v22, %v18160_v19  ;;  %v14344_v30 = vpop.f32.mrf.mxu1  ;;  %3550 = vmatmul.mubr.bf16.gmra.mxu1 %v3246_v29  ;;  %v16399_v34 = vld [vmem:[%s20975_s1 + $0x1c8] sm:$0xff]  }
 0x12d   : >> { %v15533_v6 = vpop.f32.mrf.mxu0  ;;  %15619 = vmatpush3.bf16.msra.mxu1 %v16386_v9  ;;  %15630 = vmatprep.mubr.bf16.mxu1 %v3243_v46  ;;  %v16395_v9 = vld [vmem:[%s20975_s1 + $0x250] sm:$0xff]  }
 0x12e   : >> { %v18293_v42 = vadd.f32 %v14340_v17, %v1014_v33  ;;  %v1025_v23 = vadd.f32 %v15533_v6, %v18199_v58  ;;  %14617 = vmatpush3.bf16.msra.mxu0 %v16384_v52  ;;  %v16390_v58 = vld [vmem:[%s20975_s1 + $0x1e0] sm:$0xff]   ;;  %v14345_v54 = vpop.f32.mrf.mxu1  ;;  %15620 = vmatprep.subr.bf16.mxu1 %v16389_v7  ;;  %v3011_v52 = vld [vmem:[#allocation2 + $0x88] sm:$0xff] }
 0x12f   : >> { %v1016_v19 = vpop.f32.mrf.mxu0  ;;  %14618 = vmatprep.subr.bf16.mxu0 %v16385_v25  ;;  %v3006_v17 = vld [vmem:[#allocation2 + $0x60] sm:$0xff]  ;;  %v16396_v25 = vld [vmem:[%s20975_s1 + $0x1d0] sm:$0xff]   ;;  %v16397_v6 = vld [vmem:[%s20975_s1 + $0x208] sm:$0xff]  }
 0x130   : >> { %v1017_v12 = vadd.f32 %v1016_v19, %v18172_v18  ;;  %v14346_v18 = vadd.f32 %v14345_v54, %v14344_v30  ;;  %v14347_v14 = vpop.f32.mrf.mxu1  ;;  %v18335_v29 = vpack.c.bf16 %v3011_v52, %v3006_v17  ;;  %v3256_v19 = vshrl.u32 %v18236_v31, 16  ;;  %v16402_v30 = vld [vmem:[%s20975_s1 + $0x1c0] sm:$0xff]   ;;  %v16410_v52 = vld [vmem:[%s20975_s1 + $0xb0] sm:$0xff]  }
 0x131   : >> { %15621 = vmatpush3.bf16.msra.mxu1 %v16389_v7  ;;  %v16401_v7 = vld [vmem:[%s20975_s1 + $0x240] sm:$0xff]   ;;  %v3253_v54 = vshrl.u32 %v18210_v8, 16  ;;  %v4651_v17 = vrot.slane %v3223_v51, 2  ;;  %v16409_v51 = vld [vmem:[%s20975_s1 + $0x30] sm:$0xff]  }
 0x132   : >> { %v18312_v20 = vadd.f32 %v14343_v43, %v1017_v12  ;;  %14619 = vmatpush3.bf16.msra.mxu0 %v16387_v56  ;;  %v18314_v15 = vadd.f32 %v14346_v18, %v1022_v28  ;;  %v14348_v63 = vpop.f32.mrf.mxu1  ;;  %15622 = vmatprep.subr.bf16.mxu1 %v16392_v35  ;;  %v18325_v28 = vpack.c.bf16 %v3001_v59, %v2996_v55  ;;  %v3216_v43 = vshll.u32 %v18335_v29, 16  ;;  %v16400_v56 = vld [vmem:[%s20975_s1 + $0x200] sm:$0xff]   ;;  %v16405_v18 = vld [vmem:[%s20975_s1 + $0x38] sm:$0xff]  }
 0x133   : >> { %14620 = vmatprep.subr.bf16.mxu0 %v16388_v11  ;;  %v14349_v21 = vadd.f32 %v14348_v63, %v14347_v14  ;;  %v16404_v11 = vld [vmem:[%s20975_s1 + $0xf8] sm:$0xff]   ;;  %v16407_v14 = vld [vmem:[%s20975_s1 + $0x70] sm:$0xff]   ;;  %v4653_v63 = vrot.slane %v3253_v54, 1 }
 0x134   : >> { %v3211_v33 = vshll.u32 %v18325_v28, 16  ;;  %v3209_v46 = vshrl.u32 %v18325_v28, 16  ;;  %v16406_v55 = vld [vmem:[%s20975_s1 + $0xb8] sm:$0xff]  }
 0x135   : >> { %v18327_v22 = vadd.f32 %v14349_v21, %v1025_v23  ;;  %15623 = vmatpush3.bf16.msra.mxu1 %v16392_v35  ;;  %v16403_v35 = vld [vmem:[%s20975_s1 + $0x78] sm:$0xff]   ;;  %v3250_v21 = vshrl.u32 %v18335_v29, 16 }
 0x136   : >> { %14621 = vmatpush3.bf16.msra.mxu0 %v16390_v58  ;;  %15624 = vmatprep.subr.bf16.mxu1 %v16395_v9  ;;  %v3213_v23 = vrot.slane %v3211_v33, 1  ;;  %v3218_v58 = vrot.slane %v3216_v43, 1 }
 0x137   : >> { %14622 = vmatprep.subr.bf16.mxu0 %v16391_v36  ;;  %v3258_v36 = vor.u32 %v3256_v19, %v18276_v27  ;;  %v16408_v27 = vld [vmem:[%s20975_s1 + $0xf0] sm:$0xff]  }
 0x138   : >> { %v3214_v12 = vor.u32 %v3213_v23, %v3209_v46 }
 0x139   : >> { %15625 = vmatpush3.bf16.msra.mxu1 %v16395_v9 }
 0x13a   : >> { %14623 = vmatpush3.bf16.msra.mxu0 %v16393_v61  ;;  %15626 = vmatprep.subr.bf16.mxu1 %v16398_v24  ;;  %v3219_v59 = vsel %vm555_vm1, %v3214_v12, %v3218_v58  ;;  %v3255_v61 = vor.u32 %v3253_v54, %v18246_v37  ;;  %v4654_v37 = vrot.slane %v3228_v60, 2  ;;  %v16411_v60 = vld [vmem:[%s20975_s1 + $0x68] sm:$0xff]   ;;  %v4644_v54 = vrot.slane %v3211_v33, 2  ;;  %v16415_v33 = vld [vmem:[%s20975_s1 + $0x60] sm:$0xff]  }
 0x13b   : >> { %14624 = vmatprep.subr.bf16.mxu0 %v16394_v62  ;;  %v4650_v62 = vrot.slane %v3221_v39, 1 }
 0x13d   : >> { %15627 = vmatpush3.bf16.msra.mxu1 %v16398_v24 }
 0x13e   : >> { %14625 = vmatpush3.bf16.msra.mxu0 %v16396_v25  ;;  %15628 = vmatprep.subr.bf16.mxu1 %v16401_v7  ;;  %v16412_v25 = vld [vmem:[%s20975_s1 + $0xe8] sm:$0xff]  }
 0x13f   : >> { %14626 = vmatprep.subr.bf16.mxu0 %v16397_v6  ;;  %v4652_v6 = vor.u32 %v4651_v17, %v4650_v62  ;;  %v16420_v17 = vld [vmem:[%s20975_s1 + $0xd8] sm:$0xff]  }
 0x141   : >> { %15629 = vmatpush3.bf16.msra.mxu1 %v16401_v7  ;;  %v18401_v7 = vor.u32 %v4654_v37, %v4653_v63 }
 0x142   : >> { %14627 = vmatpush3.bf16.msra.mxu0 %v16399_v34  ;;  %14680 = vmatprep.subr.bf16.mxu1 %v16404_v11  ;;  %v4646_v34 = vrot.slane %v3250_v21, 1  ;;  %v16414_v11 = vld [vmem:[%s20975_s1 + $0xa8] sm:$0xff]  }
 0x143   : >> { %14628 = vmatprep.subr.bf16.mxu0 %v16400_v56  ;;  %v4643_v56 = vrot.slane %v3209_v46, 1  ;;  %v18411_v12 = vsel %vm2004_vm2, %v4652_v6, %v18401_v7  ;;  %v16416_v46 = vld [vmem:[%s20975_s1 + $0xe0] sm:$0xff]  }
 0x144   : >> { %15631 = vmatmul.mubr.bf16.vlgmr.msra.gmra.mxu1 %v3258_v36  ;;  %v18384_v9 = vpop.f32.mrf.mxu1 }
 0x145   : >> { %14681 = vmatpush3.bf16.msra.mxu1 %v16406_v55  ;;  %3977 = vmatprep.mubr.bf16.mxu1 %v18193_v45  ;;  %v4647_v55 = vrot.slane %v3216_v43, 2 }
 0x146   : >> { %14629 = vmatpush3.bf16.msra.mxu0 %v16402_v30  ;;  %14682 = vmatprep.subr.bf16.mxu1 %v16408_v27  ;;  %v1400_v24 = vpop.f32.mrf.mxu1  ;;  %v16413_v27 = vld [vmem:[%s20975_s1 + $0x28] sm:$0xff]  }
 0x147   : >> { %14652 = vmatprep.subr.bf16.mxu0 %v16403_v35 }
 0x148   : >> { %v15553_v35 = vpop.f32.mrf.mxu1 }
 0x149   : >> { %v14366_v39 = vpop.f32.mrf.mxu0  ;;  %3591 = vmatmul.mubr.bf16.vlgmr.msra.gmra.mxu0 %v3219_v59  ;;  %14683 = vmatpush3.bf16.msra.mxu1 %v16410_v52  ;;  %v4645_v59 = vor.u32 %v4644_v54, %v4643_v56  ;;  %v16421_v56 = vld [vmem:[%s20975_s1 + $0x18] sm:$0xff]  }
 0x14a   : >> { %14653 = vmatpush3.bf16.msra.mxu0 %v16405_v18  ;;  %3598 = vmatprep.mubr.bf16.mxu0 %v3255_v61  ;;  %v3252_v18 = vor.u32 %v3250_v21, %v3218_v58  ;;  %v18425_v58 = vor.u32 %v4647_v55, %v4646_v34  ;;  %v1403_v21 = vpop.f32.mrf.mxu1  ;;  %v16425_v55 = vld [vmem:[%s20975_s1 + $0x10] sm:$0xff]  }
 0x14b   : >> { %v14367_v23 = vpop.f32.mrf.mxu0  ;;  %14654 = vmatprep.subr.bf16.mxu0 %v16407_v14  ;;  %14684 = vmatprep.subr.bf16.mxu1 %v16412_v25  ;;  %v16419_v25 = vld [vmem:[%s20975_s1 + $0x58] sm:$0xff]  }
 0x14c   : >> { %v14368_v30 = vadd.f32 %v14367_v23, %v14366_v39  ;;  %v18437_v52 = vsel %vm2004_vm2, %v4645_v59, %v18425_v58  ;;  %v16417_v39 = vld [vmem:[%s20975_s1 + $0x20] sm:$0xff]   ;;  %v16424_v23 = vld [vmem:[%s20975_s1 + $0xd0] sm:$0xff]   ;;  %v16429_v59 = vld [vmem:[%s20975_s1 + $0x8] sm:$0xff]  }
 0x14d   : >> { %v14369_v36 = vpop.f32.mrf.mxu0  ;;  %14685 = vmatpush3.bf16.msra.mxu1 %v16414_v11  ;;  %v16423_v11 = vld [vmem:[%s20975_s1 + $0x50] sm:$0xff]  }
 0x14e   : >> { %14655 = vmatpush3.bf16.msra.mxu0 %v16409_v51  ;;  %v1352_v14 = vadd.f32 %v14368_v30, %v18293_v42  ;;  %v16418_v42 = vld [vmem:[%s20975_s1 + $0xa0] sm:$0xff]   ;;  %14686 = vmatprep.subr.bf16.mxu1 %v16416_v46 }
 0x14f   : >> { %v14370_v61 = vpop.f32.mrf.mxu0  ;;  %14656 = vmatprep.subr.bf16.mxu0 %v16411_v60 }
 0x150   : >> { %v14371_v63 = vadd.f32 %v14370_v61, %v14369_v36  ;;  %v18427_v62 = vadd.f32 %v1400_v24, %v1352_v14  ;;  %v16426_v36 = vld [vmem:[%s20975_s1 + $0x90] sm:$0xff]   ;;  %v16427_v14 = vld [vmem:[%s20975_s1 + $0x48] sm:$0xff]   ;;  %v16431_v61 = vld [vmem:[%s20975_s1 + $0x40] sm:$0xff]  }
 0x151   : >> { %v14372_v43 = vpop.f32.mrf.mxu0  ;;  %3599 = vmatmul.mubr.bf16.gmra.mxu0 %v3252_v18  ;;  %14687 = vmatpush3.bf16.msra.mxu1 %v16418_v42  ;;  %v16435_v42 = vld [vmem:[%s20975_s1 + $0x138] sm:$0xff]  }
 0x152   : >> { %14657 = vmatpush3.bf16.msra.mxu0 %v16413_v27  ;;  %v1355_v37 = vadd.f32 %v14371_v63, %v18312_v20  ;;  %3928 = vmatprep.mubr.bf16.mxu0 %v18072_v57  ;;  %v16422_v20 = vld [vmem:[%s20975_s1 + $0x98] sm:$0xff]   ;;  %v16433_v63 = vld [vmem:[%s20975_s1] sm:$0xff]  }
 0x153   : >> { %v14373_v24 = vpop.f32.mrf.mxu0  ;;  %14658 = vmatprep.subr.bf16.mxu0 %v16415_v33  ;;  %14688 = vmatprep.subr.bf16.mxu1 %v16420_v17  ;;  %v16436_v33 = vld [vmem:[%s20975_s1 + $0x2f8] sm:$0xff]  }
 0x154   : >> { %v14374_v6 = vadd.f32 %v14373_v24, %v14372_v43  ;;  %v18447_v51 = vadd.f32 %v1403_v21, %v1355_v37  ;;  %v16437_v43 = vld [vmem:[%s20975_s1 + $0x2b8] sm:$0xff]   ;;  %v16439_v21 = vld [vmem:[%s20975_s1 + $0x2f0] sm:$0xff]   ;;  %v4136_v24 = vrot.slane %v18072_v57, 1 }
 0x155   : >> { %v14375_v34 = vpop.f32.mrf.mxu0  ;;  %14689 = vmatpush3.bf16.msra.mxu1 %v16422_v20  ;;  %v16438_v37 = vld [vmem:[%s20975_s1 + $0x130] sm:$0xff]   ;;  %v16442_v20 = vld [vmem:[%s20975_s1 + $0x2e8] sm:$0xff]  }
 0x156   : >> { %v1360_v60 = vadd.f32 %v14374_v6, %v18314_v15  ;;  %14659 = vmatpush3.bf16.msra.mxu0 %v16417_v39  ;;  %14690 = vmatprep.subr.bf16.mxu1 %v16424_v23  ;;  %v16428_v15 = vld [vmem:[%s20975_s1 + $0xc8] sm:$0xff]   ;;  %v16440_v39 = vld [vmem:[%s20975_s1 + $0x2b0] sm:$0xff]  }
 0x157   : >> { %v14376_v30 = vpop.f32.mrf.mxu0  ;;  %14660 = vmatprep.subr.bf16.mxu0 %v16419_v25 }
 0x158   : >> { %v14377_v54 = vadd.f32 %v14376_v30, %v14375_v34  ;;  %v18466_v18 = vadd.f32 %v18384_v9, %v1360_v60  ;;  %v16430_v9 = vld [vmem:[%s20975_s1 + $0x88] sm:$0xff]   ;;  %v4137_v34 = vrot.slane %v18086_v41, 1 }
 0x159   : >> { %14691 = vmatpush3.bf16.msra.mxu1 %v16426_v36  ;;  %v16441_v30 = vld [vmem:[%s20975_s1 + $0x128] sm:$0xff]  }
 0x15a   : >> { %v1363_v46 = vadd.f32 %v14377_v54, %v18327_v22  ;;  %14661 = vmatpush3.bf16.msra.mxu0 %v16421_v56  ;;  %14692 = vmatprep.subr.bf16.mxu1 %v16428_v15  ;;  %v16432_v22 = vld [vmem:[%s20975_s1 + $0xc0] sm:$0xff]   ;;  %v16443_v54 = vld [vmem:[%s20975_s1 + $0x2a8] sm:$0xff]  }
 0x15b   : >> { %14662 = vmatprep.subr.bf16.mxu0 %v16423_v11 }
 0x15c   : >> { %v18481_v27 = vadd.f32 %v15553_v35, %v1363_v46  ;;  %v16434_v35 = vld [vmem:[%s20975_s1 + $0x80] sm:$0xff]  }
 0x15d   : >> { %14693 = vmatpush3.bf16.msra.mxu1 %v16430_v9  ;;  %v16445_v46 = vld [vmem:[%s20975_s1 + $0x2e0] sm:$0xff]  }
 0x15e   : >> { %14663 = vmatpush3.bf16.msra.mxu0 %v16425_v55  ;;  %14694 = vmatprep.subr.bf16.mxu1 %v16432_v22  ;;  %v4138_v55 = vsel %vm1506_vm3, %v4136_v24, %v4137_v34 }
 0x15f   : >> { %14664 = vmatprep.subr.bf16.mxu0 %v16427_v14 }
 0x161   : >> { %14695 = vmatpush3.bf16.msra.mxu1 %v16434_v35 }
 0x162   : >> { %14665 = vmatpush3.bf16.msra.mxu0 %v16429_v59  ;;  %14718 = vmatprep.subr.bf16.mxu1 %v16436_v33  ;;  %v16444_v59 = vld [vmem:[%s20975_s1 + $0x120] sm:$0xff]  }
 0x163   : >> { %14666 = vmatprep.subr.bf16.mxu0 %v16431_v61  ;;  %v16446_v33 = vld [vmem:[%s20975_s1 + $0x2a0] sm:$0xff]  }
 0x164   : >> { %v14432_v17 = vpop.f32.mrf.mxu1  ;;  %3978 = vmatmul.mubr.bf16.vlgmr.msra.gmra.mxu1 %v18325_v28 }
 0x165   : >> { %14719 = vmatpush3.bf16.msra.mxu1 %v16437_v43  ;;  %3985 = vmatprep.mubr.bf16.mxu1 %v18210_v8 }
 0x166   : >> { %14667 = vmatpush3.bf16.msra.mxu0 %v16433_v63  ;;  %v14433_v6 = vpop.f32.mrf.mxu1  ;;  %14720 = vmatprep.subr.bf16.mxu1 %v16439_v21  ;;  %v16448_v63 = vld [vmem:[%s20975_s1 + $0x2d8] sm:$0xff]  }
 0x167   : >> { %15634 = vmatprep.subr.bf16.mxu0 %v16435_v42  ;;  %v14434_v23 = vadd.f32 %v14433_v6, %v14432_v17 }
 0x168   : >> { %v14435_v56 = vpop.f32.mrf.mxu1 }
 0x169   : >> { %v14404_v25 = vpop.f32.mrf.mxu0  ;;  %3929 = vmatmul.mubr.bf16.vlgmr.msra.gmra.mxu0 %v18180_v13  ;;  %14721 = vmatpush3.bf16.msra.mxu1 %v16440_v39 }
 0x16a   : >> { %15635 = vmatpush3.bf16.msra.mxu0 %v16435_v42  ;;  %3936 = vmatprep.mubr.bf16.mxu0 %v18086_v41  ;;  %v14436_v15 = vpop.f32.mrf.mxu1 }
 0x16b   : >> { %v14405_v60 = vpop.f32.mrf.mxu0  ;;  %15636 = vmatprep.subr.bf16.mxu0 %v16438_v37  ;;  %14722 = vmatprep.subr.bf16.mxu1 %v16442_v20  ;;  %v14437_v14 = vadd.f32 %v14436_v15, %v14435_v56  ;;  %v16451_v20 = vld [vmem:[%s20975_s1 + $0x2d0] sm:$0xff]  }
 0x16c   : >> { %v14406_v11 = vadd.f32 %v14405_v60, %v14404_v25  ;;  %3986 = vmatmul.mubr.bf16.gmra.mxu1 %v18335_v29  ;;  %v14438_v61 = vpop.f32.mrf.mxu1  ;;  %v16449_v25 = vld [vmem:[%s20975_s1 + $0x298] sm:$0xff]  }
 0x16d   : >> { %v14407_v36 = vpop.f32.mrf.mxu0  ;;  %14723 = vmatpush3.bf16.msra.mxu1 %v16443_v54  ;;  %4430 = vmatprep.mubr.bf16.mxu1 %v4138_v55 }
 0x16e   : >> { %15637 = vmatpush3.bf16.msra.mxu0 %v16438_v37  ;;  %v18537_v9 = vadd.f32 %v14434_v23, %v14406_v11  ;;  %14724 = vmatprep.subr.bf16.mxu1 %v16445_v46  ;;  %v14439_v43 = vpop.f32.mrf.mxu1  ;;  %v16447_v37 = vld [vmem:[%s20975_s1 + $0x118] sm:$0xff]   ;;  %v16450_v11 = vld [vmem:[%s20975_s1 + $0x110] sm:$0xff]   ;;  %v16454_v46 = vld [vmem:[%s20975_s1 + $0x2c8] sm:$0xff]  }
 0x16f   : >> { %v14408_v22 = vpop.f32.mrf.mxu0  ;;  %15638 = vmatprep.subr.bf16.mxu0 %v16441_v30  ;;  %v14440_v21 = vadd.f32 %v14439_v43, %v14438_v61  ;;  %v16456_v61 = vld [vmem:[%s20975_s1 + $0x100] sm:$0xff]   ;;  %v4142_v43 = vrot.slane %v18193_v45, 1 }
 0x170   : >> { %v14409_v35 = vadd.f32 %v14408_v22, %v14407_v36  ;;  %v14441_v24 = vpop.f32.mrf.mxu1  ;;  %v16452_v36 = vld [vmem:[%s20975_s1 + $0x290] sm:$0xff]   ;;  %v16455_v22 = vld [vmem:[%s20975_s1 + $0x288] sm:$0xff]  }
 0x171   : >> { %3937 = vmatmul.mubr.bf16.gmra.mxu0 %v18088_v26  ;;  %v14410_v42 = vpop.f32.mrf.mxu0  ;;  %14725 = vmatpush3.bf16.msra.mxu1 %v16446_v33  ;;  %v16458_v33 = vld [vmem:[%s20975_s1 + $0x280] sm:$0xff]  }
 0x172   : >> { %15639 = vmatpush3.bf16.msra.mxu0 %v16441_v30  ;;  %15650 = vmatprep.mubr.bf16.mxu0 %v18219_v38  ;;  %v18551_v17 = vadd.f32 %v14437_v14, %v14409_v35  ;;  %v14442_v60 = vpop.f32.mrf.mxu1  ;;  %v16453_v14 = vld [vmem:[%s20975_s1 + $0x108] sm:$0xff]   ;;  %v4133_v35 = vrot.slane %v18180_v13, 1 }
 0x173   : >> { %15640 = vmatprep.subr.bf16.mxu0 %v16444_v59  ;;  %v14411_v39 = vpop.f32.mrf.mxu0  ;;  %14726 = vmatprep.subr.bf16.mxu1 %v16448_v63  ;;  %v14443_v56 = vadd.f32 %v14442_v60, %v14441_v24  ;;  %v4134_v63 = vrot.slane %v18088_v26, 1  ;;  %v16463_v24 = vld [vmem:[%s20975_s1 + $0x3b0] sm:$0xff]   ;;  %v4145_v60 = vrot.slane %v18219_v38, 1 }
 0x174   : >> { %v14412_v6 = vadd.f32 %v14411_v39, %v14410_v42  ;;  %v16460_v42 = vld [vmem:[%s20975_s1 + $0x3b8] sm:$0xff]  }
 0x175   : >> { %v14413_v23 = vpop.f32.mrf.mxu0  ;;  %14727 = vmatpush3.bf16.msra.mxu1 %v16449_v25  ;;  %v4135_v39 = vsel %vm1506_vm3, %v4133_v35, %v4134_v63  ;;  %v16461_v25 = vld [vmem:[%s20975_s1 + $0x338] sm:$0xff]  }
 0x176   : >> { %15641 = vmatpush3.bf16.msra.mxu0 %v16444_v59  ;;  %v1864_v30 = vadd.f32 %v14440_v21, %v14412_v6  ;;  %14728 = vmatprep.subr.bf16.mxu1 %v16451_v20  ;;  %v16457_v59 = vld [vmem:[%s20975_s1 + $0x2c0] sm:$0xff]   ;;  %v16459_v21 = vld [vmem:[%s20975_s1 + $0x378] sm:$0xff]   ;;  %v16462_v6 = vld [vmem:[%s20975_s1 + $0x370] sm:$0xff]  }
 0x177   : >> { %15642 = vmatprep.subr.bf16.mxu0 %v16447_v37  ;;  %v14414_v54 = vpop.f32.mrf.mxu0 }
 0x178   : >> { %v14415_v15 = vadd.f32 %v14414_v54, %v14413_v23 }
 0x179   : >> { %14729 = vmatpush3.bf16.msra.mxu1 %v16452_v36  ;;  %v4146_v36 = vrot.slane %v18236_v31, 1 }
 0x17a   : >> { %15643 = vmatpush3.bf16.msra.mxu0 %v16447_v37  ;;  %v1867_v55 = vadd.f32 %v14443_v56, %v14415_v15  ;;  %14730 = vmatprep.subr.bf16.mxu1 %v16454_v46  ;;  %v4143_v37 = vrot.slane %v18210_v8, 1  ;;  %v16464_v46 = vld [vmem:[%s20975_s1 + $0x330] sm:$0xff]  }
 0x17b   : >> { %15644 = vmatprep.subr.bf16.mxu0 %v16450_v11 }
 0x17c   : >> { %v4144_v23 = vsel %vm1506_vm3, %v4142_v43, %v4143_v37  ;;  %v4147_v43 = vsel %vm1506_vm3, %v4145_v60, %v4146_v36 }
 0x17d   : >> { %14731 = vmatpush3.bf16.msra.mxu1 %v16455_v22  ;;  %v16465_v22 = vld [vmem:[%s20975_s1 + $0x368] sm:$0xff]  }
 0x17e   : >> { %15645 = vmatpush3.bf16.msra.mxu0 %v16450_v11  ;;  %14732 = vmatprep.subr.bf16.mxu1 %v16457_v59  ;;  %v16466_v11 = vld [vmem:[%s20975_s1 + $0x3a8] sm:$0xff]  }
 0x17f   : >> { %15646 = vmatprep.subr.bf16.mxu0 %v16453_v14 }
 0x181   : >> { %14733 = vmatpush3.bf16.msra.mxu1 %v16458_v33  ;;  %v16469_v33 = vld [vmem:[%s20975_s1 + $0x3a0] sm:$0xff]  }
 0x182   : >> { %15647 = vmatpush3.bf16.msra.mxu0 %v16453_v14  ;;  %15654 = vmatprep.subr.bf16.mxu1 %v16460_v42 }
 0x183   : >> { %15648 = vmatprep.subr.bf16.mxu0 %v16456_v61 }
 0x184   : >> { %4431 = vmatmul.mubr.bf16.vlgmr.msra.gmra.mxu1 %v4135_v39  ;;  %v14470_v20 = vpop.f32.mrf.mxu1 }
 0x185   : >> { %15655 = vmatpush3.bf16.msra.mxu1 %v16460_v42  ;;  %4438 = vmatprep.mubr.bf16.mxu1 %v4137_v34 }
 0x186   : >> { %15649 = vmatpush3.bf16.msra.mxu0 %v16456_v61  ;;  %15656 = vmatprep.subr.bf16.mxu1 %v16463_v24  ;;  %v14471_v54 = vpop.f32.mrf.mxu1 }
 0x187   : >> { %14746 = vmatprep.subr.bf16.mxu0 %v16459_v21  ;;  %v18620_v34 = vadd.f32 %v14471_v54, %v14470_v20  ;;  %v16473_v54 = vld [vmem:[%s20975_s1 + $0x318] sm:$0xff]  }
 0x188   : >> { %v14473_v59 = vpop.f32.mrf.mxu1 }
 0x189   : >> { %v15572_v56 = vpop.f32.mrf.mxu0  ;;  %15651 = vmatmul.mubr.bf16.vlgmr.msra.gmra.mxu0 %v18236_v31  ;;  %15657 = vmatpush3.bf16.msra.mxu1 %v16463_v24 }
 0x18a   : >> { %v1913_v15 = vadd.f32 %v15572_v56, %v1864_v30  ;;  %14747 = vmatpush3.bf16.msra.mxu0 %v16461_v25  ;;  %4479 = vmatprep.mubr.bf16.mxu0 %v4144_v23  ;;  %v14474_v42 = vpop.f32.mrf.mxu1  ;;  %v16468_v25 = vld [vmem:[%s20975_s1 + $0x360] sm:$0xff]  }
 0x18b   : >> { %v1904_v14 = vpop.f32.mrf.mxu0  ;;  %14748 = vmatprep.subr.bf16.mxu0 %v16462_v6  ;;  %15658 = vmatprep.subr.bf16.mxu1 %v16466_v11 }
 0x18c   : >> { %v18626_v61 = vadd.f32 %v1913_v15, %v18466_v18  ;;  %v1905_v30 = vadd.f32 %v1904_v14, %v18537_v9  ;;  %v16467_v18 = vld [vmem:[%s20975_s1 + $0x328] sm:$0xff]   ;;  %v18641_v9 = vadd.f32 %v14474_v42, %v14473_v59  ;;  %4439 = vmatmul.mubr.bf16.gmra.mxu1 %v4134_v63  ;;  %v14476_v6 = vpop.f32.mrf.mxu1  ;;  %v16470_v63 = vld [vmem:[%s20975_s1 + $0x320] sm:$0xff]   ;;  %v4139_v42 = vrot.slane %v18325_v28, 1 }
 0x18d   : >> { %v15573_v35 = vpop.f32.mrf.mxu0  ;;  %15659 = vmatpush3.bf16.msra.mxu1 %v16466_v11  ;;  %15670 = vmatprep.mubr.bf16.mxu1 %v4147_v43  ;;  %v16478_v14 = vld [vmem:[%s20975_s1 + $0x388] sm:$0xff]   ;;  %v16484_v43 = vld [vmem:[%s20975_s1 + $0x4b8] sm:$0xff]  }
 0x18e   : >> { %v18636_v21 = vadd.f32 %v1905_v30, %v18427_v62  ;;  %v1916_v39 = vadd.f32 %v15573_v35, %v1867_v55  ;;  %14749 = vmatpush3.bf16.msra.mxu0 %v16464_v46  ;;  %15660 = vmatprep.subr.bf16.mxu1 %v16469_v33  ;;  %v16472_v55 = vld [vmem:[%s20975_s1 + $0x398] sm:$0xff]   ;;  %v14477_v23 = vpop.f32.mrf.mxu1  ;;  %v16474_v46 = vld [vmem:[%s20975_s1 + $0x350] sm:$0xff]   ;;  %v16477_v59 = vld [vmem:[%s20975_s1 + $0x348] sm:$0xff]  }
 0x18f   : >> { %v1907_v24 = vpop.f32.mrf.mxu0  ;;  %14750 = vmatprep.subr.bf16.mxu0 %v16465_v22  ;;  %v16476_v22 = vld [vmem:[%s20975_s1 + $0x310] sm:$0xff]   ;;  %v16481_v30 = vld [vmem:[%s20975_s1 + $0x380] sm:$0xff]   ;;  %v16479_v35 = vld [vmem:[%s20975_s1 + $0x308] sm:$0xff]  }
 0x190   : >> { %v18647_v20 = vadd.f32 %v1916_v39, %v18481_v27  ;;  %v1908_v62 = vadd.f32 %v1907_v24, %v18551_v17  ;;  %v18659_v27 = vadd.f32 %v14477_v23, %v14476_v6  ;;  %v16471_v17 = vld [vmem:[%s20975_s1 + $0x358] sm:$0xff]   ;;  %v14479_v56 = vpop.f32.mrf.mxu1  ;;  %v16482_v39 = vld [vmem:[%s20975_s1 + $0x300] sm:$0xff]  }
 0x191   : >> { %15661 = vmatpush3.bf16.msra.mxu1 %v16469_v33  ;;  %v16480_v33 = vld [vmem:[%s20975_s1 + $0x340] sm:$0xff]   ;;  %v16483_v24 = vld [vmem:[%s20975_s1 + $0x438] sm:$0xff]  }
 0x192   : >> { %v18654_v60 = vadd.f32 %v1908_v62, %v18447_v51  ;;  %14751 = vmatpush3.bf16.msra.mxu0 %v16467_v18  ;;  %15662 = vmatprep.subr.bf16.mxu1 %v16472_v55  ;;  %v16475_v51 = vld [vmem:[%s20975_s1 + $0x390] sm:$0xff]   ;;  %v14480_v11 = vpop.f32.mrf.mxu1  ;;  %v4140_v18 = vrot.slane %v18335_v29, 1  ;;  %v16486_v6 = vld [vmem:[%s20975_s1 + $0x478] sm:$0xff]  }
 0x193   : >> { %14752 = vmatprep.subr.bf16.mxu0 %v16468_v25  ;;  %v18670_v15 = vadd.f32 %v14480_v11, %v14479_v56  ;;  %v4639_v25 = vrot.slane %v3247_v44, 1  ;;  %v16488_v62 = vld [vmem:[%s20975_s1 + $0x4b0] sm:$0xff]   ;;  %v16485_v44 = vld [vmem:[%s20975_s1 + $0x3f8] sm:$0xff]   ;;  %v4640_v56 = vrot.slane %v3204_v50, 2  ;;  %v16492_v11 = vld [vmem:[%s20975_s1 + $0x4a8] sm:$0xff]  }
 0x194   : >> { %v4141_v23 = vsel %vm1506_vm3, %v4139_v42, %v4140_v18  ;;  %v16489_v50 = vld [vmem:[%s20975_s1 + $0x3f0] sm:$0xff]   ;;  %v16493_v42 = vld [vmem:[%s20975_s1 + $0x3e8] sm:$0xff]  }
 0x195   : >> { %15663 = vmatpush3.bf16.msra.mxu1 %v16472_v55  ;;  %v4636_v55 = vrot.slane %v3197_v49, 1  ;;  %v16487_v49 = vld [vmem:[%s20975_s1 + $0x430] sm:$0xff]  }
 0x196   : >> { %14753 = vmatpush3.bf16.msra.mxu0 %v16470_v63  ;;  %15664 = vmatprep.subr.bf16.mxu1 %v16475_v51  ;;  %v4637_v63 = vrot.slane %v3199_v48, 2 }
 0x197   : >> { %14754 = vmatprep.subr.bf16.mxu0 %v16471_v17 }
 0x199   : >> { %15665 = vmatpush3.bf16.msra.mxu1 %v16475_v51  ;;  %v16490_v51 = vld [vmem:[%s20975_s1 + $0x470] sm:$0xff]  }
 0x19a   : >> { %14755 = vmatpush3.bf16.msra.mxu0 %v16473_v54  ;;  %15666 = vmatprep.subr.bf16.mxu1 %v16478_v14 }
 0x19b   : >> { %14756 = vmatprep.subr.bf16.mxu0 %v16474_v46  ;;  %v4638_v46 = vor.u32 %v4637_v63, %v4636_v55 }
 0x19d   : >> { %15667 = vmatpush3.bf16.msra.mxu1 %v16478_v14  ;;  %v18744_v14 = vor.u32 %v4640_v56, %v4639_v25 }
 0x19e   : >> { %14757 = vmatpush3.bf16.msra.mxu0 %v16476_v22  ;;  %15668 = vmatprep.subr.bf16.mxu1 %v16481_v30 }
 0x19f   : >> { %14758 = vmatprep.subr.bf16.mxu0 %v16477_v59  ;;  %v16494_v59 = vld [vmem:[%s20975_s1 + $0x468] sm:$0xff]  }
 0x1a1   : >> { %15669 = vmatpush3.bf16.msra.mxu1 %v16481_v30 }
 0x1a2   : >> { %14759 = vmatpush3.bf16.msra.mxu0 %v16479_v35  ;;  %14812 = vmatprep.subr.bf16.mxu1 %v16484_v43 }
 0x1a3   : >> { %14760 = vmatprep.subr.bf16.mxu0 %v16480_v33 }
 0x1a4   : >> { %15671 = vmatmul.mubr.bf16.vlgmr.msra.gmra.mxu1 %v4146_v36  ;;  %v18722_v17 = vpop.f32.mrf.mxu1 }
 0x1a5   : >> { %14813 = vmatpush3.bf16.msra.mxu1 %v16486_v6  ;;  %4995 = vmatprep.mubr.bf16.mxu1 %v18411_v12  ;;  %v16491_v12 = vld [vmem:[%s20975_s1 + $0x428] sm:$0xff]  }
 0x1a6   : >> { %14761 = vmatpush3.bf16.msra.mxu0 %v16482_v39  ;;  %14814 = vmatprep.subr.bf16.mxu1 %v16488_v62  ;;  %v2422_v36 = vpop.f32.mrf.mxu1  ;;  %v16495_v39 = vld [vmem:[%s20975_s1 + $0x420] sm:$0xff]  }
 0x1a7   : >> { %14784 = vmatprep.subr.bf16.mxu0 %v16483_v24  ;;  %v4642_v24 = vsel %vm2004_vm2, %v4638_v46, %v18744_v14  ;;  %v16503_v46 = vld [vmem:[%s20975_s1 + $0x410] sm:$0xff]  }
 0x1a8   : >> { %v15593_v35 = vpop.f32.mrf.mxu1 }
 0x1a9   : >> { %v14498_v48 = vpop.f32.mrf.mxu0  ;;  %4480 = vmatmul.mubr.bf16.vlgmr.msra.gmra.mxu0 %v4141_v23  ;;  %14815 = vmatpush3.bf16.msra.mxu1 %v16490_v51  ;;  %v16500_v23 = vld [vmem:[%s20975_s1 + $0x498] sm:$0xff]  }
 0x1aa   : >> { %14785 = vmatpush3.bf16.msra.mxu0 %v16485_v44  ;;  %4487 = vmatprep.mubr.bf16.mxu0 %v4143_v37  ;;  %v16496_v37 = vld [vmem:[%s20975_s1 + $0x4a0] sm:$0xff]   ;;  %v2425_v55 = vpop.f32.mrf.mxu1 }
 0x1ab   : >> { %v14499_v54 = vpop.f32.mrf.mxu0  ;;  %14786 = vmatprep.subr.bf16.mxu0 %v16487_v49  ;;  %14816 = vmatprep.subr.bf16.mxu1 %v16492_v11  ;;  %v16497_v49 = vld [vmem:[%s20975_s1 + $0x3e0] sm:$0xff]  }
 0x1ac   : >> { %v14500_v22 = vadd.f32 %v14499_v54, %v14498_v48  ;;  %v16501_v54 = vld [vmem:[%s20975_s1 + $0x3d8] sm:$0xff]  }
 0x1ad   : >> { %v14501_v30 = vpop.f32.mrf.mxu0  ;;  %14817 = vmatpush3.bf16.msra.mxu1 %v16494_v59 }
 0x1ae   : >> { %14787 = vmatpush3.bf16.msra.mxu0 %v16489_v50  ;;  %v2374_v33 = vadd.f32 %v14500_v22, %v18620_v34  ;;  %v16498_v34 = vld [vmem:[%s20975_s1 + $0x460] sm:$0xff]   ;;  %14818 = vmatprep.subr.bf16.mxu1 %v16496_v37  ;;  %v16505_v37 = vld [vmem:[%s20975_s1 + $0x3d0] sm:$0xff]  }
 0x1af   : >> { %v14502_v43 = vpop.f32.mrf.mxu0  ;;  %14788 = vmatprep.subr.bf16.mxu0 %v16491_v12 }
 0x1b0   : >> { %v14503_v25 = vadd.f32 %v14502_v43, %v14501_v30  ;;  %v2423_v6 = vadd.f32 %v2422_v36, %v2374_v33  ;;  %v16507_v33 = vld [vmem:[%s20975_s1 + $0x408] sm:$0xff]  }
 0x1b1   : >> { %v14504_v62 = vpop.f32.mrf.mxu0  ;;  %4488 = vmatmul.mubr.bf16.gmra.mxu0 %v4140_v18  ;;  %v16499_v18 = vld [vmem:[%s20975_s1 + $0x418] sm:$0xff]   ;;  %14819 = vmatpush3.bf16.msra.mxu1 %v16498_v34  ;;  %v16510_v43 = vld [vmem:[%s20975_s1 + $0x448] sm:$0xff]  }
 0x1b2   : >> { %v18768_v44 = vadd.f32 %v2423_v6, %v18636_v21  ;;  %14789 = vmatpush3.bf16.msra.mxu0 %v16493_v42  ;;  %v2377_v63 = vadd.f32 %v14503_v25, %v18641_v9  ;;  %4946 = vmatprep.mubr.bf16.mxu0 %v4642_v24  ;;  %v16502_v21 = vld [vmem:[%s20975_s1 + $0x458] sm:$0xff]   ;;  %v16504_v9 = vld [vmem:[%s20975_s1 + $0x490] sm:$0xff]   ;;  %v16511_v25 = vld [vmem:[%s20975_s1 + $0x400] sm:$0xff]  }
 0x1b3   : >> { %v14505_v56 = vpop.f32.mrf.mxu0  ;;  %14790 = vmatprep.subr.bf16.mxu0 %v16495_v39  ;;  %14820 = vmatprep.subr.bf16.mxu1 %v16500_v23  ;;  %v4629_v39 = vrot.slane %v3185_v53, 1  ;;  %v16514_v6 = vld [vmem:[%s20975_s1 + $0x440] sm:$0xff]   ;;  %v16517_v53 = vld [vmem:[%s20975_s1 + $0x578] sm:$0xff]  }
 0x1b4   : >> { %v14506_v51 = vadd.f32 %v14505_v56, %v14504_v62  ;;  %v2426_v48 = vadd.f32 %v2425_v55, %v2377_v63  ;;  %v16515_v34 = vld [vmem:[%s20975_s1 + $0x4f8] sm:$0xff]   ;;  %v16520_v55 = vld [vmem:[%s20975_s1 + $0x570] sm:$0xff]   ;;  %v4657_v56 = vrot.slane %v3233_v47, 1  ;;  %v5148_v47 = vrot.slane %v18072_v57, 2  ;;  %v16524_v57 = vld [vmem:[%s20975_s1 + $0x528] sm:$0xff]  }
 0x1b5   : >> { %v14507_v36 = vpop.f32.mrf.mxu0  ;;  %14821 = vmatpush3.bf16.msra.mxu1 %v16502_v21  ;;  %v16518_v62 = vld [vmem:[%s20975_s1 + $0x538] sm:$0xff]  }
 0x1b6   : >> { %v2382_v11 = vadd.f32 %v14506_v51, %v18659_v27  ;;  %v18785_v50 = vadd.f32 %v2426_v48, %v18654_v60  ;;  %14791 = vmatpush3.bf16.msra.mxu0 %v16497_v49  ;;  %v16506_v60 = vld [vmem:[%s20975_s1 + $0x450] sm:$0xff]   ;;  %14822 = vmatprep.subr.bf16.mxu1 %v16504_v9  ;;  %v16508_v27 = vld [vmem:[%s20975_s1 + $0x488] sm:$0xff]   ;;  %v4660_v51 = vrot.slane %v3256_v19, 1  ;;  %v4661_v48 = vrot.slane %v3240_v40, 2 }
 0x1b7   : >> { %v14508_v12 = vpop.f32.mrf.mxu0  ;;  %14792 = vmatprep.subr.bf16.mxu0 %v16499_v18  ;;  %v16516_v49 = vld [vmem:[%s20975_s1 + $0x4f0] sm:$0xff]   ;;  %v4658_v18 = vrot.slane %v3235_v32, 2  ;;  %v16523_v32 = vld [vmem:[%s20975_s1 + $0x568] sm:$0xff]   ;;  %v5149_v19 = vrot.slane %v18086_v41, 2 }
 0x1b8   : >> { %v2431_v22 = vadd.f32 %v18722_v17, %v2382_v11  ;;  %v14509_v59 = vadd.f32 %v14508_v12, %v14507_v36  ;;  %v18874_v12 = vor.u32 %v4661_v48, %v4660_v51  ;;  %v16533_v48 = vld [vmem:[%s20975_s1 + $0x510] sm:$0xff]  }
 0x1b9   : >> { %14823 = vmatpush3.bf16.msra.mxu1 %v16506_v60  ;;  %v5150_v60 = vsel %vm2522_vm4, %v5148_v47, %v5149_v19  ;;  %v16537_v47 = vld [vmem:[%s20975_s1 + $0x540] sm:$0xff]   ;;  %v16543_v41 = vld [vmem:[%s20975_s1 + $0x5b0] sm:$0xff]  }
 0x1ba   : >> { %v2385_v30 = vadd.f32 %v14509_v59, %v18670_v15  ;;  %14793 = vmatpush3.bf16.msra.mxu0 %v16501_v54  ;;  %v18805_v17 = vadd.f32 %v2431_v22, %v18626_v61  ;;  %14824 = vmatprep.subr.bf16.mxu1 %v16508_v27  ;;  %v16512_v15 = vld [vmem:[%s20975_s1 + $0x480] sm:$0xff]   ;;  %v16509_v61 = vld [vmem:[%s20975_s1 + $0x3c8] sm:$0xff]   ;;  %v4659_v54 = vor.u32 %v4658_v18, %v4657_v56  ;;  %v16528_v56 = vld [vmem:[%s20975_s1 + $0x4d0] sm:$0xff]  }
 0x1bb   : >> { %14794 = vmatprep.subr.bf16.mxu0 %v16503_v46 }
 0x1bc   : >> { %v2434_v42 = vadd.f32 %v15593_v35, %v2385_v30  ;;  %v4630_v35 = vrot.slane %v3187_v10, 2  ;;  %v16513_v10 = vld [vmem:[%s20975_s1 + $0x3c0] sm:$0xff]  }
 0x1bd   : >> { %14825 = vmatpush3.bf16.msra.mxu1 %v16510_v43  ;;  %v4663_v43 = vsel %vm2004_vm2, %v4659_v54, %v18874_v12  ;;  %v16542_v54 = vld [vmem:[%s20975_s1 + $0x638] sm:$0xff]  }
 0x1be   : >> { %14795 = vmatpush3.bf16.msra.mxu0 %v16505_v37  ;;  %v18824_v24 = vadd.f32 %v2434_v42, %v18647_v20  ;;  %14826 = vmatprep.subr.bf16.mxu1 %v16512_v15  ;;  %v4631_v20 = vor.u32 %v4630_v35, %v4629_v39  ;;  %v16529_v35 = vld [vmem:[%s20975_s1 + $0x558] sm:$0xff]  }
 0x1bf   : >> { %14796 = vmatprep.subr.bf16.mxu0 %v16507_v33  ;;  %v16522_v33 = vld [vmem:[%s20975_s1 + $0x4e0] sm:$0xff]  }
 0x1c0   : >> { %v4635_v23 = vsel %vm2004_vm2, %v4631_v20, %v18137_v16 }
 0x1c1   : >> { %14827 = vmatpush3.bf16.msra.mxu1 %v16514_v6 }
 0x1c2   : >> { %14797 = vmatpush3.bf16.msra.mxu0 %v16509_v61  ;;  %14850 = vmatprep.subr.bf16.mxu1 %v16517_v53  ;;  %v16527_v61 = vld [vmem:[%s20975_s1 + $0x520] sm:$0xff]   ;;  %v16525_v53 = vld [vmem:[%s20975_s1 + $0x4d8] sm:$0xff]  }
 0x1c3   : >> { %14798 = vmatprep.subr.bf16.mxu0 %v16511_v25 }
 0x1c4   : >> { %v14564_v63 = vpop.f32.mrf.mxu1  ;;  %4996 = vmatmul.mubr.bf16.vlgmr.msra.gmra.mxu1 %v18437_v52  ;;  %v16521_v52 = vld [vmem:[%s20975_s1 + $0x530] sm:$0xff]  }
 0x1c5   : >> { %14851 = vmatpush3.bf16.msra.mxu1 %v16518_v62  ;;  %5003 = vmatprep.mubr.bf16.mxu1 %v18401_v7  ;;  %v16519_v7 = vld [vmem:[%s20975_s1 + $0x4e8] sm:$0xff]  }
 0x1c6   : >> { %14799 = vmatpush3.bf16.msra.mxu0 %v16513_v10  ;;  %v14565_v36 = vpop.f32.mrf.mxu1  ;;  %14852 = vmatprep.subr.bf16.mxu1 %v16520_v55  ;;  %v16532_v55 = vld [vmem:[%s20975_s1 + $0x550] sm:$0xff]  }
 0x1c7   : >> { %15674 = vmatprep.subr.bf16.mxu0 %v16515_v34  ;;  %v14566_v40 = vadd.f32 %v14565_v36, %v14564_v63  ;;  %v16531_v36 = vld [vmem:[%s20975_s1 + $0x4c8] sm:$0xff]  }
 0x1c8   : >> { %v14567_v11 = vpop.f32.mrf.mxu1 }
 0x1c9   : >> { %v14536_v21 = vpop.f32.mrf.mxu0  ;;  %4947 = vmatmul.mubr.bf16.vlgmr.msra.gmra.mxu0 %v4635_v23  ;;  %14853 = vmatpush3.bf16.msra.mxu1 %v16521_v52  ;;  %v16535_v52 = vld [vmem:[%s20975_s1 + $0x548] sm:$0xff]  }
 0x1ca   : >> { %15675 = vmatpush3.bf16.msra.mxu0 %v16515_v34  ;;  %4954 = vmatprep.mubr.bf16.mxu0 %v18744_v14  ;;  %v14568_v59 = vpop.f32.mrf.mxu1  ;;  %v16526_v14 = vld [vmem:[%s20975_s1 + $0x560] sm:$0xff]  }
 0x1cb   : >> { %v14537_v9 = vpop.f32.mrf.mxu0  ;;  %15676 = vmatprep.subr.bf16.mxu0 %v16516_v49  ;;  %14854 = vmatprep.subr.bf16.mxu1 %v16523_v32  ;;  %v14569_v27 = vadd.f32 %v14568_v59, %v14567_v11  ;;  %v16536_v32 = vld [vmem:[%s20975_s1 + $0x508] sm:$0xff]   ;;  %v5145_v11 = vrot.slane %v18180_v13, 2  ;;  %v16540_v59 = vld [vmem:[%s20975_s1 + $0x5b8] sm:$0xff]  }
 0x1cc   : >> { %v14538_v46 = vadd.f32 %v14537_v9, %v14536_v21  ;;  %v14570_v42 = vpop.f32.mrf.mxu1  ;;  %5004 = vmatmul.mubr.bf16.gmra.mxu1 %v18425_v58  ;;  %v16539_v9 = vld [vmem:[%s20975_s1 + $0x500] sm:$0xff]  }
 0x1cd   : >> { %v14539_v22 = vpop.f32.mrf.mxu0  ;;  %14855 = vmatpush3.bf16.msra.mxu1 %v16524_v57  ;;  %5442 = vmatprep.mubr.bf16.mxu1 %v5150_v60  ;;  %v5154_v57 = vrot.slane %v18193_v45, 2  ;;  %v16541_v45 = vld [vmem:[%s20975_s1 + $0x5f0] sm:$0xff]  }
 0x1ce   : >> { %15677 = vmatpush3.bf16.msra.mxu0 %v16516_v49  ;;  %v18885_v30 = vadd.f32 %v14566_v40, %v14538_v46  ;;  %14856 = vmatprep.subr.bf16.mxu1 %v16526_v14  ;;  %v14571_v25 = vpop.f32.mrf.mxu1  ;;  %v16534_v40 = vld [vmem:[%s20975_s1 + $0x4c0] sm:$0xff]   ;;  %v16538_v46 = vld [vmem:[%s20975_s1 + $0x5f8] sm:$0xff]  }
 0x1cf   : >> { %v14540_v37 = vpop.f32.mrf.mxu0  ;;  %15678 = vmatprep.subr.bf16.mxu0 %v16519_v7  ;;  %v14572_v58 = vadd.f32 %v14571_v25, %v14570_v42  ;;  %v5157_v42 = vrot.slane %v18219_v38, 2 }
 0x1d0   : >> { %v14541_v15 = vadd.f32 %v14540_v37, %v14539_v22  ;;  %v14573_v20 = vpop.f32.mrf.mxu1  ;;  %v5155_v22 = vrot.slane %v18210_v8, 2 }
 0x1d1   : >> { %v14542_v39 = vpop.f32.mrf.mxu0  ;;  %4955 = vmatmul.mubr.bf16.gmra.mxu0 %v18137_v16  ;;  %14857 = vmatpush3.bf16.msra.mxu1 %v16527_v61  ;;  %v16530_v16 = vld [vmem:[%s20975_s1 + $0x518] sm:$0xff]   ;;  %v16544_v61 = vld [vmem:[%s20975_s1 + $0x5e8] sm:$0xff]  }
 0x1d2   : >> { %15679 = vmatpush3.bf16.msra.mxu0 %v16519_v7  ;;  %15690 = vmatprep.mubr.bf16.mxu0 %v4663_v43  ;;  %v18900_v6 = vadd.f32 %v14569_v27, %v14541_v15  ;;  %v14574_v23 = vpop.f32.mrf.mxu1  ;;  %v5146_v7 = vrot.slane %v18088_v26, 2  ;;  %v16545_v26 = vld [vmem:[%s20975_s1 + $0x630] sm:$0xff]   ;;  %v5156_v60 = vsel %vm2522_vm4, %v5154_v57, %v5155_v22  ;;  %v5158_v43 = vrot.slane %v18236_v31, 2 }
 0x1d3   : >> { %15680 = vmatprep.subr.bf16.mxu0 %v16522_v33  ;;  %v14543_v10 = vpop.f32.mrf.mxu0  ;;  %14858 = vmatprep.subr.bf16.mxu1 %v16529_v35  ;;  %v14575_v63 = vadd.f32 %v14574_v23, %v14573_v20  ;;  %v5152_v57 = vrot.slane %v18335_v29, 2 }
 0x1d4   : >> { %v14544_v34 = vadd.f32 %v14543_v10, %v14542_v39  ;;  %v5147_v13 = vsel %vm2522_vm4, %v5145_v11, %v5146_v7  ;;  %v5159_v10 = vsel %vm2522_vm4, %v5157_v42, %v5158_v43  ;;  %v16558_v11 = vld [vmem:[%s20975_s1 + $0x588] sm:$0xff]  }
 0x1d5   : >> { %v14545_v62 = vpop.f32.mrf.mxu0  ;;  %14859 = vmatpush3.bf16.msra.mxu1 %v16530_v16 }
 0x1d6   : >> { %15681 = vmatpush3.bf16.msra.mxu0 %v16522_v33  ;;  %v2880_v49 = vadd.f32 %v14572_v58, %v14544_v34  ;;  %14860 = vmatprep.subr.bf16.mxu1 %v16532_v55  ;;  %v16548_v33 = vld [vmem:[%s20975_s1 + $0x628] sm:$0xff]  }
 0x1d7   : >> { %15682 = vmatprep.subr.bf16.mxu0 %v16525_v53  ;;  %v14546_v18 = vpop.f32.mrf.mxu0 }
 0x1d8   : >> { %v14547_v51 = vadd.f32 %v14546_v18, %v14545_v62  ;;  %v16547_v62 = vld [vmem:[%s20975_s1 + $0x5e0] sm:$0xff]  }
 0x1d9   : >> { %14861 = vmatpush3.bf16.msra.mxu1 %v16533_v48  ;;  %v16549_v18 = vld [vmem:[%s20975_s1 + $0x5a0] sm:$0xff]   ;;  %v16557_v48 = vld [vmem:[%s20975_s1 + $0x610] sm:$0xff]  }
 0x1da   : >> { %15683 = vmatpush3.bf16.msra.mxu0 %v16525_v53  ;;  %v2883_v21 = vadd.f32 %v14575_v63, %v14547_v51  ;;  %14862 = vmatprep.subr.bf16.mxu1 %v16535_v52  ;;  %v16551_v53 = vld [vmem:[%s20975_s1 + $0x620] sm:$0xff]   ;;  %v16554_v63 = vld [vmem:[%s20975_s1 + $0x618] sm:$0xff]  }
 0x1db   : >> { %15684 = vmatprep.subr.bf16.mxu0 %v16528_v56  ;;  %v16552_v52 = vld [vmem:[%s20975_s1 + $0x598] sm:$0xff]  }
 0x1dd   : >> { %14863 = vmatpush3.bf16.msra.mxu1 %v16536_v32  ;;  %v16560_v32 = vld [vmem:[%s20975_s1 + $0x608] sm:$0xff]  }
 0x1de   : >> { %15685 = vmatpush3.bf16.msra.mxu0 %v16528_v56  ;;  %14864 = vmatprep.subr.bf16.mxu1 %v16537_v47  ;;  %v16555_v47 = vld [vmem:[%s20975_s1 + $0x590] sm:$0xff]  }
 0x1df   : >> { %15686 = vmatprep.subr.bf16.mxu0 %v16531_v36 }
 0x1e1   : >> { %14865 = vmatpush3.bf16.msra.mxu1 %v16539_v9  ;;  %v16562_v9 = vld [vmem:[%s20975_s1 + $0x600] sm:$0xff]  }
 0x1e2   : >> { %15687 = vmatpush3.bf16.msra.mxu0 %v16531_v36  ;;  %15694 = vmatprep.subr.bf16.mxu1 %v16542_v54  ;;  %v16553_v36 = vld [vmem:[%s20975_s1 + $0x5d0] sm:$0xff]  }
 0x1e3   : >> { %15688 = vmatprep.subr.bf16.mxu0 %v16534_v40 }
 0x1e4   : >> { %5443 = vmatmul.mubr.bf16.vlgmr.msra.gmra.mxu1 %v5147_v13  ;;  %v14602_v14 = vpop.f32.mrf.mxu1 }
 0x1e5   : >> { %15695 = vmatpush3.bf16.msra.mxu1 %v16542_v54  ;;  %5450 = vmatprep.mubr.bf16.mxu1 %v5149_v19  ;;  %v16561_v54 = vld [vmem:[%s20975_s1 + $0x580] sm:$0xff]  }
 0x1e6   : >> { %15689 = vmatpush3.bf16.msra.mxu0 %v16534_v40  ;;  %15696 = vmatprep.subr.bf16.mxu1 %v16545_v26  ;;  %v14603_v37 = vpop.f32.mrf.mxu1  ;;  %v16556_v40 = vld [vmem:[%s20975_s1 + $0x5c8] sm:$0xff]  }
 0x1e7   : >> { %14878 = vmatprep.subr.bf16.mxu0 %v16538_v46  ;;  %v18969_v19 = vadd.f32 %v14603_v37, %v14602_v14  ;;  %v5151_v46 = vrot.slane %v18325_v28, 2 }
 0x1e8   : >> { %v14605_v39 = vpop.f32.mrf.mxu1 }
 0x1e9   : >> { %v15612_v27 = vpop.f32.mrf.mxu0  ;;  %15691 = vmatmul.mubr.bf16.vlgmr.msra.gmra.mxu0 %v18874_v12  ;;  %15697 = vmatpush3.bf16.msra.mxu1 %v16545_v26  ;;  %v5153_v13 = vsel %vm2522_vm4, %v5151_v46, %v5152_v57 }
 0x1ea   : >> { %v2929_v15 = vadd.f32 %v15612_v27, %v2880_v49  ;;  %14879 = vmatpush3.bf16.msra.mxu0 %v16540_v59  ;;  %5491 = vmatprep.mubr.bf16.mxu0 %v5156_v60  ;;  %v14606_v58 = vpop.f32.mrf.mxu1 }
 0x1eb   : >> { %v2920_v12 = vpop.f32.mrf.mxu0  ;;  %14880 = vmatprep.subr.bf16.mxu0 %v16541_v45  ;;  %15698 = vmatprep.subr.bf16.mxu1 %v16548_v33 }
 0x1ec   : >> { %v18975_v38 = vadd.f32 %v2929_v15, %v18805_v17  ;;  %v2921_v35 = vadd.f32 %v2920_v12, %v18885_v30  ;;  %v16546_v17 = vld [vmem:[%s20975_s1 + $0x5a8] sm:$0xff]   ;;  %v18990_v30 = vadd.f32 %v14606_v58, %v14605_v39  ;;  %v14608_v55 = vpop.f32.mrf.mxu1  ;;  %5451 = vmatmul.mubr.bf16.gmra.mxu1 %v5146_v7  ;;  %v16559_v7 = vld [vmem:[%s20975_s1 + $0x5c0] sm:$0xff]  }
 0x1ed   : >> { %v15613_v25 = vpop.f32.mrf.mxu0  ;;  %15699 = vmatpush3.bf16.msra.mxu1 %v16548_v33  ;;  %15710 = vmatprep.mubr.bf16.mxu1 %v5159_v10 }
 0x1ee   : >> { %20991 = vst [vmem:[#allocation14_spill] sm:$0xff] %v18975_v38  ;;  %v18985_v20 = vadd.f32 %v2921_v35, %v18768_v44  ;;  %v2932_v34 = vadd.f32 %v15613_v25, %v2883_v21  ;;  %14881 = vmatpush3.bf16.msra.mxu0 %v16543_v41  ;;  %15700 = vmatprep.subr.bf16.mxu1 %v16551_v53  ;;  %v14609_v49 = vpop.f32.mrf.mxu1 }
 0x1ef   : >> { %v2923_v16 = vpop.f32.mrf.mxu0  ;;  %14882 = vmatprep.subr.bf16.mxu0 %v16544_v61 }
 0x1f0   : >> { %v18996_v23 = vadd.f32 %v2932_v34, %v18824_v24  ;;  %v2924_v44 = vadd.f32 %v2923_v16, %v18900_v6  ;;  %v14610_v24 = vadd.f32 %v14609_v49, %v14608_v55  ;;  %v16550_v6 = vld [vmem:[%s20975_s1 + $0x5d8] sm:$0xff]   ;;  %v14611_v51 = vpop.f32.mrf.mxu1 }
 0x1f1   : >> { %15701 = vmatpush3.bf16.msra.mxu1 %v16551_v53 }
 0x1f2   : >> { %20992 = vst [vmem:[#allocation15_spill] sm:$0xff] %v18996_v23  ;;  %v19003_v56 = vadd.f32 %v2924_v44, %v18785_v50  ;;  %14883 = vmatpush3.bf16.msra.mxu0 %v16546_v17  ;;  %15702 = vmatprep.subr.bf16.mxu1 %v16554_v63  ;;  %v14612_v50 = vpop.f32.mrf.mxu1 }
 0x1f3   : >> { %14884 = vmatprep.subr.bf16.mxu0 %v16547_v62  ;;  %v14613_v21 = vadd.f32 %v14612_v50, %v14611_v51 }
 0x1f4   : >> { %20993 = vst [vmem:[#allocation16_spill] sm:$0xff] %v19003_v56 }
 0x1f5   : >> { %15703 = vmatpush3.bf16.msra.mxu1 %v16554_v63 }
 0x1f6   : >> { %14885 = vmatpush3.bf16.msra.mxu0 %v16549_v18  ;;  %15704 = vmatprep.subr.bf16.mxu1 %v16557_v48 }
 0x1f7   : >> { %14886 = vmatprep.subr.bf16.mxu0 %v16550_v6 }
 0x1f9   : >> { %15705 = vmatpush3.bf16.msra.mxu1 %v16557_v48 }
 0x1fa   : >> { %14887 = vmatpush3.bf16.msra.mxu0 %v16552_v52  ;;  %15706 = vmatprep.subr.bf16.mxu1 %v16560_v32 }
 0x1fb   : >> { %14888 = vmatprep.subr.bf16.mxu0 %v16553_v36 }
 0x1fd   : >> { %15707 = vmatpush3.bf16.msra.mxu1 %v16560_v32 }
 0x1fe   : >> { %14889 = vmatpush3.bf16.msra.mxu0 %v16555_v47  ;;  %15708 = vmatprep.subr.bf16.mxu1 %v16562_v9 }
 0x1ff   : >> { %14890 = vmatprep.subr.bf16.mxu0 %v16556_v40 }
 0x201   : >> { %15709 = vmatpush3.bf16.msra.mxu1 %v16562_v9 }
 0x202   : >> { %14891 = vmatpush3.bf16.msra.mxu0 %v16558_v11 }
 0x203   : >> { %14892 = vmatprep.subr.bf16.mxu0 %v16559_v7 }
 0x204   : >> { %v15632_v26 = vpop.f32.mrf.mxu1  ;;  %15711 = vmatmul.mubr.bf16.vlgmr.msra.gmra.mxu1 %v5158_v43 }
 0x206   : >> { %14893 = vmatpush3.bf16.msra.mxu0 %v16561_v54  ;;  %v3641_v45 = vpop.f32.mrf.mxu1 }
 0x208   : >> { %v15633_v27 = vpop.f32.mrf.mxu1 }
 0x209   : >> { %v14630_v59 = vpop.f32.mrf.mxu0  ;;  %5492 = vmatmul.mubr.bf16.vlgmr.msra.gmra.mxu0 %v5153_v13 }
 0x20a   : >> { %5499 = vmatprep.mubr.bf16.mxu0 %v5155_v22  ;;  %v3644_v41 = vpop.f32.mrf.mxu1 }
 0x20b   : >> { %v14631_v14 = vpop.f32.mrf.mxu0 }
 0x20c   : >> { %v14632_v60 = vadd.f32 %v14631_v14, %v14630_v59 }
 0x20d   : >> { %v14633_v28 = vpop.f32.mrf.mxu0 }
 0x20e   : >> { %v3593_v29 = vadd.f32 %v14632_v60, %v18969_v19 }
 0x20f   : >> { %v14634_v37 = vpop.f32.mrf.mxu0 }
 0x210   : >> { %v14635_v33 = vadd.f32 %v14634_v37, %v14633_v28  ;;  %v3642_v42 = vadd.f32 %v3641_v45, %v3593_v29 }
 0x211   : >> { %v14636_v15 = vpop.f32.mrf.mxu0  ;;  %5500 = vmatmul.mubr.bf16.gmra.mxu0 %v5152_v57 }
 0x212   : >> { %v3596_v31 = vadd.f32 %v14635_v33, %v18990_v30 }
 0x213   : >> { %v14637_v43 = vpop.f32.mrf.mxu0 }
 0x214   : >> { %v14638_v12 = vadd.f32 %v14637_v43, %v14636_v15  ;;  %v3645_v61 = vadd.f32 %v3644_v41, %v3596_v31 }
 0x215   : >> { %v14639_v39 = vpop.f32.mrf.mxu0 }
 0x216   : >> { %v3601_v8 = vadd.f32 %v14638_v12, %v14610_v24 }
 0x217   : >> { %v14640_v22 = vpop.f32.mrf.mxu0 }
 0x218   : >> { %v14641_v35 = vadd.f32 %v14640_v22, %v14639_v39  ;;  %v3650_v25 = vadd.f32 %v15632_v26, %v3601_v8 }
 0x21a   : >> { %v3604_v58 = vadd.f32 %v14641_v35, %v14613_v21 }
 0x21c   : >> { %v3653_v53 = vadd.f32 %v15633_v27, %v3604_v58 }
 0x224   : >> { %v14696_v10 = vpop.f32.mrf.mxu1 }
 0x226   : >> { %v14697_v34 = vpop.f32.mrf.mxu1 }
 0x227   : >> { %v14698_v17 = vadd.f32 %v14697_v34, %v14696_v10 }
 0x228   : >> { %v14699_v62 = vpop.f32.mrf.mxu1 }
 0x229   : >> { %v14668_v19 = vpop.f32.mrf.mxu0 }
 0x22a   : >> { %v14700_v63 = vpop.f32.mrf.mxu1 }
 0x22b   : >> { %v14669_v16 = vpop.f32.mrf.mxu0  ;;  %v14701_v49 = vadd.f32 %v14700_v63, %v14699_v62 }
 0x22c   : >> { %v14670_v55 = vadd.f32 %v14669_v16, %v14668_v19  ;;  %v14702_v6 = vpop.f32.mrf.mxu1 }
 0x22d   : >> { %v14671_v44 = vpop.f32.mrf.mxu0 }
 0x22e   : >> { %v3931_v30 = vadd.f32 %v14670_v55, %v3642_v42  ;;  %v14703_v50 = vpop.f32.mrf.mxu1 }
 0x22f   : >> { %v14672_v18 = vpop.f32.mrf.mxu0  ;;  %v14704_v21 = vadd.f32 %v14703_v50, %v14702_v6 }
 0x230   : >> { %v14673_v51 = vadd.f32 %v14672_v18, %v14671_v44  ;;  %v19050_v24 = vadd.f32 %v14698_v17, %v3931_v30  ;;  %v14705_v32 = vpop.f32.mrf.mxu1 }
 0x231   : >> { %v14674_v48 = vpop.f32.mrf.mxu0 }
 0x232   : >> { %v3934_v52 = vadd.f32 %v14673_v51, %v3645_v61  ;;  %v14706_v11 = vpop.f32.mrf.mxu1 }
 0x233   : >> { %v14675_v36 = vpop.f32.mrf.mxu0  ;;  %v14707_v54 = vadd.f32 %v14706_v11, %v14705_v32 }
 0x234   : >> { %v14676_v47 = vadd.f32 %v14675_v36, %v14674_v48  ;;  %v19052_v40 = vadd.f32 %v14701_v49, %v3934_v52 }
 0x235   : >> { %v14677_v9 = vpop.f32.mrf.mxu0 }
 0x236   : >> { %v3939_v7 = vadd.f32 %v14676_v47, %v3650_v25 }
 0x237   : >> { %v14678_v46 = vpop.f32.mrf.mxu0 }
 0x238   : >> { %v14679_v57 = vadd.f32 %v14678_v46, %v14677_v9  ;;  %v19054_v13 = vadd.f32 %v14704_v21, %v3939_v7 }
 0x23a   : >> { %20994 = vst [vmem:[#allocation17_spill] sm:$0xff] %v19054_v13  ;;  %v3942_v26 = vadd.f32 %v14679_v57, %v3653_v53 }
 0x23c   : >> { %v19056_v59 = vadd.f32 %v14707_v54, %v3942_v26 }
 0x23e   : >> { %20995 = vst [vmem:[#allocation18_spill] sm:$0xff] %v19056_v59 }
 0x244   : >> { %v14734_v45 = vpop.f32.mrf.mxu1 }
 0x246   : >> { %v14735_v14 = vpop.f32.mrf.mxu1 }
 0x247   : >> { %v14736_v2 = vadd.f32 %v14735_v14, %v14734_v45 }
 0x248   : >> { %v14737_v60 = vpop.f32.mrf.mxu1 }
 0x249   : >> { %v19060_v29 = vpop.f32.mrf.mxu0 }
 0x24a   : >> { %v14738_v28 = vpop.f32.mrf.mxu1  ;;  %20996 = vst [vmem:[#allocation19_spill] sm:$0xff] %v19060_v29 }
 0x24b   : >> { %v4028_v33 = vpop.f32.mrf.mxu0  ;;  %v14739_v1 = vadd.f32 %v14738_v28, %v14737_v60 }
 0x24c   : >> { %v19058_v27 = vpop.f32.mrf.mxu1 }
 0x24d   : >> { %v19066_v15 = vpop.f32.mrf.mxu0 }
 0x24e   : >> { %v19062_v37 = vpop.f32.mrf.mxu1  ;;  %20997 = vst [vmem:[#allocation20_spill] sm:$0xff] %v19066_v15 }
 0x24f   : >> { %v4031_v31 = vpop.f32.mrf.mxu0  ;;  %v14742_v45 = vadd.f32 %v19062_v37, %v19058_v27 }
 0x250   : >> { %v19064_v42 = vpop.f32.mrf.mxu1  ;;  %v4032_v60 = vadd.f32 %v4031_v31, %v19052_v40 }
 0x252   : >> { %v19068_v41 = vpop.f32.mrf.mxu1 }
 0x264   : >> { %v19070_v43 = vpop.f32.mrf.mxu1 }
 0x266   : >> { %v4530_v61 = vpop.f32.mrf.mxu1 }
 0x268   : >> { %v19072_v8 = vpop.f32.mrf.mxu1 }
 0x269   : >> { %v14762_v12 = vpop.f32.mrf.mxu0  ;;  %20998 = vst [vmem:[#allocation21_spill] sm:$0xff] %v19072_v8 }
 0x26a   : >> { %v4533_v35 = vpop.f32.mrf.mxu1 }
 0x26b   : >> { %v14763_v39 = vpop.f32.mrf.mxu0 }
 0x26c   : >> { %v14764_v26 = vadd.f32 %v14763_v39, %v14762_v12 }
 0x26d   : >> { %v14765_v22 = vpop.f32.mrf.mxu0 }
 0x26e   : >> { %v4482_v23 = vadd.f32 %v14764_v26, %v14736_v2 }
 0x26f   : >> { %v14766_v25 = vpop.f32.mrf.mxu0 }
 0x270   : >> { %v14767_v5 = vadd.f32 %v14766_v25, %v14765_v22  ;;  %v4531_v12 = vadd.f32 %v4530_v61, %v4482_v23  ;;  %v4029_v22 = vadd.f32 %v4028_v33, %v19050_v24  ;;  %v2943_v24 = vadd.f32 %v17180_v0, %v18985_v20 }
 0x271   : >> { %v14768_v53 = vpop.f32.mrf.mxu0 }
 0x272   : >> { %v4485_v59 = vadd.f32 %v14767_v5, %v14739_v1  ;;  %v4545_v23 = vadd.f32 %v4531_v12, %v4029_v22  ;;  %v21009_v22 = vld [vmem:[#allocation20_spill] sm:$0xff] }
 0x273   : >> { %v14769_v19 = vpop.f32.mrf.mxu0 }
 0x274   : >> { %v4534_v14 = vadd.f32 %v4533_v35, %v4485_v59  ;;  %v14745_v59 = vadd.f32 %v19068_v41, %v19064_v42  ;;  %v21004_v42 = vld [vmem:[#allocation19_spill] sm:$0xff] }
 0x275   : >> { %v14771_v17 = vpop.f32.mrf.mxu0 }
 0x276   : >> { %v4546_v27 = vadd.f32 %v4534_v14, %v4032_v60 }
 0x277   : >> { %v14772_v55 = vpop.f32.mrf.mxu0 }
 0x284   : >> { %v14828_v58 = vpop.f32.mrf.mxu1 }
 0x286   : >> { %v14829_v10 = vpop.f32.mrf.mxu1 }
 0x287   : >> { %v14830_v15 = vadd.f32 %v14829_v10, %v14828_v58 }
 0x288   : >> { %v14831_v34 = vpop.f32.mrf.mxu1 }
 0x289   : >> { %v14800_v44 = vpop.f32.mrf.mxu0 }
 0x28a   : >> { %v14832_v16 = vpop.f32.mrf.mxu1 }
 0x28b   : >> { %v14801_v30 = vpop.f32.mrf.mxu0  ;;  %v14833_v13 = vadd.f32 %v14832_v16, %v14831_v34 }
 0x28c   : >> { %v14834_v62 = vpop.f32.mrf.mxu1  ;;  %v14802_v38 = vadd.f32 %v14801_v30, %v14800_v44 }
 0x28d   : >> { %v14803_v18 = vpop.f32.mrf.mxu0 }
 0x28e   : >> { %v14835_v63 = vpop.f32.mrf.mxu1  ;;  %v4998_v39 = vadd.f32 %v14830_v15, %v14802_v38  ;;  %v14773_v38 = vadd.f32 %v14772_v55, %v14771_v17 }
 0x28f   : >> { %v14804_v48 = vpop.f32.mrf.mxu0 }
 0x290   : >> { %v19074_v49 = vpop.f32.mrf.mxu1  ;;  %v14805_v29 = vadd.f32 %v14804_v48, %v14803_v18 }
 0x291   : >> { %20999 = vst [vmem:[#allocation22_spill] sm:$0xff] %v19074_v49  ;;  %v14806_v50 = vpop.f32.mrf.mxu0 }
 0x292   : >> { %v14838_v6 = vpop.f32.mrf.mxu1  ;;  %v5001_v10 = vadd.f32 %v14833_v13, %v14805_v29 }
 0x293   : >> { %v14807_v21 = vpop.f32.mrf.mxu0 }
 0x294   : >> { %v14808_v58 = vadd.f32 %v14807_v21, %v14806_v50 }
 0x295   : >> { %v14809_v32 = vpop.f32.mrf.mxu0 }
 0x297   : >> { %v14810_v11 = vpop.f32.mrf.mxu0 }
 0x298   : >> { %v14811_v29 = vadd.f32 %v14810_v11, %v14809_v32  ;;  %v21002_v16 = vld [vmem:[#allocation22_spill] sm:$0xff] }
 0x2a4   : >> { %v14866_v51 = vpop.f32.mrf.mxu1 }
 0x2a6   : >> { %v14867_v52 = vpop.f32.mrf.mxu1 }
 0x2a7   : >> { %v14868_v5 = vadd.f32 %v14867_v52, %v14866_v51 }
 0x2a8   : >> { %v14869_v36 = vpop.f32.mrf.mxu1 }
 0x2a9   : >> { %v15692_v7 = vpop.f32.mrf.mxu0 }
 0x2aa   : >> { %v14870_v47 = vpop.f32.mrf.mxu1 }
 0x2ab   : >> { %v5046_v46 = vpop.f32.mrf.mxu0  ;;  %v14871_v31 = vadd.f32 %v14870_v47, %v14869_v36  ;;  %v2947_v36 = vmax.f32 %v2943_v24, 0.0 }
 0x2ac   : >> { %v19076_v9 = vpop.f32.mrf.mxu1  ;;  %v5047_v1 = vadd.f32 %v5046_v46, %v4998_v39  ;;  %v21007_v46 = vld [vmem:[#allocation21_spill] sm:$0xff]  ;;  %v21008_v39 = vld [vmem:[#allocation18_spill] sm:$0xff] }
 0x2ad   : >> { %21000 = vst [vmem:[#allocation23_spill] sm:$0xff] %v19076_v9  ;;  %v19080_v4 = vpop.f32.mrf.mxu0  ;;  %v14770_v9 = vadd.f32 %v14769_v19, %v14768_v53  ;;  %v14836_v53 = vadd.f32 %v14835_v63, %v14834_v62  ;;  %v14839_v62 = vadd.f32 %v14838_v6, %v21002_v16  ;;  %v4493_v63 = vadd.f32 %v14773_v38, %v14745_v59  ;;  %v21006_v6 = vld [vmem:[#allocation16_spill] sm:$0xff] }
 0x2ae   : >> { %v14873_v54 = vpop.f32.mrf.mxu1  ;;  %v5061_v33 = vadd.f32 %v5047_v1, %v4545_v23  ;;  %v2944_v32 = vadd.f32 %v17180_v0, %v21006_v6 }
 0x2af   : >> { %v5049_v8 = vpop.f32.mrf.mxu0  ;;  %v4490_v25 = vadd.f32 %v14770_v9, %v14742_v45  ;;  %v5006_v17 = vadd.f32 %v14836_v53, %v14808_v58  ;;  %v5009_v9 = vadd.f32 %v14839_v62, %v14811_v29  ;;  %v4040_v45 = vadd.f32 %v21009_v22, %v21008_v39  ;;  %v21011_v53 = vld [vmem:[#allocation14_spill] sm:$0xff] }
 0x2b0   : >> { %v19078_v57 = vpop.f32.mrf.mxu1  ;;  %v5050_v40 = vadd.f32 %v5049_v8, %v5001_v10  ;;  %v2945_v10 = vadd.f32 %v17180_v0, %v21011_v53 }
 0x2b1   : >> { %21001 = vst [vmem:[#allocation24_spill] sm:$0xff] %v19078_v57  ;;  %v4539_v13 = vadd.f32 %v19070_v43, %v4490_v25  ;;  %v5055_v8 = vadd.f32 %v15692_v7, %v5006_v17  ;;  %v5058_v14 = vadd.f32 %v19080_v4, %v5009_v9 }
 0x2b2   : >> { %v19082_v3 = vpop.f32.mrf.mxu1  ;;  %v5062_v18 = vadd.f32 %v5050_v40, %v4546_v27  ;;  %v2949_v40 = vmax.f32 %v2945_v10, 0.0 }
 0x2b4   : >> { %v21005_v48 = vld [vmem:[#allocation23_spill] sm:$0xff] }
 0x2b5   : >> { %v14874_v50 = vadd.f32 %v14873_v54, %v21005_v48 }
 0x2c4   : >> { %v19084_v56 = vpop.f32.mrf.mxu1 }
 0x2c6   : >> { %v5542_v57 = vpop.f32.mrf.mxu1 }
 0x2c8   : >> { %v15713_v34 = vpop.f32.mrf.mxu1 }
 0x2c9   : >> { %v14894_v49 = vpop.f32.mrf.mxu0 }
 0x2ca   : >> { %v5545_v44 = vpop.f32.mrf.mxu1 }
 0x2cb   : >> { %v14895_v2 = vpop.f32.mrf.mxu0 }
 0x2cc   : >> { %v14896_v28 = vadd.f32 %v14895_v2, %v14894_v49  ;;  %v21003_v49 = vld [vmem:[#allocation17_spill] sm:$0xff]  ;;  %v21010_v2 = vld [vmem:[#allocation24_spill] sm:$0xff] }
 0x2cd   : >> { %v14897_v19 = vpop.f32.mrf.mxu0  ;;  %v4037_v41 = vadd.f32 %v21004_v42, %v21003_v49  ;;  %v14877_v60 = vadd.f32 %v19082_v3, %v21010_v2 }
 0x2ce   : >> { %v5494_v15 = vadd.f32 %v14896_v28, %v14868_v5 }
 0x2cf   : >> { %v14898_v37 = vpop.f32.mrf.mxu0  ;;  %v4547_v47 = vadd.f32 %v4539_v13, %v4037_v41 }
 0x2d0   : >> { %v14899_v61 = vadd.f32 %v14898_v37, %v14897_v19  ;;  %v5543_v35 = vadd.f32 %v5542_v57, %v5494_v15  ;;  %v4542_v57 = vadd.f32 %v21007_v46, %v4493_v63  ;;  %v2948_v19 = vmax.f32 %v2944_v32, 0.0 }
 0x2d1   : >> { %v14900_v55 = vpop.f32.mrf.mxu0  ;;  %v5063_v54 = vadd.f32 %v5055_v8, %v4547_v47 }
 0x2d2   : >> { %v5557_v20 = vadd.f32 %v5543_v35, %v5061_v33  ;;  %v5497_v30 = vadd.f32 %v14899_v61, %v14871_v31  ;;  %v4548_v23 = vadd.f32 %v4542_v57, %v4040_v45 }
 0x2d3   : >> { %v14901_v51 = vpop.f32.mrf.mxu0 }
 0x2d4   : >> { %v5561_v52 = vadd.f32 %v17180_v0, %v5557_v20  ;;  %v14902_v43 = vadd.f32 %v14901_v51, %v14900_v55  ;;  %v5546_v21 = vadd.f32 %v5545_v44, %v5497_v30  ;;  %v5064_v24 = vadd.f32 %v5058_v14, %v4548_v23 }
 0x2d5   : >> { %v14903_v11 = vpop.f32.mrf.mxu0 }
 0x2d6   : >> { %v5565_v26 = vmax.f32 %v5561_v52, 0.0  ;;  %v5502_v12 = vadd.f32 %v14902_v43, %v14874_v50  ;;  %v5558_v7 = vadd.f32 %v5546_v21, %v5062_v18 }
 0x2d7   : >> { %v14904_v1 = vpop.f32.mrf.mxu0 }
 0x2d8   : >> { %v5569_v5 = vmax.f32 %v2947_v36, %v5565_v26  ;;  %v5551_v28 = vadd.f32 %v19084_v56, %v5502_v12  ;;  %v5562_v25 = vadd.f32 %v17180_v0, %v5558_v7  ;;  %v14905_v58 = vadd.f32 %v14904_v1, %v14903_v11  ;;  %v21012_v56 = vld [vmem:[#allocation15_spill] sm:$0xff] }
 0x2d9   : >> { %v2946_v37 = vadd.f32 %v17180_v0, %v21012_v56 }
 0x2da   : >> { %5573 = vst [vmem:[#allocation4] sm:$0xff] %v5569_v5  ;;  %v5559_v38 = vadd.f32 %v5551_v28, %v5063_v54  ;;  %v5566_v15 = vmax.f32 %v5562_v25, 0.0  ;;  %v5505_v4 = vadd.f32 %v14905_v58, %v14877_v60 }
 0x2db   : >> { %v2950_v13 = vmax.f32 %v2946_v37, 0.0 }
 0x2dc   : >> { %v5563_v3 = vadd.f32 %v17180_v0, %v5559_v38  ;;  %v5570_v59 = vmax.f32 %v2948_v19, %v5566_v15  ;;  %v5554_v27 = vadd.f32 %v15713_v34, %v5505_v4 }
 0x2de   : >> { %v5567_v33 = vmax.f32 %v5563_v3, 0.0  ;;  %5574 = vst [vmem:[#allocation4 + $0x8] sm:$0xff] %v5570_v59  ;;  %v5560_v31 = vadd.f32 %v5554_v27, %v5064_v24 }
 0x2e0   : >> { %v5571_v61 = vmax.f32 %v2949_v40, %v5567_v33  ;;  %v5564_v35 = vadd.f32 %v17180_v0, %v5560_v31 }
 0x2e2   : >> { %5575 = vst [vmem:[#allocation4 + $0x10] sm:$0xff] %v5571_v61  ;;  %v5568_v29 = vmax.f32 %v5564_v35, 0.0 }
 0x2e4   : >> { %v5572_v16 = vmax.f32 %v2950_v13, %v5568_v29 }
 0x2e5   : >> { %v5577_v62 = vld [vmem:[#allocation4] ss:$2 sm:$0xff]  ;;  %v5581_v17 = vld [vmem:[#allocation4 + $0x1] ss:$2 sm:$0xff] }
 0x2e6   : >> { %v5584_v55 = vmax.f32 %v5577_v62, %v5581_v17  ;;  %5576 = vst [vmem:[#allocation4 + $0x18] sm:$0xf] %v5572_v16 }
 0x2e8   : >> { %5588 = vst [vmem:[%s5587_s8] sm:$0xff] %v5584_v55 }
 0x2ec   : > { %306 = sbr.rel (!%p304_p11) target bundleno = 33 (0x21), region = 127 }
 0x2ed   : >> { %v5579_v34 = vld [vmem:[#allocation4 + $0x10] ss:$2 sm:$0x3f]  ;;  %v5583_v44 = vld [vmem:[#allocation4 + $0x11] ss:$2 sm:$0x3f] }
 0x2ee   : >> { %v5585_v63 = vmax.f32 %v5579_v34, %v5583_v44 }
 0x2f0   : >> { %5589 = vst [vmem:[%s5587_s8 + $0x8] sm:$0x3f] %v5585_v63 }
 0x2f1 LB: >> { %v16563_v20 = vld [vmem:[%s20976_s2 + $0x1b8] sm:$0xff]   ;;  %v16567_v42 = vld [vmem:[%s20976_s2 + $0x1b0] sm:$0xff]   ;;  %v16571_v51 = vld [vmem:[%s20976_s2 + $0x1a8] sm:$0xff]   ;;  %s14250_s8 = sshll.u32 %s17080_s9, 5  ;;  %v17083_v53 = vmov 0.0   ;;  %vm17084_vm5 = vmmov 0   ;;  %s17080_s9 = sphi %s19120_s9, %s5595_s9  }
 0x2f2   : >> { %v16564_v30 = vld [vmem:[%s20976_s2 + $0x238] sm:$0xff]   ;;  %14916 = vmatprep.subr.bf16.mxu0 %v16563_v20  ;;  %v16568_v41 = vld [vmem:[%s20976_s2 + $0x230] sm:$0xff]   ;;  %v16572_v48 = vld [vmem:[%s20976_s2 + $0x228] sm:$0xff]   ;;  %s19222_s14 = scalar_lea.vmem [#allocation5], %s14250_s8  ;;  %s14173_s18 = sshll.u32 %s17080_s9, 3 }
 0x2f3   : >> { %v16565_v49 = vld [vmem:[%s20976_s2 + $0x178] sm:$0xff]   ;;  %14938 = vmatprep.subr.bf16.mxu1 %v16564_v30  ;;  %v16569_v8 = vld [vmem:[%s20976_s2 + $0x170] sm:$0xff]   ;;  %v16573_v50 = vld [vmem:[%s20976_s2 + $0x168] sm:$0xff]   ;;  %s10321_s20 = scalar_lea.vmem [#allocation6], %s14173_s18  ;;  %s5595_s9 = sadd.s32 1, %s17080_s9  }
 0x2f4   : >> { %v16566_v0 = vld [vmem:[%s20976_s2 + $0x1f8] sm:$0xff]   ;;  %14917 = vmatpush3.bf16.msra.mxu0 %v16565_v49  ;;  %v16570_v18 = vld [vmem:[%s20976_s2 + $0x1f0] sm:$0xff]   ;;  %v16574_v52 = vld [vmem:[%s20976_s2 + $0x1e8] sm:$0xff]   ;;  %p5592_p12 = scmp.ge.s32.totalorder %s5595_s9, 5  }
 0x2f5   : >> { %14939 = vmatpush3.bf16.msra.mxu1 %v16566_v0  ;;  %14918 = vmatprep.subr.bf16.mxu0 %v16567_v42  ;;  %v16575_v43 = vld [vmem:[%s20976_s2 + $0x1a0] sm:$0xff]   ;;  %v16579_v32 = vld [vmem:[%s20976_s2 + $0x198] sm:$0xff]   ;;  %v16583_v46 = vld [vmem:[%s20976_s2 + $0x190] sm:$0xff]   ;;  %vm17085_vm6 = vmmov (%p5592_p12), 0   ;;  %vm10338_vm7 = vcmask (%p5592_p12), 130048   ;;  %s14240_s18 = sshll.u32 (%p5592_p12), %s17148_s28, 4 }
 0x2f6   : >> { %14940 = vmatprep.subr.bf16.mxu1 %v16568_v41  ;;  %v16576_v21 = vld [vmem:[%s20976_s2 + $0x220] sm:$0xff]   ;;  %v16580_v47 = vld [vmem:[%s20976_s2 + $0x218] sm:$0xff]   ;;  %v16584_v57 = vld [vmem:[%s20976_s2 + $0x210] sm:$0xff]   ;;  %s20930_s15 = scalar_lea.hbm (%p5592_p12), %s20981_s7, %s14240_s18  ;;  %s11881_s17 = scalar_lea.sflag (%p5592_p12), [#allocation8], %s269_s13 }
 0x2f7   : >> { %v16577_v36 = vld [vmem:[%s20976_s2 + $0x160] sm:$0xff]   ;;  %v16581_v9 = vld [vmem:[%s20976_s2 + $0x158] sm:$0xff]   ;;  %v16585_v26 = vld [vmem:[%s20976_s2 + $0x150] sm:$0xff]   ;;  %s17086_s9 = smov (%p5592_p12), [#allocation7]  }
 0x2f8   : >> { %14919 = vmatpush3.bf16.msra.mxu0 %v16569_v8  ;;  %v16578_v6 = vld [vmem:[%s20976_s2 + $0x1e0] sm:$0xff]   ;;  %v16582_v11 = vld [vmem:[%s20976_s2 + $0x1d8] sm:$0xff]   ;;  %v16586_v12 = vld [vmem:[%s20976_s2 + $0x1d0] sm:$0xff]   ;;  %s17008_s29 = sshll.u32 (%p5592_p12), %s17086_s9, 4  ;;  %s17009_s29 = int_to_ptr.vmem [resolvable:$false] %s17008_s29 }
 0x2f9   : >> { %14941 = vmatpush3.bf16.msra.mxu1 %v16570_v18  ;;  %14920 = vmatprep.subr.bf16.mxu0 %v16571_v51  ;;  %v16587_v7 = vld [vmem:[%s20976_s2 + $0x188] sm:$0xff]   ;;  %v16591_v54 = vld [vmem:[%s20976_s2 + $0x180] sm:$0xff]   ;;  %v13106_v1 = vld [vmem:[%s19222_s14 + $0x10] sm:$0xff]  ;;  %s17010_s22 = scalar_lea.vmem (%p5592_p12), %s17009_s29, 32 }
 0x2fa   : >> { %14942 = vmatprep.subr.bf16.mxu1 %v16572_v48  ;;  %v16588_v39 = vld [vmem:[%s20976_s2 + $0x208] sm:$0xff]   ;;  %v16592_v14 = vld [vmem:[%s20976_s2 + $0x200] sm:$0xff]   ;;  %v13107_v5 = vld [vmem:[%s19222_s14 + $0x18] sm:$0x3f]  ;;  %7966 = vst [vmem:[#allocation3 + $0x18] sm:$0xff] %v13106_v1 }
 0x2fb   : >> { %v16589_v22 = vld [vmem:[%s20976_s2 + $0x148] sm:$0xff]   ;;  %v16593_v2 = vld [vmem:[%s20976_s2 + $0x140] sm:$0xff]   ;;  %5609 = vst [vmem:[#allocation3 + $0x8] sm:$0x3f] %v13107_v5  ;;  %v13114_v25 = vld [vmem:[%s19222_s14 + $0x30] sm:$0xff] }
 0x2fc   : >> { %14921 = vmatpush3.bf16.msra.mxu0 %v16573_v50  ;;  %v16590_v45 = vld [vmem:[%s20976_s2 + $0x1c8] sm:$0xff]   ;;  %v16594_v60 = vld [vmem:[%s20976_s2 + $0x1c0] sm:$0xff]   ;;  %v13115_v58 = vld [vmem:[%s19222_s14 + $0x38] sm:$0x3f]  ;;  %7974 = vst [vmem:[#allocation3 + $0x48] sm:$0xff] %v13114_v25 }
 0x2fd   : >> { %14943 = vmatpush3.bf16.msra.mxu1 %v16574_v52  ;;  %14922 = vmatprep.subr.bf16.mxu0 %v16575_v43  ;;  %v13643_v28 = vld [vmem:[%s19222_s14 + $0x20] sm:$0xff]  ;;  %5623 = vst [vmem:[#allocation3 + $0x10] sm:$0x3f] %v13115_v58  ;;  %v5600_v19 = vld [vmem:[%s19222_s14 + $0x8] sm:$0x3f]  ;;  %v16595_v15 = vld [vmem:[%s20976_s2 + $0x78] sm:$0xff]  }
 0x2fe   : >> { %14944 = vmatprep.subr.bf16.mxu1 %v16576_v21  ;;  %7970 = vst [vmem:[#allocation3 + $0x30] sm:$0xff] %v13643_v28  ;;  %v19231_v10 = vld [vmem:[%s19222_s14 + $0x40] sm:$0xff]  ;;  %v13111_v23 = vld [vmem:[%s19222_s14 + $0x28] sm:$0x3f]  ;;  %5602 = vst [vmem:[#allocation3] sm:$0x3f] %v5600_v19 }
 0x2ff   : >> { %7978 = vst [vmem:[#allocation3 + $0x28] sm:$0xff] %v19231_v10  ;;  %v13644_v38 = vld [vmem:[%s19222_s14 + $0x28] sm:$0x3f]  ;;  %5616 = vst [vmem:[#allocation3 + $0x38] sm:$0x3f] %v13111_v23  ;;  %v5599_v24 = vld [vmem:[%s19222_s14] sm:$0xff] }
 0x300   : >> { %14923 = vmatpush3.bf16.msra.mxu0 %v16577_v36  ;;  %v13648_v4 = vld [vmem:[%s19222_s14 + $0x48] sm:$0x3f]  ;;  %v13642_v59 = vld [vmem:[%s19222_s14 + $0x18] sm:$0x3f]  ;;  %v16598_v48 = vld [vmem:[%s20976_s2 + $0x70] sm:$0xff]  }
 0x301   : >> { %14945 = vmatpush3.bf16.msra.mxu1 %v16578_v6  ;;  %14924 = vmatprep.subr.bf16.mxu0 %v16579_v32  ;;  %v13646_v56 = vld [vmem:[%s19222_s14 + $0x38] sm:$0x3f]  ;;  %v16599_v43 = vld [vmem:[%s20976_s2 + $0x270] sm:$0xff]   ;;  %v16601_v6 = vld [vmem:[%s20976_s2 + $0x68] sm:$0xff]  }
 0x302   : >> { %14946 = vmatprep.subr.bf16.mxu1 %v16580_v47  ;;  %v5637_v3 = vld [vmem:[#allocation3 + $0x8] sm:$0x3f]  ;;  %v16596_v41 = vld [vmem:[%s20976_s2 + $0x278] sm:$0xff]   ;;  %v16600_v21 = vld [vmem:[%s20976_s2 + $0x30] sm:$0xff]  }
 0x303   : >> { %v19243_v27 = vpack.c.bf16 %v5637_v3, %v13106_v1  ;;  %7971 = vst [vmem:[#allocation3 + $0x8] sm:$0x3f] %v13644_v38  ;;  %v16597_v18 = vld [vmem:[%s20976_s2 + $0x38] sm:$0xff]   ;;  %v16612_v1 = vld [vmem:[%s20976_s2 + $0x10] sm:$0xff]   ;;  %v16613_v5 = vld [vmem:[%s20976_s2 + $0x48] sm:$0xff]  }
 0x304   : >> { %14925 = vmatpush3.bf16.msra.mxu0 %v16581_v9  ;;  %v5639_v40 = vld [vmem:[#allocation3 + $0x10] sm:$0x3f]  ;;  %v16602_v9 = vld [vmem:[%s20976_s2 + $0x268] sm:$0xff]   ;;  %v16616_v23 = vld [vmem:[%s20976_s2 + $0x40] sm:$0xff]  }
 0x305   : >> { %14947 = vmatpush3.bf16.msra.mxu1 %v16582_v11  ;;  %14926 = vmatprep.subr.bf16.mxu0 %v16583_v46  ;;  %v19246_v37 = vpack.c.bf16 %v5639_v40, %v13114_v25  ;;  %7979 = vst [vmem:[#allocation3 + $0x10] sm:$0x3f] %v13648_v4  ;;  %v5815_v33 = vshrl.u32 %v19243_v27, 16  ;;  %v5817_v31 = vshll.u32 %v19243_v27, 16  ;;  %v5636_v61 = vld [vmem:[#allocation3] sm:$0x3f] }
 0x306   : >> { %14948 = vmatprep.subr.bf16.mxu1 %v16584_v57  ;;  %v5638_v35 = vld [vmem:[#allocation3 + $0x38] sm:$0x3f]  ;;  %v19252_v16 = vpack.c.bf16 %v5636_v61, %v5599_v24  ;;  %7967 = vst [vmem:[#allocation3] sm:$0x3f] %v13642_v59  ;;  %v16603_v46 = vld [vmem:[%s20976_s2 + $0x28] sm:$0xff]   ;;  %v16604_v57 = vld [vmem:[%s20976_s2 + $0x60] sm:$0xff]  }
 0x307   : >> { %v5829_v13 = vshrl.u32 %v19246_v37, 16  ;;  %v5831_v29 = vshll.u32 %v19246_v37, 16  ;;  %v19254_v62 = vpack.c.bf16 %v5638_v35, %v13643_v28  ;;  %7975 = vst [vmem:[#allocation3 + $0x38] sm:$0x3f] %v13646_v56  ;;  %v5819_v17 = vrot.slane %v5817_v31, 1  ;;  %v16614_v25 = vld [vmem:[%s20976_s2 + $0x248] sm:$0xff]  }
 0x308   : >> { %14927 = vmatpush3.bf16.msra.mxu0 %v16585_v26  ;;  %v5808_v34 = vshrl.u32 %v19252_v16, 16  ;;  %v5810_v44 = vshll.u32 %v19252_v16, 16  ;;  %v19277_v50 = vrot.slane %v5815_v33, 1  ;;  %v19288_v36 = vrot.slane %v5817_v31, 2  ;;  %v16605_v26 = vld [vmem:[%s20976_s2 + $0x260] sm:$0xff]   ;;  %v16615_v19 = vld [vmem:[%s20976_s2 + $0x8] sm:$0xff]  }
 0x309   : >> { %14949 = vmatpush3.bf16.msra.mxu1 %v16586_v12  ;;  %14928 = vmatprep.subr.bf16.mxu0 %v16587_v7  ;;  %v5833_v55 = vrot.slane %v5831_v29, 1  ;;  %v5820_v63 = vor.u32 %v5819_v17, %v5815_v33  ;;  %v5822_v20 = vshrl.u32 %v19254_v62, 16  ;;  %v5824_v30 = vshll.u32 %v19254_v62, 16  ;;  %v16606_v12 = vld [vmem:[%s20976_s2 + $0x20] sm:$0xff]   ;;  %v16607_v7 = vld [vmem:[%s20976_s2 + $0x58] sm:$0xff]  }
 0x30a   : >> { %14950 = vmatprep.subr.bf16.mxu1 %v16588_v39  ;;  %v5812_v0 = vrot.slane %v5810_v44, 1  ;;  %v19279_v52 = vrot.slane %v5808_v34, 1  ;;  %v19295_v32 = vrot.slane %v5810_v44, 2  ;;  %v7120_v47 = vor.u32 %v19288_v36, %v19277_v50  ;;  %v13119_v39 = vld [vmem:[%s19222_s14 + $0x48] sm:$0x3f]  ;;  %v16618_v24 = vld [vmem:[%s20976_s2] sm:$0xff]  }
 0x30b   : >> { %v5834_v49 = vor.u32 %v5833_v55, %v5829_v13  ;;  %6119 = vmatprep.mubr.bf16.mxu0 %v5820_v63  ;;  %v5826_v42 = vrot.slane %v5824_v30, 1  ;;  %5630 = vst [vmem:[#allocation3 + $0x40] sm:$0x3f] %v13119_v39  ;;  %v19368_v3 = vrot.slane %v5829_v13, 1  ;;  %v16619_v59 = vld [vmem:[%s20976_s2 + $0xf8] sm:$0xff]   ;;  %v19376_v40 = vrot.slane %v5822_v20, 1 }
 0x30c   : >> { %14929 = vmatpush3.bf16.msra.mxu0 %v16589_v22  ;;  %v5813_v8 = vor.u32 %v5812_v0, %v5808_v34  ;;  %v7117_v11 = vor.u32 %v19295_v32, %v19279_v52  ;;  %v13651_v22 = vld [vmem:[%s19222_s14 + $0x50] sm:$0xff]  ;;  %v16620_v33 = vld [vmem:[%s20976_s2 + $0xb8] sm:$0xff]   ;;  %v19383_v31 = vrot.slane %v5831_v29, 2  ;;  %v19390_v35 = vrot.slane %v5824_v30, 2  ;;  %v16625_v30 = vld [vmem:[%s20976_s2 + $0xe8] sm:$0xff]  }
 0x30d   : >> { %14951 = vmatpush3.bf16.msra.mxu1 %v16590_v45  ;;  %14930 = vmatprep.subr.bf16.mxu0 %v16591_v54  ;;  %v5827_v51 = vor.u32 %v5826_v42, %v5822_v20  ;;  %v16608_v45 = vld [vmem:[%s20976_s2 + $0x258] sm:$0xff]   ;;  %7985 = vst [vmem:[#allocation3 + $0x20] sm:$0xff] %v13651_v22  ;;  %v16622_v13 = vld [vmem:[%s20976_s2 + $0xf0] sm:$0xff]   ;;  %v16627_v0 = vld [vmem:[%s20976_s2 + $0x128] sm:$0xff]  }
 0x30e   : >> { %14952 = vmatprep.subr.bf16.mxu1 %v16592_v14  ;;  %6160 = vmatprep.mubr.bf16.mxu1 %v5834_v49  ;;  %v16609_v54 = vld [vmem:[%s20976_s2 + $0x18] sm:$0xff]   ;;  %v16610_v14 = vld [vmem:[%s20976_s2 + $0x50] sm:$0xff]   ;;  %v7126_v17 = vor.u32 %v19383_v31, %v19368_v3  ;;  %v7123_v55 = vor.u32 %v19390_v35, %v19376_v40  ;;  %v16626_v49 = vld [vmem:[%s20976_s2 + $0xa8] sm:$0xff]  }
 0x30f   : >> { %v16621_v61 = vld [vmem:[%s20976_s2 + $0x138] sm:$0xff]   ;;  %v16623_v44 = vld [vmem:[%s20976_s2 + $0xb0] sm:$0xff]   ;;  %v16628_v42 = vld [vmem:[%s20976_s2 + $0xe0] sm:$0xff]  }
 0x310   : >> { %14931 = vmatpush3.bf16.msra.mxu0 %v16593_v2  ;;  %v16611_v2 = vld [vmem:[%s20976_s2 + $0x250] sm:$0xff]   ;;  %v16643_v39 = vld [vmem:[%s20976_s2 + $0x2f8] sm:$0xff]   ;;  %v16685_v50 = vld [vmem:[%s20976_s2 + $0x3a0] sm:$0xff]  }
 0x311   : >> { %14953 = vmatpush3.bf16.msra.mxu1 %v16594_v60  ;;  %15714 = vmatprep.subr.bf16.mxu0 %v17083_v53  ;;  %v13652_v60 = vld [vmem:[%s19222_s14 + $0x58] sm:$0x3f]  ;;  %v16624_v63 = vld [vmem:[%s20976_s2 + $0x130] sm:$0xff]   ;;  %v16686_v36 = vld [vmem:[%s20976_s2 + $0x3e0] sm:$0xff]  }
 0x312   : >> { %14969 = vmatprep.subr.bf16.mxu1 %v16595_v15  ;;  %v5640_v28 = vld [vmem:[#allocation3 + $0x40] sm:$0x3f]  ;;  %v16644_v22 = vld [vmem:[%s20976_s2 + $0x378] sm:$0xff]   ;;  %v16706_v52 = vld [vmem:[%s20976_s2 + $0x468] sm:$0xff]  }
 0x313   : >> { %6120 = vmatmul.mubr.bf16.vlgmr.msra.gmra.mxu0 %v5813_v8  ;;  %v19349_v58 = vpack.c.bf16 %v5640_v28, %v19231_v10  ;;  %7986 = vst [vmem:[#allocation3 + $0x40] sm:$0x3f] %v13652_v60  ;;  %v16617_v10 = vld [vmem:[%s20976_s2 + $0x240] sm:$0xff]   ;;  %v6660_v60 = vrot.slane %v19243_v27, 1  ;;  %v16650_v28 = vld [vmem:[%s20976_s2 + $0x330] sm:$0xff]   ;;  %v16707_v32 = vld [vmem:[%s20976_s2 + $0x4e8] sm:$0xff]  }
 0x314   : >> { %6161 = vmatmul.mubr.bf16.vlgmr.msra.gmra.mxu1 %v5827_v51  ;;  %15715 = vmatpush3.bf16.msra.mxu0 %v16596_v41  ;;  %v16629_v41 = vld [vmem:[%s20976_s2 + $0xa0] sm:$0xff]   ;;  %v16632_v51 = vld [vmem:[%s20976_s2 + $0x98] sm:$0xff]   ;;  %v16733_v40 = vld [vmem:[%s20976_s2 + $0x528] sm:$0xff]  }
 0x315   : >> { %14970 = vmatpush3.bf16.msra.mxu1 %v16597_v18  ;;  %15716 = vmatprep.subr.bf16.mxu0 %v17083_v53  ;;  %v5838_v38 = vshll.u32 %v19349_v58, 16  ;;  %v5836_v15 = vshrl.u32 %v19349_v58, 16  ;;  %v16630_v8 = vld [vmem:[%s20976_s2 + $0x120] sm:$0xff]   ;;  %v16631_v18 = vld [vmem:[%s20976_s2 + $0xd8] sm:$0xff]   ;;  %v16734_v35 = vld [vmem:[%s20976_s2 + $0x5a8] sm:$0xff]  }
 0x316   : >> { %14971 = vmatprep.subr.bf16.mxu1 %v16598_v48  ;;  %15730 = vmatprep.mubr.msk.bf16.mxu0 %vm17084_vm5, %v17083_v53  ;;  %v16633_v48 = vld [vmem:[%s20976_s2 + $0x118] sm:$0xff]   ;;  %v16709_v3 = vld [vmem:[%s20976_s2 + $0x460] sm:$0xff]  }
 0x317   : >> { %6482 = vmatprep.mubr.bf16.mxu1 %v19243_v27  ;;  %v5840_v4 = vrot.slane %v5838_v38, 1  ;;  %v19397_v29 = vrot.slane %v5836_v15, 1  ;;  %v19402_v34 = vrot.slane %v5838_v38, 2  ;;  %v16654_v38 = vld [vmem:[%s20976_s2 + $0x328] sm:$0xff]   ;;  %v16710_v31 = vld [vmem:[%s20976_s2 + $0x4e0] sm:$0xff]  }
 0x318   : >> { %15717 = vmatpush3.bf16.msra.mxu0 %v16599_v43  ;;  %v16634_v43 = vld [vmem:[%s20976_s2 + $0xd0] sm:$0xff]  }
 0x319   : >> { %14972 = vmatpush3.bf16.msra.mxu1 %v16600_v21  ;;  %15718 = vmatprep.subr.bf16.mxu0 %v17083_v53  ;;  %v5841_v56 = vor.u32 %v5840_v4, %v5836_v15  ;;  %v7129_v20 = vor.u32 %v19402_v34, %v19397_v29  ;;  %v16635_v21 = vld [vmem:[%s20976_s2 + $0x90] sm:$0xff]   ;;  %v16656_v15 = vld [vmem:[%s20976_s2 + $0x360] sm:$0xff]  }
 0x31a   : >> { %14973 = vmatprep.subr.bf16.mxu1 %v16601_v6  ;;  %v16636_v6 = vld [vmem:[%s20976_s2 + $0x110] sm:$0xff]   ;;  %v16657_v4 = vld [vmem:[%s20976_s2 + $0x2a0] sm:$0xff]  }
 0x31b   : >> { %v16735_v29 = vld [vmem:[%s20976_s2 + $0x560] sm:$0xff]  }
 0x31c   : >> { %15719 = vmatpush3.bf16.msra.mxu0 %v16602_v9  ;;  %v16637_v9 = vld [vmem:[%s20976_s2 + $0xc8] sm:$0xff]   ;;  %v16737_v34 = vld [vmem:[%s20976_s2 + $0x520] sm:$0xff]  }
 0x31d   : >> { %14974 = vmatpush3.bf16.msra.mxu1 %v16603_v46  ;;  %15720 = vmatprep.subr.bf16.mxu0 %v17083_v53  ;;  %v16638_v46 = vld [vmem:[%s20976_s2 + $0x88] sm:$0xff]  }
 0x31e   : >> { %14975 = vmatprep.subr.bf16.mxu1 %v16604_v57  ;;  %v16639_v57 = vld [vmem:[%s20976_s2 + $0x108] sm:$0xff]  }
 0x320   : >> { %15721 = vmatpush3.bf16.msra.mxu0 %v16605_v26  ;;  %v16640_v26 = vld [vmem:[%s20976_s2 + $0xc0] sm:$0xff]  }
 0x321   : >> { %14976 = vmatpush3.bf16.msra.mxu1 %v16606_v12  ;;  %15722 = vmatprep.subr.bf16.mxu0 %v17083_v53  ;;  %v16641_v12 = vld [vmem:[%s20976_s2 + $0x80] sm:$0xff]  }
 0x322   : >> { %14977 = vmatprep.subr.bf16.mxu1 %v16607_v7  ;;  %v16642_v7 = vld [vmem:[%s20976_s2 + $0x100] sm:$0xff]  }
 0x324   : >> { %15723 = vmatpush3.bf16.msra.mxu0 %v16608_v45  ;;  %v16645_v45 = vld [vmem:[%s20976_s2 + $0x2b8] sm:$0xff]  }
 0x325   : >> { %14978 = vmatpush3.bf16.msra.mxu1 %v16609_v54  ;;  %15724 = vmatprep.subr.bf16.mxu0 %v17083_v53  ;;  %v16646_v54 = vld [vmem:[%s20976_s2 + $0x338] sm:$0xff]  }
 0x326   : >> { %14979 = vmatprep.subr.bf16.mxu1 %v16610_v14  ;;  %v16647_v14 = vld [vmem:[%s20976_s2 + $0x2f0] sm:$0xff]  }
 0x328   : >> { %15725 = vmatpush3.bf16.msra.mxu0 %v16611_v2  ;;  %v16648_v2 = vld [vmem:[%s20976_s2 + $0x370] sm:$0xff]  }
 0x329   : >> { %14980 = vmatpush3.bf16.msra.mxu1 %v16612_v1  ;;  %15726 = vmatprep.subr.bf16.mxu0 %v17083_v53  ;;  %v16649_v1 = vld [vmem:[%s20976_s2 + $0x2b0] sm:$0xff]  }
 0x32a   : >> { %14981 = vmatprep.subr.bf16.mxu1 %v16613_v5  ;;  %v6662_v5 = vrot.slane %v19246_v37, 1 }
 0x32c   : >> { %15727 = vmatpush3.bf16.msra.mxu0 %v16614_v25  ;;  %v16651_v25 = vld [vmem:[%s20976_s2 + $0x2e8] sm:$0xff]  }
 0x32d   : >> { %14982 = vmatpush3.bf16.msra.mxu1 %v16615_v19  ;;  %15728 = vmatprep.subr.bf16.mxu0 %v17083_v53  ;;  %v16652_v19 = vld [vmem:[%s20976_s2 + $0x368] sm:$0xff]  }
 0x32e   : >> { %14983 = vmatprep.subr.bf16.mxu1 %v16616_v23  ;;  %v16653_v23 = vld [vmem:[%s20976_s2 + $0x2a8] sm:$0xff]  }
 0x330   : >> { %15729 = vmatpush3.bf16.msra.mxu0 %v16617_v10  ;;  %v16655_v10 = vld [vmem:[%s20976_s2 + $0x2e0] sm:$0xff]  }
 0x331   : >> { %14984 = vmatpush3.bf16.msra.mxu1 %v16618_v24  ;;  %14991 = vmatprep.subr.bf16.mxu0 %v16619_v59  ;;  %v16658_v24 = vld [vmem:[%s20976_s2 + $0x320] sm:$0xff]   ;;  %v16659_v59 = vld [vmem:[%s20976_s2 + $0x2d8] sm:$0xff]  }
 0x332   : >> { %15734 = vmatprep.subr.bf16.mxu1 %v17083_v53 }
 0x333   : >> { %15731 = vmatmul.mubr.bf16.vlgmr.msra.gmra.mxu0 %v5841_v56  ;;  %v16660_v56 = vld [vmem:[%s20976_s2 + $0x358] sm:$0xff]  }
 0x334   : >> { %6483 = vmatmul.mubr.bf16.vlgmr.msra.gmra.mxu1 %v19252_v16  ;;  %14992 = vmatpush3.bf16.msra.mxu0 %v16620_v33  ;;  %v16661_v33 = vld [vmem:[%s20976_s2 + $0x298] sm:$0xff]  }
 0x335   : >> { %15735 = vmatpush3.bf16.msra.mxu1 %v16621_v61  ;;  %14993 = vmatprep.subr.bf16.mxu0 %v16622_v13  ;;  %v16662_v61 = vld [vmem:[%s20976_s2 + $0x318] sm:$0xff]   ;;  %v16663_v13 = vld [vmem:[%s20976_s2 + $0x2d0] sm:$0xff]  }
 0x336   : >> { %15736 = vmatprep.subr.bf16.mxu1 %v17083_v53  ;;  %6523 = vmatprep.mubr.bf16.mxu0 %v19246_v37 }
 0x337   : >> { %15750 = vmatprep.mubr.msk.bf16.mxu1 %vm17084_vm5, %v17083_v53 }
 0x338   : >> { %14994 = vmatpush3.bf16.msra.mxu0 %v16623_v44  ;;  %v16664_v44 = vld [vmem:[%s20976_s2 + $0x350] sm:$0xff]  }
 0x339   : >> { %15737 = vmatpush3.bf16.msra.mxu1 %v16624_v63  ;;  %14995 = vmatprep.subr.bf16.mxu0 %v16625_v30  ;;  %v16665_v63 = vld [vmem:[%s20976_s2 + $0x290] sm:$0xff]  }
 0x33a   : >> { %15738 = vmatprep.subr.bf16.mxu1 %v17083_v53  ;;  %v16666_v30 = vld [vmem:[%s20976_s2 + $0x310] sm:$0xff]  }
 0x33c   : >> { %14996 = vmatpush3.bf16.msra.mxu0 %v16626_v49  ;;  %v16667_v49 = vld [vmem:[%s20976_s2 + $0x2c8] sm:$0xff]  }
 0x33d   : >> { %15739 = vmatpush3.bf16.msra.mxu1 %v16627_v0  ;;  %14997 = vmatprep.subr.bf16.mxu0 %v16628_v42  ;;  %v16668_v0 = vld [vmem:[%s20976_s2 + $0x348] sm:$0xff]  }
 0x33e   : >> { %15740 = vmatprep.subr.bf16.mxu1 %v17083_v53  ;;  %v16669_v42 = vld [vmem:[%s20976_s2 + $0x288] sm:$0xff]  }
 0x340   : >> { %14998 = vmatpush3.bf16.msra.mxu0 %v16629_v41  ;;  %v16670_v41 = vld [vmem:[%s20976_s2 + $0x308] sm:$0xff]  }
 0x341   : >> { %15741 = vmatpush3.bf16.msra.mxu1 %v16630_v8  ;;  %14999 = vmatprep.subr.bf16.mxu0 %v16631_v18  ;;  %v16671_v8 = vld [vmem:[%s20976_s2 + $0x2c0] sm:$0xff]  }
 0x342   : >> { %15742 = vmatprep.subr.bf16.mxu1 %v17083_v53  ;;  %v16672_v18 = vld [vmem:[%s20976_s2 + $0x340] sm:$0xff]  }
 0x344   : >> { %15000 = vmatpush3.bf16.msra.mxu0 %v16632_v51  ;;  %v16673_v51 = vld [vmem:[%s20976_s2 + $0x280] sm:$0xff]  }
 0x345   : >> { %15743 = vmatpush3.bf16.msra.mxu1 %v16633_v48  ;;  %15001 = vmatprep.subr.bf16.mxu0 %v16634_v43  ;;  %v16674_v48 = vld [vmem:[%s20976_s2 + $0x300] sm:$0xff]   ;;  %v16675_v43 = vld [vmem:[%s20976_s2 + $0x438] sm:$0xff]  }
 0x346   : >> { %15744 = vmatprep.subr.bf16.mxu1 %v17083_v53 }
 0x348   : >> { %15002 = vmatpush3.bf16.msra.mxu0 %v16635_v21  ;;  %v6659_v21 = vrot.slane %v19252_v16, 1 }
 0x349   : >> { %15745 = vmatpush3.bf16.msra.mxu1 %v16636_v6  ;;  %15003 = vmatprep.subr.bf16.mxu0 %v16637_v9  ;;  %v6661_v6 = vrot.slane %v19254_v62, 1  ;;  %v16676_v9 = vld [vmem:[%s20976_s2 + $0x3b8] sm:$0xff]  }
 0x34a   : >> { %15746 = vmatprep.subr.bf16.mxu1 %v17083_v53 }
 0x34c   : >> { %15004 = vmatpush3.bf16.msra.mxu0 %v16638_v46  ;;  %v16677_v46 = vld [vmem:[%s20976_s2 + $0x3f8] sm:$0xff]  }
 0x34d   : >> { %15747 = vmatpush3.bf16.msra.mxu1 %v16639_v57  ;;  %15005 = vmatprep.subr.bf16.mxu0 %v16640_v26  ;;  %v16678_v57 = vld [vmem:[%s20976_s2 + $0x430] sm:$0xff]  }
 0x34e   : >> { %15748 = vmatprep.subr.bf16.mxu1 %v17083_v53  ;;  %v16679_v26 = vld [vmem:[%s20976_s2 + $0x3b0] sm:$0xff]  }
 0x350   : >> { %15006 = vmatpush3.bf16.msra.mxu0 %v16641_v12  ;;  %v16680_v12 = vld [vmem:[%s20976_s2 + $0x3f0] sm:$0xff]  }
 0x351   : >> { %15749 = vmatpush3.bf16.msra.mxu1 %v16642_v7  ;;  %15022 = vmatprep.subr.bf16.mxu0 %v16643_v39  ;;  %v16681_v7 = vld [vmem:[%s20976_s2 + $0x428] sm:$0xff]  }
 0x352   : >> { %15044 = vmatprep.subr.bf16.mxu1 %v16644_v22  ;;  %v16682_v39 = vld [vmem:[%s20976_s2 + $0x3a8] sm:$0xff]  }
 0x353   : >> { %6524 = vmatmul.mubr.bf16.vlgmr.msra.gmra.mxu0 %v19254_v62  ;;  %v16683_v22 = vld [vmem:[%s20976_s2 + $0x3e8] sm:$0xff]  }
 0x354   : >> { %15751 = vmatmul.mubr.bf16.vlgmr.msra.gmra.mxu1 %v19349_v58  ;;  %15023 = vmatpush3.bf16.msra.mxu0 %v16645_v45  ;;  %v16684_v45 = vld [vmem:[%s20976_s2 + $0x420] sm:$0xff]  }
 0x355   : >> { %15045 = vmatpush3.bf16.msra.mxu1 %v16646_v54  ;;  %15024 = vmatprep.subr.bf16.mxu0 %v16647_v14  ;;  %v16688_v54 = vld [vmem:[%s20976_s2 + $0x398] sm:$0xff]  }
 0x356   : >> { %15046 = vmatprep.subr.bf16.mxu1 %v16648_v2  ;;  %6941 = vmatprep.mubr.bf16.mxu0 %v6660_v60  ;;  %v16689_v14 = vld [vmem:[%s20976_s2 + $0x3d8] sm:$0xff]   ;;  %v16690_v2 = vld [vmem:[%s20976_s2 + $0x410] sm:$0xff]  }
 0x357   : >> { %6982 = vmatprep.mubr.bf16.mxu1 %v6662_v5  ;;  %v16691_v60 = vld [vmem:[%s20976_s2 + $0x390] sm:$0xff]   ;;  %v16693_v5 = vld [vmem:[%s20976_s2 + $0x408] sm:$0xff]  }
 0x358   : >> { %15025 = vmatpush3.bf16.msra.mxu0 %v16649_v1  ;;  %v16692_v1 = vld [vmem:[%s20976_s2 + $0x3d0] sm:$0xff]  }
 0x359   : >> { %15047 = vmatpush3.bf16.msra.mxu1 %v16650_v28  ;;  %15026 = vmatprep.subr.bf16.mxu0 %v16651_v25  ;;  %v16694_v28 = vld [vmem:[%s20976_s2 + $0x388] sm:$0xff]  }
 0x35a   : >> { %15048 = vmatprep.subr.bf16.mxu1 %v16652_v19  ;;  %v16695_v25 = vld [vmem:[%s20976_s2 + $0x3c8] sm:$0xff]   ;;  %v16696_v19 = vld [vmem:[%s20976_s2 + $0x400] sm:$0xff]  }
 0x35c   : >> { %15027 = vmatpush3.bf16.msra.mxu0 %v16653_v23  ;;  %v16697_v23 = vld [vmem:[%s20976_s2 + $0x380] sm:$0xff]  }
 0x35d   : >> { %15049 = vmatpush3.bf16.msra.mxu1 %v16654_v38  ;;  %15028 = vmatprep.subr.bf16.mxu0 %v16655_v10  ;;  %v16698_v38 = vld [vmem:[%s20976_s2 + $0x3c0] sm:$0xff]   ;;  %v16699_v10 = vld [vmem:[%s20976_s2 + $0x4b8] sm:$0xff]  }
 0x35e   : >> { %15050 = vmatprep.subr.bf16.mxu1 %v16656_v15  ;;  %v6663_v15 = vrot.slane %v19349_v58, 1 }
 0x360   : >> { %15029 = vmatpush3.bf16.msra.mxu0 %v16657_v4  ;;  %v16700_v4 = vld [vmem:[%s20976_s2 + $0x478] sm:$0xff]  }
 0x361   : >> { %15051 = vmatpush3.bf16.msra.mxu1 %v16658_v24  ;;  %15030 = vmatprep.subr.bf16.mxu0 %v16659_v59  ;;  %v16701_v24 = vld [vmem:[%s20976_s2 + $0x4f8] sm:$0xff]   ;;  %v16702_v59 = vld [vmem:[%s20976_s2 + $0x4b0] sm:$0xff]  }
 0x362   : >> { %15052 = vmatprep.subr.bf16.mxu1 %v16660_v56  ;;  %v16703_v56 = vld [vmem:[%s20976_s2 + $0x470] sm:$0xff]  }
 0x364   : >> { %15031 = vmatpush3.bf16.msra.mxu0 %v16661_v33  ;;  %v16704_v33 = vld [vmem:[%s20976_s2 + $0x4f0] sm:$0xff]  }
 0x365   : >> { %15053 = vmatpush3.bf16.msra.mxu1 %v16662_v61  ;;  %15032 = vmatprep.subr.bf16.mxu0 %v16663_v13  ;;  %v16705_v61 = vld [vmem:[%s20976_s2 + $0x4a8] sm:$0xff]   ;;  %v16712_v13 = vld [vmem:[%s20976_s2 + $0x458] sm:$0xff]  }
 0x366   : >> { %15054 = vmatprep.subr.bf16.mxu1 %v16664_v44  ;;  %v16713_v44 = vld [vmem:[%s20976_s2 + $0x4d8] sm:$0xff]  }
 0x368   : >> { %15033 = vmatpush3.bf16.msra.mxu0 %v16665_v63  ;;  %v16714_v63 = vld [vmem:[%s20976_s2 + $0x490] sm:$0xff]  }
 0x369   : >> { %15055 = vmatpush3.bf16.msra.mxu1 %v16666_v30  ;;  %15034 = vmatprep.subr.bf16.mxu0 %v16667_v49  ;;  %v16715_v30 = vld [vmem:[%s20976_s2 + $0x450] sm:$0xff]  }
 0x36a   : >> { %15056 = vmatprep.subr.bf16.mxu1 %v16668_v0  ;;  %v16716_v49 = vld [vmem:[%s20976_s2 + $0x4d0] sm:$0xff]   ;;  %v16717_v0 = vld [vmem:[%s20976_s2 + $0x488] sm:$0xff]  }
 0x36c   : >> { %15035 = vmatpush3.bf16.msra.mxu0 %v16669_v42  ;;  %v16718_v42 = vld [vmem:[%s20976_s2 + $0x448] sm:$0xff]  }
 0x36d   : >> { %15057 = vmatpush3.bf16.msra.mxu1 %v16670_v41  ;;  %15036 = vmatprep.subr.bf16.mxu0 %v16671_v8  ;;  %v16719_v41 = vld [vmem:[%s20976_s2 + $0x4c8] sm:$0xff]   ;;  %v16720_v8 = vld [vmem:[%s20976_s2 + $0x480] sm:$0xff]  }
 0x36e   : >> { %15058 = vmatprep.subr.bf16.mxu1 %v16672_v18  ;;  %v16721_v18 = vld [vmem:[%s20976_s2 + $0x440] sm:$0xff]  }
 0x370   : >> { %15037 = vmatpush3.bf16.msra.mxu0 %v16673_v51  ;;  %v16722_v51 = vld [vmem:[%s20976_s2 + $0x4c0] sm:$0xff]  }
 0x371   : >> { %15059 = vmatpush3.bf16.msra.mxu1 %v16674_v48  ;;  %15754 = vmatprep.subr.bf16.mxu0 %v17083_v53  ;;  %v16723_v48 = vld [vmem:[%s20976_s2 + $0x578] sm:$0xff]  }
 0x372   : >> { %15075 = vmatprep.subr.bf16.mxu1 %v16675_v43  ;;  %v16724_v43 = vld [vmem:[%s20976_s2 + $0x5f8] sm:$0xff]  }
 0x373   : >> { %6942 = vmatmul.mubr.bf16.vlgmr.msra.gmra.mxu0 %v6659_v21  ;;  %v16725_v21 = vld [vmem:[%s20976_s2 + $0x538] sm:$0xff]  }
 0x374   : >> { %6983 = vmatmul.mubr.bf16.vlgmr.msra.gmra.mxu1 %v6661_v6  ;;  %15755 = vmatpush3.bf16.msra.mxu0 %v16676_v9  ;;  %v16726_v6 = vld [vmem:[%s20976_s2 + $0x5b8] sm:$0xff]   ;;  %v16727_v9 = vld [vmem:[%s20976_s2 + $0x570] sm:$0xff]  }
 0x375   : >> { %15076 = vmatpush3.bf16.msra.mxu1 %v16677_v46  ;;  %15756 = vmatprep.subr.bf16.mxu0 %v17083_v53  ;;  %v16728_v46 = vld [vmem:[%s20976_s2 + $0x5f0] sm:$0xff]  }
 0x376   : >> { %15077 = vmatprep.subr.bf16.mxu1 %v16678_v57  ;;  %15770 = vmatprep.mubr.msk.bf16.mxu0 %vm17084_vm5, %v17083_v53  ;;  %v7582_v57 = vrot.slane %v19243_v27, 2  ;;  %v16731_v27 = vld [vmem:[%s20976_s2 + $0x568] sm:$0xff]  }
 0x377   : >> { %7407 = vmatprep.mubr.bf16.mxu1 %v7120_v47  ;;  %v16687_v47 = vld [vmem:[%s20976_s2 + $0x418] sm:$0xff]  }
 0x378   : >> { %15757 = vmatpush3.bf16.msra.mxu0 %v16679_v26  ;;  %v16729_v26 = vld [vmem:[%s20976_s2 + $0x530] sm:$0xff]  }
 0x379   : >> { %15078 = vmatpush3.bf16.msra.mxu1 %v16680_v12  ;;  %15758 = vmatprep.subr.bf16.mxu0 %v17083_v53  ;;  %v7584_v12 = vrot.slane %v19246_v37, 2  ;;  %v16732_v37 = vld [vmem:[%s20976_s2 + $0x5e8] sm:$0xff]  }
 0x37a   : >> { %15079 = vmatprep.subr.bf16.mxu1 %v16681_v7  ;;  %v16730_v7 = vld [vmem:[%s20976_s2 + $0x5b0] sm:$0xff]  }
 0x37c   : >> { %15759 = vmatpush3.bf16.msra.mxu0 %v16682_v39  ;;  %v16739_v39 = vld [vmem:[%s20976_s2 + $0x558] sm:$0xff]  }
 0x37d   : >> { %15080 = vmatpush3.bf16.msra.mxu1 %v16683_v22  ;;  %15760 = vmatprep.subr.bf16.mxu0 %v17083_v53  ;;  %v16740_v22 = vld [vmem:[%s20976_s2 + $0x5d8] sm:$0xff]  }
 0x37e   : >> { %15081 = vmatprep.subr.bf16.mxu1 %v16684_v45  ;;  %v16741_v45 = vld [vmem:[%s20976_s2 + $0x518] sm:$0xff]  }
 0x380   : >> { %15761 = vmatpush3.bf16.msra.mxu0 %v16685_v50  ;;  %v16742_v50 = vld [vmem:[%s20976_s2 + $0x598] sm:$0xff]  }
 0x381   : >> { %15082 = vmatpush3.bf16.msra.mxu1 %v16686_v36  ;;  %15762 = vmatprep.subr.bf16.mxu0 %v17083_v53  ;;  %v16743_v36 = vld [vmem:[%s20976_s2 + $0x550] sm:$0xff]  }
 0x382   : >> { %15083 = vmatprep.subr.bf16.mxu1 %v16687_v47  ;;  %v16744_v47 = vld [vmem:[%s20976_s2 + $0x5d0] sm:$0xff]  }
 0x384   : >> { %15763 = vmatpush3.bf16.msra.mxu0 %v16688_v54  ;;  %v16745_v54 = vld [vmem:[%s20976_s2 + $0x510] sm:$0xff]  }
 0x385   : >> { %15084 = vmatpush3.bf16.msra.mxu1 %v16689_v14  ;;  %15764 = vmatprep.subr.bf16.mxu0 %v17083_v53  ;;  %v7988_v14 = vld [vmem:[#allocation3 + $0x30] sm:$0xff] }
 0x386   : >> { %15085 = vmatprep.subr.bf16.mxu1 %v16690_v2  ;;  %v7993_v2 = vld [vmem:[#allocation3 + $0x8] sm:$0x3f] }
 0x388   : >> { %15765 = vmatpush3.bf16.msra.mxu0 %v16691_v60  ;;  %v16746_v60 = vld [vmem:[%s20976_s2 + $0x590] sm:$0xff]  }
 0x389   : >> { %15086 = vmatpush3.bf16.msra.mxu1 %v16692_v1  ;;  %15766 = vmatprep.subr.bf16.mxu0 %v17083_v53  ;;  %v16747_v1 = vld [vmem:[%s20976_s2 + $0x548] sm:$0xff]  }
 0x38a   : >> { %15087 = vmatprep.subr.bf16.mxu1 %v16693_v5  ;;  %v16748_v5 = vld [vmem:[%s20976_s2 + $0x5c8] sm:$0xff]  }
 0x38c   : >> { %15767 = vmatpush3.bf16.msra.mxu0 %v16694_v28  ;;  %v16749_v28 = vld [vmem:[%s20976_s2 + $0x508] sm:$0xff]  }
 0x38d   : >> { %15088 = vmatpush3.bf16.msra.mxu1 %v16695_v25  ;;  %15768 = vmatprep.subr.bf16.mxu0 %v17083_v53  ;;  %v19842_v25 = vpack.c.bf16 %v7993_v2, %v7988_v14  ;;  %v16778_v2 = vld [vmem:[%s20976_s2 + $0x140] sm:$0xff]  }
 0x38e   : >> { %15089 = vmatprep.subr.bf16.mxu1 %v16696_v19  ;;  %v16750_v19 = vld [vmem:[%s20976_s2 + $0x588] sm:$0xff]  }
 0x390   : >> { %15769 = vmatpush3.bf16.msra.mxu0 %v16697_v23  ;;  %v16751_v23 = vld [vmem:[%s20976_s2 + $0x540] sm:$0xff]  }
 0x391   : >> { %15090 = vmatpush3.bf16.msra.mxu1 %v16698_v38  ;;  %15097 = vmatprep.subr.bf16.mxu0 %v16699_v10  ;;  %v16752_v38 = vld [vmem:[%s20976_s2 + $0x5c0] sm:$0xff]   ;;  %v8172_v10 = vshll.u32 %v19842_v25, 16 }
 0x392   : >> { %15774 = vmatprep.subr.bf16.mxu1 %v17083_v53 }
 0x393   : >> { %15771 = vmatmul.mubr.bf16.vlgmr.msra.gmra.mxu0 %v6663_v15  ;;  %v16753_v15 = vld [vmem:[%s20976_s2 + $0x500] sm:$0xff]  }
 0x394   : >> { %7408 = vmatmul.mubr.bf16.vlgmr.msra.gmra.mxu1 %v7117_v11  ;;  %15098 = vmatpush3.bf16.msra.mxu0 %v16700_v4  ;;  %v16708_v11 = vld [vmem:[%s20976_s2 + $0x4a0] sm:$0xff]  }
 0x395   : >> { %15775 = vmatpush3.bf16.msra.mxu1 %v16701_v24  ;;  %15099 = vmatprep.subr.bf16.mxu0 %v16702_v59  ;;  %v16754_v4 = vld [vmem:[%s20976_s2 + $0x580] sm:$0xff]   ;;  %v7581_v24 = vrot.slane %v19252_v16, 2  ;;  %v16755_v59 = vld [vmem:[%s20976_s2 + $0x1b8] sm:$0xff]  }
 0x396   : >> { %15776 = vmatprep.subr.bf16.mxu1 %v17083_v53  ;;  %7448 = vmatprep.mubr.bf16.mxu0 %v7126_v17  ;;  %v16711_v17 = vld [vmem:[%s20976_s2 + $0x498] sm:$0xff]  }
 0x397   : >> { %15790 = vmatprep.mubr.msk.bf16.mxu1 %vm17084_vm5, %v17083_v53  ;;  %v16757_v16 = vld [vmem:[%s20976_s2 + $0x178] sm:$0xff]  }
 0x398   : >> { %15100 = vmatpush3.bf16.msra.mxu0 %v16703_v56  ;;  %v8170_v56 = vshrl.u32 %v19842_v25, 16 }
 0x399   : >> { %15777 = vmatpush3.bf16.msra.mxu1 %v16704_v33  ;;  %15101 = vmatprep.subr.bf16.mxu0 %v16705_v61  ;;  %v8174_v33 = vrot.slane %v8172_v10, 1  ;;  %v7583_v61 = vrot.slane %v19254_v62, 2 }
 0x39a   : >> { %15778 = vmatprep.subr.bf16.mxu1 %v17083_v53 }
 0x39b   : >> { %v8175_v62 = vor.u32 %v8174_v33, %v8170_v56  ;;  %v16783_v33 = vld [vmem:[%s20976_s2 + $0x1f0] sm:$0xff]  }
 0x39c   : >> { %15102 = vmatpush3.bf16.msra.mxu0 %v16706_v52  ;;  %v16756_v52 = vld [vmem:[%s20976_s2 + $0x638] sm:$0xff]  }
 0x39d   : >> { %15779 = vmatpush3.bf16.msra.mxu1 %v16707_v32  ;;  %15103 = vmatprep.subr.bf16.mxu0 %v16708_v11  ;;  %v16758_v32 = vld [vmem:[%s20976_s2 + $0x1b0] sm:$0xff]  }
 0x39e   : >> { %15780 = vmatprep.subr.bf16.mxu1 %v17083_v53 }
 0x3a0   : >> { %15104 = vmatpush3.bf16.msra.mxu0 %v16709_v3 }
 0x3a1   : >> { %15781 = vmatpush3.bf16.msra.mxu1 %v16710_v31  ;;  %15105 = vmatprep.subr.bf16.mxu0 %v16711_v17  ;;  %v16759_v31 = vld [vmem:[%s20976_s2 + $0x630] sm:$0xff]  }
 0x3a2   : >> { %15782 = vmatprep.subr.bf16.mxu1 %v17083_v53 }
 0x3a4   : >> { %15106 = vmatpush3.bf16.msra.mxu0 %v16712_v13  ;;  %v16760_v13 = vld [vmem:[%s20976_s2 + $0x170] sm:$0xff]  }
 0x3a5   : >> { %15783 = vmatpush3.bf16.msra.mxu1 %v16713_v44  ;;  %15107 = vmatprep.subr.bf16.mxu0 %v16714_v63 }
 0x3a6   : >> { %15784 = vmatprep.subr.bf16.mxu1 %v17083_v53 }
 0x3a8   : >> { %15108 = vmatpush3.bf16.msra.mxu0 %v16715_v30  ;;  %v16761_v30 = vld [vmem:[%s20976_s2 + $0x1a8] sm:$0xff]  }
 0x3a9   : >> { %15785 = vmatpush3.bf16.msra.mxu1 %v16716_v49  ;;  %15109 = vmatprep.subr.bf16.mxu0 %v16717_v0 }
 0x3aa   : >> { %15786 = vmatprep.subr.bf16.mxu1 %v17083_v53 }
 0x3ac   : >> { %15110 = vmatpush3.bf16.msra.mxu0 %v16718_v42 }
 0x3ad   : >> { %15787 = vmatpush3.bf16.msra.mxu1 %v16719_v41  ;;  %15111 = vmatprep.subr.bf16.mxu0 %v16720_v8  ;;  %v16762_v41 = vld [vmem:[%s20976_s2 + $0x628] sm:$0xff]  }
 0x3ae   : >> { %15788 = vmatprep.subr.bf16.mxu1 %v17083_v53 }
 0x3b0   : >> { %15112 = vmatpush3.bf16.msra.mxu0 %v16721_v18  ;;  %v16763_v18 = vld [vmem:[%s20976_s2 + $0x168] sm:$0xff]  }
 0x3b1   : >> { %15789 = vmatpush3.bf16.msra.mxu1 %v16722_v51  ;;  %15128 = vmatprep.subr.bf16.mxu0 %v16723_v48 }
 0x3b2   : >> { %15150 = vmatprep.subr.bf16.mxu1 %v16724_v43 }
 0x3b3   : >> { %7449 = vmatmul.mubr.bf16.vlgmr.msra.gmra.mxu0 %v7123_v55  ;;  %v16736_v55 = vld [vmem:[%s20976_s2 + $0x5e0] sm:$0xff]  }
 0x3b4   : >> { %15791 = vmatmul.mubr.bf16.vlgmr.msra.gmra.mxu1 %v7129_v20  ;;  %15129 = vmatpush3.bf16.msra.mxu0 %v16725_v21  ;;  %v16738_v20 = vld [vmem:[%s20976_s2 + $0x5a0] sm:$0xff]  }
 0x3b5   : >> { %15151 = vmatpush3.bf16.msra.mxu1 %v16726_v6  ;;  %15130 = vmatprep.subr.bf16.mxu0 %v16727_v9  ;;  %v16764_v21 = vld [vmem:[%s20976_s2 + $0x1a0] sm:$0xff]  }
 0x3b6   : >> { %15152 = vmatprep.subr.bf16.mxu1 %v16728_v46  ;;  %7863 = vmatprep.mubr.bf16.mxu0 %v7582_v57  ;;  %v16765_v9 = vld [vmem:[%s20976_s2 + $0x620] sm:$0xff]   ;;  %v16767_v57 = vld [vmem:[%s20976_s2 + $0x198] sm:$0xff]  }
 0x3b7   : >> { %7904 = vmatprep.mubr.bf16.mxu1 %v7584_v12  ;;  %v16766_v46 = vld [vmem:[%s20976_s2 + $0x160] sm:$0xff]   ;;  %v16768_v12 = vld [vmem:[%s20976_s2 + $0x618] sm:$0xff]  }
 0x3b8   : >> { %15131 = vmatpush3.bf16.msra.mxu0 %v16729_v26 }
 0x3b9   : >> { %15153 = vmatpush3.bf16.msra.mxu1 %v16730_v7  ;;  %15132 = vmatprep.subr.bf16.mxu0 %v16731_v27  ;;  %v16769_v7 = vld [vmem:[%s20976_s2 + $0x158] sm:$0xff]   ;;  %v16770_v27 = vld [vmem:[%s20976_s2 + $0x190] sm:$0xff]  }
 0x3ba   : >> { %15154 = vmatprep.subr.bf16.mxu1 %v16732_v37  ;;  %v7987_v37 = vld [vmem:[#allocation3 + $0x18] sm:$0xff] }
 0x3bc   : >> { %15133 = vmatpush3.bf16.msra.mxu0 %v16733_v40  ;;  %v7992_v40 = vld [vmem:[#allocation3] sm:$0x3f] }
 0x3bd   : >> { %15155 = vmatpush3.bf16.msra.mxu1 %v16734_v35  ;;  %15134 = vmatprep.subr.bf16.mxu0 %v16735_v29  ;;  %v7990_v35 = vld [vmem:[#allocation3 + $0x28] sm:$0xff]  ;;  %v7995_v29 = vld [vmem:[#allocation3 + $0x10] sm:$0x3f] }
 0x3be   : >> { %15156 = vmatprep.subr.bf16.mxu1 %v16736_v55  ;;  %v16771_v55 = vld [vmem:[%s20976_s2 + $0x610] sm:$0xff]  }
 0x3c0   : >> { %15135 = vmatpush3.bf16.msra.mxu0 %v16737_v34  ;;  %v19929_v34 = vpack.c.bf16 %v7992_v40, %v7987_v37  ;;  %v16797_v40 = vld [vmem:[%s20976_s2 + $0x208] sm:$0xff]  }
 0x3c1   : >> { %15157 = vmatpush3.bf16.msra.mxu1 %v16738_v20  ;;  %15136 = vmatprep.subr.bf16.mxu0 %v16739_v39  ;;  %v16772_v20 = vld [vmem:[%s20976_s2 + $0x150] sm:$0xff]   ;;  %v16773_v39 = vld [vmem:[%s20976_s2 + $0x188] sm:$0xff]  }
 0x3c2   : >> { %15158 = vmatprep.subr.bf16.mxu1 %v16740_v22  ;;  %v19938_v22 = vpack.c.bf16 %v7995_v29, %v7990_v35  ;;  %v16798_v35 = vld [vmem:[%s20976_s2 + $0x1c8] sm:$0xff]  }
 0x3c4   : >> { %15137 = vmatpush3.bf16.msra.mxu0 %v16741_v45  ;;  %v16774_v45 = vld [vmem:[%s20976_s2 + $0x608] sm:$0xff]   ;;  %v8186_v14 = vshll.u32 %v19938_v22, 16 }
 0x3c5   : >> { %15159 = vmatpush3.bf16.msra.mxu1 %v16742_v50  ;;  %15138 = vmatprep.subr.bf16.mxu0 %v16743_v36  ;;  %v16775_v50 = vld [vmem:[%s20976_s2 + $0x148] sm:$0xff]   ;;  %v8165_v36 = vshll.u32 %v19929_v34, 16 }
 0x3c6   : >> { %15160 = vmatprep.subr.bf16.mxu1 %v16744_v47  ;;  %v16776_v47 = vld [vmem:[%s20976_s2 + $0x180] sm:$0xff]  }
 0x3c8   : >> { %15139 = vmatpush3.bf16.msra.mxu0 %v16745_v54  ;;  %v16777_v54 = vld [vmem:[%s20976_s2 + $0x600] sm:$0xff]  }
 0x3c9   : >> { %15161 = vmatpush3.bf16.msra.mxu1 %v16746_v60  ;;  %15140 = vmatprep.subr.bf16.mxu0 %v16747_v1  ;;  %v8163_v60 = vshrl.u32 %v19929_v34, 16  ;;  %v8167_v1 = vrot.slane %v8165_v36, 1 }
 0x3ca   : >> { %15162 = vmatprep.subr.bf16.mxu1 %v16748_v5  ;;  %v16779_v5 = vld [vmem:[%s20976_s2 + $0x238] sm:$0xff]  }
 0x3cc   : >> { %15141 = vmatpush3.bf16.msra.mxu0 %v16749_v28  ;;  %v8184_v28 = vshrl.u32 %v19938_v22, 16 }
 0x3cd   : >> { %15163 = vmatpush3.bf16.msra.mxu1 %v16750_v19  ;;  %15142 = vmatprep.subr.bf16.mxu0 %v16751_v23  ;;  %v8188_v19 = vrot.slane %v8186_v14, 1  ;;  %v7585_v23 = vrot.slane %v19349_v58, 2 }
 0x3ce   : >> { %15164 = vmatprep.subr.bf16.mxu1 %v16752_v38  ;;  %v16780_v38 = vld [vmem:[%s20976_s2 + $0x1f8] sm:$0xff]  }
 0x3cf   : >> { %v8189_v58 = vor.u32 %v8188_v19, %v8184_v28  ;;  %v16804_v19 = vld [vmem:[%s20976_s2 + $0xf8] sm:$0xff]  }
 0x3d0   : >> { %15143 = vmatpush3.bf16.msra.mxu0 %v16753_v15  ;;  %v8168_v15 = vor.u32 %v8167_v1, %v8163_v60 }
 0x3d1   : >> { %15165 = vmatpush3.bf16.msra.mxu1 %v16754_v4  ;;  %15794 = vmatprep.subr.bf16.mxu0 %v17083_v53  ;;  %v16781_v4 = vld [vmem:[%s20976_s2 + $0x278] sm:$0xff]  }
 0x3d2   : >> { %15181 = vmatprep.subr.bf16.mxu1 %v16755_v59 }
 0x3d3   : >> { %v14932_v11 = vpop.f32.mrf.mxu0  ;;  %7864 = vmatmul.mubr.bf16.vlgmr.msra.gmra.mxu0 %v7581_v24  ;;  %v16782_v24 = vld [vmem:[%s20976_s2 + $0x230] sm:$0xff]  }
 0x3d4   : >> { %v14954_v3 = vpop.f32.mrf.mxu1  ;;  %7905 = vmatmul.mubr.bf16.vlgmr.msra.gmra.mxu1 %v7583_v61  ;;  %15795 = vmatpush3.bf16.msra.mxu0 %v16756_v52 }
 0x3d5   : >> { %15182 = vmatpush3.bf16.msra.mxu1 %v16757_v16  ;;  %v14933_v17 = vpop.f32.mrf.mxu0  ;;  %15796 = vmatprep.subr.bf16.mxu0 %v17083_v53  ;;  %v16784_v16 = vld [vmem:[%s20976_s2 + $0x270] sm:$0xff]  }
 0x3d6   : >> { %v14934_v44 = vadd.f32 %v14933_v17, %v14932_v11  ;;  %v14955_v63 = vpop.f32.mrf.mxu1  ;;  %15183 = vmatprep.subr.bf16.mxu1 %v16758_v32  ;;  %15810 = vmatprep.mubr.msk.bf16.mxu0 %vm17084_vm5, %v17083_v53  ;;  %v16785_v11 = vld [vmem:[%s20976_s2 + $0x228] sm:$0xff]  }
 0x3d7   : >> { %v14956_v49 = vadd.f32 %v14955_v63, %v14954_v3  ;;  %v14935_v0 = vpop.f32.mrf.mxu0  ;;  %8474 = vmatprep.mubr.bf16.mxu1 %v8175_v62  ;;  %v16786_v17 = vld [vmem:[%s20976_s2 + $0x1e8] sm:$0xff]  }
 0x3d8   : >> { %v14957_v42 = vpop.f32.mrf.mxu1  ;;  %15797 = vmatpush3.bf16.msra.mxu0 %v16759_v31  ;;  %v16787_v63 = vld [vmem:[%s20976_s2 + $0x268] sm:$0xff]  }
 0x3d9   : >> { %15184 = vmatpush3.bf16.msra.mxu1 %v16760_v13  ;;  %v14936_v8 = vpop.f32.mrf.mxu0  ;;  %15798 = vmatprep.subr.bf16.mxu0 %v17083_v53  ;;  %v19899_v51 = vadd.f32 %v14956_v49, %v14934_v44 }
 0x3da   : >> { %v14937_v48 = vadd.f32 %v14936_v8, %v14935_v0  ;;  %v14958_v43 = vpop.f32.mrf.mxu1  ;;  %15185 = vmatprep.subr.bf16.mxu1 %v16761_v30  ;;  %v16788_v0 = vld [vmem:[%s20976_s2 + $0x220] sm:$0xff]  }
 0x3db   : >> { %v14959_v6 = vadd.f32 %v14958_v43, %v14957_v42  ;;  %v16789_v8 = vld [vmem:[%s20976_s2 + $0x1e0] sm:$0xff]   ;;  %v16792_v43 = vld [vmem:[%s20976_s2 + $0x1d8] sm:$0xff]  }
 0x3dc   : >> { %15799 = vmatpush3.bf16.msra.mxu0 %v16762_v41 }
 0x3dd   : >> { %15186 = vmatpush3.bf16.msra.mxu1 %v16763_v18  ;;  %15800 = vmatprep.subr.bf16.mxu0 %v17083_v53  ;;  %v19914_v26 = vadd.f32 %v14959_v6, %v14937_v48  ;;  %v16790_v18 = vld [vmem:[%s20976_s2 + $0x260] sm:$0xff]   ;;  %v16791_v48 = vld [vmem:[%s20976_s2 + $0x218] sm:$0xff]  }
 0x3de   : >> { %15187 = vmatprep.subr.bf16.mxu1 %v16764_v21  ;;  %v7989_v21 = vld [vmem:[#allocation3 + $0x48] sm:$0xff]  ;;  %v16793_v6 = vld [vmem:[%s20976_s2 + $0x258] sm:$0xff]  }
 0x3e0   : >> { %15801 = vmatpush3.bf16.msra.mxu0 %v16765_v9  ;;  %v16794_v9 = vld [vmem:[%s20976_s2 + $0x210] sm:$0xff]  }
 0x3e1   : >> { %15188 = vmatpush3.bf16.msra.mxu1 %v16766_v46  ;;  %15802 = vmatprep.subr.bf16.mxu0 %v17083_v53  ;;  %v7994_v46 = vld [vmem:[#allocation3 + $0x38] sm:$0x3f] }
 0x3e2   : >> { %15189 = vmatprep.subr.bf16.mxu1 %v16767_v57  ;;  %v7991_v57 = vld [vmem:[#allocation3 + $0x20] sm:$0xff] }
 0x3e4   : >> { %15803 = vmatpush3.bf16.msra.mxu0 %v16768_v12  ;;  %v16795_v12 = vld [vmem:[%s20976_s2 + $0x1d0] sm:$0xff]  }
 0x3e5   : >> { %15190 = vmatpush3.bf16.msra.mxu1 %v16769_v7  ;;  %15804 = vmatprep.subr.bf16.mxu0 %v17083_v53  ;;  %v20034_v7 = vpack.c.bf16 %v7994_v46, %v7989_v21  ;;  %v16818_v46 = vld [vmem:[%s20976_s2 + $0xa0] sm:$0xff]  }
 0x3e6   : >> { %15191 = vmatprep.subr.bf16.mxu1 %v16770_v27  ;;  %v16796_v27 = vld [vmem:[%s20976_s2 + $0x250] sm:$0xff]  }
 0x3e7   : >> { %v8179_v29 = vshll.u32 %v20034_v7, 16 }
 0x3e8   : >> { %15805 = vmatpush3.bf16.msra.mxu0 %v16771_v55  ;;  %v16799_v55 = vld [vmem:[%s20976_s2 + $0x248] sm:$0xff]  }
 0x3e9   : >> { %15192 = vmatpush3.bf16.msra.mxu1 %v16772_v20  ;;  %15806 = vmatprep.subr.bf16.mxu0 %v17083_v53 }
 0x3ea   : >> { %15193 = vmatprep.subr.bf16.mxu1 %v16773_v39  ;;  %v16800_v39 = vld [vmem:[%s20976_s2 + $0x200] sm:$0xff]  }
 0x3ec   : >> { %15807 = vmatpush3.bf16.msra.mxu0 %v16774_v45  ;;  %v16801_v45 = vld [vmem:[%s20976_s2 + $0x1c0] sm:$0xff]  }
 0x3ed   : >> { %15194 = vmatpush3.bf16.msra.mxu1 %v16775_v50  ;;  %15808 = vmatprep.subr.bf16.mxu0 %v17083_v53  ;;  %v16802_v50 = vld [vmem:[%s20976_s2 + $0x240] sm:$0xff]  }
 0x3ee   : >> { %15195 = vmatprep.subr.bf16.mxu1 %v16776_v47  ;;  %v8177_v47 = vshrl.u32 %v20034_v7, 16 }
 0x3f0   : >> { %15809 = vmatpush3.bf16.msra.mxu0 %v16777_v54  ;;  %v8181_v54 = vrot.slane %v8179_v29, 1 }
 0x3f1   : >> { %15196 = vmatpush3.bf16.msra.mxu1 %v16778_v2  ;;  %15203 = vmatprep.subr.bf16.mxu0 %v16779_v5  ;;  %v16803_v5 = vld [vmem:[%s20976_s2 + $0x78] sm:$0xff]  }
 0x3f2   : >> { %15814 = vmatprep.subr.bf16.mxu1 %v17083_v53 }
 0x3f3   : >> { %v6203_v59 = vpop.f32.mrf.mxu0  ;;  %15811 = vmatmul.mubr.bf16.vlgmr.msra.gmra.mxu0 %v7585_v23  ;;  %v8182_v23 = vor.u32 %v8181_v54, %v8177_v47  ;;  %v16831_v54 = vld [vmem:[%s20976_s2 + $0x40] sm:$0xff]  }
 0x3f4   : >> { %v6204_v61 = vadd.f32 %v6203_v59, %v19899_v51  ;;  %v14985_v52 = vpop.f32.mrf.mxu1  ;;  %8475 = vmatmul.mubr.bf16.vlgmr.msra.gmra.mxu1 %v8168_v15  ;;  %15204 = vmatpush3.bf16.msra.mxu0 %v16780_v38  ;;  %v16805_v38 = vld [vmem:[%s20976_s2 + $0x38] sm:$0xff]   ;;  %v16808_v59 = vld [vmem:[%s20976_s2 + $0xf0] sm:$0xff]  }
 0x3f5   : >> { %15815 = vmatpush3.bf16.msra.mxu1 %v16781_v4  ;;  %v15732_v32 = vpop.f32.mrf.mxu0  ;;  %15205 = vmatprep.subr.bf16.mxu0 %v16782_v24  ;;  %v16806_v4 = vld [vmem:[%s20976_s2 + $0xb8] sm:$0xff]   ;;  %v16807_v24 = vld [vmem:[%s20976_s2 + $0x70] sm:$0xff]  }
 0x3f6   : >> { %v14986_v62 = vpop.f32.mrf.mxu1  ;;  %15816 = vmatprep.subr.bf16.mxu1 %v17083_v53  ;;  %8515 = vmatprep.mubr.bf16.mxu0 %v8189_v58  ;;  %v20087_v58 = vrot.slane %v8184_v28, 1  ;;  %v16810_v28 = vld [vmem:[%s20976_s2 + $0xb0] sm:$0xff]  }
 0x3f7   : >> { %v14987_v3 = vadd.f32 %v14986_v62, %v14985_v52  ;;  %v6206_v31 = vpop.f32.mrf.mxu0  ;;  %15830 = vmatprep.mubr.msk.bf16.mxu1 %vm17084_vm5, %v17083_v53  ;;  %v16809_v52 = vld [vmem:[%s20976_s2 + $0x30] sm:$0xff]   ;;  %v20107_v62 = vrot.slane %v8177_v47, 1  ;;  %v16830_v47 = vld [vmem:[%s20976_s2 + $0x88] sm:$0xff]  }
 0x3f8   : >> { %v6207_v13 = vadd.f32 %v6206_v31, %v19914_v26  ;;  %v14988_v44 = vpop.f32.mrf.mxu1  ;;  %15206 = vmatpush3.bf16.msra.mxu0 %v16783_v33  ;;  %v7996_v26 = vld [vmem:[#allocation3 + $0x40] sm:$0x3f]  ;;  %v20094_v33 = vrot.slane %v8186_v14, 2  ;;  %v16811_v14 = vld [vmem:[%s20976_s2 + $0x68] sm:$0xff]  }
 0x3f9   : >> { %v20003_v30 = vadd.f32 %v14987_v3, %v6204_v61  ;;  %15817 = vmatpush3.bf16.msra.mxu1 %v16784_v16  ;;  %v15733_v49 = vpop.f32.mrf.mxu0  ;;  %15207 = vmatprep.subr.bf16.mxu0 %v16785_v11  ;;  %v20039_v37 = vpack.c.bf16 %v7996_v26, %v7991_v57  ;;  %v16819_v57 = vld [vmem:[%s20976_s2 + $0x58] sm:$0xff]  }
 0x3fa   : >> { %v14989_v42 = vpop.f32.mrf.mxu1  ;;  %15818 = vmatprep.subr.bf16.mxu1 %v17083_v53  ;;  %v9479_v32 = vor.u32 %v20094_v33, %v20087_v58  ;;  %v16820_v26 = vld [vmem:[%s20976_s2 + $0xd8] sm:$0xff]   ;;  %v16896_v58 = vld [vmem:[%s20976_s2 + $0x4a0] sm:$0xff]  }
 0x3fb   : >> { %v14990_v41 = vadd.f32 %v14989_v42, %v14988_v44  ;;  %v8193_v20 = vshll.u32 %v20039_v37, 16  ;;  %v8191_v2 = vshrl.u32 %v20039_v37, 16  ;;  %v16814_v42 = vld [vmem:[%s20976_s2 + $0xa8] sm:$0xff]  }
 0x3fc   : >> { %15208 = vmatpush3.bf16.msra.mxu0 %v16786_v17  ;;  %v16812_v17 = vld [vmem:[%s20976_s2 + $0xe8] sm:$0xff]  }
 0x3fd   : >> { %v20015_v51 = vadd.f32 %v14990_v41, %v6207_v13  ;;  %15819 = vmatpush3.bf16.msra.mxu1 %v16787_v63  ;;  %15209 = vmatprep.subr.bf16.mxu0 %v16788_v0  ;;  %v8195_v1 = vrot.slane %v8193_v20, 1  ;;  %v20113_v13 = vrot.slane %v8179_v29, 2  ;;  %v16813_v63 = vld [vmem:[%s20976_s2 + $0x28] sm:$0xff]   ;;  %v16825_v29 = vld [vmem:[%s20976_s2 + $0x10] sm:$0xff]  }
 0x3fe   : >> { %15820 = vmatprep.subr.bf16.mxu1 %v17083_v53 }
 0x3ff   : >> { %v8196_v15 = vor.u32 %v8195_v1, %v8191_v2  ;;  %v9476_v41 = vor.u32 %v20113_v13, %v20107_v62  ;;  %v16832_v1 = vld [vmem:[%s20976_s2 + $0xc0] sm:$0xff]   ;;  %v16921_v62 = vld [vmem:[%s20976_s2 + $0x568] sm:$0xff]  }
 0x400   : >> { %15210 = vmatpush3.bf16.msra.mxu0 %v16789_v8 }
 0x401   : >> { %15821 = vmatpush3.bf16.msra.mxu1 %v16790_v18  ;;  %15211 = vmatprep.subr.bf16.mxu0 %v16791_v48  ;;  %v16815_v18 = vld [vmem:[%s20976_s2 + $0x60] sm:$0xff]  }
 0x402   : >> { %15822 = vmatprep.subr.bf16.mxu1 %v17083_v53 }
 0x404   : >> { %15212 = vmatpush3.bf16.msra.mxu0 %v16792_v43 }
 0x405   : >> { %15823 = vmatpush3.bf16.msra.mxu1 %v16793_v6  ;;  %15213 = vmatprep.subr.bf16.mxu0 %v16794_v9  ;;  %v16817_v6 = vld [vmem:[%s20976_s2 + $0x20] sm:$0xff]  }
 0x406   : >> { %15824 = vmatprep.subr.bf16.mxu1 %v17083_v53 }
 0x408   : >> { %15214 = vmatpush3.bf16.msra.mxu0 %v16795_v12 }
 0x409   : >> { %15825 = vmatpush3.bf16.msra.mxu1 %v16796_v27  ;;  %15215 = vmatprep.subr.bf16.mxu0 %v16797_v40  ;;  %v16822_v27 = vld [vmem:[%s20976_s2 + $0x98] sm:$0xff]   ;;  %v16823_v40 = vld [vmem:[%s20976_s2 + $0x50] sm:$0xff]  }
 0x40a   : >> { %15826 = vmatprep.subr.bf16.mxu1 %v17083_v53 }
 0x40c   : >> { %15216 = vmatpush3.bf16.msra.mxu0 %v16798_v35  ;;  %v16824_v35 = vld [vmem:[%s20976_s2 + $0xd0] sm:$0xff]  }
 0x40d   : >> { %15827 = vmatpush3.bf16.msra.mxu1 %v16799_v55  ;;  %15217 = vmatprep.subr.bf16.mxu0 %v16800_v39  ;;  %v16826_v55 = vld [vmem:[%s20976_s2 + $0x90] sm:$0xff]   ;;  %v16827_v39 = vld [vmem:[%s20976_s2 + $0x48] sm:$0xff]  }
 0x40e   : >> { %15828 = vmatprep.subr.bf16.mxu1 %v17083_v53 }
 0x410   : >> { %15218 = vmatpush3.bf16.msra.mxu0 %v16801_v45  ;;  %v16828_v45 = vld [vmem:[%s20976_s2 + $0xc8] sm:$0xff]  }
 0x411   : >> { %15829 = vmatpush3.bf16.msra.mxu1 %v16802_v50  ;;  %15234 = vmatprep.subr.bf16.mxu0 %v16803_v5  ;;  %v16829_v50 = vld [vmem:[%s20976_s2 + $0x8] sm:$0xff]   ;;  %v16833_v5 = vld [vmem:[%s20976_s2] sm:$0xff]  }
 0x412   : >> { %15256 = vmatprep.subr.bf16.mxu1 %v16804_v19  ;;  %v16834_v19 = vld [vmem:[%s20976_s2 + $0x80] sm:$0xff]  }
 0x413   : >> { %v15007_v61 = vpop.f32.mrf.mxu0  ;;  %8516 = vmatmul.mubr.bf16.vlgmr.msra.gmra.mxu0 %v8182_v23  ;;  %v16835_v23 = vld [vmem:[%s20976_s2 + $0x2f8] sm:$0xff]  }
 0x414   : >> { %v6566_v16 = vpop.f32.mrf.mxu1  ;;  %15831 = vmatmul.mubr.bf16.vlgmr.msra.gmra.mxu1 %v8196_v15  ;;  %15235 = vmatpush3.bf16.msra.mxu0 %v16805_v38  ;;  %v16836_v38 = vld [vmem:[%s20976_s2 + $0x138] sm:$0xff]  }
 0x415   : >> { %15257 = vmatpush3.bf16.msra.mxu1 %v16806_v4  ;;  %v15008_v11 = vpop.f32.mrf.mxu0  ;;  %15236 = vmatprep.subr.bf16.mxu0 %v16807_v24  ;;  %v16837_v15 = vld [vmem:[%s20976_s2 + $0x2b8] sm:$0xff]   ;;  %v16838_v4 = vld [vmem:[%s20976_s2 + $0x2f0] sm:$0xff]  }
 0x416   : >> { %v15009_v3 = vadd.f32 %v15008_v11, %v15007_v61  ;;  %v15752_v31 = vpop.f32.mrf.mxu1  ;;  %15258 = vmatprep.subr.bf16.mxu1 %v16808_v59  ;;  %8837 = vmatprep.mubr.bf16.mxu0 %v19842_v25  ;;  %v9014_v59 = vrot.slane %v19842_v25, 1 }
 0x417   : >> { %v15010_v44 = vpop.f32.mrf.mxu0  ;;  %8878 = vmatprep.mubr.bf16.mxu1 %v19938_v22 }
 0x418   : >> { %v6526_v49 = vadd.f32 %v15009_v3, %v20003_v30  ;;  %v6569_v0 = vpop.f32.mrf.mxu1  ;;  %15237 = vmatpush3.bf16.msra.mxu0 %v16809_v52  ;;  %v16816_v30 = vld [vmem:[%s20976_s2 + $0xe0] sm:$0xff]   ;;  %v16839_v52 = vld [vmem:[%s20976_s2 + $0x130] sm:$0xff]   ;;  %v16841_v3 = vld [vmem:[%s20976_s2 + $0x2e8] sm:$0xff]  }
 0x419   : >> { %15259 = vmatpush3.bf16.msra.mxu1 %v16810_v28  ;;  %v15011_v8 = vpop.f32.mrf.mxu0  ;;  %15238 = vmatprep.subr.bf16.mxu0 %v16811_v14  ;;  %v16840_v28 = vld [vmem:[%s20976_s2 + $0x2b0] sm:$0xff]  }
 0x41a   : >> { %v15012_v48 = vadd.f32 %v15011_v8, %v15010_v44  ;;  %v15753_v43 = vpop.f32.mrf.mxu1  ;;  %15260 = vmatprep.subr.bf16.mxu1 %v16812_v17  ;;  %v20131_v21 = vadd.f32 %v6566_v16, %v6526_v49 }
 0x41c   : >> { %v6529_v9 = vadd.f32 %v15012_v48, %v20015_v51  ;;  %15239 = vmatpush3.bf16.msra.mxu0 %v16813_v63  ;;  %v16821_v51 = vld [vmem:[%s20976_s2 + $0x18] sm:$0xff]   ;;  %v16842_v63 = vld [vmem:[%s20976_s2 + $0x128] sm:$0xff]   ;;  %v16844_v48 = vld [vmem:[%s20976_s2 + $0x2e0] sm:$0xff]  }
 0x41d   : >> { %15261 = vmatpush3.bf16.msra.mxu1 %v16814_v42  ;;  %15240 = vmatprep.subr.bf16.mxu0 %v16815_v18 }
 0x41e   : >> { %15262 = vmatprep.subr.bf16.mxu1 %v16816_v30  ;;  %v20146_v12 = vadd.f32 %v6569_v0, %v6529_v9  ;;  %v16843_v0 = vld [vmem:[%s20976_s2 + $0x2a8] sm:$0xff]   ;;  %v16845_v30 = vld [vmem:[%s20976_s2 + $0x120] sm:$0xff]  }
 0x420   : >> { %15241 = vmatpush3.bf16.msra.mxu0 %v16817_v6  ;;  %v16846_v6 = vld [vmem:[%s20976_s2 + $0x2a0] sm:$0xff]  }
 0x421   : >> { %15263 = vmatpush3.bf16.msra.mxu1 %v16818_v46  ;;  %15242 = vmatprep.subr.bf16.mxu0 %v16819_v57  ;;  %v16847_v46 = vld [vmem:[%s20976_s2 + $0x2d8] sm:$0xff]  }
 0x422   : >> { %15264 = vmatprep.subr.bf16.mxu1 %v16820_v26  ;;  %v16848_v57 = vld [vmem:[%s20976_s2 + $0x118] sm:$0xff]  }
 0x423   : >> { %v16849_v26 = vld [vmem:[%s20976_s2 + $0x298] sm:$0xff]  }
 0x424   : >> { %15243 = vmatpush3.bf16.msra.mxu0 %v16821_v51  ;;  %v16850_v51 = vld [vmem:[%s20976_s2 + $0x2d0] sm:$0xff]  }
 0x425   : >> { %15265 = vmatpush3.bf16.msra.mxu1 %v16822_v27  ;;  %15244 = vmatprep.subr.bf16.mxu0 %v16823_v40  ;;  %v16851_v27 = vld [vmem:[%s20976_s2 + $0x110] sm:$0xff]  }
 0x426   : >> { %15266 = vmatprep.subr.bf16.mxu1 %v16824_v35  ;;  %v16852_v40 = vld [vmem:[%s20976_s2 + $0x290] sm:$0xff]   ;;  %v16853_v35 = vld [vmem:[%s20976_s2 + $0x2c8] sm:$0xff]  }
 0x428   : >> { %15245 = vmatpush3.bf16.msra.mxu0 %v16825_v29  ;;  %v16854_v29 = vld [vmem:[%s20976_s2 + $0x108] sm:$0xff]  }
 0x429   : >> { %15267 = vmatpush3.bf16.msra.mxu1 %v16826_v55  ;;  %15246 = vmatprep.subr.bf16.mxu0 %v16827_v39  ;;  %v16855_v55 = vld [vmem:[%s20976_s2 + $0x288] sm:$0xff]   ;;  %v16856_v39 = vld [vmem:[%s20976_s2 + $0x2c0] sm:$0xff]  }
 0x42a   : >> { %15268 = vmatprep.subr.bf16.mxu1 %v16828_v45  ;;  %v16857_v45 = vld [vmem:[%s20976_s2 + $0x100] sm:$0xff]  }
 0x42c   : >> { %15247 = vmatpush3.bf16.msra.mxu0 %v16829_v50  ;;  %v16858_v50 = vld [vmem:[%s20976_s2 + $0x280] sm:$0xff]  }
 0x42d   : >> { %15269 = vmatpush3.bf16.msra.mxu1 %v16830_v47  ;;  %15248 = vmatprep.subr.bf16.mxu0 %v16831_v54  ;;  %v16859_v47 = vld [vmem:[%s20976_s2 + $0x378] sm:$0xff]  }
 0x42e   : >> { %15270 = vmatprep.subr.bf16.mxu1 %v16832_v1  ;;  %v16860_v54 = vld [vmem:[%s20976_s2 + $0x338] sm:$0xff]   ;;  %v9013_v1 = vrot.slane %v19929_v34, 1 }
 0x430   : >> { %15249 = vmatpush3.bf16.msra.mxu0 %v16833_v5  ;;  %v16861_v5 = vld [vmem:[%s20976_s2 + $0x3b8] sm:$0xff]  }
 0x431   : >> { %15271 = vmatpush3.bf16.msra.mxu1 %v16834_v19  ;;  %15834 = vmatprep.subr.bf16.mxu0 %v17083_v53  ;;  %v16862_v19 = vld [vmem:[%s20976_s2 + $0x370] sm:$0xff]  }
 0x432   : >> { %15287 = vmatprep.subr.bf16.mxu1 %v16835_v23  ;;  %v9016_v23 = vrot.slane %v19938_v22, 1 }
 0x433   : >> { %v15038_v24 = vpop.f32.mrf.mxu0  ;;  %8838 = vmatmul.mubr.bf16.vlgmr.msra.gmra.mxu0 %v19929_v34 }
 0x434   : >> { %v15060_v61 = vpop.f32.mrf.mxu1  ;;  %8879 = vmatmul.mubr.bf16.vlgmr.msra.gmra.mxu1 %v20034_v7  ;;  %15835 = vmatpush3.bf16.msra.mxu0 %v16836_v38 }
 0x435   : >> { %15288 = vmatpush3.bf16.msra.mxu1 %v16837_v15  ;;  %v15039_v16 = vpop.f32.mrf.mxu0  ;;  %15836 = vmatprep.subr.bf16.mxu0 %v17083_v53  ;;  %v16863_v15 = vld [vmem:[%s20976_s2 + $0x330] sm:$0xff]  }
 0x436   : >> { %v15040_v11 = vadd.f32 %v15039_v16, %v15038_v24  ;;  %v15061_v14 = vpop.f32.mrf.mxu1  ;;  %15289 = vmatprep.subr.bf16.mxu1 %v16838_v4  ;;  %15850 = vmatprep.mubr.msk.bf16.mxu0 %vm17084_vm5, %v17083_v53 }
 0x437   : >> { %v15062_v31 = vadd.f32 %v15061_v14, %v15060_v61  ;;  %v15041_v17 = vpop.f32.mrf.mxu0  ;;  %9295 = vmatprep.mubr.bf16.mxu1 %v9014_v59  ;;  %v16864_v59 = vld [vmem:[%s20976_s2 + $0x3b0] sm:$0xff]  }
 0x438   : >> { %v15063_v44 = vpop.f32.mrf.mxu1  ;;  %15837 = vmatpush3.bf16.msra.mxu0 %v16839_v52  ;;  %v16865_v52 = vld [vmem:[%s20976_s2 + $0x368] sm:$0xff]  }
 0x439   : >> { %15290 = vmatpush3.bf16.msra.mxu1 %v16840_v28  ;;  %v15042_v49 = vpop.f32.mrf.mxu0  ;;  %15838 = vmatprep.subr.bf16.mxu0 %v17083_v53  ;;  %v6985_v42 = vadd.f32 %v15062_v31, %v15040_v11 }
 0x43a   : >> { %v15043_v8 = vadd.f32 %v15042_v49, %v15041_v17  ;;  %v15064_v18 = vpop.f32.mrf.mxu1  ;;  %15291 = vmatprep.subr.bf16.mxu1 %v16841_v3  ;;  %v16866_v3 = vld [vmem:[%s20976_s2 + $0x328] sm:$0xff]  }
 0x43b   : >> { %v15065_v43 = vadd.f32 %v15064_v18, %v15063_v44  ;;  %v16870_v18 = vld [vmem:[%s20976_s2 + $0x3a0] sm:$0xff]  }
 0x43c   : >> { %15839 = vmatpush3.bf16.msra.mxu0 %v16842_v63  ;;  %v16868_v63 = vld [vmem:[%s20976_s2 + $0x360] sm:$0xff]  }
 0x43d   : >> { %15292 = vmatpush3.bf16.msra.mxu1 %v16843_v0  ;;  %15840 = vmatprep.subr.bf16.mxu0 %v17083_v53  ;;  %v6988_v9 = vadd.f32 %v15065_v43, %v15043_v8  ;;  %v16869_v8 = vld [vmem:[%s20976_s2 + $0x320] sm:$0xff]   ;;  %v16873_v43 = vld [vmem:[%s20976_s2 + $0x398] sm:$0xff]  }
 0x43e   : >> { %15293 = vmatprep.subr.bf16.mxu1 %v16844_v48  ;;  %v16872_v48 = vld [vmem:[%s20976_s2 + $0x318] sm:$0xff]  }
 0x440   : >> { %15841 = vmatpush3.bf16.msra.mxu0 %v16845_v30  ;;  %v16874_v30 = vld [vmem:[%s20976_s2 + $0x350] sm:$0xff]  }
 0x441   : >> { %15294 = vmatpush3.bf16.msra.mxu1 %v16846_v6  ;;  %15842 = vmatprep.subr.bf16.mxu0 %v17083_v53  ;;  %v16875_v6 = vld [vmem:[%s20976_s2 + $0x310] sm:$0xff]  }
 0x442   : >> { %15295 = vmatprep.subr.bf16.mxu1 %v16847_v46  ;;  %v16877_v46 = vld [vmem:[%s20976_s2 + $0x348] sm:$0xff]  }
 0x444   : >> { %15843 = vmatpush3.bf16.msra.mxu0 %v16848_v57  ;;  %v16878_v57 = vld [vmem:[%s20976_s2 + $0x308] sm:$0xff]  }
 0x445   : >> { %15296 = vmatpush3.bf16.msra.mxu1 %v16849_v26  ;;  %15844 = vmatprep.subr.bf16.mxu0 %v17083_v53  ;;  %v16879_v26 = vld [vmem:[%s20976_s2 + $0x388] sm:$0xff]  }
 0x446   : >> { %15297 = vmatprep.subr.bf16.mxu1 %v16850_v51  ;;  %v16880_v51 = vld [vmem:[%s20976_s2 + $0x340] sm:$0xff]  }
 0x448   : >> { %15845 = vmatpush3.bf16.msra.mxu0 %v16851_v27  ;;  %v16881_v27 = vld [vmem:[%s20976_s2 + $0x300] sm:$0xff]  }
 0x449   : >> { %15298 = vmatpush3.bf16.msra.mxu1 %v16852_v40  ;;  %15846 = vmatprep.subr.bf16.mxu0 %v17083_v53  ;;  %v16882_v40 = vld [vmem:[%s20976_s2 + $0x380] sm:$0xff]  }
 0x44a   : >> { %15299 = vmatprep.subr.bf16.mxu1 %v16853_v35  ;;  %v16883_v35 = vld [vmem:[%s20976_s2 + $0x438] sm:$0xff]  }
 0x44c   : >> { %15847 = vmatpush3.bf16.msra.mxu0 %v16854_v29  ;;  %v9471_v29 = vrot.slane %v8170_v56, 1  ;;  %v16886_v56 = vld [vmem:[%s20976_s2 + $0x478] sm:$0xff]  }
 0x44d   : >> { %15300 = vmatpush3.bf16.msra.mxu1 %v16855_v55  ;;  %15848 = vmatprep.subr.bf16.mxu0 %v17083_v53  ;;  %v16884_v55 = vld [vmem:[%s20976_s2 + $0x4b8] sm:$0xff]  }
 0x44e   : >> { %15301 = vmatprep.subr.bf16.mxu1 %v16856_v39  ;;  %v9472_v39 = vrot.slane %v8172_v10, 2  ;;  %v16888_v10 = vld [vmem:[%s20976_s2 + $0x4b0] sm:$0xff]  }
 0x450   : >> { %15849 = vmatpush3.bf16.msra.mxu0 %v16857_v45  ;;  %v9015_v45 = vrot.slane %v20034_v7, 1 }
 0x451   : >> { %15302 = vmatpush3.bf16.msra.mxu1 %v16858_v50  ;;  %15309 = vmatprep.subr.bf16.mxu0 %v16859_v47  ;;  %v16885_v50 = vld [vmem:[%s20976_s2 + $0x3f8] sm:$0xff]   ;;  %v9017_v47 = vrot.slane %v20039_v37, 1 }
 0x452   : >> { %15854 = vmatprep.subr.bf16.mxu1 %v17083_v53 }
 0x453   : >> { %v7025_v38 = vpop.f32.mrf.mxu0  ;;  %15851 = vmatmul.mubr.bf16.vlgmr.msra.gmra.mxu0 %v20039_v37 }
 0x454   : >> { %v7026_v4 = vadd.f32 %v7025_v38, %v6985_v42  ;;  %v15091_v24 = vpop.f32.mrf.mxu1  ;;  %9296 = vmatmul.mubr.bf16.vlgmr.msra.gmra.mxu1 %v9013_v1  ;;  %15310 = vmatpush3.bf16.msra.mxu0 %v16860_v54  ;;  %v16887_v54 = vld [vmem:[%s20976_s2 + $0x430] sm:$0xff]   ;;  %v9473_v1 = vor.u32 %v9472_v39, %v9471_v29  ;;  %v9469_v29 = vrot.slane %v8165_v36, 2  ;;  %v16914_v39 = vld [vmem:[%s20976_s2 + $0x440] sm:$0xff]   ;;  %v16916_v36 = vld [vmem:[%s20976_s2 + $0x4f8] sm:$0xff]  }
 0x455   : >> { %15855 = vmatpush3.bf16.msra.mxu1 %v16861_v5  ;;  %v15772_v61 = vpop.f32.mrf.mxu0  ;;  %15311 = vmatprep.subr.bf16.mxu0 %v16862_v19  ;;  %v16889_v19 = vld [vmem:[%s20976_s2 + $0x3f0] sm:$0xff]  }
 0x456   : >> { %v20301_v16 = vadd.f32 %v7026_v4, %v20131_v21  ;;  %v15092_v28 = vpop.f32.mrf.mxu1  ;;  %15856 = vmatprep.subr.bf16.mxu1 %v17083_v53  ;;  %9336 = vmatprep.mubr.bf16.mxu0 %v9016_v23  ;;  %v16867_v21 = vld [vmem:[%s20976_s2 + $0x3a8] sm:$0xff]   ;;  %v16890_v38 = vld [vmem:[%s20976_s2 + $0x470] sm:$0xff]  }
 0x457   : >> { %v20304_v11 = vadd.f32 %v15092_v28, %v15091_v24  ;;  %v7028_v14 = vpop.f32.mrf.mxu0  ;;  %15870 = vmatprep.mubr.msk.bf16.mxu1 %vm17084_vm5, %v17083_v53  ;;  %v16891_v4 = vld [vmem:[%s20976_s2 + $0x428] sm:$0xff]  }
 0x458   : >> { %v7029_v31 = vadd.f32 %v7028_v14, %v6988_v9  ;;  %v15094_v17 = vpop.f32.mrf.mxu1  ;;  %15312 = vmatpush3.bf16.msra.mxu0 %v16863_v15  ;;  %v16876_v9 = vld [vmem:[%s20976_s2 + $0x390] sm:$0xff]   ;;  %v16892_v61 = vld [vmem:[%s20976_s2 + $0x4a8] sm:$0xff]  }
 0x459   : >> { %15857 = vmatpush3.bf16.msra.mxu1 %v16864_v59  ;;  %v15773_v44 = vpop.f32.mrf.mxu0  ;;  %15313 = vmatprep.subr.bf16.mxu0 %v16865_v52  ;;  %v16893_v28 = vld [vmem:[%s20976_s2 + $0x3e8] sm:$0xff]  }
 0x45a   : >> { %v20318_v49 = vadd.f32 %v7029_v31, %v20146_v12  ;;  %v15095_v0 = vpop.f32.mrf.mxu1  ;;  %15858 = vmatprep.subr.bf16.mxu1 %v17083_v53  ;;  %v16871_v12 = vld [vmem:[%s20976_s2 + $0x358] sm:$0xff]   ;;  %v16894_v31 = vld [vmem:[%s20976_s2 + $0x468] sm:$0xff]  }
 0x45b   : >> { %v20321_v42 = vadd.f32 %v15095_v0, %v15094_v17 }
 0x45c   : >> { %15314 = vmatpush3.bf16.msra.mxu0 %v16866_v3 }
 0x45d   : >> { %15859 = vmatpush3.bf16.msra.mxu1 %v16867_v21  ;;  %15315 = vmatprep.subr.bf16.mxu0 %v16868_v63  ;;  %v16895_v21 = vld [vmem:[%s20976_s2 + $0x420] sm:$0xff]  }
 0x45e   : >> { %15860 = vmatprep.subr.bf16.mxu1 %v17083_v53 }
 0x460   : >> { %15316 = vmatpush3.bf16.msra.mxu0 %v16869_v8  ;;  %v16898_v8 = vld [vmem:[%s20976_s2 + $0x460] sm:$0xff]  }
 0x461   : >> { %15861 = vmatpush3.bf16.msra.mxu1 %v16870_v18  ;;  %15317 = vmatprep.subr.bf16.mxu0 %v16871_v12  ;;  %v16899_v18 = vld [vmem:[%s20976_s2 + $0x418] sm:$0xff]  }
 0x462   : >> { %15862 = vmatprep.subr.bf16.mxu1 %v17083_v53 }
 0x464   : >> { %15318 = vmatpush3.bf16.msra.mxu0 %v16872_v48 }
 0x465   : >> { %15863 = vmatpush3.bf16.msra.mxu1 %v16873_v43  ;;  %15319 = vmatprep.subr.bf16.mxu0 %v16874_v30  ;;  %v16902_v43 = vld [vmem:[%s20976_s2 + $0x458] sm:$0xff]   ;;  %v16903_v30 = vld [vmem:[%s20976_s2 + $0x410] sm:$0xff]  }
 0x466   : >> { %15864 = vmatprep.subr.bf16.mxu1 %v17083_v53 }
 0x468   : >> { %15320 = vmatpush3.bf16.msra.mxu0 %v16875_v6  ;;  %v16904_v6 = vld [vmem:[%s20976_s2 + $0x490] sm:$0xff]  }
 0x469   : >> { %15865 = vmatpush3.bf16.msra.mxu1 %v16876_v9  ;;  %15321 = vmatprep.subr.bf16.mxu0 %v16877_v46  ;;  %v16906_v9 = vld [vmem:[%s20976_s2 + $0x450] sm:$0xff]   ;;  %v16907_v46 = vld [vmem:[%s20976_s2 + $0x408] sm:$0xff]  }
 0x46a   : >> { %15866 = vmatprep.subr.bf16.mxu1 %v17083_v53 }
 0x46c   : >> { %15322 = vmatpush3.bf16.msra.mxu0 %v16878_v57  ;;  %v16908_v57 = vld [vmem:[%s20976_s2 + $0x488] sm:$0xff]  }
 0x46d   : >> { %15867 = vmatpush3.bf16.msra.mxu1 %v16879_v26  ;;  %15323 = vmatprep.subr.bf16.mxu0 %v16880_v51  ;;  %v16909_v26 = vld [vmem:[%s20976_s2 + $0x3c8] sm:$0xff]  }
 0x46e   : >> { %15868 = vmatprep.subr.bf16.mxu1 %v17083_v53  ;;  %v16910_v51 = vld [vmem:[%s20976_s2 + $0x448] sm:$0xff]  }
 0x470   : >> { %15324 = vmatpush3.bf16.msra.mxu0 %v16881_v27  ;;  %v16911_v27 = vld [vmem:[%s20976_s2 + $0x400] sm:$0xff]  }
 0x471   : >> { %15869 = vmatpush3.bf16.msra.mxu1 %v16882_v40  ;;  %15340 = vmatprep.subr.bf16.mxu0 %v16883_v35  ;;  %v16912_v40 = vld [vmem:[%s20976_s2 + $0x480] sm:$0xff]   ;;  %v9468_v35 = vrot.slane %v8163_v60, 1 }
 0x472   : >> { %15362 = vmatprep.subr.bf16.mxu1 %v16884_v55  ;;  %v16913_v55 = vld [vmem:[%s20976_s2 + $0x3c0] sm:$0xff]  }
 0x473   : >> { %v15113_v5 = vpop.f32.mrf.mxu0  ;;  %9337 = vmatmul.mubr.bf16.vlgmr.msra.gmra.mxu0 %v9015_v45  ;;  %v16915_v45 = vld [vmem:[%s20976_s2 + $0x578] sm:$0xff]   ;;  %v9470_v60 = vor.u32 %v9469_v29, %v9468_v35  ;;  %v16944_v35 = vld [vmem:[%s20976_s2 + $0x630] sm:$0xff]  }
 0x474   : >> { %v7491_v23 = vpop.f32.mrf.mxu1  ;;  %15871 = vmatmul.mubr.bf16.vlgmr.msra.gmra.mxu1 %v9017_v47  ;;  %15341 = vmatpush3.bf16.msra.mxu0 %v16885_v50  ;;  %v16917_v50 = vld [vmem:[%s20976_s2 + $0x538] sm:$0xff]   ;;  %v16918_v47 = vld [vmem:[%s20976_s2 + $0x570] sm:$0xff]  }
 0x475   : >> { %15363 = vmatpush3.bf16.msra.mxu1 %v16886_v56  ;;  %v15114_v15 = vpop.f32.mrf.mxu0  ;;  %15342 = vmatprep.subr.bf16.mxu0 %v16887_v54  ;;  %v9934_v54 = vrot.slane %v19842_v25, 2 }
 0x476   : >> { %v15115_v24 = vadd.f32 %v15114_v15, %v15113_v5  ;;  %v15792_v59 = vpop.f32.mrf.mxu1  ;;  %15364 = vmatprep.subr.bf16.mxu1 %v16888_v10  ;;  %9760 = vmatprep.mubr.bf16.mxu0 %v9473_v1  ;;  %v16919_v1 = vld [vmem:[%s20976_s2 + $0x4f0] sm:$0xff]   ;;  %v16922_v15 = vld [vmem:[%s20976_s2 + $0x4e8] sm:$0xff]  }
 0x477   : >> { %v15116_v52 = vpop.f32.mrf.mxu0  ;;  %9801 = vmatprep.mubr.bf16.mxu1 %v9479_v32  ;;  %v16897_v32 = vld [vmem:[%s20976_s2 + $0x3e0] sm:$0xff]  }
 0x478   : >> { %v7451_v14 = vadd.f32 %v15115_v24, %v20304_v11  ;;  %v7494_v3 = vpop.f32.mrf.mxu1  ;;  %15343 = vmatpush3.bf16.msra.mxu0 %v16889_v19  ;;  %v16920_v19 = vld [vmem:[%s20976_s2 + $0x530] sm:$0xff]   ;;  %v16923_v24 = vld [vmem:[%s20976_s2 + $0x528] sm:$0xff]  }
 0x479   : >> { %15365 = vmatpush3.bf16.msra.mxu1 %v16890_v38  ;;  %v15117_v17 = vpop.f32.mrf.mxu0  ;;  %15344 = vmatprep.subr.bf16.mxu0 %v16891_v4 }
 0x47a   : >> { %v7492_v44 = vadd.f32 %v7491_v23, %v7451_v14  ;;  %v15118_v63 = vadd.f32 %v15117_v17, %v15116_v52  ;;  %v15793_v0 = vpop.f32.mrf.mxu1  ;;  %15366 = vmatprep.subr.bf16.mxu1 %v16892_v61 }
 0x47b   : >> { %v16930_v0 = vld [vmem:[%s20976_s2 + $0x550] sm:$0xff]  }
 0x47c   : >> { %v7454_v33 = vadd.f32 %v15118_v63, %v20321_v42  ;;  %15345 = vmatpush3.bf16.msra.mxu0 %v16893_v28  ;;  %v20427_v11 = vadd.f32 %v7492_v44, %v20301_v16  ;;  %v16900_v42 = vld [vmem:[%s20976_s2 + $0x498] sm:$0xff]   ;;  %v16924_v28 = vld [vmem:[%s20976_s2 + $0x560] sm:$0xff]  }
 0x47d   : >> { %15367 = vmatpush3.bf16.msra.mxu1 %v16894_v31  ;;  %15346 = vmatprep.subr.bf16.mxu0 %v16895_v21  ;;  %v16901_v16 = vld [vmem:[%s20976_s2 + $0x3d8] sm:$0xff]   ;;  %v16926_v31 = vld [vmem:[%s20976_s2 + $0x520] sm:$0xff]  }
 0x47e   : >> { %v7495_v12 = vadd.f32 %v7494_v3, %v7454_v33  ;;  %15368 = vmatprep.subr.bf16.mxu1 %v16896_v58  ;;  %v16925_v3 = vld [vmem:[%s20976_s2 + $0x4e0] sm:$0xff]   ;;  %v16927_v21 = vld [vmem:[%s20976_s2 + $0x558] sm:$0xff]   ;;  %v16931_v58 = vld [vmem:[%s20976_s2 + $0x4d0] sm:$0xff]  }
 0x47f   : >> { %v16928_v44 = vld [vmem:[%s20976_s2 + $0x4d8] sm:$0xff]   ;;  %v16932_v33 = vld [vmem:[%s20976_s2 + $0x510] sm:$0xff]  }
 0x480   : >> { %15347 = vmatpush3.bf16.msra.mxu0 %v16897_v32  ;;  %v20442_v48 = vadd.f32 %v7495_v12, %v20318_v49  ;;  %v16905_v49 = vld [vmem:[%s20976_s2 + $0x3d0] sm:$0xff]   ;;  %v16929_v63 = vld [vmem:[%s20976_s2 + $0x518] sm:$0xff]   ;;  %v16933_v32 = vld [vmem:[%s20976_s2 + $0x548] sm:$0xff]  }
 0x481   : >> { %15369 = vmatpush3.bf16.msra.mxu1 %v16898_v8  ;;  %15348 = vmatprep.subr.bf16.mxu0 %v16899_v18  ;;  %v16934_v8 = vld [vmem:[%s20976_s2 + $0x4c8] sm:$0xff]   ;;  %v16936_v12 = vld [vmem:[%s20976_s2 + $0x540] sm:$0xff]  }
 0x482   : >> { %15370 = vmatprep.subr.bf16.mxu1 %v16900_v42  ;;  %v16935_v18 = vld [vmem:[%s20976_s2 + $0x508] sm:$0xff]   ;;  %v9480_v42 = vrot.slane %v8191_v2, 1 }
 0x484   : >> { %15349 = vmatpush3.bf16.msra.mxu0 %v16901_v16  ;;  %v9481_v16 = vrot.slane %v8193_v20, 2  ;;  %v9933_v20 = vrot.slane %v19929_v34, 2 }
 0x485   : >> { %15371 = vmatpush3.bf16.msra.mxu1 %v16902_v43  ;;  %15350 = vmatprep.subr.bf16.mxu0 %v16903_v30  ;;  %v16937_v43 = vld [vmem:[%s20976_s2 + $0x4c0] sm:$0xff]  }
 0x486   : >> { %15372 = vmatprep.subr.bf16.mxu1 %v16904_v6  ;;  %v16938_v30 = vld [vmem:[%s20976_s2 + $0x500] sm:$0xff]   ;;  %v16939_v6 = vld [vmem:[%s20976_s2 + $0x5f8] sm:$0xff]   ;;  %v9482_v2 = vor.u32 %v9481_v16, %v9480_v42 }
 0x488   : >> { %15351 = vmatpush3.bf16.msra.mxu0 %v16905_v49  ;;  %v16940_v49 = vld [vmem:[%s20976_s2 + $0x5b8] sm:$0xff]  }
 0x489   : >> { %15373 = vmatpush3.bf16.msra.mxu1 %v16906_v9  ;;  %15352 = vmatprep.subr.bf16.mxu0 %v16907_v46  ;;  %v16941_v9 = vld [vmem:[%s20976_s2 + $0x638] sm:$0xff]   ;;  %v16942_v46 = vld [vmem:[%s20976_s2 + $0x5f0] sm:$0xff]  }
 0x48a   : >> { %15374 = vmatprep.subr.bf16.mxu1 %v16908_v57  ;;  %v9936_v57 = vrot.slane %v19938_v22, 2  ;;  %v16945_v22 = vld [vmem:[%s20976_s2 + $0x5e8] sm:$0xff]  }
 0x48c   : >> { %15353 = vmatpush3.bf16.msra.mxu0 %v16909_v26 }
 0x48d   : >> { %15375 = vmatpush3.bf16.msra.mxu1 %v16910_v51  ;;  %15354 = vmatprep.subr.bf16.mxu0 %v16911_v27  ;;  %v16943_v27 = vld [vmem:[%s20976_s2 + $0x5b0] sm:$0xff]  }
 0x48e   : >> { %15376 = vmatprep.subr.bf16.mxu1 %v16912_v40 }
 0x490   : >> { %15355 = vmatpush3.bf16.msra.mxu0 %v16913_v55 }
 0x491   : >> { %15377 = vmatpush3.bf16.msra.mxu1 %v16914_v39  ;;  %15874 = vmatprep.subr.bf16.mxu0 %v17083_v53 }
 0x492   : >> { %15393 = vmatprep.subr.bf16.mxu1 %v16915_v45 }
 0x493   : >> { %v15144_v56 = vpop.f32.mrf.mxu0  ;;  %9761 = vmatmul.mubr.bf16.vlgmr.msra.gmra.mxu0 %v9470_v60 }
 0x494   : >> { %v15166_v10 = vpop.f32.mrf.mxu1  ;;  %9802 = vmatmul.mubr.bf16.vlgmr.msra.gmra.mxu1 %v9476_v41  ;;  %15875 = vmatpush3.bf16.msra.mxu0 %v16916_v36 }
 0x495   : >> { %15394 = vmatpush3.bf16.msra.mxu1 %v16917_v50  ;;  %v15145_v5 = vpop.f32.mrf.mxu0  ;;  %15876 = vmatprep.subr.bf16.mxu0 %v17083_v53  ;;  %v16946_v50 = vld [vmem:[%s20976_s2 + $0x5a8] sm:$0xff]  }
 0x496   : >> { %v15146_v23 = vadd.f32 %v15145_v5, %v15144_v56  ;;  %v15167_v25 = vpop.f32.mrf.mxu1  ;;  %15395 = vmatprep.subr.bf16.mxu1 %v16918_v47  ;;  %15890 = vmatprep.mubr.msk.bf16.mxu0 %vm17084_vm5, %v17083_v53  ;;  %v16948_v56 = vld [vmem:[%s20976_s2 + $0x5e0] sm:$0xff]  }
 0x497   : >> { %v15168_v13 = vadd.f32 %v15167_v25, %v15166_v10  ;;  %v15147_v41 = vpop.f32.mrf.mxu0  ;;  %10215 = vmatprep.mubr.bf16.mxu1 %v9934_v54  ;;  %v16949_v5 = vld [vmem:[%s20976_s2 + $0x5a0] sm:$0xff]   ;;  %v16953_v25 = vld [vmem:[%s20976_s2 + $0x618] sm:$0xff]  }
 0x498   : >> { %v15169_v38 = vpop.f32.mrf.mxu1  ;;  %15877 = vmatpush3.bf16.msra.mxu0 %v16919_v1 }
 0x499   : >> { %15396 = vmatpush3.bf16.msra.mxu1 %v16920_v19  ;;  %v15148_v4 = vpop.f32.mrf.mxu0  ;;  %15878 = vmatprep.subr.bf16.mxu0 %v17083_v53  ;;  %v7907_v59 = vadd.f32 %v15168_v13, %v15146_v23  ;;  %v16950_v19 = vld [vmem:[%s20976_s2 + $0x620] sm:$0xff]   ;;  %v16952_v23 = vld [vmem:[%s20976_s2 + $0x598] sm:$0xff]   ;;  %v16955_v13 = vld [vmem:[%s20976_s2 + $0x590] sm:$0xff]  }
 0x49a   : >> { %v15149_v61 = vadd.f32 %v15148_v4, %v15147_v41  ;;  %v15170_v52 = vpop.f32.mrf.mxu1  ;;  %15397 = vmatprep.subr.bf16.mxu1 %v16921_v62  ;;  %v16954_v62 = vld [vmem:[%s20976_s2 + $0x5d0] sm:$0xff]   ;;  %v16959_v4 = vld [vmem:[%s20976_s2 + $0x608] sm:$0xff]  }
 0x49b   : >> { %v15171_v14 = vadd.f32 %v15170_v52, %v15169_v38  ;;  %v16956_v41 = vld [vmem:[%s20976_s2 + $0x610] sm:$0xff]   ;;  %v16957_v38 = vld [vmem:[%s20976_s2 + $0x5c8] sm:$0xff]   ;;  %v9935_v52 = vrot.slane %v20034_v7, 2 }
 0x49c   : >> { %15879 = vmatpush3.bf16.msra.mxu0 %v16922_v15  ;;  %v16958_v15 = vld [vmem:[%s20976_s2 + $0x588] sm:$0xff]  }
 0x49d   : >> { %15398 = vmatpush3.bf16.msra.mxu1 %v16923_v24  ;;  %15880 = vmatprep.subr.bf16.mxu0 %v17083_v53  ;;  %v7910_v17 = vadd.f32 %v15171_v14, %v15149_v61  ;;  %v16960_v24 = vld [vmem:[%s20976_s2 + $0x5c0] sm:$0xff]  }
 0x49e   : >> { %15399 = vmatprep.subr.bf16.mxu1 %v16924_v28  ;;  %v16962_v61 = vld [vmem:[%s20976_s2 + $0x600] sm:$0xff]   ;;  %v9937_v28 = vrot.slane %v20039_v37, 2 }
 0x4a0   : >> { %15881 = vmatpush3.bf16.msra.mxu0 %v16925_v3 }
 0x4a1   : >> { %15400 = vmatpush3.bf16.msra.mxu1 %v16926_v31  ;;  %15882 = vmatprep.subr.bf16.mxu0 %v17083_v53 }
 0x4a2   : >> { %15401 = vmatprep.subr.bf16.mxu1 %v16927_v21 }
 0x4a4   : >> { %15883 = vmatpush3.bf16.msra.mxu0 %v16928_v44 }
 0x4a5   : >> { %15402 = vmatpush3.bf16.msra.mxu1 %v16929_v63  ;;  %15884 = vmatprep.subr.bf16.mxu0 %v17083_v53 }
 0x4a6   : >> { %15403 = vmatprep.subr.bf16.mxu1 %v16930_v0 }
 0x4a8   : >> { %15885 = vmatpush3.bf16.msra.mxu0 %v16931_v58 }
 0x4a9   : >> { %15404 = vmatpush3.bf16.msra.mxu1 %v16932_v33  ;;  %15886 = vmatprep.subr.bf16.mxu0 %v17083_v53 }
 0x4aa   : >> { %15405 = vmatprep.subr.bf16.mxu1 %v16933_v32 }
 0x4ac   : >> { %15887 = vmatpush3.bf16.msra.mxu0 %v16934_v8 }
 0x4ad   : >> { %15406 = vmatpush3.bf16.msra.mxu1 %v16935_v18  ;;  %15888 = vmatprep.subr.bf16.mxu0 %v17083_v53 }
 0x4ae   : >> { %15407 = vmatprep.subr.bf16.mxu1 %v16936_v12 }
 0x4b0   : >> { %15889 = vmatpush3.bf16.msra.mxu0 %v16937_v43 }
 0x4b1   : >> { %15408 = vmatpush3.bf16.msra.mxu1 %v16938_v30  ;;  %15415 = vmatprep.subr.bf16.mxu0 %v16939_v6 }
 0x4b2   : >> { %15894 = vmatprep.subr.bf16.mxu1 %v17083_v53 }
 0x4b3   : >> { %v7947_v26 = vpop.f32.mrf.mxu0  ;;  %15891 = vmatmul.mubr.bf16.vlgmr.msra.gmra.mxu0 %v9482_v2 }
 0x4b4   : >> { %v7948_v34 = vadd.f32 %v7947_v26, %v7907_v59  ;;  %v15197_v51 = vpop.f32.mrf.mxu1  ;;  %10216 = vmatmul.mubr.bf16.vlgmr.msra.gmra.mxu1 %v9933_v20  ;;  %15416 = vmatpush3.bf16.msra.mxu0 %v16940_v49  ;;  %v16961_v59 = vld [vmem:[%s20976_s2 + $0x580] sm:$0xff]  }
 0x4b5   : >> { %15895 = vmatpush3.bf16.msra.mxu1 %v16941_v9  ;;  %v15812_v40 = vpop.f32.mrf.mxu0  ;;  %15417 = vmatprep.subr.bf16.mxu0 %v16942_v46 }
 0x4b6   : >> { %v20602_v29 = vadd.f32 %v7948_v34, %v20427_v11  ;;  %v15198_v55 = vpop.f32.mrf.mxu1  ;;  %15896 = vmatprep.subr.bf16.mxu1 %v17083_v53  ;;  %10256 = vmatprep.mubr.bf16.mxu0 %v9936_v57  ;;  %v16947_v11 = vld [vmem:[%s20976_s2 + $0x628] sm:$0xff]  }
 0x4b7   : >> { %v15199_v39 = vadd.f32 %v15198_v55, %v15197_v51  ;;  %v7950_v45 = vpop.f32.mrf.mxu0  ;;  %15910 = vmatprep.mubr.msk.bf16.mxu1 %vm17084_vm5, %v17083_v53 }
 0x4b8   : >> { %v7951_v60 = vadd.f32 %v7950_v45, %v7910_v17  ;;  %v15200_v36 = vpop.f32.mrf.mxu1  ;;  %15418 = vmatpush3.bf16.msra.mxu0 %v16943_v27 }
 0x4b9   : >> { %15897 = vmatpush3.bf16.msra.mxu1 %v16944_v35  ;;  %v15813_v47 = vpop.f32.mrf.mxu0  ;;  %15419 = vmatprep.subr.bf16.mxu0 %v16945_v22 }
 0x4ba   : >> { %v20617_v54 = vadd.f32 %v7951_v60, %v20442_v48  ;;  %v15201_v10 = vpop.f32.mrf.mxu1  ;;  %15898 = vmatprep.subr.bf16.mxu1 %v17083_v53  ;;  %v16951_v48 = vld [vmem:[%s20976_s2 + $0x5d8] sm:$0xff]  }
 0x4bb   : >> { %v15202_v1 = vadd.f32 %v15201_v10, %v15200_v36 }
 0x4bc   : >> { %15420 = vmatpush3.bf16.msra.mxu0 %v16946_v50 }
 0x4bd   : >> { %15899 = vmatpush3.bf16.msra.mxu1 %v16947_v11  ;;  %15421 = vmatprep.subr.bf16.mxu0 %v16948_v56 }
 0x4be   : >> { %15900 = vmatprep.subr.bf16.mxu1 %v17083_v53 }
 0x4c0   : >> { %15422 = vmatpush3.bf16.msra.mxu0 %v16949_v5 }
 0x4c1   : >> { %15901 = vmatpush3.bf16.msra.mxu1 %v16950_v19  ;;  %15423 = vmatprep.subr.bf16.mxu0 %v16951_v48 }
 0x4c2   : >> { %15902 = vmatprep.subr.bf16.mxu1 %v17083_v53 }
 0x4c4   : >> { %15424 = vmatpush3.bf16.msra.mxu0 %v16952_v23 }
 0x4c5   : >> { %15903 = vmatpush3.bf16.msra.mxu1 %v16953_v25  ;;  %15425 = vmatprep.subr.bf16.mxu0 %v16954_v62 }
 0x4c6   : >> { %15904 = vmatprep.subr.bf16.mxu1 %v17083_v53 }
 0x4c8   : >> { %15426 = vmatpush3.bf16.msra.mxu0 %v16955_v13 }
 0x4c9   : >> { %15905 = vmatpush3.bf16.msra.mxu1 %v16956_v41  ;;  %15427 = vmatprep.subr.bf16.mxu0 %v16957_v38 }
 0x4ca   : >> { %15906 = vmatprep.subr.bf16.mxu1 %v17083_v53 }
 0x4cc   : >> { %15428 = vmatpush3.bf16.msra.mxu0 %v16958_v15 }
 0x4cd   : >> { %15907 = vmatpush3.bf16.msra.mxu1 %v16959_v4  ;;  %15429 = vmatprep.subr.bf16.mxu0 %v16960_v24 }
 0x4ce   : >> { %15908 = vmatprep.subr.bf16.mxu1 %v17083_v53 }
 0x4d0   : >> { %15430 = vmatpush3.bf16.msra.mxu0 %v16961_v59 }
 0x4d1   : >> { %15909 = vmatpush3.bf16.msra.mxu1 %v16962_v61 }
 0x4d3   : >> { %v15219_v14 = vpop.f32.mrf.mxu0  ;;  %10257 = vmatmul.mubr.bf16.vlgmr.msra.gmra.mxu0 %v9935_v52 }
 0x4d4   : >> { %15911 = vmatmul.mubr.bf16.vlgmr.msra.gmra.mxu1 %v9937_v28  ;;  %v8558_v3 = vpop.f32.mrf.mxu1 }
 0x4d5   : >> { %v15220_v31 = vpop.f32.mrf.mxu0 }
 0x4d6   : >> { %v15221_v17 = vadd.f32 %v15220_v31, %v15219_v14  ;;  %v15832_v21 = vpop.f32.mrf.mxu1 }
 0x4d7   : >> { %v15222_v44 = vpop.f32.mrf.mxu0 }
 0x4d8   : >> { %v8518_v63 = vadd.f32 %v15221_v17, %v15199_v39  ;;  %v8561_v0 = vpop.f32.mrf.mxu1 }
 0x4d9   : >> { %v15223_v58 = vpop.f32.mrf.mxu0 }
 0x4da   : >> { %v15224_v33 = vadd.f32 %v15223_v58, %v15222_v44  ;;  %v15833_v32 = vpop.f32.mrf.mxu1  ;;  %v8559_v53 = vadd.f32 %v8558_v3, %v8518_v63 }
 0x4dc   : >> { %v8521_v8 = vadd.f32 %v15224_v33, %v15202_v1 }
 0x4de   : >> { %v8562_v7 = vadd.f32 %v8561_v0, %v8521_v8 }
 0x4f3   : >> { %v15250_v18 = vpop.f32.mrf.mxu0 }
 0x4f4   : >> { %v15272_v12 = vpop.f32.mrf.mxu1 }
 0x4f5   : >> { %v15251_v37 = vpop.f32.mrf.mxu0 }
 0x4f6   : >> { %v15252_v42 = vadd.f32 %v15251_v37, %v15250_v18  ;;  %v15273_v16 = vpop.f32.mrf.mxu1 }
 0x4f7   : >> { %v15274_v43 = vadd.f32 %v15273_v16, %v15272_v12  ;;  %v15253_v30 = vpop.f32.mrf.mxu0 }
 0x4f8   : >> { %v8840_v6 = vadd.f32 %v15252_v42, %v8559_v53  ;;  %v15275_v2 = vpop.f32.mrf.mxu1 }
 0x4f9   : >> { %v15254_v20 = vpop.f32.mrf.mxu0 }
 0x4fa   : >> { %v15255_v49 = vadd.f32 %v15254_v20, %v15253_v30  ;;  %v15276_v9 = vpop.f32.mrf.mxu1  ;;  %v8881_v46 = vadd.f32 %v15274_v43, %v8840_v6 }
 0x4fb   : >> { %v15277_v57 = vadd.f32 %v15276_v9, %v15275_v2 }
 0x4fc   : >> { %v8843_v26 = vadd.f32 %v15255_v49, %v8562_v7 }
 0x4fe   : >> { %v8884_v34 = vadd.f32 %v15277_v57, %v8843_v26 }
 0x513   : >> { %v8921_v51 = vpop.f32.mrf.mxu0 }
 0x514   : >> { %v8922_v27 = vadd.f32 %v8921_v51, %v8881_v46  ;;  %v15303_v40 = vpop.f32.mrf.mxu1 }
 0x515   : >> { %v15852_v35 = vpop.f32.mrf.mxu0 }
 0x516   : >> { %v15304_v22 = vpop.f32.mrf.mxu1 }
 0x517   : >> { %v15305_v55 = vadd.f32 %v15304_v22, %v15303_v40  ;;  %v8924_v39 = vpop.f32.mrf.mxu0 }
 0x518   : >> { %v8925_v45 = vadd.f32 %v8924_v39, %v8884_v34  ;;  %v15306_v60 = vpop.f32.mrf.mxu1 }
 0x519   : >> { %v15853_v36 = vpop.f32.mrf.mxu0 }
 0x51a   : >> { %v15307_v50 = vpop.f32.mrf.mxu1 }
 0x51b   : >> { %v15308_v47 = vadd.f32 %v15307_v50, %v15306_v60 }
 0x533   : >> { %v15325_v11 = vpop.f32.mrf.mxu0 }
 0x534   : >> { %v9379_v56 = vpop.f32.mrf.mxu1 }
 0x535   : >> { %v15326_v10 = vpop.f32.mrf.mxu0 }
 0x536   : >> { %v15327_v1 = vadd.f32 %v15326_v10, %v15325_v11  ;;  %v15872_v5 = vpop.f32.mrf.mxu1 }
 0x537   : >> { %v15328_v19 = vpop.f32.mrf.mxu0 }
 0x538   : >> { %v9339_v48 = vadd.f32 %v15327_v1, %v15305_v55  ;;  %v9382_v23 = vpop.f32.mrf.mxu1  ;;  %v21013_v55 = vld [vmem:[#allocation10_spill] sm:$0xff] }
 0x539   : >> { %v15329_v25 = vpop.f32.mrf.mxu0  ;;  %v7960_v39 = vadd.f32 %v21013_v55, %v20602_v29 }
 0x53a   : >> { %v9380_v62 = vadd.f32 %v9379_v56, %v9339_v48  ;;  %v15330_v13 = vadd.f32 %v15329_v25, %v15328_v19  ;;  %v15873_v41 = vpop.f32.mrf.mxu1  ;;  %v7961_v56 = vadd.f32 %v21013_v55, %v20617_v54  ;;  %v21014_v54 = vmov (%p5592_p12), 0.0  }
 0x53b   : >> { %v7962_v11 = vmax.f32 %v7960_v39, 0.0  ;;  %15914 = vmatprep.subr.bf16.mxu0 (%p5592_p12), %v21014_v54  ;;  %v16963_v41 = vld [vmem:[%s20977_s3 + $0x8] sm:$0xff] (%p5592_p12)   ;;  %15920 = vmatprep.subr.bf16.mxu1 (%p5592_p12), %v21014_v54 }
 0x53c   : >> { %v9342_v38 = vadd.f32 %v15330_v13, %v15308_v47  ;;  %v9386_v15 = vadd.f32 %v9380_v62, %v8922_v27  ;;  %v7963_v48 = vmax.f32 %v7961_v56, 0.0  ;;  %15916 = vmatprep.mubr.msk.bf16.mxu0 (%p5592_p12), %vm17085_vm6, %v21014_v54  ;;  %15922 = vmatprep.mubr.msk.bf16.mxu1 (%p5592_p12), %vm17085_vm6, %v21014_v54 }
 0x53d   : > { %15915 = vmatpush3.bf16.msra.mxu0 (%p5592_p12), %v16963_v41  ;;  %v16996_v41 = vld [vmem:[%s20979_s5 + $0x38] sm:$0xff] (%p5592_p12)  }
 0x53e   : >> { %v9383_v4 = vadd.f32 %v9382_v23, %v9342_v38  ;;  %v16964_v38 = vld [vmem:[%s20977_s3] sm:$0xff] (%p5592_p12)   ;;  %15926 = vmatprep.subr.bf16.mxu0 (%p5592_p12), %v21014_v54 }
 0x53f   : > { %15921 = vmatpush3.bf16.msra.mxu1 (%p5592_p12), %v16964_v38  ;;  %v16997_v38 = vld [vmem:[%s20979_s5 + $0x30] sm:$0xff] (%p5592_p12)  }
 0x540   : >> { %v9387_v24 = vadd.f32 %v9383_v4, %v8925_v45  ;;  %15932 = vmatprep.subr.bf16.mxu1 (%p5592_p12), %v21014_v54 }
 0x553   : >> { %v15356_v59 = vpop.f32.mrf.mxu0 }
 0x554   : >> { %v15378_v17 = vpop.f32.mrf.mxu1 }
 0x555   : >> { %v15357_v61 = vpop.f32.mrf.mxu0 }
 0x556   : >> { %v15379_v44 = vpop.f32.mrf.mxu1  ;;  %v15358_v53 = vadd.f32 %v15357_v61, %v15356_v59  ;;  %v16966_v59 = vld [vmem:[%s20977_s3 + $0x18] sm:$0xff] (%p5592_p12)  }
 0x557   : >> { %v15359_v52 = vpop.f32.mrf.mxu0  ;;  %v15380_v8 = vadd.f32 %v15379_v44, %v15378_v17  ;;  %v16970_v44 = vld [vmem:[%s20977_s3 + $0x38] sm:$0xff] (%p5592_p12)  }
 0x558   : >> { %v15381_v63 = vpop.f32.mrf.mxu1 }
 0x559   : >> { %v15360_v28 = vpop.f32.mrf.mxu0  ;;  %v9804_v18 = vadd.f32 %v15380_v8, %v15358_v53 }
 0x55a   : >> { %v15382_v0 = vpop.f32.mrf.mxu1  ;;  %v15361_v37 = vadd.f32 %v15360_v28, %v15359_v52 }
 0x55b   : >> { %v15383_v42 = vadd.f32 %v15382_v0, %v15381_v63  ;;  %v16969_v63 = vld [vmem:[%s20977_s3 + $0x30] sm:$0xff] (%p5592_p12)  }
 0x55d   : >> { %v9807_v9 = vadd.f32 %v15383_v42, %v15361_v37 }
 0x573   : >> { %v9844_v14 = vpop.f32.mrf.mxu0 }
 0x574   : >> { %v15409_v58 = vpop.f32.mrf.mxu1  ;;  %v9845_v43 = vadd.f32 %v9844_v14, %v9804_v18  ;;  %v16968_v14 = vld [vmem:[%s20977_s3 + $0x28] sm:$0xff] (%p5592_p12)  }
 0x575   : >> { %v15892_v3 = vpop.f32.mrf.mxu0 }
 0x576   : >> { %v15410_v33 = vpop.f32.mrf.mxu1  ;;  %v9851_v26 = vadd.f32 %v9845_v43, %v9386_v15  ;;  %v16967_v3 = vld [vmem:[%s20977_s3 + $0x20] sm:$0xff] (%p5592_p12)  }
 0x577   : >> { %v9847_v31 = vpop.f32.mrf.mxu0  ;;  %v15411_v6 = vadd.f32 %v15410_v33, %v15409_v58  ;;  %v16971_v33 = vld [vmem:[%s20977_s3 + $0x40] sm:$0xff] (%p5592_p12)  }
 0x578   : >> { %v15412_v32 = vpop.f32.mrf.mxu1  ;;  %v9848_v51 = vadd.f32 %v9847_v31, %v9807_v9  ;;  %v16975_v43 = vld [vmem:[%s20977_s3 + $0x60] sm:$0xff] (%p5592_p12)  }
 0x579   : >> { %v15893_v21 = vpop.f32.mrf.mxu0 }
 0x57a   : >> { %v15413_v7 = vpop.f32.mrf.mxu1  ;;  %v9852_v36 = vadd.f32 %v9848_v51, %v9387_v24  ;;  %v16965_v24 = vld [vmem:[%s20977_s3 + $0x10] sm:$0xff] (%p5592_p12)  }
 0x57b   : >> { %v15414_v27 = vadd.f32 %v15413_v7, %v15412_v32  ;;  %v16972_v32 = vld [vmem:[%s20977_s3 + $0x48] sm:$0xff] (%p5592_p12)   ;;  %v16974_v7 = vld [vmem:[%s20977_s3 + $0x58] sm:$0xff] (%p5592_p12)  }
 0x593   : >> { %v15431_v12 = vpop.f32.mrf.mxu0 }
 0x594   : >> { %v10299_v16 = vpop.f32.mrf.mxu1 }
 0x595   : >> { %v15432_v30 = vpop.f32.mrf.mxu0 }
 0x596   : >> { %v15433_v2 = vadd.f32 %v15432_v30, %v15431_v12  ;;  %v15912_v20 = vpop.f32.mrf.mxu1  ;;  %v16973_v12 = vld [vmem:[%s20977_s3 + $0x50] sm:$0xff] (%p5592_p12)  }
 0x597   : >> { %v15434_v49 = vpop.f32.mrf.mxu0  ;;  %v16977_v20 = vld [vmem:[%s20977_s3 + $0x70] sm:$0xff] (%p5592_p12)  }
 0x598   : >> { %v10259_v46 = vadd.f32 %v15433_v2, %v15411_v6  ;;  %v10302_v57 = vpop.f32.mrf.mxu1  ;;  %v16978_v2 = vld [vmem:[%s20977_s3 + $0x78] sm:$0xff] (%p5592_p12)  }
 0x599   : >> { %v15435_v34 = vpop.f32.mrf.mxu0 }
 0x59a   : >> { %v10300_v40 = vadd.f32 %v10299_v16, %v10259_v46  ;;  %v15436_v35 = vadd.f32 %v15435_v34, %v15434_v49  ;;  %v15913_v22 = vpop.f32.mrf.mxu1  ;;  %v16976_v16 = vld [vmem:[%s20977_s3 + $0x68] sm:$0xff] (%p5592_p12)  }
 0x59c   : >> { %v10306_v45 = vadd.f32 %v10300_v40, %v9851_v26  ;;  %v10262_v60 = vadd.f32 %v15436_v35, %v15414_v27  ;;  %v16979_v26 = vld [vmem:[%s20977_s3 + $0x80] sm:$0xff] (%p5592_p12)   ;;  %v16982_v27 = vld [vmem:[%s20977_s3 + $0x98] sm:$0xff] (%p5592_p12)   ;;  %v16981_v40 = vld [vmem:[%s20977_s3 + $0x90] sm:$0xff] (%p5592_p12)  }
 0x59e   : >> { %v10308_v50 = vadd.f32 %v21013_v55, %v10306_v45  ;;  %v10303_v47 = vadd.f32 %v10302_v57, %v10262_v60  ;;  %v16980_v57 = vld [vmem:[%s20977_s3 + $0x88] sm:$0xff] (%p5592_p12)   ;;  %v16983_v45 = vld [vmem:[%s20977_s3 + $0xa0] sm:$0xff] (%p5592_p12)  }
 0x5a0   : >> { %v10310_v10 = vmax.f32 %v10308_v50, 0.0  ;;  %v10307_v1 = vadd.f32 %v10303_v47, %v9852_v36  ;;  %v16986_v50 = vld [vmem:[%s20977_s3 + $0xb8] sm:$0xff] (%p5592_p12)   ;;  %v16985_v47 = vld [vmem:[%s20977_s3 + $0xb0] sm:$0xff] (%p5592_p12)  }
 0x5a2   : >> { %v10312_v5 = vmax.f32 %v7962_v11, %v10310_v10  ;;  %v10309_v19 = vadd.f32 %v21013_v55, %v10307_v1  ;;  %v16984_v55 = vld [vmem:[%s20977_s3 + $0xa8] sm:$0xff] (%p5592_p12)   ;;  %v16987_v10 = vld [vmem:[%s20977_s3 + $0xc0] sm:$0xff] (%p5592_p12)  }
 0x5a4   : >> { %10314 = vst [vmem:[#allocation4] sm:$0xff] %v10312_v5  ;;  %v10311_v23 = vmax.f32 %v10309_v19, 0.0  ;;  %v16988_v5 = vld [vmem:[%s20978_s4 + $0x38] sm:$0xff] (%p5592_p12)   ;;  %v16989_v19 = vld [vmem:[%s20978_s4 + $0x30] sm:$0xff] (%p5592_p12)  }
 0x5a6   : >> { %v10313_v29 = vmax.f32 %v7963_v48, %v10311_v23  ;;  %v16990_v48 = vld [vmem:[%s20978_s4 + $0x28] sm:$0xff] (%p5592_p12)   ;;  %v16991_v23 = vld [vmem:[%s20978_s4 + $0x20] sm:$0xff] (%p5592_p12)  }
 0x5a8   : >> { %10315 = vst [vmem:[#allocation4 + $0x8] sm:$0x3] %v10313_v29  ;;  %v16992_v29 = vld [vmem:[%s20978_s4 + $0x18] sm:$0xff] (%p5592_p12)  }
 0x5ae   : > { %5594 = sbr.rel (!%p5592_p12) target bundleno = 753 (0x2f1), region = 138 }
 0x5af   : >> { %v10316_v25 = vld [vmem:[#allocation4] ss:$2 sm:$0x1f]  ;;  %v10318_v62 = vld [vmem:[#allocation4 + $0x1] ss:$2 sm:$0x1f] }
 0x5b0   : >> { %v10319_v13 = vmax.f32 %v10316_v25, %v10318_v62  ;;  %v16993_v25 = vld [vmem:[%s20978_s4 + $0x10] sm:$0xff] (%p5592_p12)   ;;  %v16994_v62 = vld [vmem:[%s20978_s4 + $0x8] sm:$0xff] (%p5592_p12)  }
 0x5b2   : >> { %10322 = vst [vmem:[%s10321_s20] sm:$0x1f] %v10319_v13  ;;  %v16995_v13 = vld [vmem:[%s20978_s4] sm:$0xff] (%p5592_p12)   ;;  %s11893_s20 = sshll.u32 (%p5592_p12), %s17230_s16, 4  ;;  %s20932_s20 = int_to_ptr.vmem [resolvable:$true] %s11893_s20 }
 0x5b3   : > { %s17004_s28 = scalar_lea.vmem %s20932_s20, 16  ;;  %p17011_p2 = scmp.lt.s32.totalorder %s20932_s20, %s17009_s29 }
 0x5b4   : > { %p17005_p13 = scmp.ne.s32.totalorder %s20932_s20, %s17004_s28  ;;  %p17012_p3 = scmp.lt.s32.totalorder %s17010_s22, %s17004_s28 }
 0x5b6   : > { %p17006_p0 = pnand %p17005_p13, %p17165_p5  ;;  %p17013_p4 = por %p17012_p3, %p17011_p2 }
 0x5b8   : > { %p17007_p1 = pneg %p17006_p0 }
 0x5b9   : > { %v10323_v15 = vld [vmem:[#allocation6] sm:$0x1f]  ;;  %v10591_v31 = vld [vmem:[#allocation6 + $0x8] sm:$0x1f]  ;;  %v10860_v18 = vld [vmem:[#allocation6 + $0x10] sm:$0x1f] }
 0x5ba   : > { %v10324_v4 = vpack.c.bf16 %v10323_v15, %v10323_v15  ;;  %v10592_v17 = vpack.c.bf16 %v10591_v31, %v10591_v31  ;;  %v10861_v37 = vpack.c.bf16 %v10860_v18, %v10860_v18  ;;  %v11129_v49 = vld [vmem:[#allocation6 + $0x18] sm:$0x1f]  ;;  %v11398_v39 = vld [vmem:[#allocation6 + $0x20] sm:$0x1f]  ;;  %p17014_p7 = pnand %p17013_p4, %p17007_p1 }
 0x5bb   : > { %v11130_v9 = vpack.c.bf16 %v11129_v49, %v11129_v49  ;;  %v11399_v60 = vpack.c.bf16 %v11398_v39, %v11398_v39  ;;  %v16998_v15 = vld [vmem:[%s20979_s5 + $0x28] sm:$0xff]  }
 0x5bc   : > { %v10330_v61 = vshrl.u32 %v10324_v4, 16  ;;  %15923 = vmatmul.mubr.msk.bf16.vlgmr.msra.gmra.mxu1 %vm10338_vm7, %v10324_v4  ;;  %v10433_v28 = vrot.slane %v10324_v4, 1  ;;  %v10539_v21 = vrot.slane %v10324_v4, 2  ;;  %v10647_v0 = vshrl.u32 %v10592_v17, 16  ;;  %v16999_v4 = vld [vmem:[%s20979_s5 + $0x20] sm:$0xff]  }
 0x5bd   : > { %15933 = vmatpush3.bf16.msra.mxu1 %v16966_v59  ;;  %15934 = vmatprep.mubr.msk.bf16.mxu1 %vm17085_vm6, %v21014_v54  ;;  %v10702_v58 = vrot.slane %v10592_v17, 1  ;;  %v10808_v8 = vrot.slane %v10592_v17, 2  ;;  %v10916_v42 = vshrl.u32 %v10861_v37, 16  ;;  %v10971_v6 = vrot.slane %v10861_v37, 1  ;;  %v17001_v59 = vld [vmem:[%s20979_s5 + $0x10] sm:$0xff]  }
 0x5be   : > { %15917 = vmatmul.mubr.msk.bf16.vlgmr.msra.gmra.mxu0 %vm10338_vm7, %v10330_v61  ;;  %v10486_v52 = vrot.slane %v10330_v61, 1  ;;  %15944 = vmatprep.subr.bf16.mxu1 %v21014_v54  ;;  %v10755_v53 = vrot.slane %v10647_v0, 1  ;;  %v11077_v46 = vrot.slane %v10861_v37, 2  ;;  %v11240_v34 = vrot.slane %v11130_v9, 1 }
 0x5bf   : > { %15927 = vmatpush3.bf16.msra.mxu0 %v16965_v24  ;;  %15928 = vmatprep.mubr.msk.bf16.mxu0 %vm17085_vm6, %v21014_v54  ;;  %v11024_v30 = vrot.slane %v10916_v42, 1  ;;  %v11185_v51 = vshrl.u32 %v11130_v9, 16  ;;  %v11346_v35 = vrot.slane %v11130_v9, 2  ;;  %v11454_v36 = vshrl.u32 %v11399_v60, 16  ;;  %v17000_v24 = vld [vmem:[%s20979_s5 + $0x18] sm:$0xff]  }
 0x5c0   : > { %15938 = vmatprep.subr.bf16.mxu0 %v21014_v54  ;;  %v11509_v56 = vrot.slane %v11399_v60, 1  ;;  %v11615_v1 = vrot.slane %v11399_v60, 2 }
 0x5c1   : > { %v11293_v22 = vrot.slane %v11185_v51, 1  ;;  %v11562_v11 = vrot.slane %v11454_v36, 1 }
 0x5c4   : > { %15935 = vmatmul.mubr.msk.bf16.vlgmr.msra.gmra.mxu1 %vm10338_vm7, %v10486_v52 }
 0x5c5   : > { %15945 = vmatpush3.bf16.msra.mxu1 %v16968_v14  ;;  %15946 = vmatprep.mubr.msk.bf16.mxu1 %vm17085_vm6, %v21014_v54 }
 0x5c6   : > { %15929 = vmatmul.mubr.msk.bf16.vlgmr.msra.gmra.mxu0 %vm10338_vm7, %v10433_v28  ;;  %15956 = vmatprep.subr.bf16.mxu1 %v21014_v54 }
 0x5c7   : > { %15939 = vmatpush3.bf16.msra.mxu0 %v16967_v3  ;;  %15940 = vmatprep.mubr.msk.bf16.mxu0 %vm17085_vm6, %v21014_v54 }
 0x5c8   : > { %15950 = vmatprep.subr.bf16.mxu0 %v21014_v54 }
 0x5cc   : > { %15947 = vmatmul.mubr.msk.bf16.vlgmr.msra.gmra.mxu1 %vm10338_vm7, %v10592_v17 }
 0x5cd   : > { %15957 = vmatpush3.bf16.msra.mxu1 %v16970_v44  ;;  %15958 = vmatprep.mubr.msk.bf16.mxu1 %vm17085_vm6, %v21014_v54 }
 0x5ce   : > { %15941 = vmatmul.mubr.msk.bf16.vlgmr.msra.gmra.mxu0 %vm10338_vm7, %v10539_v21  ;;  %15968 = vmatprep.subr.bf16.mxu1 %v21014_v54 }
 0x5cf   : > { %15951 = vmatpush3.bf16.msra.mxu0 %v16969_v63  ;;  %15952 = vmatprep.mubr.msk.bf16.mxu0 %vm17085_vm6, %v21014_v54 }
 0x5d0   : > { %15962 = vmatprep.subr.bf16.mxu0 %v21014_v54 }
 0x5d4   : > { %15959 = vmatmul.mubr.msk.bf16.vlgmr.msra.gmra.mxu1 %vm10338_vm7, %v10702_v58 }
 0x5d5   : > { %15969 = vmatpush3.bf16.msra.mxu1 %v16972_v32  ;;  %15970 = vmatprep.mubr.msk.bf16.mxu1 %vm17085_vm6, %v21014_v54 }
 0x5d6   : > { %15953 = vmatmul.mubr.msk.bf16.vlgmr.msra.gmra.mxu0 %vm10338_vm7, %v10647_v0  ;;  %15980 = vmatprep.subr.bf16.mxu1 %v21014_v54 }
 0x5d7   : > { %15963 = vmatpush3.bf16.msra.mxu0 %v16971_v33  ;;  %15964 = vmatprep.mubr.msk.bf16.mxu0 %vm17085_vm6, %v21014_v54 }
 0x5d8   : > { %15974 = vmatprep.subr.bf16.mxu0 %v21014_v54 }
 0x5dc   : > { %15971 = vmatmul.mubr.msk.bf16.vlgmr.msra.gmra.mxu1 %vm10338_vm7, %v10808_v8 }
 0x5dd   : > { %15981 = vmatpush3.bf16.msra.mxu1 %v16974_v7  ;;  %15982 = vmatprep.mubr.msk.bf16.mxu1 %vm17085_vm6, %v21014_v54 }
 0x5de   : > { %15965 = vmatmul.mubr.msk.bf16.vlgmr.msra.gmra.mxu0 %vm10338_vm7, %v10755_v53  ;;  %15992 = vmatprep.subr.bf16.mxu1 %v21014_v54 }
 0x5df   : > { %15975 = vmatpush3.bf16.msra.mxu0 %v16973_v12  ;;  %15976 = vmatprep.mubr.msk.bf16.mxu0 %vm17085_vm6, %v21014_v54 }
 0x5e0   : > { %15986 = vmatprep.subr.bf16.mxu0 %v21014_v54 }
 0x5e4   : > { %15983 = vmatmul.mubr.msk.bf16.vlgmr.msra.gmra.mxu1 %vm10338_vm7, %v10916_v42 }
 0x5e5   : > { %15993 = vmatpush3.bf16.msra.mxu1 %v16976_v16  ;;  %15994 = vmatprep.mubr.msk.bf16.mxu1 %vm17085_vm6, %v21014_v54 }
 0x5e6   : > { %15977 = vmatmul.mubr.msk.bf16.vlgmr.msra.gmra.mxu0 %vm10338_vm7, %v10861_v37  ;;  %16004 = vmatprep.subr.bf16.mxu1 %v21014_v54 }
 0x5e7   : > { %15987 = vmatpush3.bf16.msra.mxu0 %v16975_v43  ;;  %15988 = vmatprep.mubr.msk.bf16.mxu0 %vm17085_vm6, %v21014_v54 }
 0x5e8   : > { %15998 = vmatprep.subr.bf16.mxu0 %v21014_v54 }
 0x5ec   : > { %15995 = vmatmul.mubr.msk.bf16.vlgmr.msra.gmra.mxu1 %vm10338_vm7, %v11024_v30 }
 0x5ed   : > { %16005 = vmatpush3.bf16.msra.mxu1 %v16978_v2  ;;  %16006 = vmatprep.mubr.msk.bf16.mxu1 %vm17085_vm6, %v21014_v54 }
 0x5ee   : > { %15989 = vmatmul.mubr.msk.bf16.vlgmr.msra.gmra.mxu0 %vm10338_vm7, %v10971_v6  ;;  %16016 = vmatprep.subr.bf16.mxu1 %v21014_v54 }
 0x5ef   : > { %15999 = vmatpush3.bf16.msra.mxu0 %v16977_v20  ;;  %16000 = vmatprep.mubr.msk.bf16.mxu0 %vm17085_vm6, %v21014_v54 }
 0x5f0   : > { %16010 = vmatprep.subr.bf16.mxu0 %v21014_v54 }
 0x5f4   : > { %16007 = vmatmul.mubr.msk.bf16.vlgmr.msra.gmra.mxu1 %vm10338_vm7, %v11130_v9 }
 0x5f5   : > { %16017 = vmatpush3.bf16.msra.mxu1 %v16980_v57  ;;  %16018 = vmatprep.mubr.msk.bf16.mxu1 %vm17085_vm6, %v21014_v54 }
 0x5f6   : > { %16001 = vmatmul.mubr.msk.bf16.vlgmr.msra.gmra.mxu0 %vm10338_vm7, %v11077_v46  ;;  %16028 = vmatprep.subr.bf16.mxu1 %v21014_v54 }
 0x5f7   : > { %16011 = vmatpush3.bf16.msra.mxu0 %v16979_v26  ;;  %16012 = vmatprep.mubr.msk.bf16.mxu0 %vm17085_vm6, %v21014_v54 }
 0x5f8   : > { %16022 = vmatprep.subr.bf16.mxu0 %v21014_v54 }
 0x5fc   : > { %16019 = vmatmul.mubr.msk.bf16.vlgmr.msra.gmra.mxu1 %vm10338_vm7, %v11240_v34 }
 0x5fd   : > { %16029 = vmatpush3.bf16.msra.mxu1 %v16982_v27  ;;  %16030 = vmatprep.mubr.msk.bf16.mxu1 %vm17085_vm6, %v21014_v54 }
 0x5fe   : > { %16013 = vmatmul.mubr.msk.bf16.vlgmr.msra.gmra.mxu0 %vm10338_vm7, %v11185_v51  ;;  %16040 = vmatprep.subr.bf16.mxu1 %v21014_v54 }
 0x5ff   : > { %16023 = vmatpush3.bf16.msra.mxu0 %v16981_v40  ;;  %16024 = vmatprep.mubr.msk.bf16.mxu0 %vm17085_vm6, %v21014_v54 }
 0x600   : > { %16034 = vmatprep.subr.bf16.mxu0 %v21014_v54 }
 0x604   : > { %16031 = vmatmul.mubr.msk.bf16.vlgmr.msra.gmra.mxu1 %vm10338_vm7, %v11346_v35 }
 0x605   : > { %16041 = vmatpush3.bf16.msra.mxu1 %v16984_v55  ;;  %16042 = vmatprep.mubr.msk.bf16.mxu1 %vm17085_vm6, %v21014_v54 }
 0x606   : > { %16025 = vmatmul.mubr.msk.bf16.vlgmr.msra.gmra.mxu0 %vm10338_vm7, %v11293_v22  ;;  %16052 = vmatprep.subr.bf16.mxu1 %v21014_v54 }
 0x607   : > { %16035 = vmatpush3.bf16.msra.mxu0 %v16983_v45  ;;  %16036 = vmatprep.mubr.msk.bf16.mxu0 %vm17085_vm6, %v21014_v54 }
 0x608   : > { %16046 = vmatprep.subr.bf16.mxu0 %v21014_v54 }
 0x60c   : > { %16043 = vmatmul.mubr.msk.bf16.vlgmr.msra.gmra.mxu1 %vm10338_vm7, %v11454_v36 }
 0x60d   : > { %16053 = vmatpush3.bf16.msra.mxu1 %v16986_v50  ;;  %16054 = vmatprep.mubr.msk.bf16.mxu1 %vm17085_vm6, %v21014_v54 }
 0x60e   : > { %16037 = vmatmul.mubr.msk.bf16.vlgmr.msra.gmra.mxu0 %vm10338_vm7, %v11399_v60  ;;  %16064 = vmatprep.subr.bf16.mxu1 %v21014_v54 }
 0x60f   : > { %16047 = vmatpush3.bf16.msra.mxu0 %v16985_v47  ;;  %16048 = vmatprep.mubr.msk.bf16.mxu0 %vm17085_vm6, %v21014_v54 }
 0x610   : > { %16058 = vmatprep.subr.bf16.mxu0 %v21014_v54 }
 0x614   : > { %16055 = vmatmul.mubr.msk.bf16.vlgmr.msra.gmra.mxu1 %vm10338_vm7, %v11562_v11 }
 0x615   : > { %16080 = vmatprep.mubr.msk.bf16.mxu1 %vm17085_vm6, %v21014_v54  ;;  %16065 = vmatpush3.bf16.msra.mxu1 %v16988_v5 }
 0x616   : > { %16049 = vmatmul.mubr.msk.bf16.vlgmr.msra.gmra.mxu0 %vm10338_vm7, %v11509_v56  ;;  %16066 = vmatprep.subr.bf16.mxu1 %v21014_v54 }
 0x617   : > { %16059 = vmatpush3.bf16.msra.mxu0 %v16987_v10  ;;  %16060 = vmatprep.mubr.msk.bf16.mxu0 %vm17085_vm6, %v21014_v54 }
 0x618   : > { %16084 = vmatprep.subr.bf16.mxu0 %v21014_v54 }
 0x619   : > { %16067 = vmatpush3.bf16.msra.mxu1 %v16989_v19 }
 0x61a   : > { %16068 = vmatprep.subr.bf16.mxu1 %v21014_v54 }
 0x61d   : > { %16069 = vmatpush3.bf16.msra.mxu1 %v16990_v48 }
 0x61e   : > { %16061 = vmatmul.mubr.msk.bf16.vlgmr.msra.gmra.mxu0 %vm10338_vm7, %v11615_v1  ;;  %16070 = vmatprep.subr.bf16.mxu1 %v21014_v54 }
 0x61f   : > { %16100 = vmatprep.mubr.msk.bf16.mxu0 %vm17085_vm6, %v21014_v54  ;;  %16085 = vmatpush3.bf16.msra.mxu0 %v16996_v41 }
 0x620   : > { %16086 = vmatprep.subr.bf16.mxu0 %v21014_v54 }
 0x621   : > { %16071 = vmatpush3.bf16.msra.mxu1 %v16991_v23 }
 0x622   : > { %16072 = vmatprep.subr.bf16.mxu1 %v21014_v54 }
 0x623   : > { %16087 = vmatpush3.bf16.msra.mxu0 %v16997_v38 }
 0x624   : > { %16088 = vmatprep.subr.bf16.mxu0 %v21014_v54 }
 0x625   : > { %16073 = vmatpush3.bf16.msra.mxu1 %v16992_v29 }
 0x626   : > { %16074 = vmatprep.subr.bf16.mxu1 %v21014_v54 }
 0x627   : > { %16089 = vmatpush3.bf16.msra.mxu0 %v16998_v15 }
 0x628   : > { %16090 = vmatprep.subr.bf16.mxu0 %v21014_v54 }
 0x629   : > { %16075 = vmatpush3.bf16.msra.mxu1 %v16993_v25 }
 0x62a   : > { %16076 = vmatprep.subr.bf16.mxu1 %v21014_v54 }
 0x62b   : > { %16091 = vmatpush3.bf16.msra.mxu0 %v16999_v4 }
 0x62c   : > { %16092 = vmatprep.subr.bf16.mxu0 %v21014_v54 }
 0x62d   : > { %16077 = vmatpush3.bf16.msra.mxu1 %v16994_v62 }
 0x62e   : > { %16078 = vmatprep.subr.bf16.mxu1 %v21014_v54 }
 0x62f   : > { %16093 = vmatpush3.bf16.msra.mxu0 %v17000_v24 }
 0x630   : > { %16094 = vmatprep.subr.bf16.mxu0 %v21014_v54 }
 0x631   : > { %16079 = vmatpush3.bf16.msra.mxu1 %v16995_v13 }
 0x633   : > { %16095 = vmatpush3.bf16.msra.mxu0 %v17001_v59 }
 0x634   : > { %16096 = vmatprep.subr.bf16.mxu0 %v21014_v54 }
 0x67c   : > { %v10424_v61 = vpop.f32.mrf.mxu1 }
 0x67e   : > { %v10376_v52 = vpop.f32.mrf.mxu0  ;;  %v15924_v28 = vpop.f32.mrf.mxu1 }
 0x67f   : > { %v10425_v57 = vadd.f32 %v10424_v61, %v10376_v52 }
 0x680   : > { %v15918_v14 = vpop.f32.mrf.mxu0  ;;  %v10427_v3 = vpop.f32.mrf.mxu1 }
 0x682   : > { %v10379_v31 = vpop.f32.mrf.mxu0  ;;  %v15925_v17 = vpop.f32.mrf.mxu1 }
 0x684   : > { %v15919_v21 = vpop.f32.mrf.mxu0  ;;  %v10530_v44 = vpop.f32.mrf.mxu1 }
 0x686   : > { %v10477_v63 = vpop.f32.mrf.mxu0  ;;  %v15936_v0 = vpop.f32.mrf.mxu1 }
 0x687   : > { %v10483_v51 = vadd.f32 %v10477_v63, %v10425_v57 }
 0x688   : > { %v15930_v58 = vpop.f32.mrf.mxu0  ;;  %v10533_v33 = vpop.f32.mrf.mxu1 }
 0x689   : > { %v10536_v55 = vadd.f32 %v10530_v44, %v10483_v51 }
 0x68a   : > { %v10480_v32 = vpop.f32.mrf.mxu0  ;;  %v15937_v53 = vpop.f32.mrf.mxu1 }
 0x68c   : > { %v15931_v8 = vpop.f32.mrf.mxu0  ;;  %v10638_v7 = vpop.f32.mrf.mxu1 }
 0x68e   : > { %v10583_v18 = vpop.f32.mrf.mxu0  ;;  %v15948_v12 = vpop.f32.mrf.mxu1 }
 0x68f   : > { %v10589_v60 = vadd.f32 %v10583_v18, %v10536_v55 }
 0x690   : > { %v15942_v37 = vpop.f32.mrf.mxu0  ;;  %v10641_v42 = vpop.f32.mrf.mxu1 }
 0x691   : > { %v10644_v56 = vadd.f32 %v10638_v7, %v10589_v60 }
 0x692   : > { %v10586_v16 = vpop.f32.mrf.mxu0  ;;  %v15949_v43 = vpop.f32.mrf.mxu1 }
 0x694   : > { %v15943_v30 = vpop.f32.mrf.mxu0  ;;  %v10746_v6 = vpop.f32.mrf.mxu1 }
 0x696   : > { %v10692_v2 = vpop.f32.mrf.mxu0  ;;  %v15960_v20 = vpop.f32.mrf.mxu1 }
 0x697   : > { %v10698_v5 = vadd.f32 %v10692_v2, %v10644_v56 }
 0x698   : > { %v15954_v49 = vpop.f32.mrf.mxu0  ;;  %v10749_v9 = vpop.f32.mrf.mxu1 }
 0x699   : > { %v10752_v25 = vadd.f32 %v10746_v6, %v10698_v5 }
 0x69a   : > { %v10695_v46 = vpop.f32.mrf.mxu0  ;;  %v15961_v26 = vpop.f32.mrf.mxu1 }
 0x69c   : > { %v15955_v34 = vpop.f32.mrf.mxu0  ;;  %v10852_v27 = vpop.f32.mrf.mxu1 }
 0x69e   : > { %v10799_v40 = vpop.f32.mrf.mxu0  ;;  %v15972_v35 = vpop.f32.mrf.mxu1 }
 0x69f   : > { %v10805_v41 = vadd.f32 %v10799_v40, %v10752_v25 }
 0x6a0   : > { %v15966_v22 = vpop.f32.mrf.mxu0  ;;  %v10855_v39 = vpop.f32.mrf.mxu1 }
 0x6a1   : > { %v10858_v59 = vadd.f32 %v10852_v27, %v10805_v41 }
 0x6a2   : > { %v10802_v45 = vpop.f32.mrf.mxu0  ;;  %v15973_v36 = vpop.f32.mrf.mxu1 }
 0x6a4   : > { %v15967_v50 = vpop.f32.mrf.mxu0  ;;  %v10961_v47 = vpop.f32.mrf.mxu1 }
 0x6a6   : > { %v10907_v11 = vpop.f32.mrf.mxu0  ;;  %v15984_v10 = vpop.f32.mrf.mxu1 }
 0x6a7   : > { %v10913_v28 = vadd.f32 %v10907_v11, %v10858_v59 }
 0x6a8   : > { %v15978_v1 = vpop.f32.mrf.mxu0  ;;  %v10964_v19 = vpop.f32.mrf.mxu1 }
 0x6a9   : > { %v10967_v21 = vadd.f32 %v10961_v47, %v10913_v28  ;;  %v17002_v28 = vld [vmem:[%s20979_s5 + $0x8] sm:$0xff]  }
 0x6aa   : > { %v10910_v48 = vpop.f32.mrf.mxu0  ;;  %v15985_v23 = vpop.f32.mrf.mxu1  ;;  %16097 = vmatpush3.bf16.msra.mxu0 %v17002_v28 }
 0x6ab   : > { %16098 = vmatprep.subr.bf16.mxu0 %v21014_v54 }
 0x6ac   : > { %v15979_v29 = vpop.f32.mrf.mxu0  ;;  %v11068_v62 = vpop.f32.mrf.mxu1 }
 0x6ae   : > { %v11015_v13 = vpop.f32.mrf.mxu0  ;;  %v15996_v38 = vpop.f32.mrf.mxu1 }
 0x6af   : > { %v11021_v0 = vadd.f32 %v11015_v13, %v10967_v21 }
 0x6b0   : > { %v15990_v15 = vpop.f32.mrf.mxu0  ;;  %v11071_v4 = vpop.f32.mrf.mxu1 }
 0x6b1   : > { %v11074_v8 = vadd.f32 %v11068_v62, %v11021_v0  ;;  %v21015_v15 = vld [vmem:[#allocation11_spill] sm:$0xff] }
 0x6b2   : > { %v11018_v24 = vpop.f32.mrf.mxu0  ;;  %v15997_v61 = vpop.f32.mrf.mxu1 }
 0x6b4   : > { %v15991_v52 = vpop.f32.mrf.mxu0  ;;  %v11176_v14 = vpop.f32.mrf.mxu1 }
 0x6b6   : > { %v11121_v3 = vpop.f32.mrf.mxu0  ;;  %v16008_v31 = vpop.f32.mrf.mxu1 }
 0x6b7   : > { %v11127_v12 = vadd.f32 %v11121_v3, %v11074_v8  ;;  %v21016_v31 = vld [vmem:[#allocation12_spill] sm:$0xff] }
 0x6b8   : > { %v16002_v17 = vpop.f32.mrf.mxu0  ;;  %v11179_v44 = vpop.f32.mrf.mxu1 }
 0x6b9   : > { %v11182_v30 = vadd.f32 %v11176_v14, %v11127_v12  ;;  %v17003_v14 = vld [vmem:[%s20979_s5] sm:$0xff]  }
 0x6ba   : > { %v11124_v63 = vpop.f32.mrf.mxu0  ;;  %v16009_v58 = vpop.f32.mrf.mxu1  ;;  %16099 = vmatpush3.bf16.msra.mxu0 %v17003_v14 }
 0x6bc   : > { %v16003_v33 = vpop.f32.mrf.mxu0  ;;  %v11284_v32 = vpop.f32.mrf.mxu1 }
 0x6bd   : > { %v21017_v33 = vld [vmem:[#allocation13_spill] sm:$0xff] }
 0x6be   : > { %v11230_v53 = vpop.f32.mrf.mxu0  ;;  %v16020_v7 = vpop.f32.mrf.mxu1 }
 0x6bf   : > { %v11236_v20 = vadd.f32 %v11230_v53, %v11182_v30 }
 0x6c0   : > { %v16014_v18 = vpop.f32.mrf.mxu0  ;;  %v11287_v37 = vpop.f32.mrf.mxu1 }
 0x6c1   : > { %v11290_v26 = vadd.f32 %v11284_v32, %v11236_v20 }
 0x6c2   : > { %v11233_v42 = vpop.f32.mrf.mxu0  ;;  %v16021_v16 = vpop.f32.mrf.mxu1 }
 0x6c4   : > { %v16015_v43 = vpop.f32.mrf.mxu0  ;;  %v11390_v6 = vpop.f32.mrf.mxu1 }
 0x6c6   : > { %v11337_v2 = vpop.f32.mrf.mxu0  ;;  %v16032_v49 = vpop.f32.mrf.mxu1 }
 0x6c7   : > { %v11343_v27 = vadd.f32 %v11337_v2, %v11290_v26 }
 0x6c8   : > { %v16026_v9 = vpop.f32.mrf.mxu0  ;;  %v11393_v46 = vpop.f32.mrf.mxu1 }
 0x6c9   : > { %v11396_v39 = vadd.f32 %v11390_v6, %v11343_v27 }
 0x6ca   : > { %v11340_v57 = vpop.f32.mrf.mxu0  ;;  %v16033_v34 = vpop.f32.mrf.mxu1 }
 0x6cc   : > { %v16027_v51 = vpop.f32.mrf.mxu0  ;;  %v11499_v40 = vpop.f32.mrf.mxu1 }
 0x6ce   : > { %v11445_v35 = vpop.f32.mrf.mxu0  ;;  %v16044_v22 = vpop.f32.mrf.mxu1 }
 0x6cf   : > { %v11451_v36 = vadd.f32 %v11445_v35, %v11396_v39 }
 0x6d0   : > { %v16038_v55 = vpop.f32.mrf.mxu0  ;;  %v11502_v45 = vpop.f32.mrf.mxu1 }
 0x6d1   : > { %v11505_v10 = vadd.f32 %v11499_v40, %v11451_v36 }
 0x6d2   : > { %v11448_v60 = vpop.f32.mrf.mxu0  ;;  %v16045_v50 = vpop.f32.mrf.mxu1 }
 0x6d4   : > { %v16039_v47 = vpop.f32.mrf.mxu0  ;;  %v11606_v11 = vpop.f32.mrf.mxu1 }
 0x6d6   : > { %v11553_v56 = vpop.f32.mrf.mxu0  ;;  %v16056_v1 = vpop.f32.mrf.mxu1 }
 0x6d7   : > { %v11559_v19 = vadd.f32 %v11553_v56, %v11505_v10 }
 0x6d8   : > { %v16050_v5 = vpop.f32.mrf.mxu0  ;;  %v11609_v48 = vpop.f32.mrf.mxu1 }
 0x6d9   : > { %v11612_v62 = vadd.f32 %v11606_v11, %v11559_v19 }
 0x6da   : > { %v11556_v23 = vpop.f32.mrf.mxu0  ;;  %v16057_v29 = vpop.f32.mrf.mxu1 }
 0x6dc   : > { %v16051_v25 = vpop.f32.mrf.mxu0 }
 0x6de   : > { %v11659_v13 = vpop.f32.mrf.mxu0 }
 0x6df   : > { %v11665_v41 = vadd.f32 %v11659_v13, %v11612_v62 }
 0x6e0   : > { %v16062_v38 = vpop.f32.mrf.mxu0 }
 0x6e1   : > { %v11666_v4 = vadd.f32 %v11665_v41, %v21015_v15 }
 0x6e2   : > { %v11662_v24 = vpop.f32.mrf.mxu0 }
 0x6e3   : > { %v11667_v59 = vmax.f32 %v11666_v4, 0.0 }
 0x6e4   : > { %v16063_v61 = vpop.f32.mrf.mxu0 }
 0x6e5   : > { %v11668_v52 = vpack.c.bf16 %v11667_v59, %v11667_v59 }
 0x6e7   : > { %16081 = vmatmul.mubr.bf16.vlgmr.msra.gmra.mxu1 %v11668_v52 }
 0x7a7   : > { %v11767_v3 = vpop.f32.mrf.mxu1 }
 0x7a8   : > { %v11768_v17 = vadd.f32 %v11767_v3, %v21016_v31 }
 0x7a9   : > { %v16082_v21 = vpop.f32.mrf.mxu1 }
 0x7aa   : > { %v11773_v44 = vmax.f32 %v11768_v17, 0.0 }
 0x7ab   : > { %v11770_v63 = vpop.f32.mrf.mxu1 }
 0x7ac   : > { %v11774_v0 = vpack.c.bf16 %v11773_v44, %v11773_v44 }
 0x7ad   : > { %v16083_v58 = vpop.f32.mrf.mxu1 }
 0x7ae   : > { %16101 = vmatmul.mubr.bf16.vlgmr.msra.gmra.mxu0 %v11774_v0 }
 0x86e   : > { %v11873_v54 = vpop.f32.mrf.mxu0 }
 0x86f   : > { %v11874_v32 = vadd.f32 %v11873_v54, %v21017_v33 }
 0x870   : > { %v16102_v53 = vpop.f32.mrf.mxu0 }
 0x871   : > { %11879 = vst [vmem:[%s17230_s16] sm:$0x1] %v11874_v32 }
 0x872   : > { %v11876_v8 = vpop.f32.mrf.mxu0 }
 0x873   : > { %17017 = shalt.err (!%p17014_p7)
}
 0x874   : > { %s17018_s16 = scalar_lea.hbm %s20930_s15, 16  ;;  %s17022_s8 = scalar_lea.hbm %s20981_s7, 128 }
 0x875   : > { %p17019_p8 = scmp.ne.s32.totalorder %s20930_s15, %s17018_s16  ;;  %p17023_p11 = scmp.lt.s32.totalorder %s20930_s15, %s20981_s7 }
 0x876   : > { %p17024_p12 = scmp.lt.s32.totalorder %s17022_s8, %s17018_s16 }
 0x877   : > { %p17020_p9 = pnand %p17019_p8, %p17165_p5 }
 0x878   : > { %p17025_p13 = por %p17024_p12, %p17023_p11 }
 0x879   : > { %p17021_p10 = pneg %p17020_p9 }
 0x87b   : > { %p17026_p0 = pnand %p17025_p13, %p17021_p10 }
 0x87d   : > { %17029 = shalt.err (!%p17026_p0)
}
 0x87e   : > { %16104 = dma.vmem_to_hbm [thread:$0]  (%p17165_p5), %s20932_s20, 16, %s20930_s15, %s11881_s17   ;;  %v16103_v7 = vpop.f32.mrf.mxu0 }
 0x87f PF: > { %p16110_p1 = scmp.ge.s32.totalorder %s17072_s27, 2  ;;  %s11905_s21 = sand.u32 1, %s17060_s24  }
 0x880   : > { %s11906_s23 = scalar_lea.sflag [#allocation8], %s11905_s21 }
 0x881   : > { %p16107_p2 = pnand %p16110_p1, %p17169_p6 }
 0x883   : > { %p16108_p3 = pneg %p16107_p2 }
 0x885   : > { %17055 = dma.done.wait (%p16108_p3), %s11906_s23, 16  }
 0x886   : > { %17057 = vsyncadd (%p16108_p3), %s11906_s23, 4294967280  ;;  %p17_p4 = scmp.ge.s32.totalorder %s17152_s30, 10   ;;  %s21018_s24 = smov %s17064_s25 }
 0x887   : > { %s21019_s25 = smov %s17068_s26  ;;  %s21020_s26 = smov %s17163_s10 }
 0x888   : > { %s21021_s27 = smov %s17152_s30  ;;  %19 = sbr.rel (!%p17_p4) target bundleno = 3 (0x3), region = 149 }
 0x88d   :  { %11910 = vsyncpa [#allocation8], 1 }
 0x88e   :  { %11912 = vsyncpa [#allocation8 + $0x1], 1 }

</bundles_post_ra>
